<compile_context>
chip_gen: v5e
topology: v5e:2x2
jax: 0.10.0
libtpu: 0.0.40
codegen_flags: <defaults>
</compile_context>

<pallas_src>
import jax
import jax.numpy as jnp
from jax.experimental import pallas as pl
from jax.experimental.pallas import tpu as pltpu

# ---- hyperparameters (mirror the PyTorch module) ----
DIM_CAPSULE = 16
NUM_CAPSULE = 10
ROUTINGS = 5
T_EPSILON = 1e-7
GRU_LEN = 128              # hidden size per direction
EMB_DIM = 300
EMB_PAD = 384              # 300 zero-padded to a multiple of 128 for dense MXU K passes
NUM_CLASSES = 2
INPUT_DIM_CAPSULE = GRU_LEN * 2   # 256


def _round_up(x, m):
    return ((x + m - 1) // m) * m


# ---------------------------------------------------------------------------
# Kernel 1: bidirectional GRU with the time loop inside the kernel.
# grid = (direction, T_pad // TILE_T).  Per grid step:
#   - one (TILE_T*B, 384) x (384, 384) bf16 matmul computes gi for the whole chunk
#   - lax.fori_loop runs the recurrence over the chunk entirely from VMEM
#   - the chunk's hidden states are written as one (TILE_T, B, 128) slab
# Forward/backward share the body; the backward direction gets reversed chunk order via
# the index_map and reversed in-chunk order via t = i + d*(TT-1-2i).  Hidden state lives
# in a VMEM scratch that persists across chunks and is reset at chunk 0 of each direction.
# ---------------------------------------------------------------------------
def _make_gru_kernel(t_valid):
    H = GRU_LEN

    def kernel(x_ref, wih_ref, bih_ref, whh_ref, bhh_ref, out_ref, h_scr, gi_scr):
        d = pl.program_id(0)            # direction: 0 = forward, 1 = backward
        c = pl.program_id(1)            # time-chunk index
        nblk = pl.num_programs(1)

        @pl.when(c == 0)
        def _():
            h_scr[...] = jnp.zeros_like(h_scr)

        TT, B, E = x_ref.shape          # (TILE_T, B_pad, EMB_PAD)

        # Chunk input projection: gi = x @ W_ih + b_ih for all TILE_T*B rows at once.
        x2 = x_ref[...].reshape(TT * B, E).astype(jnp.bfloat16)
        gi = jnp.dot(x2, wih_ref[0], preferred_element_type=jnp.float32) + bih_ref[0]
        gi_scr[...] = gi.reshape(TT, B, 3 * H)

        whh = whh_ref[0]                # (H, 3H) bf16
        bhh = bhh_ref[0]                # (1, 3H) f32
        blk = c + d * (nblk - 1 - 2 * c)   # which time-block of the padded sequence

        def step(i, h):
            # forward: local index i ; backward: TT-1-i
            t = i + d * (TT - 1 - 2 * i)
            gi_t = gi_scr[t]                                     # (B, 3H)
            gh = jnp.dot(h.astype(jnp.bfloat16), whh,
                         preferred_element_type=jnp.float32) + bhh
            # PyTorch GRU gate order: r, z, n
            r = jax.nn.sigmoid(gi_t[:, :H] + gh[:, :H])
            z = jax.nn.sigmoid(gi_t[:, H:2 * H] + gh[:, H:2 * H])
            n = jnp.tanh(gi_t[:, 2 * H:] + r * gh[:, 2 * H:])
            h_new = (1.0 - z) * n + z * h
            # Freeze state on padded tail time-steps (keeps backward pass exact when
            # T % TILE_T != 0; padded outputs are sliced away by the wrapper).
            valid = (blk * TT + t) < t_valid
            h_new = jnp.where(valid, h_new, h)
            out_ref[t, :, :] = h_new.astype(out_ref.dtype)
            return h_new

        h_fin = jax.lax.fori_loop(0, TT, step, h_scr[...], unroll=(TT <= 16))
        h_scr[...] = h_fin

    return kernel


def bigru_pallas(x, w_ih_t, b_ih, w_hh_t, b_hh, *, t_valid, tile_t):
    T_pad, B_pad, E = x.shape
    H = GRU_LEN
    nblk = T_pad // tile_t

    def x_map(d, c):
        return (c + d * (nblk - 1 - 2 * c), 0, 0)

    def out_map(d, c):
        # direction d selects the feature half of the (T, B, 2H) output: fwd -> [0:H], bwd -> [H:2H]
        return (c + d * (nblk - 1 - 2 * c), 0, d)

    return pl.pallas_call(
        _make_gru_kernel(t_valid),
        out_shape=jax.ShapeDtypeStruct((T_pad, B_pad, 2 * H), jnp.float32),
        grid_spec=pltpu.PrefetchScalarGridSpec(
            num_scalar_prefetch=0,
            grid=(2, nblk),
            in_specs=[
                pl.BlockSpec((tile_t, B_pad, E), x_map),
                pl.BlockSpec((1, E, 3 * H), lambda d, c: (d, 0, 0)),
                pl.BlockSpec((1, 1, 3 * H), lambda d, c: (d, 0, 0)),
                pl.BlockSpec((1, H, 3 * H), lambda d, c: (d, 0, 0)),
                pl.BlockSpec((1, 1, 3 * H), lambda d, c: (d, 0, 0)),
            ],
            out_specs=pl.BlockSpec((tile_t, B_pad, H), out_map),
            scratch_shapes=[
                pltpu.VMEM((B_pad, H), jnp.float32),            # carried hidden state
                pltpu.VMEM((tile_t, B_pad, 3 * H), jnp.float32)  # per-chunk gi
            ],
        ),
        compiler_params=pltpu.CompilerParams(
            dimension_semantics=("parallel", "arbitrary")),
    )(x, w_ih_t, b_ih, w_hh_t, b_hh)


# ---------------------------------------------------------------------------
# Kernel 2: Caps_Layer (shared-weight projection + dynamic routing + squash)
# fused with Dense_Layer (Linear + Sigmoid), batched over a time tile.
# x.size(0)=T is the capsule batch, x.size(1)=B the input capsules.  Routing tensors stay
# lane-dense at width 160; per-capsule (16-lane) sums / broadcasts use constant 0/1
# matrices on the MXU.  Padded batch rows are zeroed out of the routing sums.
# ---------------------------------------------------------------------------
def _make_caps_kernel(b_valid):
    F = NUM_CAPSULE * DIM_CAPSULE                               # 160

    def kernel(x_ref, wc_ref, exp_ref, gat_ref, wd_ref, bd_ref, out_ref):
        tt, B, D = x_ref.shape

        x2 = x_ref[...].reshape(tt * B, D).astype(jnp.bfloat16)  # layout-clean: B % 8 == 0
        u2 = jnp.dot(x2, wc_ref[...], preferred_element_type=jnp.float32)
        u3 = u2.reshape(tt, B, F)                                # (tt, B, 160) lane-dense
        if b_valid < B:
            bmask = jax.lax.broadcasted_iota(jnp.int32, (1, B, 1), 1) < b_valid
            u3 = jnp.where(bmask, u3, 0.0)                       # padded batch rows -> 0

        expand = exp_ref[...]                                    # (10, 160): j -> lanes 16j..16j+15
        gather = gat_ref[...]                                    # (160, 10): 16-lane group sum

        # b kept as (tt*B, num_capsule) == torch's b.permute(0,2,1) flattened over (t, i)
        b = jnp.zeros((tt * B, NUM_CAPSULE), dtype=jnp.float32)
        v = jnp.zeros((tt, F), dtype=jnp.float32)
        for it in range(ROUTINGS):
            c = jax.nn.softmax(b, axis=-1)                       # softmax over num_capsule
            c_wide = jnp.dot(c, expand,
                             preferred_element_type=jnp.float32).reshape(tt, B, F)
            s = jnp.sum(c_wide * u3, axis=1)                     # (tt, 160) sum over input caps
            sq = jnp.dot(s * s, gather,
                         preferred_element_type=jnp.float32)     # (tt, 10) per-capsule |s|^2
            inv = jax.lax.rsqrt(sq + T_EPSILON)
            v = s * jnp.dot(inv, expand,
                            preferred_element_type=jnp.float32)  # squash, (tt, 160)
            if it < ROUTINGS - 1:
                bv = (v[:, None, :] * u3).reshape(tt * B, F)
                b = jnp.dot(bv, gather,
                            preferred_element_type=jnp.float32)  # (tt*B, 10)

        logits = jnp.dot(v, wd_ref[...],
                         preferred_element_type=jnp.float32) + bd_ref[...]
        out_ref[...] = jax.nn.sigmoid(logits).astype(out_ref.dtype)

    return kernel


def caps_dense_pallas(x, w_caps, w_dense_t, b_dense, *, b_valid, tile_t):
    T_pad, B_pad, D = x.shape
    F = NUM_CAPSULE * DIM_CAPSULE
    nblk = T_pad // tile_t

    # constant 0/1 matrices for 16-lane group broadcast / reduction
    expand = jnp.kron(jnp.eye(NUM_CAPSULE, dtype=jnp.float32),
                      jnp.ones((1, DIM_CAPSULE), jnp.float32))   # (10, 160)
    gather = expand.T                                            # (160, 10)

    return pl.pallas_call(
        _make_caps_kernel(b_valid),
        out_shape=jax.ShapeDtypeStruct((T_pad, NUM_CLASSES), jnp.float32),
        grid_spec=pltpu.PrefetchScalarGridSpec(
            num_scalar_prefetch=0,
            grid=(nblk,),
            in_specs=[
                pl.BlockSpec((tile_t, B_pad, D), lambda i: (i, 0, 0)),
                pl.BlockSpec((D, F), lambda i: (0, 0)),
                pl.BlockSpec((NUM_CAPSULE, F), lambda i: (0, 0)),
                pl.BlockSpec((F, NUM_CAPSULE), lambda i: (0, 0)),
                pl.BlockSpec((F, NUM_CLASSES), lambda i: (0, 0)),
                pl.BlockSpec((1, NUM_CLASSES), lambda i: (0, 0)),
            ],
            out_specs=pl.BlockSpec((tile_t, NUM_CLASSES), lambda i: (i, 0)),
        ),
        compiler_params=pltpu.CompilerParams(dimension_semantics=("parallel",)),
    )(x, w_caps, expand, gather, w_dense_t, b_dense)


# ---------------------------------------------------------------------------
# Parameters (deterministic synthetic init, shapes from the module __init__).
# emb / W_ih are zero-padded along the 300-dim axis to 384 (numerically identical).
# ---------------------------------------------------------------------------
def init_params(key, vocab_size):
    ks = jax.random.split(key, 8)
    H = GRU_LEN
    emb = jax.random.normal(ks[0], (vocab_size, EMB_DIM), jnp.float32) * 0.1
    emb = jnp.pad(emb, ((0, 0), (0, EMB_PAD - EMB_DIM)))
    kg = 1.0 / (H ** 0.5)
    # GRU weights stored pre-transposed per direction: (2, in, 3H), (2, H, 3H)
    w_ih_t = jax.random.uniform(ks[1], (2, EMB_DIM, 3 * H), jnp.float32, -kg, kg)
    w_ih_t = jnp.pad(w_ih_t, ((0, 0), (0, EMB_PAD - EMB_DIM), (0, 0)))
    w_hh_t = jax.random.uniform(ks[2], (2, H, 3 * H), jnp.float32, -kg, kg)
    b_ih = jax.random.uniform(ks[3], (2, 1, 3 * H), jnp.float32, -kg, kg)
    b_hh = jax.random.uniform(ks[4], (2, 1, 3 * H), jnp.float32, -kg, kg)
    # Caps_Layer.W : xavier_normal_ on (1, 256, 160)
    fan_in = INPUT_DIM_CAPSULE * NUM_CAPSULE * DIM_CAPSULE
    fan_out = 1 * NUM_CAPSULE * DIM_CAPSULE
    std = (2.0 / (fan_in + fan_out)) ** 0.5
    w_caps = jax.random.normal(
        ks[5], (INPUT_DIM_CAPSULE, NUM_CAPSULE * DIM_CAPSULE), jnp.float32) * std
    # Dense: nn.Linear(160, 2), stored transposed (160, 2)
    kd = 1.0 / ((NUM_CAPSULE * DIM_CAPSULE) ** 0.5)
    w_dense_t = jax.random.uniform(
        ks[6], (NUM_CAPSULE * DIM_CAPSULE, NUM_CLASSES), jnp.float32, -kd, kd)
    b_dense = jax.random.uniform(ks[7], (1, NUM_CLASSES), jnp.float32, -kd, kd)
    return dict(emb=emb, w_ih_t=w_ih_t, w_hh_t=w_hh_t, b_ih=b_ih, b_hh=b_hh,
                w_caps=w_caps, w_dense_t=w_dense_t, b_dense=b_dense)


@jax.jit
def capsule_main(content, params):
    T, B = content.shape
    B_pad = max(8, _round_up(B, 8))
    gru_tile = _round_up(T, 8) if T <= 64 else 64
    T_pad = _round_up(T, gru_tile)

    # pad tokens (token 0) -- padded batch columns / tail time steps are masked / sliced away
    tok = jnp.pad(content, ((0, T_pad - T), (0, B_pad - B)))

    # embedding lookup is a data-dependent gather -> plain JAX glue
    x = jnp.take(params["emb"], tok, axis=0)                          # (T_pad, B_pad, 384) f32

    # bf16 MXU operands (f32 accumulation); one cast per call, outside the kernels
    w_ih_bf = params["w_ih_t"].astype(jnp.bfloat16)
    w_hh_bf = params["w_hh_t"].astype(jnp.bfloat16)
    w_caps_bf = params["w_caps"].astype(jnp.bfloat16)

    content2 = bigru_pallas(x, w_ih_bf, params["b_ih"], w_hh_bf, params["b_hh"],
                            t_valid=T, tile_t=gru_tile)               # (T_pad, B_pad, 256)

    # TODO(synk): nn.Dropout(p=0.25) is stochastic; forward here is eval-mode (identity).
    caps_tile = T_pad if T_pad <= 128 else (128 if T_pad % 128 == 0 else gru_tile)
    out = caps_dense_pallas(content2, w_caps_bf,
                            params["w_dense_t"], params["b_dense"],
                            b_valid=B, tile_t=caps_tile)              # (T_pad, 2)
    return out[:T]


# ---------------------------------------------------------------------------
# Pure-JAX reference (same math) for a sanity check
# ---------------------------------------------------------------------------
def reference_forward(content, params):
    H = GRU_LEN
    x = jnp.take(params["emb"], content, axis=0)

    def run_dir(seq, Wt, Ut, bi, bh):
        def step(h, x_t):
            gi = x_t @ Wt + bi
            gh = h @ Ut + bh
            r = jax.nn.sigmoid(gi[:, :H] + gh[:, :H])
            z = jax.nn.sigmoid(gi[:, H:2 * H] + gh[:, H:2 * H])
            n = jnp.tanh(gi[:, 2 * H:] + r * gh[:, 2 * H:])
            h_new = (1.0 - z) * n + z * h
            return h_new, h_new
        h0 = jnp.zeros((seq.shape[1], H), jnp.float32)
        _, hs = jax.lax.scan(step, h0, seq)
        return hs

    fwd = run_dir(x, params["w_ih_t"][0], params["w_hh_t"][0],
                  params["b_ih"][0], params["b_hh"][0])
    bwd = run_dir(x[::-1], params["w_ih_t"][1], params["w_hh_t"][1],
                  params["b_ih"][1], params["b_hh"][1])[::-1]
    content2 = jnp.concatenate([fwd, bwd], axis=-1)             # (T, B, 256)

    Tn, Bn = content2.shape[0], content2.shape[1]
    u = content2 @ params["w_caps"]
    u = u.reshape(Tn, Bn, NUM_CAPSULE, DIM_CAPSULE).transpose(0, 2, 1, 3)
    b = jnp.zeros((Tn, NUM_CAPSULE, Bn), jnp.float32)
    for i in range(ROUTINGS):
        c = jax.nn.softmax(b, axis=1)
        s = jnp.einsum('bij,bijk->bik', c, u)
        outputs = s / jnp.sqrt(jnp.sum(s * s, axis=-1, keepdims=True) + T_EPSILON)
        if i < ROUTINGS - 1:
            b = jnp.einsum('bik,bijk->bij', outputs, u)
    flat = outputs.reshape(Tn, -1)
    logits = flat @ params["w_dense_t"] + params["b_dense"]
    return jax.nn.sigmoid(logits)


if __name__ == "__main__":
    T, B, VOCAB = 8, 4, 50
    key = jax.random.PRNGKey(0)
    k_tok, k_par = jax.random.split(key)
    content = jax.random.randint(k_tok, (T, B), 0, VOCAB, dtype=jnp.int32)
    params = init_params(k_par, VOCAB)

    out = jax.block_until_ready(capsule_main(content, params))
    assert out.shape == (T, NUM_CLASSES), out.shape

    ref = reference_forward(content, params)
    err = float(jnp.max(jnp.abs(out - ref)))
    assert err < 1e-2, f"mismatch vs reference: {err}"
    print("KERNEL_OK")
</pallas_src>

<mosaic_0001>
module attributes {stable_mosaic.version = 11 : i64} {
  func.func @kernel(%arg0: i32, %arg1: i32, %arg2: memref<8x8x384xf32, #tpu.memory_space<vmem>>, %arg3: memref<1x384x384xbf16, #tpu.memory_space<vmem>>, %arg4: memref<1x1x384xf32, #tpu.memory_space<vmem>>, %arg5: memref<1x128x384xbf16, #tpu.memory_space<vmem>>, %arg6: memref<1x1x384xf32, #tpu.memory_space<vmem>>, %arg7: memref<8x8x128xf32, #tpu.memory_space<vmem>>, %arg8: memref<8x128xf32, #tpu.memory_space<vmem>>, %arg9: memref<8x8x384xf32, #tpu.memory_space<vmem>>) attributes {dimension_semantics = [#tpu.dimension_semantics<parallel>, #tpu.dimension_semantics<arbitrary>], iteration_bounds = array<i64: 2, 1>, scalar_prefetch = 0 : i64, scratch_operands = 2 : i64, tpu.core_type = #tpu.core_type<tc>, window_params = [{transform_indices = @transform_0, window_bounds = array<i64: 8, 8, 384>}, {transform_indices = @transform_1, window_bounds = array<i64: 1, 384, 384>}, {transform_indices = @transform_2, window_bounds = array<i64: 1, 1, 384>}, {transform_indices = @transform_3, window_bounds = array<i64: 1, 128, 384>}, {transform_indices = @transform_4, window_bounds = array<i64: 1, 1, 384>}, {transform_indices = @transform_5, window_bounds = array<i64: 8, 8, 128>}]} {
    %c0_i32 = arith.constant 0 : i32
    %0 = arith.cmpi eq, %arg1, %c0_i32 : i32
    %1 = arith.extui %0 : i1 to i32
    %c0_i32_0 = arith.constant 0 : i32
    %2 = arith.cmpi ne, %1, %c0_i32_0 : i32
    scf.if %2 {
      %cst_121 = arith.constant 0.000000e+00 : f32
      %385 = vector.broadcast %cst_121 : f32 to vector<8x128xf32>
      %c0_122 = arith.constant 0 : index
      %c0_123 = arith.constant 0 : index
      %386 = vector.load %arg8[%c0_122, %c0_123] : memref<8x128xf32, #tpu.memory_space<vmem>>, vector<8x128xf32>
      tpu.vector_store %arg8[%c0_122, %c0_123], %385 {strides = array<i32>} : memref<8x128xf32, #tpu.memory_space<vmem>>, vector<8x128xf32>,
    } else {
    }
    %c0 = arith.constant 0 : index
    %c0_1 = arith.constant 0 : index
    %c0_2 = arith.constant 0 : index
    %3 = vector.load %arg2[%c0, %c0_1, %c0_2] : memref<8x8x384xf32, #tpu.memory_space<vmem>>, vector<8x8x384xf32>
    %4 = vector.shape_cast %3 : vector<8x8x384xf32> to vector<64x384xf32>
    %5 = arith.truncf %4 : vector<64x384xf32> to vector<64x384xbf16>
    %c0_3 = arith.constant 0 : index
    %c0_4 = arith.constant 0 : index
    %c0_5 = arith.constant 0 : index
    %6 = vector.load %arg3[%c0_3, %c0_4, %c0_5] : memref<1x384x384xbf16, #tpu.memory_space<vmem>>, vector<1x384x384xbf16>
    %7 = vector.shape_cast %6 : vector<1x384x384xbf16> to vector<384x384xbf16>
    %cst = arith.constant dense<0.000000e+00> : vector<64x384xf32>
    %8 = tpu.matmul %5, %7, %cst {dimension_numbers = #tpu.dot_dimension_numbers<[1], [0], [0], [1], [0, 0, 1, 1], [], []>} : vector<64x384xbf16>, vector<384x384xbf16>, vector<64x384xf32> -> vector<64x384xf32>
    %c0_6 = arith.constant 0 : index
    %c0_7 = arith.constant 0 : index
    %c0_8 = arith.constant 0 : index
    %9 = vector.load %arg4[%c0_6, %c0_7, %c0_8] : memref<1x1x384xf32, #tpu.memory_space<vmem>>, vector<1x1x384xf32>
    %10 = vector.shape_cast %9 : vector<1x1x384xf32> to vector<1x384xf32>
    %11 = vector.broadcast %10 : vector<1x384xf32> to vector<64x384xf32>
    %12 = arith.addf %8, %11 : vector<64x384xf32>
    %13 = vector.shape_cast %12 : vector<64x384xf32> to vector<8x8x384xf32>
    %c0_9 = arith.constant 0 : index
    %c0_10 = arith.constant 0 : index
    %c0_11 = arith.constant 0 : index
    %14 = vector.load %arg9[%c0_9, %c0_10, %c0_11] : memref<8x8x384xf32, #tpu.memory_space<vmem>>, vector<8x8x384xf32>
    tpu.vector_store %arg9[%c0_9, %c0_10, %c0_11], %13 {strides = array<i32>} : memref<8x8x384xf32, #tpu.memory_space<vmem>>, vector<8x8x384xf32>,
    %c0_12 = arith.constant 0 : index
    %c0_13 = arith.constant 0 : index
    %c0_14 = arith.constant 0 : index
    %15 = vector.load %arg5[%c0_12, %c0_13, %c0_14] : memref<1x128x384xbf16, #tpu.memory_space<vmem>>, vector<1x128x384xbf16>
    %16 = vector.shape_cast %15 : vector<1x128x384xbf16> to vector<128x384xbf16>
    %c0_15 = arith.constant 0 : index
    %c0_16 = arith.constant 0 : index
    %c0_17 = arith.constant 0 : index
    %17 = vector.load %arg6[%c0_15, %c0_16, %c0_17] : memref<1x1x384xf32, #tpu.memory_space<vmem>>, vector<1x1x384xf32>
    %18 = vector.shape_cast %17 : vector<1x1x384xf32> to vector<1x384xf32>
    %c2_i32 = arith.constant 2 : i32
    %19 = arith.muli %c2_i32, %arg1 : i32
    %c0_i32_18 = arith.constant 0 : i32
    %20 = arith.subi %c0_i32_18, %19 : i32
    %21 = arith.muli %arg0, %20 : i32
    %22 = arith.addi %arg1, %21 : i32
    %c0_19 = arith.constant 0 : index
    %c0_20 = arith.constant 0 : index
    %23 = vector.load %arg8[%c0_19, %c0_20] : memref<8x128xf32, #tpu.memory_space<vmem>>, vector<8x128xf32>
    %c0_i32_21 = arith.constant 0 : i32
    %c2_i32_22 = arith.constant 2 : i32
    %24 = arith.muli %c2_i32_22, %c0_i32_21 : i32
    %c7_i32 = arith.constant 7 : i32
    %25 = arith.subi %c7_i32, %24 : i32
    %26 = arith.muli %arg0, %25 : i32
    %27 = arith.addi %c0_i32_21, %26 : i32
    %28 = arith.index_cast %27 : i32 to index
    %c0_23 = arith.constant 0 : index
    %c0_24 = arith.constant 0 : index
    %29 = vector.load %arg9[%28, %c0_23, %c0_24] : memref<8x8x384xf32, #tpu.memory_space<vmem>>, vector<1x8x384xf32>
    %30 = vector.shape_cast %29 : vector<1x8x384xf32> to vector<8x384xf32>
    %31 = arith.truncf %23 : vector<8x128xf32> to vector<8x128xbf16>
    %cst_25 = arith.constant dense<0.000000e+00> : vector<8x384xf32>
    %32 = tpu.matmul %31, %16, %cst_25 {dimension_numbers = #tpu.dot_dimension_numbers<[1], [0], [0], [1], [0, 0, 1, 1], [], []>} : vector<8x128xbf16>, vector<128x384xbf16>, vector<8x384xf32> -> vector<8x384xf32>
    %33 = vector.broadcast %18 : vector<1x384xf32> to vector<8x384xf32>
    %34 = arith.addf %32, %33 : vector<8x384xf32>
    %35 = vector.extract_strided_slice %30 {offsets = [0, 0], sizes = [8, 128], strides = [1, 1]} : vector<8x384xf32> to vector<8x128xf32>
    %36 = vector.extract_strided_slice %34 {offsets = [0, 0], sizes = [8, 128], strides = [1, 1]} : vector<8x384xf32> to vector<8x128xf32>
    %37 = arith.addf %35, %36 : vector<8x128xf32>
    %38 = arith.negf %37 : vector<8x128xf32>
    %39 = math.exp %38 : vector<8x128xf32>
    %cst_26 = arith.constant 1.000000e+00 : f32
    %40 = vector.broadcast %cst_26 : f32 to vector<8x128xf32>
    %41 = arith.addf %40, %39 : vector<8x128xf32>
    %42 = arith.divf %40, %41 : vector<8x128xf32>
    %43 = vector.extract_strided_slice %30 {offsets = [0, 128], sizes = [8, 128], strides = [1, 1]} : vector<8x384xf32> to vector<8x128xf32>
    %44 = vector.extract_strided_slice %34 {offsets = [0, 128], sizes = [8, 128], strides = [1, 1]} : vector<8x384xf32> to vector<8x128xf32>
    %45 = arith.addf %43, %44 : vector<8x128xf32>
    %46 = arith.negf %45 : vector<8x128xf32>
    %47 = math.exp %46 : vector<8x128xf32>
    %cst_27 = arith.constant 1.000000e+00 : f32
    %48 = vector.broadcast %cst_27 : f32 to vector<8x128xf32>
    %49 = arith.addf %48, %47 : vector<8x128xf32>
    %50 = arith.divf %48, %49 : vector<8x128xf32>
    %51 = vector.extract_strided_slice %30 {offsets = [0, 256], sizes = [8, 128], strides = [1, 1]} : vector<8x384xf32> to vector<8x128xf32>
    %52 = vector.extract_strided_slice %34 {offsets = [0, 256], sizes = [8, 128], strides = [1, 1]} : vector<8x384xf32> to vector<8x128xf32>
    %53 = arith.mulf %42, %52 : vector<8x128xf32>
    %54 = arith.addf %51, %53 : vector<8x128xf32>
    %55 = math.tanh %54 : vector<8x128xf32>
    %cst_28 = arith.constant 1.000000e+00 : f32
    %56 = vector.broadcast %cst_28 : f32 to vector<8x128xf32>
    %57 = arith.subf %56, %50 : vector<8x128xf32>
    %58 = arith.mulf %57, %55 : vector<8x128xf32>
    %59 = arith.mulf %50, %23 : vector<8x128xf32>
    %60 = arith.addf %58, %59 : vector<8x128xf32>
    %c8_i32 = arith.constant 8 : i32
    %61 = arith.muli %22, %c8_i32 : i32
    %62 = arith.addi %61, %27 : i32
    %c8_i32_29 = arith.constant 8 : i32
    %63 = arith.cmpi slt, %62, %c8_i32_29 : i32
    %64 = arith.select %63, %60, %23 : vector<8x128xf32>
    %65 = arith.index_cast %27 : i32 to index
    %c0_30 = arith.constant 0 : index
    %c0_31 = arith.constant 0 : index
    %66 = vector.load %arg7[%65, %c0_30, %c0_31] : memref<8x8x128xf32, #tpu.memory_space<vmem>>, vector<1x8x128xf32>
    %67 = vector.shape_cast %66 : vector<1x8x128xf32> to vector<8x128xf32>
    %68 = vector.shape_cast %64 : vector<8x128xf32> to vector<1x8x128xf32>
    tpu.vector_store %arg7[%65, %c0_30, %c0_31], %68 {strides = array<i32>} : memref<8x8x128xf32, #tpu.memory_space<vmem>>, vector<1x8x128xf32>,
    %c1_i32 = arith.constant 1 : i32
    %c2_i32_32 = arith.constant 2 : i32
    %69 = arith.muli %c2_i32_32, %c1_i32 : i32
    %c7_i32_33 = arith.constant 7 : i32
    %70 = arith.subi %c7_i32_33, %69 : i32
    %71 = arith.muli %arg0, %70 : i32
    %72 = arith.addi %c1_i32, %71 : i32
    %73 = arith.index_cast %72 : i32 to index
    %c0_34 = arith.constant 0 : index
    %c0_35 = arith.constant 0 : index
    %74 = vector.load %arg9[%73, %c0_34, %c0_35] : memref<8x8x384xf32, #tpu.memory_space<vmem>>, vector<1x8x384xf32>
    %75 = vector.shape_cast %74 : vector<1x8x384xf32> to vector<8x384xf32>
    %76 = arith.truncf %64 : vector<8x128xf32> to vector<8x128xbf16>
    %cst_36 = arith.constant dense<0.000000e+00> : vector<8x384xf32>
    %77 = tpu.matmul %76, %16, %cst_36 {dimension_numbers = #tpu.dot_dimension_numbers<[1], [0], [0], [1], [0, 0, 1, 1], [], []>} : vector<8x128xbf16>, vector<128x384xbf16>, vector<8x384xf32> -> vector<8x384xf32>
    %78 = vector.broadcast %18 : vector<1x384xf32> to vector<8x384xf32>
    %79 = arith.addf %77, %78 : vector<8x384xf32>
    %80 = vector.extract_strided_slice %75 {offsets = [0, 0], sizes = [8, 128], strides = [1, 1]} : vector<8x384xf32> to vector<8x128xf32>
    %81 = vector.extract_strided_slice %79 {offsets = [0, 0], sizes = [8, 128], strides = [1, 1]} : vector<8x384xf32> to vector<8x128xf32>
    %82 = arith.addf %80, %81 : vector<8x128xf32>
    %83 = arith.negf %82 : vector<8x128xf32>
    %84 = math.exp %83 : vector<8x128xf32>
    %cst_37 = arith.constant 1.000000e+00 : f32
    %85 = vector.broadcast %cst_37 : f32 to vector<8x128xf32>
    %86 = arith.addf %85, %84 : vector<8x128xf32>
    %87 = arith.divf %85, %86 : vector<8x128xf32>
    %88 = vector.extract_strided_slice %75 {offsets = [0, 128], sizes = [8, 128], strides = [1, 1]} : vector<8x384xf32> to vector<8x128xf32>
    %89 = vector.extract_strided_slice %79 {offsets = [0, 128], sizes = [8, 128], strides = [1, 1]} : vector<8x384xf32> to vector<8x128xf32>
    %90 = arith.addf %88, %89 : vector<8x128xf32>
    %91 = arith.negf %90 : vector<8x128xf32>
    %92 = math.exp %91 : vector<8x128xf32>
    %cst_38 = arith.constant 1.000000e+00 : f32
    %93 = vector.broadcast %cst_38 : f32 to vector<8x128xf32>
    %94 = arith.addf %93, %92 : vector<8x128xf32>
    %95 = arith.divf %93, %94 : vector<8x128xf32>
    %96 = vector.extract_strided_slice %75 {offsets = [0, 256], sizes = [8, 128], strides = [1, 1]} : vector<8x384xf32> to vector<8x128xf32>
    %97 = vector.extract_strided_slice %79 {offsets = [0, 256], sizes = [8, 128], strides = [1, 1]} : vector<8x384xf32> to vector<8x128xf32>
    %98 = arith.mulf %87, %97 : vector<8x128xf32>
    %99 = arith.addf %96, %98 : vector<8x128xf32>
    %100 = math.tanh %99 : vector<8x128xf32>
    %cst_39 = arith.constant 1.000000e+00 : f32
    %101 = vector.broadcast %cst_39 : f32 to vector<8x128xf32>
    %102 = arith.subf %101, %95 : vector<8x128xf32>
    %103 = arith.mulf %102, %100 : vector<8x128xf32>
    %104 = arith.mulf %95, %64 : vector<8x128xf32>
    %105 = arith.addf %103, %104 : vector<8x128xf32>
    %c8_i32_40 = arith.constant 8 : i32
    %106 = arith.muli %22, %c8_i32_40 : i32
    %107 = arith.addi %106, %72 : i32
    %c8_i32_41 = arith.constant 8 : i32
    %108 = arith.cmpi slt, %107, %c8_i32_41 : i32
    %109 = arith.select %108, %105, %64 : vector<8x128xf32>
    %110 = arith.index_cast %72 : i32 to index
    %c0_42 = arith.constant 0 : index
    %c0_43 = arith.constant 0 : index
    %111 = vector.load %arg7[%110, %c0_42, %c0_43] : memref<8x8x128xf32, #tpu.memory_space<vmem>>, vector<1x8x128xf32>
    %112 = vector.shape_cast %111 : vector<1x8x128xf32> to vector<8x128xf32>
    %113 = vector.shape_cast %109 : vector<8x128xf32> to vector<1x8x128xf32>
    tpu.vector_store %arg7[%110, %c0_42, %c0_43], %113 {strides = array<i32>} : memref<8x8x128xf32, #tpu.memory_space<vmem>>, vector<1x8x128xf32>,
    %c2_i32_44 = arith.constant 2 : i32
    %c2_i32_45 = arith.constant 2 : i32
    %114 = arith.muli %c2_i32_45, %c2_i32_44 : i32
    %c7_i32_46 = arith.constant 7 : i32
    %115 = arith.subi %c7_i32_46, %114 : i32
    %116 = arith.muli %arg0, %115 : i32
    %117 = arith.addi %c2_i32_44, %116 : i32
    %118 = arith.index_cast %117 : i32 to index
    %c0_47 = arith.constant 0 : index
    %c0_48 = arith.constant 0 : index
    %119 = vector.load %arg9[%118, %c0_47, %c0_48] : memref<8x8x384xf32, #tpu.memory_space<vmem>>, vector<1x8x384xf32>
    %120 = vector.shape_cast %119 : vector<1x8x384xf32> to vector<8x384xf32>
    %121 = arith.truncf %109 : vector<8x128xf32> to vector<8x128xbf16>
    %cst_49 = arith.constant dense<0.000000e+00> : vector<8x384xf32>
    %122 = tpu.matmul %121, %16, %cst_49 {dimension_numbers = #tpu.dot_dimension_numbers<[1], [0], [0], [1], [0, 0, 1, 1], [], []>} : vector<8x128xbf16>, vector<128x384xbf16>, vector<8x384xf32> -> vector<8x384xf32>
    %123 = vector.broadcast %18 : vector<1x384xf32> to vector<8x384xf32>
    %124 = arith.addf %122, %123 : vector<8x384xf32>
    %125 = vector.extract_strided_slice %120 {offsets = [0, 0], sizes = [8, 128], strides = [1, 1]} : vector<8x384xf32> to vector<8x128xf32>
    %126 = vector.extract_strided_slice %124 {offsets = [0, 0], sizes = [8, 128], strides = [1, 1]} : vector<8x384xf32> to vector<8x128xf32>
    %127 = arith.addf %125, %126 : vector<8x128xf32>
    %128 = arith.negf %127 : vector<8x128xf32>
    %129 = math.exp %128 : vector<8x128xf32>
    %cst_50 = arith.constant 1.000000e+00 : f32
    %130 = vector.broadcast %cst_50 : f32 to vector<8x128xf32>
    %131 = arith.addf %130, %129 : vector<8x128xf32>
    %132 = arith.divf %130, %131 : vector<8x128xf32>
    %133 = vector.extract_strided_slice %120 {offsets = [0, 128], sizes = [8, 128], strides = [1, 1]} : vector<8x384xf32> to vector<8x128xf32>
    %134 = vector.extract_strided_slice %124 {offsets = [0, 128], sizes = [8, 128], strides = [1, 1]} : vector<8x384xf32> to vector<8x128xf32>
    %135 = arith.addf %133, %134 : vector<8x128xf32>
    %136 = arith.negf %135 : vector<8x128xf32>
    %137 = math.exp %136 : vector<8x128xf32>
    %cst_51 = arith.constant 1.000000e+00 : f32
    %138 = vector.broadcast %cst_51 : f32 to vector<8x128xf32>
    %139 = arith.addf %138, %137 : vector<8x128xf32>
    %140 = arith.divf %138, %139 : vector<8x128xf32>
    %141 = vector.extract_strided_slice %120 {offsets = [0, 256], sizes = [8, 128], strides = [1, 1]} : vector<8x384xf32> to vector<8x128xf32>
    %142 = vector.extract_strided_slice %124 {offsets = [0, 256], sizes = [8, 128], strides = [1, 1]} : vector<8x384xf32> to vector<8x128xf32>
    %143 = arith.mulf %132, %142 : vector<8x128xf32>
    %144 = arith.addf %141, %143 : vector<8x128xf32>
    %145 = math.tanh %144 : vector<8x128xf32>
    %cst_52 = arith.constant 1.000000e+00 : f32
    %146 = vector.broadcast %cst_52 : f32 to vector<8x128xf32>
    %147 = arith.subf %146, %140 : vector<8x128xf32>
    %148 = arith.mulf %147, %145 : vector<8x128xf32>
    %149 = arith.mulf %140, %109 : vector<8x128xf32>
    %150 = arith.addf %148, %149 : vector<8x128xf32>
    %c8_i32_53 = arith.constant 8 : i32
    %151 = arith.muli %22, %c8_i32_53 : i32
    %152 = arith.addi %151, %117 : i32
    %c8_i32_54 = arith.constant 8 : i32
    %153 = arith.cmpi slt, %152, %c8_i32_54 : i32
    %154 = arith.select %153, %150, %109 : vector<8x128xf32>
    %155 = arith.index_cast %117 : i32 to index
    %c0_55 = arith.constant 0 : index
    %c0_56 = arith.constant 0 : index
    %156 = vector.load %arg7[%155, %c0_55, %c0_56] : memref<8x8x128xf32, #tpu.memory_space<vmem>>, vector<1x8x128xf32>
    %157 = vector.shape_cast %156 : vector<1x8x128xf32> to vector<8x128xf32>
    %158 = vector.shape_cast %154 : vector<8x128xf32> to vector<1x8x128xf32>
    tpu.vector_store %arg7[%155, %c0_55, %c0_56], %158 {strides = array<i32>} : memref<8x8x128xf32, #tpu.memory_space<vmem>>, vector<1x8x128xf32>,
    %c3_i32 = arith.constant 3 : i32
    %c2_i32_57 = arith.constant 2 : i32
    %159 = arith.muli %c2_i32_57, %c3_i32 : i32
    %c7_i32_58 = arith.constant 7 : i32
    %160 = arith.subi %c7_i32_58, %159 : i32
    %161 = arith.muli %arg0, %160 : i32
    %162 = arith.addi %c3_i32, %161 : i32
    %163 = arith.index_cast %162 : i32 to index
    %c0_59 = arith.constant 0 : index
    %c0_60 = arith.constant 0 : index
    %164 = vector.load %arg9[%163, %c0_59, %c0_60] : memref<8x8x384xf32, #tpu.memory_space<vmem>>, vector<1x8x384xf32>
    %165 = vector.shape_cast %164 : vector<1x8x384xf32> to vector<8x384xf32>
    %166 = arith.truncf %154 : vector<8x128xf32> to vector<8x128xbf16>
    %cst_61 = arith.constant dense<0.000000e+00> : vector<8x384xf32>
    %167 = tpu.matmul %166, %16, %cst_61 {dimension_numbers = #tpu.dot_dimension_numbers<[1], [0], [0], [1], [0, 0, 1, 1], [], []>} : vector<8x128xbf16>, vector<128x384xbf16>, vector<8x384xf32> -> vector<8x384xf32>
    %168 = vector.broadcast %18 : vector<1x384xf32> to vector<8x384xf32>
    %169 = arith.addf %167, %168 : vector<8x384xf32>
    %170 = vector.extract_strided_slice %165 {offsets = [0, 0], sizes = [8, 128], strides = [1, 1]} : vector<8x384xf32> to vector<8x128xf32>
    %171 = vector.extract_strided_slice %169 {offsets = [0, 0], sizes = [8, 128], strides = [1, 1]} : vector<8x384xf32> to vector<8x128xf32>
    %172 = arith.addf %170, %171 : vector<8x128xf32>
    %173 = arith.negf %172 : vector<8x128xf32>
    %174 = math.exp %173 : vector<8x128xf32>
    %cst_62 = arith.constant 1.000000e+00 : f32
    %175 = vector.broadcast %cst_62 : f32 to vector<8x128xf32>
    %176 = arith.addf %175, %174 : vector<8x128xf32>
    %177 = arith.divf %175, %176 : vector<8x128xf32>
    %178 = vector.extract_strided_slice %165 {offsets = [0, 128], sizes = [8, 128], strides = [1, 1]} : vector<8x384xf32> to vector<8x128xf32>
    %179 = vector.extract_strided_slice %169 {offsets = [0, 128], sizes = [8, 128], strides = [1, 1]} : vector<8x384xf32> to vector<8x128xf32>
    %180 = arith.addf %178, %179 : vector<8x128xf32>
    %181 = arith.negf %180 : vector<8x128xf32>
    %182 = math.exp %181 : vector<8x128xf32>
    %cst_63 = arith.constant 1.000000e+00 : f32
    %183 = vector.broadcast %cst_63 : f32 to vector<8x128xf32>
    %184 = arith.addf %183, %182 : vector<8x128xf32>
    %185 = arith.divf %183, %184 : vector<8x128xf32>
    %186 = vector.extract_strided_slice %165 {offsets = [0, 256], sizes = [8, 128], strides = [1, 1]} : vector<8x384xf32> to vector<8x128xf32>
    %187 = vector.extract_strided_slice %169 {offsets = [0, 256], sizes = [8, 128], strides = [1, 1]} : vector<8x384xf32> to vector<8x128xf32>
    %188 = arith.mulf %177, %187 : vector<8x128xf32>
    %189 = arith.addf %186, %188 : vector<8x128xf32>
    %190 = math.tanh %189 : vector<8x128xf32>
    %cst_64 = arith.constant 1.000000e+00 : f32
    %191 = vector.broadcast %cst_64 : f32 to vector<8x128xf32>
    %192 = arith.subf %191, %185 : vector<8x128xf32>
    %193 = arith.mulf %192, %190 : vector<8x128xf32>
    %194 = arith.mulf %185, %154 : vector<8x128xf32>
    %195 = arith.addf %193, %194 : vector<8x128xf32>
    %c8_i32_65 = arith.constant 8 : i32
    %196 = arith.muli %22, %c8_i32_65 : i32
    %197 = arith.addi %196, %162 : i32
    %c8_i32_66 = arith.constant 8 : i32
    %198 = arith.cmpi slt, %197, %c8_i32_66 : i32
    %199 = arith.select %198, %195, %154 : vector<8x128xf32>
    %200 = arith.index_cast %162 : i32 to index
    %c0_67 = arith.constant 0 : index
    %c0_68 = arith.constant 0 : index
    %201 = vector.load %arg7[%200, %c0_67, %c0_68] : memref<8x8x128xf32, #tpu.memory_space<vmem>>, vector<1x8x128xf32>
    %202 = vector.shape_cast %201 : vector<1x8x128xf32> to vector<8x128xf32>
    %203 = vector.shape_cast %199 : vector<8x128xf32> to vector<1x8x128xf32>
    tpu.vector_store %arg7[%200, %c0_67, %c0_68], %203 {strides = array<i32>} : memref<8x8x128xf32, #tpu.memory_space<vmem>>, vector<1x8x128xf32>,
    %c4_i32 = arith.constant 4 : i32
    %c2_i32_69 = arith.constant 2 : i32
    %204 = arith.muli %c2_i32_69, %c4_i32 : i32
    %c7_i32_70 = arith.constant 7 : i32
    %205 = arith.subi %c7_i32_70, %204 : i32
    %206 = arith.muli %arg0, %205 : i32
    %207 = arith.addi %c4_i32, %206 : i32
    %208 = arith.index_cast %207 : i32 to index
    %c0_71 = arith.constant 0 : index
    %c0_72 = arith.constant 0 : index
    %209 = vector.load %arg9[%208, %c0_71, %c0_72] : memref<8x8x384xf32, #tpu.memory_space<vmem>>, vector<1x8x384xf32>
    %210 = vector.shape_cast %209 : vector<1x8x384xf32> to vector<8x384xf32>
    %211 = arith.truncf %199 : vector<8x128xf32> to vector<8x128xbf16>
    %cst_73 = arith.constant dense<0.000000e+00> : vector<8x384xf32>
    %212 = tpu.matmul %211, %16, %cst_73 {dimension_numbers = #tpu.dot_dimension_numbers<[1], [0], [0], [1], [0, 0, 1, 1], [], []>} : vector<8x128xbf16>, vector<128x384xbf16>, vector<8x384xf32> -> vector<8x384xf32>
    %213 = vector.broadcast %18 : vector<1x384xf32> to vector<8x384xf32>
    %214 = arith.addf %212, %213 : vector<8x384xf32>
    %215 = vector.extract_strided_slice %210 {offsets = [0, 0], sizes = [8, 128], strides = [1, 1]} : vector<8x384xf32> to vector<8x128xf32>
    %216 = vector.extract_strided_slice %214 {offsets = [0, 0], sizes = [8, 128], strides = [1, 1]} : vector<8x384xf32> to vector<8x128xf32>
    %217 = arith.addf %215, %216 : vector<8x128xf32>
    %218 = arith.negf %217 : vector<8x128xf32>
    %219 = math.exp %218 : vector<8x128xf32>
    %cst_74 = arith.constant 1.000000e+00 : f32
    %220 = vector.broadcast %cst_74 : f32 to vector<8x128xf32>
    %221 = arith.addf %220, %219 : vector<8x128xf32>
    %222 = arith.divf %220, %221 : vector<8x128xf32>
    %223 = vector.extract_strided_slice %210 {offsets = [0, 128], sizes = [8, 128], strides = [1, 1]} : vector<8x384xf32> to vector<8x128xf32>
    %224 = vector.extract_strided_slice %214 {offsets = [0, 128], sizes = [8, 128], strides = [1, 1]} : vector<8x384xf32> to vector<8x128xf32>
    %225 = arith.addf %223, %224 : vector<8x128xf32>
    %226 = arith.negf %225 : vector<8x128xf32>
    %227 = math.exp %226 : vector<8x128xf32>
    %cst_75 = arith.constant 1.000000e+00 : f32
    %228 = vector.broadcast %cst_75 : f32 to vector<8x128xf32>
    %229 = arith.addf %228, %227 : vector<8x128xf32>
    %230 = arith.divf %228, %229 : vector<8x128xf32>
    %231 = vector.extract_strided_slice %210 {offsets = [0, 256], sizes = [8, 128], strides = [1, 1]} : vector<8x384xf32> to vector<8x128xf32>
    %232 = vector.extract_strided_slice %214 {offsets = [0, 256], sizes = [8, 128], strides = [1, 1]} : vector<8x384xf32> to vector<8x128xf32>
    %233 = arith.mulf %222, %232 : vector<8x128xf32>
    %234 = arith.addf %231, %233 : vector<8x128xf32>
    %235 = math.tanh %234 : vector<8x128xf32>
    %cst_76 = arith.constant 1.000000e+00 : f32
    %236 = vector.broadcast %cst_76 : f32 to vector<8x128xf32>
    %237 = arith.subf %236, %230 : vector<8x128xf32>
    %238 = arith.mulf %237, %235 : vector<8x128xf32>
    %239 = arith.mulf %230, %199 : vector<8x128xf32>
    %240 = arith.addf %238, %239 : vector<8x128xf32>
    %c8_i32_77 = arith.constant 8 : i32
    %241 = arith.muli %22, %c8_i32_77 : i32
    %242 = arith.addi %241, %207 : i32
    %c8_i32_78 = arith.constant 8 : i32
    %243 = arith.cmpi slt, %242, %c8_i32_78 : i32
    %244 = arith.select %243, %240, %199 : vector<8x128xf32>
    %245 = arith.index_cast %207 : i32 to index
    %c0_79 = arith.constant 0 : index
    %c0_80 = arith.constant 0 : index
    %246 = vector.load %arg7[%245, %c0_79, %c0_80] : memref<8x8x128xf32, #tpu.memory_space<vmem>>, vector<1x8x128xf32>
    %247 = vector.shape_cast %246 : vector<1x8x128xf32> to vector<8x128xf32>
    %248 = vector.shape_cast %244 : vector<8x128xf32> to vector<1x8x128xf32>
    tpu.vector_store %arg7[%245, %c0_79, %c0_80], %248 {strides = array<i32>} : memref<8x8x128xf32, #tpu.memory_space<vmem>>, vector<1x8x128xf32>,
    %c5_i32 = arith.constant 5 : i32
    %c2_i32_81 = arith.constant 2 : i32
    %249 = arith.muli %c2_i32_81, %c5_i32 : i32
    %c7_i32_82 = arith.constant 7 : i32
    %250 = arith.subi %c7_i32_82, %249 : i32
    %251 = arith.muli %arg0, %250 : i32
    %252 = arith.addi %c5_i32, %251 : i32
    %253 = arith.index_cast %252 : i32 to index
    %c0_83 = arith.constant 0 : index
    %c0_84 = arith.constant 0 : index
    %254 = vector.load %arg9[%253, %c0_83, %c0_84] : memref<8x8x384xf32, #tpu.memory_space<vmem>>, vector<1x8x384xf32>
    %255 = vector.shape_cast %254 : vector<1x8x384xf32> to vector<8x384xf32>
    %256 = arith.truncf %244 : vector<8x128xf32> to vector<8x128xbf16>
    %cst_85 = arith.constant dense<0.000000e+00> : vector<8x384xf32>
    %257 = tpu.matmul %256, %16, %cst_85 {dimension_numbers = #tpu.dot_dimension_numbers<[1], [0], [0], [1], [0, 0, 1, 1], [], []>} : vector<8x128xbf16>, vector<128x384xbf16>, vector<8x384xf32> -> vector<8x384xf32>
    %258 = vector.broadcast %18 : vector<1x384xf32> to vector<8x384xf32>
    %259 = arith.addf %257, %258 : vector<8x384xf32>
    %260 = vector.extract_strided_slice %255 {offsets = [0, 0], sizes = [8, 128], strides = [1, 1]} : vector<8x384xf32> to vector<8x128xf32>
    %261 = vector.extract_strided_slice %259 {offsets = [0, 0], sizes = [8, 128], strides = [1, 1]} : vector<8x384xf32> to vector<8x128xf32>
    %262 = arith.addf %260, %261 : vector<8x128xf32>
    %263 = arith.negf %262 : vector<8x128xf32>
    %264 = math.exp %263 : vector<8x128xf32>
    %cst_86 = arith.constant 1.000000e+00 : f32
    %265 = vector.broadcast %cst_86 : f32 to vector<8x128xf32>
    %266 = arith.addf %265, %264 : vector<8x128xf32>
    %267 = arith.divf %265, %266 : vector<8x128xf32>
    %268 = vector.extract_strided_slice %255 {offsets = [0, 128], sizes = [8, 128], strides = [1, 1]} : vector<8x384xf32> to vector<8x128xf32>
    %269 = vector.extract_strided_slice %259 {offsets = [0, 128], sizes = [8, 128], strides = [1, 1]} : vector<8x384xf32> to vector<8x128xf32>
    %270 = arith.addf %268, %269 : vector<8x128xf32>
    %271 = arith.negf %270 : vector<8x128xf32>
    %272 = math.exp %271 : vector<8x128xf32>
    %cst_87 = arith.constant 1.000000e+00 : f32
    %273 = vector.broadcast %cst_87 : f32 to vector<8x128xf32>
    %274 = arith.addf %273, %272 : vector<8x128xf32>
    %275 = arith.divf %273, %274 : vector<8x128xf32>
    %276 = vector.extract_strided_slice %255 {offsets = [0, 256], sizes = [8, 128], strides = [1, 1]} : vector<8x384xf32> to vector<8x128xf32>
    %277 = vector.extract_strided_slice %259 {offsets = [0, 256], sizes = [8, 128], strides = [1, 1]} : vector<8x384xf32> to vector<8x128xf32>
    %278 = arith.mulf %267, %277 : vector<8x128xf32>
    %279 = arith.addf %276, %278 : vector<8x128xf32>
    %280 = math.tanh %279 : vector<8x128xf32>
    %cst_88 = arith.constant 1.000000e+00 : f32
    %281 = vector.broadcast %cst_88 : f32 to vector<8x128xf32>
    %282 = arith.subf %281, %275 : vector<8x128xf32>
    %283 = arith.mulf %282, %280 : vector<8x128xf32>
    %284 = arith.mulf %275, %244 : vector<8x128xf32>
    %285 = arith.addf %283, %284 : vector<8x128xf32>
    %c8_i32_89 = arith.constant 8 : i32
    %286 = arith.muli %22, %c8_i32_89 : i32
    %287 = arith.addi %286, %252 : i32
    %c8_i32_90 = arith.constant 8 : i32
    %288 = arith.cmpi slt, %287, %c8_i32_90 : i32
    %289 = arith.select %288, %285, %244 : vector<8x128xf32>
    %290 = arith.index_cast %252 : i32 to index
    %c0_91 = arith.constant 0 : index
    %c0_92 = arith.constant 0 : index
    %291 = vector.load %arg7[%290, %c0_91, %c0_92] : memref<8x8x128xf32, #tpu.memory_space<vmem>>, vector<1x8x128xf32>
    %292 = vector.shape_cast %291 : vector<1x8x128xf32> to vector<8x128xf32>
    %293 = vector.shape_cast %289 : vector<8x128xf32> to vector<1x8x128xf32>
    tpu.vector_store %arg7[%290, %c0_91, %c0_92], %293 {strides = array<i32>} : memref<8x8x128xf32, #tpu.memory_space<vmem>>, vector<1x8x128xf32>,
    %c6_i32 = arith.constant 6 : i32
    %c2_i32_93 = arith.constant 2 : i32
    %294 = arith.muli %c2_i32_93, %c6_i32 : i32
    %c7_i32_94 = arith.constant 7 : i32
    %295 = arith.subi %c7_i32_94, %294 : i32
    %296 = arith.muli %arg0, %295 : i32
    %297 = arith.addi %c6_i32, %296 : i32
    %298 = arith.index_cast %297 : i32 to index
    %c0_95 = arith.constant 0 : index
    %c0_96 = arith.constant 0 : index
    %299 = vector.load %arg9[%298, %c0_95, %c0_96] : memref<8x8x384xf32, #tpu.memory_space<vmem>>, vector<1x8x384xf32>
    %300 = vector.shape_cast %299 : vector<1x8x384xf32> to vector<8x384xf32>
    %301 = arith.truncf %289 : vector<8x128xf32> to vector<8x128xbf16>
    %cst_97 = arith.constant dense<0.000000e+00> : vector<8x384xf32>
    %302 = tpu.matmul %301, %16, %cst_97 {dimension_numbers = #tpu.dot_dimension_numbers<[1], [0], [0], [1], [0, 0, 1, 1], [], []>} : vector<8x128xbf16>, vector<128x384xbf16>, vector<8x384xf32> -> vector<8x384xf32>
    %303 = vector.broadcast %18 : vector<1x384xf32> to vector<8x384xf32>
    %304 = arith.addf %302, %303 : vector<8x384xf32>
    %305 = vector.extract_strided_slice %300 {offsets = [0, 0], sizes = [8, 128], strides = [1, 1]} : vector<8x384xf32> to vector<8x128xf32>
    %306 = vector.extract_strided_slice %304 {offsets = [0, 0], sizes = [8, 128], strides = [1, 1]} : vector<8x384xf32> to vector<8x128xf32>
    %307 = arith.addf %305, %306 : vector<8x128xf32>
    %308 = arith.negf %307 : vector<8x128xf32>
    %309 = math.exp %308 : vector<8x128xf32>
    %cst_98 = arith.constant 1.000000e+00 : f32
    %310 = vector.broadcast %cst_98 : f32 to vector<8x128xf32>
    %311 = arith.addf %310, %309 : vector<8x128xf32>
    %312 = arith.divf %310, %311 : vector<8x128xf32>
    %313 = vector.extract_strided_slice %300 {offsets = [0, 128], sizes = [8, 128], strides = [1, 1]} : vector<8x384xf32> to vector<8x128xf32>
    %314 = vector.extract_strided_slice %304 {offsets = [0, 128], sizes = [8, 128], strides = [1, 1]} : vector<8x384xf32> to vector<8x128xf32>
    %315 = arith.addf %313, %314 : vector<8x128xf32>
    %316 = arith.negf %315 : vector<8x128xf32>
    %317 = math.exp %316 : vector<8x128xf32>
    %cst_99 = arith.constant 1.000000e+00 : f32
    %318 = vector.broadcast %cst_99 : f32 to vector<8x128xf32>
    %319 = arith.addf %318, %317 : vector<8x128xf32>
    %320 = arith.divf %318, %319 : vector<8x128xf32>
    %321 = vector.extract_strided_slice %300 {offsets = [0, 256], sizes = [8, 128], strides = [1, 1]} : vector<8x384xf32> to vector<8x128xf32>
    %322 = vector.extract_strided_slice %304 {offsets = [0, 256], sizes = [8, 128], strides = [1, 1]} : vector<8x384xf32> to vector<8x128xf32>
    %323 = arith.mulf %312, %322 : vector<8x128xf32>
    %324 = arith.addf %321, %323 : vector<8x128xf32>
    %325 = math.tanh %324 : vector<8x128xf32>
    %cst_100 = arith.constant 1.000000e+00 : f32
    %326 = vector.broadcast %cst_100 : f32 to vector<8x128xf32>
    %327 = arith.subf %326, %320 : vector<8x128xf32>
    %328 = arith.mulf %327, %325 : vector<8x128xf32>
    %329 = arith.mulf %320, %289 : vector<8x128xf32>
    %330 = arith.addf %328, %329 : vector<8x128xf32>
    %c8_i32_101 = arith.constant 8 : i32
    %331 = arith.muli %22, %c8_i32_101 : i32
    %332 = arith.addi %331, %297 : i32
    %c8_i32_102 = arith.constant 8 : i32
    %333 = arith.cmpi slt, %332, %c8_i32_102 : i32
    %334 = arith.select %333, %330, %289 : vector<8x128xf32>
    %335 = arith.index_cast %297 : i32 to index
    %c0_103 = arith.constant 0 : index
    %c0_104 = arith.constant 0 : index
    %336 = vector.load %arg7[%335, %c0_103, %c0_104] : memref<8x8x128xf32, #tpu.memory_space<vmem>>, vector<1x8x128xf32>
    %337 = vector.shape_cast %336 : vector<1x8x128xf32> to vector<8x128xf32>
    %338 = vector.shape_cast %334 : vector<8x128xf32> to vector<1x8x128xf32>
    tpu.vector_store %arg7[%335, %c0_103, %c0_104], %338 {strides = array<i32>} : memref<8x8x128xf32, #tpu.memory_space<vmem>>, vector<1x8x128xf32>,
    %c7_i32_105 = arith.constant 7 : i32
    %c2_i32_106 = arith.constant 2 : i32
    %339 = arith.muli %c2_i32_106, %c7_i32_105 : i32
    %c7_i32_107 = arith.constant 7 : i32
    %340 = arith.subi %c7_i32_107, %339 : i32
    %341 = arith.muli %arg0, %340 : i32
    %342 = arith.addi %c7_i32_105, %341 : i32
    %343 = arith.index_cast %342 : i32 to index
    %c0_108 = arith.constant 0 : index
    %c0_109 = arith.constant 0 : index
    %344 = vector.load %arg9[%343, %c0_108, %c0_109] : memref<8x8x384xf32, #tpu.memory_space<vmem>>, vector<1x8x384xf32>
    %345 = vector.shape_cast %344 : vector<1x8x384xf32> to vector<8x384xf32>
    %346 = arith.truncf %334 : vector<8x128xf32> to vector<8x128xbf16>
    %cst_110 = arith.constant dense<0.000000e+00> : vector<8x384xf32>
    %347 = tpu.matmul %346, %16, %cst_110 {dimension_numbers = #tpu.dot_dimension_numbers<[1], [0], [0], [1], [0, 0, 1, 1], [], []>} : vector<8x128xbf16>, vector<128x384xbf16>, vector<8x384xf32> -> vector<8x384xf32>
    %348 = vector.broadcast %18 : vector<1x384xf32> to vector<8x384xf32>
    %349 = arith.addf %347, %348 : vector<8x384xf32>
    %350 = vector.extract_strided_slice %345 {offsets = [0, 0], sizes = [8, 128], strides = [1, 1]} : vector<8x384xf32> to vector<8x128xf32>
    %351 = vector.extract_strided_slice %349 {offsets = [0, 0], sizes = [8, 128], strides = [1, 1]} : vector<8x384xf32> to vector<8x128xf32>
    %352 = arith.addf %350, %351 : vector<8x128xf32>
    %353 = arith.negf %352 : vector<8x128xf32>
    %354 = math.exp %353 : vector<8x128xf32>
    %cst_111 = arith.constant 1.000000e+00 : f32
    %355 = vector.broadcast %cst_111 : f32 to vector<8x128xf32>
    %356 = arith.addf %355, %354 : vector<8x128xf32>
    %357 = arith.divf %355, %356 : vector<8x128xf32>
    %358 = vector.extract_strided_slice %345 {offsets = [0, 128], sizes = [8, 128], strides = [1, 1]} : vector<8x384xf32> to vector<8x128xf32>
    %359 = vector.extract_strided_slice %349 {offsets = [0, 128], sizes = [8, 128], strides = [1, 1]} : vector<8x384xf32> to vector<8x128xf32>
    %360 = arith.addf %358, %359 : vector<8x128xf32>
    %361 = arith.negf %360 : vector<8x128xf32>
    %362 = math.exp %361 : vector<8x128xf32>
    %cst_112 = arith.constant 1.000000e+00 : f32
    %363 = vector.broadcast %cst_112 : f32 to vector<8x128xf32>
    %364 = arith.addf %363, %362 : vector<8x128xf32>
    %365 = arith.divf %363, %364 : vector<8x128xf32>
    %366 = vector.extract_strided_slice %345 {offsets = [0, 256], sizes = [8, 128], strides = [1, 1]} : vector<8x384xf32> to vector<8x128xf32>
    %367 = vector.extract_strided_slice %349 {offsets = [0, 256], sizes = [8, 128], strides = [1, 1]} : vector<8x384xf32> to vector<8x128xf32>
    %368 = arith.mulf %357, %367 : vector<8x128xf32>
    %369 = arith.addf %366, %368 : vector<8x128xf32>
    %370 = math.tanh %369 : vector<8x128xf32>
    %cst_113 = arith.constant 1.000000e+00 : f32
    %371 = vector.broadcast %cst_113 : f32 to vector<8x128xf32>
    %372 = arith.subf %371, %365 : vector<8x128xf32>
    %373 = arith.mulf %372, %370 : vector<8x128xf32>
    %374 = arith.mulf %365, %334 : vector<8x128xf32>
    %375 = arith.addf %373, %374 : vector<8x128xf32>
    %c8_i32_114 = arith.constant 8 : i32
    %376 = arith.muli %22, %c8_i32_114 : i32
    %377 = arith.addi %376, %342 : i32
    %c8_i32_115 = arith.constant 8 : i32
    %378 = arith.cmpi slt, %377, %c8_i32_115 : i32
    %379 = arith.select %378, %375, %334 : vector<8x128xf32>
    %380 = arith.index_cast %342 : i32 to index
    %c0_116 = arith.constant 0 : index
    %c0_117 = arith.constant 0 : index
    %381 = vector.load %arg7[%380, %c0_116, %c0_117] : memref<8x8x128xf32, #tpu.memory_space<vmem>>, vector<1x8x128xf32>
    %382 = vector.shape_cast %381 : vector<1x8x128xf32> to vector<8x128xf32>
    %383 = vector.shape_cast %379 : vector<8x128xf32> to vector<1x8x128xf32>
    tpu.vector_store %arg7[%380, %c0_116, %c0_117], %383 {strides = array<i32>} : memref<8x8x128xf32, #tpu.memory_space<vmem>>, vector<1x8x128xf32>,
    %c8_i32_118 = arith.constant 8 : i32
    %c0_119 = arith.constant 0 : index
    %c0_120 = arith.constant 0 : index
    %384 = vector.load %arg8[%c0_119, %c0_120] : memref<8x128xf32, #tpu.memory_space<vmem>>, vector<8x128xf32>
    tpu.vector_store %arg8[%c0_119, %c0_120], %379 {strides = array<i32>} : memref<8x128xf32, #tpu.memory_space<vmem>>, vector<8x128xf32>,
    return
  }
  func.func @transform_0(%arg0: i32, %arg1: i32) -> (i32, i32, i32) {
    %c2_i32 = arith.constant 2 : i32
    %0 = arith.muli %c2_i32, %arg1 : i32
    %c0_i32 = arith.constant 0 : i32
    %1 = arith.subi %c0_i32, %0 : i32
    %2 = arith.muli %arg0, %1 : i32
    %3 = arith.addi %arg1, %2 : i32
    %c0_i32_0 = arith.constant 0 : i32
    %c0_i32_1 = arith.constant 0 : i32
    %c0_i32_2 = arith.constant 0 : i32
    return %3, %c0_i32_0, %c0_i32_1 : i32, i32, i32
  }
  func.func @transform_1(%arg0: i32, %arg1: i32) -> (i32, i32, i32) {
    %c0_i32 = arith.constant 0 : i32
    %c0_i32_0 = arith.constant 0 : i32
    %c0_i32_1 = arith.constant 0 : i32
    return %arg0, %c0_i32, %c0_i32_0 : i32, i32, i32
  }
  func.func @transform_2(%arg0: i32, %arg1: i32) -> (i32, i32, i32) {
    %c0_i32 = arith.constant 0 : i32
    %c0_i32_0 = arith.constant 0 : i32
    %c0_i32_1 = arith.constant 0 : i32
    return %arg0, %c0_i32, %c0_i32_0 : i32, i32, i32
  }
  func.func @transform_3(%arg0: i32, %arg1: i32) -> (i32, i32, i32) {
    %c0_i32 = arith.constant 0 : i32
    %c0_i32_0 = arith.constant 0 : i32
    %c0_i32_1 = arith.constant 0 : i32
    return %arg0, %c0_i32, %c0_i32_0 : i32, i32, i32
  }
  func.func @transform_4(%arg0: i32, %arg1: i32) -> (i32, i32, i32) {
    %c0_i32 = arith.constant 0 : i32
    %c0_i32_0 = arith.constant 0 : i32
    %c0_i32_1 = arith.constant 0 : i32
    return %arg0, %c0_i32, %c0_i32_0 : i32, i32, i32
  }
  func.func @transform_5(%arg0: i32, %arg1: i32) -> (i32, i32, i32) {
    %c2_i32 = arith.constant 2 : i32
    %0 = arith.muli %c2_i32, %arg1 : i32
    %c0_i32 = arith.constant 0 : i32
    %1 = arith.subi %c0_i32, %0 : i32
    %2 = arith.muli %arg0, %1 : i32
    %3 = arith.addi %arg1, %2 : i32
    %c0_i32_0 = arith.constant 0 : i32
    %c0_i32_1 = arith.constant 0 : i32
    return %3, %c0_i32_0, %arg0 : i32, i32, i32
  }
}

module attributes {stable_mosaic.version = 11 : i64} {
  func.func @kernel(%arg0: i32, %arg1: memref<8x8x256xf32, #tpu.memory_space<vmem>>, %arg2: memref<256x160xbf16, #tpu.memory_space<vmem>>, %arg3: memref<10x160xf32, #tpu.memory_space<vmem>>, %arg4: memref<160x10xf32, #tpu.memory_space<vmem>>, %arg5: memref<160x2xf32, #tpu.memory_space<vmem>>, %arg6: memref<1x2xf32, #tpu.memory_space<vmem>>, %arg7: memref<8x2xf32, #tpu.memory_space<vmem>>) attributes {dimension_semantics = [#tpu.dimension_semantics<parallel>], iteration_bounds = array<i64: 1>, scalar_prefetch = 0 : i64, scratch_operands = 0 : i64, tpu.core_type = #tpu.core_type<tc>, window_params = [{transform_indices = @transform_0, window_bounds = array<i64: 8, 8, 256>}, {pipeline_mode = #tpu.pipeline_mode<synchronous>, transform_indices = @transform_1, window_bounds = array<i64: 256, 160>}, {pipeline_mode = #tpu.pipeline_mode<synchronous>, transform_indices = @transform_2, window_bounds = array<i64: 10, 160>}, {pipeline_mode = #tpu.pipeline_mode<synchronous>, transform_indices = @transform_3, window_bounds = array<i64: 160, 10>}, {pipeline_mode = #tpu.pipeline_mode<synchronous>, transform_indices = @transform_4, window_bounds = array<i64: 160, 2>}, {pipeline_mode = #tpu.pipeline_mode<synchronous>, transform_indices = @transform_5, window_bounds = array<i64: 1, 2>}, {transform_indices = @transform_6, window_bounds = array<i64: 8, 2>}]} {
    %c0 = arith.constant 0 : index
    %c0_0 = arith.constant 0 : index
    %c0_1 = arith.constant 0 : index
    %0 = vector.load %arg1[%c0, %c0_0, %c0_1] : memref<8x8x256xf32, #tpu.memory_space<vmem>>, vector<8x8x256xf32>
    %1 = vector.shape_cast %0 : vector<8x8x256xf32> to vector<64x256xf32>
    %2 = arith.truncf %1 : vector<64x256xf32> to vector<64x256xbf16>
    %c0_2 = arith.constant 0 : index
    %c0_3 = arith.constant 0 : index
    %3 = vector.load %arg2[%c0_2, %c0_3] : memref<256x160xbf16, #tpu.memory_space<vmem>>, vector<256x160xbf16>
    %cst = arith.constant dense<0.000000e+00> : vector<64x160xf32>
    %4 = tpu.matmul %2, %3, %cst {dimension_numbers = #tpu.dot_dimension_numbers<[1], [0], [0], [1], [0, 0, 1, 1], [], []>} : vector<64x256xbf16>, vector<256x160xbf16>, vector<64x160xf32> -> vector<64x160xf32>
    %5 = vector.shape_cast %4 : vector<64x160xf32> to vector<8x8x160xf32>
    %6 = tpu.iota {dimensions = array<i32: 1>} : vector<1x8x1xi32>
    %c4_i32 = arith.constant 4 : i32
    %7 = vector.broadcast %c4_i32 : i32 to vector<1x8x1xi32>
    %8 = arith.cmpi slt, %6, %7 : vector<1x8x1xi32>
    %cst_4 = arith.constant 0.000000e+00 : f32
    %9 = vector.shape_cast %8 : vector<1x8x1xi1> to vector<1x8x1xi1>
    %10 = vector.broadcast %9 : vector<1x8x1xi1> to vector<8x8x160xi1>
    %11 = vector.broadcast %cst_4 : f32 to vector<8x8x160xf32>
    %12 = arith.select %10, %5, %11 : vector<8x8x160xi1>, vector<8x8x160xf32>
    %c0_5 = arith.constant 0 : index
    %c0_6 = arith.constant 0 : index
    %13 = vector.load %arg3[%c0_5, %c0_6] : memref<10x160xf32, #tpu.memory_space<vmem>>, vector<10x160xf32>
    %c0_7 = arith.constant 0 : index
    %c0_8 = arith.constant 0 : index
    %14 = vector.load %arg4[%c0_7, %c0_8] : memref<160x10xf32, #tpu.memory_space<vmem>>, vector<160x10xf32>
    %cst_9 = arith.constant 0.000000e+00 : f32
    %15 = vector.broadcast %cst_9 : f32 to vector<64x10xf32>
    %cst_10 = arith.constant dense<0xFF800000> : vector<64xf32>
    %16 = vector.multi_reduction <maximumf>, %15, %cst_10 [1] : vector<64x10xf32> to vector<64xf32>
    %cst_11 = arith.constant 0xFF800000 : f32
    %17 = vector.broadcast %cst_11 : f32 to vector<64xf32>
    %18 = arith.maximumf %17, %16 : vector<64xf32>
    %19 = vector.shape_cast %18 : vector<64xf32> to vector<64x1xf32>
    %20 = vector.broadcast %19 : vector<64x1xf32> to vector<64x10xf32>
    %21 = arith.subf %15, %20 : vector<64x10xf32>
    %22 = math.exp %21 : vector<64x10xf32>
    %cst_12 = arith.constant dense<0.000000e+00> : vector<64xf32>
    %23 = vector.multi_reduction <add>, %22, %cst_12 [1] : vector<64x10xf32> to vector<64xf32>
    %24 = vector.shape_cast %23 : vector<64xf32> to vector<64x1xf32>
    %25 = vector.broadcast %24 : vector<64x1xf32> to vector<64x10xf32>
    %26 = arith.divf %22, %25 : vector<64x10xf32>
    %cst_13 = arith.constant dense<0.000000e+00> : vector<64x160xf32>
    %27 = tpu.matmul %26, %13, %cst_13 {dimension_numbers = #tpu.dot_dimension_numbers<[1], [0], [0], [1], [0, 0, 1, 1], [], []>} : vector<64x10xf32>, vector<10x160xf32>, vector<64x160xf32> -> vector<64x160xf32>
    %28 = vector.shape_cast %27 : vector<64x160xf32> to vector<8x8x160xf32>
    %29 = arith.mulf %28, %12 : vector<8x8x160xf32>
    %cst_14 = arith.constant dense<0.000000e+00> : vector<8x160xf32>
    %30 = vector.multi_reduction <add>, %29, %cst_14 [1] : vector<8x8x160xf32> to vector<8x160xf32>
    %31 = arith.mulf %30, %30 : vector<8x160xf32>
    %cst_15 = arith.constant dense<0.000000e+00> : vector<8x10xf32>
    %32 = tpu.matmul %31, %14, %cst_15 {dimension_numbers = #tpu.dot_dimension_numbers<[1], [0], [0], [1], [0, 0, 1, 1], [], []>} : vector<8x160xf32>, vector<160x10xf32>, vector<8x10xf32> -> vector<8x10xf32>
    %cst_16 = arith.constant 1.000000e-07 : f32
    %33 = vector.broadcast %cst_16 : f32 to vector<8x10xf32>
    %34 = arith.addf %32, %33 : vector<8x10xf32>
    %35 = math.rsqrt %34 : vector<8x10xf32>
    %cst_17 = arith.constant dense<0.000000e+00> : vector<8x160xf32>
    %36 = tpu.matmul %35, %13, %cst_17 {dimension_numbers = #tpu.dot_dimension_numbers<[1], [0], [0], [1], [0, 0, 1, 1], [], []>} : vector<8x10xf32>, vector<10x160xf32>, vector<8x160xf32> -> vector<8x160xf32>
    %37 = arith.mulf %30, %36 : vector<8x160xf32>
    %38 = vector.shape_cast %37 : vector<8x160xf32> to vector<8x1x160xf32>
    %39 = vector.broadcast %38 : vector<8x1x160xf32> to vector<8x8x160xf32>
    %40 = arith.mulf %39, %12 : vector<8x8x160xf32>
    %41 = vector.shape_cast %40 : vector<8x8x160xf32> to vector<64x160xf32>
    %cst_18 = arith.constant dense<0.000000e+00> : vector<64x10xf32>
    %42 = tpu.matmul %41, %14, %cst_18 {dimension_numbers = #tpu.dot_dimension_numbers<[1], [0], [0], [1], [0, 0, 1, 1], [], []>} : vector<64x160xf32>, vector<160x10xf32>, vector<64x10xf32> -> vector<64x10xf32>
    %cst_19 = arith.constant dense<0xFF800000> : vector<64xf32>
    %43 = vector.multi_reduction <maximumf>, %42, %cst_19 [1] : vector<64x10xf32> to vector<64xf32>
    %cst_20 = arith.constant 0xFF800000 : f32
    %44 = vector.broadcast %cst_20 : f32 to vector<64xf32>
    %45 = arith.maximumf %44, %43 : vector<64xf32>
    %46 = vector.shape_cast %45 : vector<64xf32> to vector<64x1xf32>
    %47 = vector.broadcast %46 : vector<64x1xf32> to vector<64x10xf32>
    %48 = arith.subf %42, %47 : vector<64x10xf32>
    %49 = math.exp %48 : vector<64x10xf32>
    %cst_21 = arith.constant dense<0.000000e+00> : vector<64xf32>
    %50 = vector.multi_reduction <add>, %49, %cst_21 [1] : vector<64x10xf32> to vector<64xf32>
    %51 = vector.shape_cast %50 : vector<64xf32> to vector<64x1xf32>
    %52 = vector.broadcast %51 : vector<64x1xf32> to vector<64x10xf32>
    %53 = arith.divf %49, %52 : vector<64x10xf32>
    %cst_22 = arith.constant dense<0.000000e+00> : vector<64x160xf32>
    %54 = tpu.matmul %53, %13, %cst_22 {dimension_numbers = #tpu.dot_dimension_numbers<[1], [0], [0], [1], [0, 0, 1, 1], [], []>} : vector<64x10xf32>, vector<10x160xf32>, vector<64x160xf32> -> vector<64x160xf32>
    %55 = vector.shape_cast %54 : vector<64x160xf32> to vector<8x8x160xf32>
    %56 = arith.mulf %55, %12 : vector<8x8x160xf32>
    %cst_23 = arith.constant dense<0.000000e+00> : vector<8x160xf32>
    %57 = vector.multi_reduction <add>, %56, %cst_23 [1] : vector<8x8x160xf32> to vector<8x160xf32>
    %58 = arith.mulf %57, %57 : vector<8x160xf32>
    %cst_24 = arith.constant dense<0.000000e+00> : vector<8x10xf32>
    %59 = tpu.matmul %58, %14, %cst_24 {dimension_numbers = #tpu.dot_dimension_numbers<[1], [0], [0], [1], [0, 0, 1, 1], [], []>} : vector<8x160xf32>, vector<160x10xf32>, vector<8x10xf32> -> vector<8x10xf32>
    %cst_25 = arith.constant 1.000000e-07 : f32
    %60 = vector.broadcast %cst_25 : f32 to vector<8x10xf32>
    %61 = arith.addf %59, %60 : vector<8x10xf32>
    %62 = math.rsqrt %61 : vector<8x10xf32>
    %cst_26 = arith.constant dense<0.000000e+00> : vector<8x160xf32>
    %63 = tpu.matmul %62, %13, %cst_26 {dimension_numbers = #tpu.dot_dimension_numbers<[1], [0], [0], [1], [0, 0, 1, 1], [], []>} : vector<8x10xf32>, vector<10x160xf32>, vector<8x160xf32> -> vector<8x160xf32>
    %64 = arith.mulf %57, %63 : vector<8x160xf32>
    %65 = vector.shape_cast %64 : vector<8x160xf32> to vector<8x1x160xf32>
    %66 = vector.broadcast %65 : vector<8x1x160xf32> to vector<8x8x160xf32>
    %67 = arith.mulf %66, %12 : vector<8x8x160xf32>
    %68 = vector.shape_cast %67 : vector<8x8x160xf32> to vector<64x160xf32>
    %cst_27 = arith.constant dense<0.000000e+00> : vector<64x10xf32>
    %69 = tpu.matmul %68, %14, %cst_27 {dimension_numbers = #tpu.dot_dimension_numbers<[1], [0], [0], [1], [0, 0, 1, 1], [], []>} : vector<64x160xf32>, vector<160x10xf32>, vector<64x10xf32> -> vector<64x10xf32>
    %cst_28 = arith.constant dense<0xFF800000> : vector<64xf32>
    %70 = vector.multi_reduction <maximumf>, %69, %cst_28 [1] : vector<64x10xf32> to vector<64xf32>
    %cst_29 = arith.constant 0xFF800000 : f32
    %71 = vector.broadcast %cst_29 : f32 to vector<64xf32>
    %72 = arith.maximumf %71, %70 : vector<64xf32>
    %73 = vector.shape_cast %72 : vector<64xf32> to vector<64x1xf32>
    %74 = vector.broadcast %73 : vector<64x1xf32> to vector<64x10xf32>
    %75 = arith.subf %69, %74 : vector<64x10xf32>
    %76 = math.exp %75 : vector<64x10xf32>
    %cst_30 = arith.constant dense<0.000000e+00> : vector<64xf32>
    %77 = vector.multi_reduction <add>, %76, %cst_30 [1] : vector<64x10xf32> to vector<64xf32>
    %78 = vector.shape_cast %77 : vector<64xf32> to vector<64x1xf32>
    %79 = vector.broadcast %78 : vector<64x1xf32> to vector<64x10xf32>
    %80 = arith.divf %76, %79 : vector<64x10xf32>
    %cst_31 = arith.constant dense<0.000000e+00> : vector<64x160xf32>
    %81 = tpu.matmul %80, %13, %cst_31 {dimension_numbers = #tpu.dot_dimension_numbers<[1], [0], [0], [1], [0, 0, 1, 1], [], []>} : vector<64x10xf32>, vector<10x160xf32>, vector<64x160xf32> -> vector<64x160xf32>
    %82 = vector.shape_cast %81 : vector<64x160xf32> to vector<8x8x160xf32>
    %83 = arith.mulf %82, %12 : vector<8x8x160xf32>
    %cst_32 = arith.constant dense<0.000000e+00> : vector<8x160xf32>
    %84 = vector.multi_reduction <add>, %83, %cst_32 [1] : vector<8x8x160xf32> to vector<8x160xf32>
    %85 = arith.mulf %84, %84 : vector<8x160xf32>
    %cst_33 = arith.constant dense<0.000000e+00> : vector<8x10xf32>
    %86 = tpu.matmul %85, %14, %cst_33 {dimension_numbers = #tpu.dot_dimension_numbers<[1], [0], [0], [1], [0, 0, 1, 1], [], []>} : vector<8x160xf32>, vector<160x10xf32>, vector<8x10xf32> -> vector<8x10xf32>
    %cst_34 = arith.constant 1.000000e-07 : f32
    %87 = vector.broadcast %cst_34 : f32 to vector<8x10xf32>
    %88 = arith.addf %86, %87 : vector<8x10xf32>
    %89 = math.rsqrt %88 : vector<8x10xf32>
    %cst_35 = arith.constant dense<0.000000e+00> : vector<8x160xf32>
    %90 = tpu.matmul %89, %13, %cst_35 {dimension_numbers = #tpu.dot_dimension_numbers<[1], [0], [0], [1], [0, 0, 1, 1], [], []>} : vector<8x10xf32>, vector<10x160xf32>, vector<8x160xf32> -> vector<8x160xf32>
    %91 = arith.mulf %84, %90 : vector<8x160xf32>
    %92 = vector.shape_cast %91 : vector<8x160xf32> to vector<8x1x160xf32>
    %93 = vector.broadcast %92 : vector<8x1x160xf32> to vector<8x8x160xf32>
    %94 = arith.mulf %93, %12 : vector<8x8x160xf32>
    %95 = vector.shape_cast %94 : vector<8x8x160xf32> to vector<64x160xf32>
    %cst_36 = arith.constant dense<0.000000e+00> : vector<64x10xf32>
    %96 = tpu.matmul %95, %14, %cst_36 {dimension_numbers = #tpu.dot_dimension_numbers<[1], [0], [0], [1], [0, 0, 1, 1], [], []>} : vector<64x160xf32>, vector<160x10xf32>, vector<64x10xf32> -> vector<64x10xf32>
    %cst_37 = arith.constant dense<0xFF800000> : vector<64xf32>
    %97 = vector.multi_reduction <maximumf>, %96, %cst_37 [1] : vector<64x10xf32> to vector<64xf32>
    %cst_38 = arith.constant 0xFF800000 : f32
    %98 = vector.broadcast %cst_38 : f32 to vector<64xf32>
    %99 = arith.maximumf %98, %97 : vector<64xf32>
    %100 = vector.shape_cast %99 : vector<64xf32> to vector<64x1xf32>
    %101 = vector.broadcast %100 : vector<64x1xf32> to vector<64x10xf32>
    %102 = arith.subf %96, %101 : vector<64x10xf32>
    %103 = math.exp %102 : vector<64x10xf32>
    %cst_39 = arith.constant dense<0.000000e+00> : vector<64xf32>
    %104 = vector.multi_reduction <add>, %103, %cst_39 [1] : vector<64x10xf32> to vector<64xf32>
    %105 = vector.shape_cast %104 : vector<64xf32> to vector<64x1xf32>
    %106 = vector.broadcast %105 : vector<64x1xf32> to vector<64x10xf32>
    %107 = arith.divf %103, %106 : vector<64x10xf32>
    %cst_40 = arith.constant dense<0.000000e+00> : vector<64x160xf32>
    %108 = tpu.matmul %107, %13, %cst_40 {dimension_numbers = #tpu.dot_dimension_numbers<[1], [0], [0], [1], [0, 0, 1, 1], [], []>} : vector<64x10xf32>, vector<10x160xf32>, vector<64x160xf32> -> vector<64x160xf32>
    %109 = vector.shape_cast %108 : vector<64x160xf32> to vector<8x8x160xf32>
    %110 = arith.mulf %109, %12 : vector<8x8x160xf32>
    %cst_41 = arith.constant dense<0.000000e+00> : vector<8x160xf32>
    %111 = vector.multi_reduction <add>, %110, %cst_41 [1] : vector<8x8x160xf32> to vector<8x160xf32>
    %112 = arith.mulf %111, %111 : vector<8x160xf32>
    %cst_42 = arith.constant dense<0.000000e+00> : vector<8x10xf32>
    %113 = tpu.matmul %112, %14, %cst_42 {dimension_numbers = #tpu.dot_dimension_numbers<[1], [0], [0], [1], [0, 0, 1, 1], [], []>} : vector<8x160xf32>, vector<160x10xf32>, vector<8x10xf32> -> vector<8x10xf32>
    %cst_43 = arith.constant 1.000000e-07 : f32
    %114 = vector.broadcast %cst_43 : f32 to vector<8x10xf32>
    %115 = arith.addf %113, %114 : vector<8x10xf32>
    %116 = math.rsqrt %115 : vector<8x10xf32>
    %cst_44 = arith.constant dense<0.000000e+00> : vector<8x160xf32>
    %117 = tpu.matmul %116, %13, %cst_44 {dimension_numbers = #tpu.dot_dimension_numbers<[1], [0], [0], [1], [0, 0, 1, 1], [], []>} : vector<8x10xf32>, vector<10x160xf32>, vector<8x160xf32> -> vector<8x160xf32>
    %118 = arith.mulf %111, %117 : vector<8x160xf32>
    %119 = vector.shape_cast %118 : vector<8x160xf32> to vector<8x1x160xf32>
    %120 = vector.broadcast %119 : vector<8x1x160xf32> to vector<8x8x160xf32>
    %121 = arith.mulf %120, %12 : vector<8x8x160xf32>
    %122 = vector.shape_cast %121 : vector<8x8x160xf32> to vector<64x160xf32>
    %cst_45 = arith.constant dense<0.000000e+00> : vector<64x10xf32>
    %123 = tpu.matmul %122, %14, %cst_45 {dimension_numbers = #tpu.dot_dimension_numbers<[1], [0], [0], [1], [0, 0, 1, 1], [], []>} : vector<64x160xf32>, vector<160x10xf32>, vector<64x10xf32> -> vector<64x10xf32>
    %cst_46 = arith.constant dense<0xFF800000> : vector<64xf32>
    %124 = vector.multi_reduction <maximumf>, %123, %cst_46 [1] : vector<64x10xf32> to vector<64xf32>
    %cst_47 = arith.constant 0xFF800000 : f32
    %125 = vector.broadcast %cst_47 : f32 to vector<64xf32>
    %126 = arith.maximumf %125, %124 : vector<64xf32>
    %127 = vector.shape_cast %126 : vector<64xf32> to vector<64x1xf32>
    %128 = vector.broadcast %127 : vector<64x1xf32> to vector<64x10xf32>
    %129 = arith.subf %123, %128 : vector<64x10xf32>
    %130 = math.exp %129 : vector<64x10xf32>
    %cst_48 = arith.constant dense<0.000000e+00> : vector<64xf32>
    %131 = vector.multi_reduction <add>, %130, %cst_48 [1] : vector<64x10xf32> to vector<64xf32>
    %132 = vector.shape_cast %131 : vector<64xf32> to vector<64x1xf32>
    %133 = vector.broadcast %132 : vector<64x1xf32> to vector<64x10xf32>
    %134 = arith.divf %130, %133 : vector<64x10xf32>
    %cst_49 = arith.constant dense<0.000000e+00> : vector<64x160xf32>
    %135 = tpu.matmul %134, %13, %cst_49 {dimension_numbers = #tpu.dot_dimension_numbers<[1], [0], [0], [1], [0, 0, 1, 1], [], []>} : vector<64x10xf32>, vector<10x160xf32>, vector<64x160xf32> -> vector<64x160xf32>
    %136 = vector.shape_cast %135 : vector<64x160xf32> to vector<8x8x160xf32>
    %137 = arith.mulf %136, %12 : vector<8x8x160xf32>
    %cst_50 = arith.constant dense<0.000000e+00> : vector<8x160xf32>
    %138 = vector.multi_reduction <add>, %137, %cst_50 [1] : vector<8x8x160xf32> to vector<8x160xf32>
    %139 = arith.mulf %138, %138 : vector<8x160xf32>
    %cst_51 = arith.constant dense<0.000000e+00> : vector<8x10xf32>
    %140 = tpu.matmul %139, %14, %cst_51 {dimension_numbers = #tpu.dot_dimension_numbers<[1], [0], [0], [1], [0, 0, 1, 1], [], []>} : vector<8x160xf32>, vector<160x10xf32>, vector<8x10xf32> -> vector<8x10xf32>
    %cst_52 = arith.constant 1.000000e-07 : f32
    %141 = vector.broadcast %cst_52 : f32 to vector<8x10xf32>
    %142 = arith.addf %140, %141 : vector<8x10xf32>
    %143 = math.rsqrt %142 : vector<8x10xf32>
    %cst_53 = arith.constant dense<0.000000e+00> : vector<8x160xf32>
    %144 = tpu.matmul %143, %13, %cst_53 {dimension_numbers = #tpu.dot_dimension_numbers<[1], [0], [0], [1], [0, 0, 1, 1], [], []>} : vector<8x10xf32>, vector<10x160xf32>, vector<8x160xf32> -> vector<8x160xf32>
    %145 = arith.mulf %138, %144 : vector<8x160xf32>
    %c0_54 = arith.constant 0 : index
    %c0_55 = arith.constant 0 : index
    %146 = vector.load %arg5[%c0_54, %c0_55] : memref<160x2xf32, #tpu.memory_space<vmem>>, vector<160x2xf32>
    %cst_56 = arith.constant dense<0.000000e+00> : vector<8x2xf32>
    %147 = tpu.matmul %145, %146, %cst_56 {dimension_numbers = #tpu.dot_dimension_numbers<[1], [0], [0], [1], [0, 0, 1, 1], [], []>} : vector<8x160xf32>, vector<160x2xf32>, vector<8x2xf32> -> vector<8x2xf32>
    %c0_57 = arith.constant 0 : index
    %c0_58 = arith.constant 0 : index
    %148 = vector.load %arg6[%c0_57, %c0_58] : memref<1x2xf32, #tpu.memory_space<vmem>>, vector<1x2xf32>
    %149 = vector.broadcast %148 : vector<1x2xf32> to vector<8x2xf32>
    %150 = arith.addf %147, %149 : vector<8x2xf32>
    %151 = arith.negf %150 : vector<8x2xf32>
    %152 = math.exp %151 : vector<8x2xf32>
    %cst_59 = arith.constant 1.000000e+00 : f32
    %153 = vector.broadcast %cst_59 : f32 to vector<8x2xf32>
    %154 = arith.addf %153, %152 : vector<8x2xf32>
    %155 = arith.divf %153, %154 : vector<8x2xf32>
    %c0_60 = arith.constant 0 : index
    %c0_61 = arith.constant 0 : index
    %156 = vector.load %arg7[%c0_60, %c0_61] : memref<8x2xf32, #tpu.memory_space<vmem>>, vector<8x2xf32>
    tpu.vector_store %arg7[%c0_60, %c0_61], %155 {strides = array<i32>} : memref<8x2xf32, #tpu.memory_space<vmem>>, vector<8x2xf32>,
    return
  }
  func.func @transform_0(%arg0: i32) -> (i32, i32, i32) {
    %c0_i32 = arith.constant 0 : i32
    %c0_i32_0 = arith.constant 0 : i32
    %c0_i32_1 = arith.constant 0 : i32
    return %arg0, %c0_i32, %c0_i32_0 : i32, i32, i32
  }
  func.func @transform_1(%arg0: i32) -> (i32, i32) {
    %c0_i32 = arith.constant 0 : i32
    %c0_i32_0 = arith.constant 0 : i32
    %c0_i32_1 = arith.constant 0 : i32
    return %c0_i32, %c0_i32_0 : i32, i32
  }
  func.func @transform_2(%arg0: i32) -> (i32, i32) {
    %c0_i32 = arith.constant 0 : i32
    %c0_i32_0 = arith.constant 0 : i32
    %c0_i32_1 = arith.constant 0 : i32
    return %c0_i32, %c0_i32_0 : i32, i32
  }
  func.func @transform_3(%arg0: i32) -> (i32, i32) {
    %c0_i32 = arith.constant 0 : i32
    %c0_i32_0 = arith.constant 0 : i32
    %c0_i32_1 = arith.constant 0 : i32
    return %c0_i32, %c0_i32_0 : i32, i32
  }
  func.func @transform_4(%arg0: i32) -> (i32, i32) {
    %c0_i32 = arith.constant 0 : i32
    %c0_i32_0 = arith.constant 0 : i32
    %c0_i32_1 = arith.constant 0 : i32
    return %c0_i32, %c0_i32_0 : i32, i32
  }
  func.func @transform_5(%arg0: i32) -> (i32, i32) {
    %c0_i32 = arith.constant 0 : i32
    %c0_i32_0 = arith.constant 0 : i32
    %c0_i32_1 = arith.constant 0 : i32
    return %c0_i32, %c0_i32_0 : i32, i32
  }
  func.func @transform_6(%arg0: i32) -> (i32, i32) {
    %c0_i32 = arith.constant 0 : i32
    %c0_i32_0 = arith.constant 0 : i32
    return %arg0, %c0_i32 : i32, i32
  }
}

</mosaic_0001>

<bundles_post_ra>
// kernel: capsule_main.2
= control target key start
LH: loop header
LB: loop body
LE: loop exit
PB: predicated region body
PF: predicated region fallthrough
CT: control target
= control target key end

     0   :  { %s3167_s18 = smov 0   ;;  %s3169_s19 = smov 0   ;;  %s4031_s0 = inlined_call_operand.vmem [shape: f32[8,8,384], index: 0, kind: input, shape index: {}]   ;;  %s4032_s1 = inlined_call_operand.vmem [shape: bf16[2,384,384], index: 1, kind: input, shape index: {}]   ;;  %s4033_s2 = inlined_call_operand.vmem [shape: f32[2,1,384], index: 2, kind: input, shape index: {}]   ;;  %s4034_s3 = inlined_call_operand.vmem [shape: bf16[2,128,384], index: 3, kind: input, shape index: {}]   ;;  %s4035_s4 = inlined_call_operand.vmem [shape: f32[2,1,384], index: 4, kind: input, shape index: {}]   ;;  %s4036_s5 = inlined_call_operand.vmem [shape: f32[8,8,256], index: 5, kind: output, shape index: {}]  }
   0x1   :  { %s3171_s20 = smov 0   ;;  %s3173_s21 = smov 0  }
   0x2   :  { %s3175_s22 = smov 0  }
   0x3 LB: > { %s2412_s23 = sadd.s32 4294967295, %s3134_s22   ;;  %s27_s24 = sadd.s32 1, %s3130_s21  ;;  %s3134_s22 = sphi %s3175_s22, %s15_s22   ;;  %s3130_s21 = sphi %s3173_s21, %s4042_s21   ;;  %s3126_s20 = sphi %s3171_s20, %s4041_s20   ;;  %s3122_s19 = sphi %s3169_s19, %s4040_s19   ;;  %s3118_s18 = sphi %s3167_s18, %s4039_s18  }
   0x4   : > { %p29_p0 = scmp.ge.s32.totalorder %s27_s24, 2  ;;  %s182_s25 = sadd.s32 1, %s3122_s19 }
   0x5   : > { %p192_p1 = scmp.ne.s32.totalorder %s3122_s19, %s3118_s18  ;;  %p193_p2 = scmp.eq.s32.totalorder %s2412_s23, 1 }
   0x6   : > { %s4044_s24 = smov (%p29_p0, %s27_s24), 0  ;;  %p2417_p4 = scmp.ge.s32.totalorder %s3134_s22, 1 }
   0x7   : > { %p3199_p3 = por %p193_p2, %p192_p1  ;;  %s178_s27 = ssub.s32 %s3130_s21, %s4044_s24 }
   0x8   : > { %p265_p5 = scmp.lt.s32.totalorder %s3134_s22, 3  ;;  %p180_p6 = scmp.eq.s32.totalorder %s178_s27, 0 }
   0xa   : > { %p266_p7 = pnand %p2417_p4, %p265_p5 }
   0xb   : > { %s3208_s28 = scalar_select %p180_p6, %s3122_s19, %s182_s25  }
   0xc   : > { %269 = sbr.rel (%p266_p7) target bundleno = 1687 (0x697), region = 40  ;;  %p330_p8 = scmp.lt.s32.totalorder (!%p266_p7), %s3126_s20, 1 }
   0xd   : > { %s2961_s6 = smul.u32 (!%p266_p7), 168, %s3126_s20  ;;  %s312_s10 = sand.u32 (!%p266_p7), 1, %s3118_s18  }
   0xe   : > { %s1205_s7 = smul.u32 (!%p266_p7), 7, %s3126_s20 }
   0xf   : > { %s2809_s13 = smul.u32 (!%p266_p7), 56, %s3126_s20 }
  0x10   : > { %p3746_p9 = scmp.lt.s32.totalorder (!%p266_p7), %s1205_s7, 8  ;;  %s1444_s16 = smul.u32 (!%p266_p7), 5, %s3126_s20 }
  0x11   : > { %s3212_s29 = scalar_select %p330_p8, %s3126_s20, 1 }
  0x12   : > { %s1437_s11 = scalar_select %p3746_p9, 1, 0 }
  0x13   : > { %s2972_s30 = smul.u32 576, %s3212_s29  ;;  %s1445_s17 = sadd.s32 1, %s1444_s16 }
  0x14   : > { %s2974_s12 = smul.u32 192, %s3212_s29  ;;  %p1540_p10 = scmp.lt.s32.totalorder %s1445_s17, 8 }
  0x15   : > { %s3218_s8 = scalar_lea.vmem %s4032_s1, %s2972_s30  ;;  %s2816_s25 = smul.u32 40, %s3126_s20 }
  0x16   : > { %v2507_v0 = vld [vmem:[%s3218_s8 + $0xa8] sm:$0xf]  ;;  %v2887_v1 = vld [vmem:[%s3218_s8 + $0xb0] sm:$0xf0]  ;;  %v2495_v9 = vld [vmem:[%s3218_s8 + $0x90] sm:$0xf]  ;;  %s3487_s15 = scalar_lea.vmem %s4034_s3, %s2974_s12 }
  0x17   : > { %v2699_v2 = vld [vmem:[%s3218_s8 + $0x228] sm:$0xf]  ;;  %v2508_v3 = vor.u32 %v2887_v1, %v2507_v0  ;;  %v2935_v4 = vld [vmem:[%s3218_s8 + $0x230] sm:$0xf0]  ;;  %v2884_v10 = vld [vmem:[%s3218_s8 + $0x98] sm:$0xf0] }
  0x18   : > { %v2603_v5 = vld [vmem:[%s3218_s8 + $0x168] sm:$0xf]  ;;  %v2911_v6 = vld [vmem:[%s3218_s8 + $0x170] sm:$0xf0]  ;;  %v2700_v7 = vor.u32 %v2935_v4, %v2699_v2  ;;  %v2687_v11 = vld [vmem:[%s3218_s8 + $0x210] sm:$0xf]  ;;  %v2496_v12 = vor.u32 %v2884_v10, %v2495_v9 }
  0x19   : > { %v2604_v8 = vor.u32 %v2911_v6, %v2603_v5  ;;  %882 = vmatpush.bf16.msra.mxu0 %v2508_v3  ;;  %v2932_v13 = vld [vmem:[%s3218_s8 + $0x218] sm:$0xf0]  ;;  %v2591_v14 = vld [vmem:[%s3218_s8 + $0x150] sm:$0xf]  ;;  %v2483_v18 = vld [vmem:[%s3218_s8 + $0x78] sm:$0xf] }
  0x1a   : > { %v2908_v15 = vld [vmem:[%s3218_s8 + $0x158] sm:$0xf0]  ;;  %940 = vmatpush.bf16.msra.mxu2 %v2700_v7  ;;  %v2688_v16 = vor.u32 %v2932_v13, %v2687_v11  ;;  %v2881_v19 = vld [vmem:[%s3218_s8 + $0x80] sm:$0xf0]  ;;  %v2675_v20 = vld [vmem:[%s3218_s8 + $0x1f8] sm:$0xf] }
  0x1b   : > { %911 = vmatpush.bf16.msra.mxu1 %v2604_v8  ;;  %v2592_v17 = vor.u32 %v2908_v15, %v2591_v14  ;;  %v2929_v21 = vld [vmem:[%s3218_s8 + $0x200] sm:$0xf0]  ;;  %v2579_v22 = vld [vmem:[%s3218_s8 + $0x138] sm:$0xf]  ;;  %v2484_v24 = vor.u32 %v2881_v19, %v2483_v18  ;;  %v2471_v27 = vld [vmem:[%s3218_s8 + $0x60] sm:$0xf] }
  0x1c   : > { %v2905_v23 = vld [vmem:[%s3218_s8 + $0x140] sm:$0xf0]  ;;  %v2676_v25 = vor.u32 %v2929_v21, %v2675_v20  ;;  %v2878_v28 = vld [vmem:[%s3218_s8 + $0x68] sm:$0xf0]  ;;  %v2663_v29 = vld [vmem:[%s3218_s8 + $0x1e0] sm:$0xf] }
  0x1d   : > { %883 = vmatpush.bf16.msra.mxu0 %v2496_v12  ;;  %v2580_v26 = vor.u32 %v2905_v23, %v2579_v22  ;;  %v2926_v30 = vld [vmem:[%s3218_s8 + $0x1e8] sm:$0xf0]  ;;  %v2567_v31 = vld [vmem:[%s3218_s8 + $0x120] sm:$0xf]  ;;  %v2472_v33 = vor.u32 %v2878_v28, %v2471_v27  ;;  %v2459_v36 = vld [vmem:[%s3218_s8 + $0x48] sm:$0xf] }
  0x1e   : > { %941 = vmatpush.bf16.msra.mxu2 %v2688_v16  ;;  %v2902_v32 = vld [vmem:[%s3218_s8 + $0x128] sm:$0xf0]  ;;  %v2664_v34 = vor.u32 %v2926_v30, %v2663_v29  ;;  %v2875_v37 = vld [vmem:[%s3218_s8 + $0x50] sm:$0xf0]  ;;  %v2651_v38 = vld [vmem:[%s3218_s8 + $0x1c8] sm:$0xf] }
  0x1f   : > { %912 = vmatpush.bf16.msra.mxu1 %v2592_v17  ;;  %v2568_v35 = vor.u32 %v2902_v32, %v2567_v31  ;;  %v2923_v39 = vld [vmem:[%s3218_s8 + $0x1d0] sm:$0xf0]  ;;  %v2555_v40 = vld [vmem:[%s3218_s8 + $0x108] sm:$0xf]  ;;  %v2460_v42 = vor.u32 %v2875_v37, %v2459_v36  ;;  %v2447_v45 = vld [vmem:[%s3218_s8 + $0x30] sm:$0xf] }
  0x20   : > { %v2899_v41 = vld [vmem:[%s3218_s8 + $0x110] sm:$0xf0]  ;;  %v2652_v43 = vor.u32 %v2923_v39, %v2651_v38  ;;  %v2872_v46 = vld [vmem:[%s3218_s8 + $0x38] sm:$0xf0]  ;;  %v2639_v47 = vld [vmem:[%s3218_s8 + $0x1b0] sm:$0xf] }
  0x21   : > { %884 = vmatpush.bf16.msra.mxu0 %v2484_v24  ;;  %v2556_v44 = vor.u32 %v2899_v41, %v2555_v40  ;;  %v2920_v48 = vld [vmem:[%s3218_s8 + $0x1b8] sm:$0xf0]  ;;  %v2543_v49 = vld [vmem:[%s3218_s8 + $0xf0] sm:$0xf]  ;;  %v2448_v51 = vor.u32 %v2872_v46, %v2447_v45  ;;  %v2435_v52 = vld [vmem:[%s3218_s8 + $0x18] sm:$0xf] }
  0x22   : > { %942 = vmatpush.bf16.msra.mxu2 %v2676_v25  ;;  %v2896_v50 = vld [vmem:[%s3218_s8 + $0xf8] sm:$0xf0]  ;;  %v2869_v53 = vld [vmem:[%s3218_s8 + $0x20] sm:$0xf0]  ;;  %v2640_v54 = vor.u32 %v2920_v48, %v2639_v47  ;;  %v2627_v56 = vld [vmem:[%s3218_s8 + $0x198] sm:$0xf] }
  0x23   : > { %913 = vmatpush.bf16.msra.mxu1 %v2580_v26  ;;  %v2544_v55 = vor.u32 %v2896_v50, %v2543_v49  ;;  %v2917_v57 = vld [vmem:[%s3218_s8 + $0x1a0] sm:$0xf0]  ;;  %v2531_v58 = vld [vmem:[%s3218_s8 + $0xd8] sm:$0xf]  ;;  %v2886_v60 = vld [vmem:[%s3218_s8 + $0xac] sm:$0xf]  ;;  %v2436_v0 = vor.u32 %v2869_v53, %v2435_v52 }
  0x24   : > { %v2893_v59 = vld [vmem:[%s3218_s8 + $0xe0] sm:$0xf0]  ;;  %v2509_v61 = vld [vmem:[%s3218_s8 + $0xb4] sm:$0xf0]  ;;  %v2883_v63 = vld [vmem:[%s3218_s8 + $0x94] sm:$0xf]  ;;  %v2628_v3 = vor.u32 %v2917_v57, %v2627_v56 }
  0x25   : > { %885 = vmatpush.bf16.msra.mxu0 %v2472_v33  ;;  %v2512_v62 = vor.u32 %v2886_v60, %v2509_v61  ;;  %v2423_v1 = vld [vmem:[%s3218_s8] sm:$0xf]  ;;  %v2532_v4 = vor.u32 %v2893_v59, %v2531_v58  ;;  %v2866_v5 = vld [vmem:[%s3218_s8 + $0x8] sm:$0xf0]  ;;  %v2605_v12 = vld [vmem:[%s3218_s8 + $0x174] sm:$0xf0] }
  0x26   : > { %943 = vmatpush.bf16.msra.mxu2 %v2664_v34  ;;  %v2497_v2 = vld [vmem:[%s3218_s8 + $0x9c] sm:$0xf0]  ;;  %v2914_v7 = vld [vmem:[%s3218_s8 + $0x188] sm:$0xf0]  ;;  %v2880_v13 = vld [vmem:[%s3218_s8 + $0x7c] sm:$0xf]  ;;  %v2424_v15 = vor.u32 %v2866_v5, %v2423_v1 }
  0x27   : > { %914 = vmatpush.bf16.msra.mxu1 %v2568_v35  ;;  %v2615_v6 = vld [vmem:[%s3218_s8 + $0x180] sm:$0xf]  ;;  %v2890_v9 = vld [vmem:[%s3218_s8 + $0xc8] sm:$0xf0]  ;;  %969 = vmatpush.bf16.msra.mxu3 %v2512_v62  ;;  %v2500_v11 = vor.u32 %v2883_v63, %v2497_v2  ;;  %v2485_v14 = vld [vmem:[%s3218_s8 + $0x84] sm:$0xf0] }
  0x28   : > { %v2519_v8 = vld [vmem:[%s3218_s8 + $0xc0] sm:$0xf]  ;;  %v2910_v10 = vld [vmem:[%s3218_s8 + $0x16c] sm:$0xf]  ;;  %v361_v17 = vld [vmem:[%s4031_s0 + $0x18] sm:$0xff]  ;;  %v2616_v19 = vor.u32 %v2914_v7, %v2615_v6  ;;  %v2488_v26 = vor.u32 %v2880_v13, %v2485_v14  ;;  %s2418_s12 = sshll.u32 %s312_s10, 6 }
  0x29   : > { %886 = vmatpush.bf16.msra.mxu0 %v2460_v42  ;;  %v358_v16 = vld [vmem:[%s4031_s0] sm:$0xff]  ;;  %v360_v18 = vld [vmem:[%s4031_s0 + $0x10] sm:$0xff]  ;;  %v2520_v20 = vor.u32 %v2890_v9, %v2519_v8  ;;  %v363_v21 = vld [vmem:[%s4031_s0 + $0x28] sm:$0xff]  ;;  %v2608_v24 = vor.u32 %v2910_v10, %v2605_v12  ;;  %s3755_s14 = scalar_lea.vmem [#allocation4], %s2418_s12  ;;  %s2824_s10 = smul.u32 24, %s3126_s20 }
  0x2a   : > { %944 = vmatpush.bf16.msra.mxu2 %v2652_v43  ;;  %v359_v22 = vld [vmem:[%s4031_s0 + $0x8] sm:$0xff]  ;;  %v362_v23 = vld [vmem:[%s4031_s0 + $0x20] sm:$0xff]  ;;  %v2907_v25 = vld [vmem:[%s3218_s8 + $0x154] sm:$0xf]  ;;  %v3295_v27 = vpack.c.bf16 %v361_v17, %v358_v16  ;;  %v3300_v31 = vpack.c.bf16 %v363_v21, %v360_v18  ;;  %s1442_s18 = scalar_lea.vmem %s3755_s14, %s2809_s13 [#allocation4]  ;;  %s2302_s27 = scalar_lea.vmem %s3755_s14, %s2816_s25 [#allocation4] }
  0x2b   : > { %915 = vmatpush.bf16.msra.mxu1 %v2556_v44  ;;  %970 = vmatpush.bf16.msra.mxu3 %v2500_v11  ;;  %v2593_v28 = vld [vmem:[%s3218_s8 + $0x15c] sm:$0xf0]  ;;  %v2877_v29 = vld [vmem:[%s3218_s8 + $0x64] sm:$0xf]  ;;  %v2473_v30 = vld [vmem:[%s3218_s8 + $0x6c] sm:$0xf0]  ;;  %v3302_v32 = vpack.c.bf16 %v362_v23, %v359_v22 }
  0x2c   : > { %v2596_v33 = vor.u32 %v2907_v25, %v2593_v28  ;;  %v2904_v34 = vld [vmem:[%s3218_s8 + $0x13c] sm:$0xf]  ;;  %v2476_v35 = vor.u32 %v2877_v29, %v2473_v30  ;;  %v2581_v36 = vld [vmem:[%s3218_s8 + $0x144] sm:$0xf0]  ;;  %v2874_v37 = vld [vmem:[%s3218_s8 + $0x4c] sm:$0xf] }
  0x2d   : > { %887 = vmatpush.bf16.msra.mxu0 %v2448_v51  ;;  %v2461_v38 = vld [vmem:[%s3218_s8 + $0x54] sm:$0xf0]  ;;  %v2934_v39 = vld [vmem:[%s3218_s8 + $0x22c] sm:$0xf]  ;;  %v2584_v41 = vor.u32 %v2904_v34, %v2581_v36  ;;  %v2901_v42 = vld [vmem:[%s3218_s8 + $0x124] sm:$0xf] }
  0x2e   : > { %945 = vmatpush.bf16.msra.mxu2 %v2640_v54  ;;  %v2701_v40 = vld [vmem:[%s3218_s8 + $0x234] sm:$0xf0]  ;;  %v2464_v43 = vor.u32 %v2874_v37, %v2461_v38  ;;  %v2931_v45 = vld [vmem:[%s3218_s8 + $0x214] sm:$0xf]  ;;  %v2689_v46 = vld [vmem:[%s3218_s8 + $0x21c] sm:$0xf0] }
  0x2f   : > { %916 = vmatpush.bf16.msra.mxu1 %v2544_v55  ;;  %971 = vmatpush.bf16.msra.mxu3 %v2488_v26  ;;  %v2704_v44 = vor.u32 %v2934_v39, %v2701_v40  ;;  %v2569_v47 = vld [vmem:[%s3218_s8 + $0x12c] sm:$0xf0]  ;;  %v2871_v48 = vld [vmem:[%s3218_s8 + $0x34] sm:$0xf]  ;;  %v2449_v49 = vld [vmem:[%s3218_s8 + $0x3c] sm:$0xf0]  ;;  %v2692_v50 = vor.u32 %v2931_v45, %v2689_v46 }
  0x30   : > { %v2928_v51 = vld [vmem:[%s3218_s8 + $0x1fc] sm:$0xf]  ;;  %v2677_v52 = vld [vmem:[%s3218_s8 + $0x204] sm:$0xf0]  ;;  %v2572_v53 = vor.u32 %v2901_v42, %v2569_v47  ;;  %v2898_v54 = vld [vmem:[%s3218_s8 + $0x10c] sm:$0xf]  ;;  %v2452_v55 = vor.u32 %v2871_v48, %v2449_v49 }
  0x31   : > { %888 = vmatpush.bf16.msra.mxu0 %v2436_v0  ;;  %v2557_v56 = vld [vmem:[%s3218_s8 + $0x114] sm:$0xf0]  ;;  %v2868_v57 = vld [vmem:[%s3218_s8 + $0x1c] sm:$0xf]  ;;  %v2437_v58 = vld [vmem:[%s3218_s8 + $0x24] sm:$0xf0]  ;;  %v2680_v62 = vor.u32 %v2928_v51, %v2677_v52 }
  0x32   : > { %946 = vmatpush.bf16.msra.mxu2 %v2628_v3  ;;  %v364_v59 = vld [vmem:[%s4031_s0 + $0x30] sm:$0xff]  ;;  %v367_v60 = vld [vmem:[%s4031_s0 + $0x48] sm:$0xff]  ;;  %v366_v61 = vld [vmem:[%s4031_s0 + $0x40] sm:$0xff]  ;;  %v2560_v2 = vor.u32 %v2898_v54, %v2557_v56  ;;  %s3876_s12 = scalar_lea.vmem [#allocation3], %s2824_s10  ;;  %s1652_s13 = sadd.s32 3, %s3126_s20 }
  0x33   : > { %917 = vmatpush.bf16.msra.mxu1 %v2532_v4  ;;  %972 = vmatpush.bf16.msra.mxu3 %v2476_v35  ;;  %v369_v63 = vld [vmem:[%s4031_s0 + $0x58] sm:$0xff]  ;;  %v368_v1 = vld [vmem:[%s4031_s0 + $0x50] sm:$0xff]  ;;  %v2440_v4 = vor.u32 %v2868_v57, %v2437_v58  ;;  %v2925_v5 = vld [vmem:[%s3218_s8 + $0x1e4] sm:$0xf]  ;;  %v3346_v7 = vpack.c.bf16 %v367_v60, %v364_v59  ;;  %p1747_p12 = scmp.lt.s32.totalorder %s1652_s13, 8  ;;  %s3920_s16 = ssub.s32 4, %s3126_s20 }
  0x34   : > { %v365_v0 = vld [vmem:[%s4031_s0 + $0x38] sm:$0xff]  ;;  %v2895_v3 = vld [vmem:[%s3218_s8 + $0xf4] sm:$0xf]  ;;  %v2665_v6 = vld [vmem:[%s3218_s8 + $0x1ec] sm:$0xf0]  ;;  %v3351_v11 = vpack.c.bf16 %v369_v63, %v366_v61  ;;  %s2962_s17 = smul.u32 24, %s3920_s16 }
  0x35   : > { %889 = vmatpush.bf16.msra.mxu0 %v2424_v15  ;;  %v2545_v8 = vld [vmem:[%s3218_s8 + $0xfc] sm:$0xf0]  ;;  %v2865_v9 = vld [vmem:[%s3218_s8 + $0x4] sm:$0xf]  ;;  %v2425_v10 = vld [vmem:[%s3218_s8 + $0xc] sm:$0xf0]  ;;  %v3353_v12 = vpack.c.bf16 %v368_v1, %v365_v0  ;;  %v2668_v13 = vor.u32 %v2925_v5, %v2665_v6 }
  0x36   : > { %947 = vmatpush.bf16.msra.mxu2 %v2616_v19  ;;  %v2548_v14 = vor.u32 %v2895_v3, %v2545_v8  ;;  %v2428_v15 = vor.u32 %v2865_v9, %v2425_v10  ;;  %v2892_v16 = vld [vmem:[%s3218_s8 + $0xdc] sm:$0xf]  ;;  %v2533_v17 = vld [vmem:[%s3218_s8 + $0xe4] sm:$0xf0]  ;;  %v2922_v18 = vld [vmem:[%s3218_s8 + $0x1cc] sm:$0xf] }
  0x37   : > { %918 = vmatpush.bf16.msra.mxu1 %v2520_v20  ;;  %973 = vmatpush.bf16.msra.mxu3 %v2464_v43  ;;  %v2653_v19 = vld [vmem:[%s3218_s8 + $0x1d4] sm:$0xf0]  ;;  %v2515_v20 = vld [vmem:[%s3218_s8 + $0xb0] sm:$0xf]  ;;  %v2888_v21 = vld [vmem:[%s3218_s8 + $0xb8] sm:$0xf0]  ;;  %v2536_v22 = vor.u32 %v2892_v16, %v2533_v17 }
  0x38   : > { %890 = vmatmul.bf16.vlgmr.msra.gmra.mxu0 %v3295_v27  ;;  %v2656_v23 = vor.u32 %v2922_v18, %v2653_v19  ;;  %v2919_v25 = vld [vmem:[%s3218_s8 + $0x1b4] sm:$0xf]  ;;  %v2641_v26 = vld [vmem:[%s3218_s8 + $0x1bc] sm:$0xf0]  ;;  %v2889_v28 = vld [vmem:[%s3218_s8 + $0xc4] sm:$0xf] }
  0x39   : > { %998 = vmatpush.bf16.msrb.mxu0 %v2608_v24  ;;  %948 = vmatmul.bf16.vlgmr.msra.gmra.mxu2 %v3300_v31  ;;  %v2516_v24 = vor.u32 %v2888_v21, %v2515_v20  ;;  %v2521_v29 = vld [vmem:[%s3218_s8 + $0xcc] sm:$0xf0]  ;;  %v2503_v35 = vld [vmem:[%s3218_s8 + $0x98] sm:$0xf]  ;;  %v2644_v36 = vor.u32 %v2919_v25, %v2641_v26  ;;  %v2885_v37 = vld [vmem:[%s3218_s8 + $0xa0] sm:$0xf0] }
  0x3a   : > { %919 = vmatmul.bf16.vlgmr.msra.gmra.mxu1 %v3302_v32  ;;  %v2611_v30 = vld [vmem:[%s3218_s8 + $0x170] sm:$0xf]  ;;  %v2524_v38 = vor.u32 %v2889_v28, %v2521_v29  ;;  %v2916_v39 = vld [vmem:[%s3218_s8 + $0x19c] sm:$0xf]  ;;  %v2629_v40 = vld [vmem:[%s3218_s8 + $0x1a4] sm:$0xf0] }
  0x3b   : > { %1027 = vmatpush.bf16.msrb.mxu1 %v2704_v44  ;;  %974 = vmatpush.bf16.msra.mxu3 %v2452_v55  ;;  %v370_v42 = vld [vmem:[%s4031_s0 + $0x60] sm:$0xff]  ;;  %v373_v43 = vld [vmem:[%s4031_s0 + $0x78] sm:$0xff]  ;;  %v372_v44 = vld [vmem:[%s4031_s0 + $0x70] sm:$0xff]  ;;  %v2632_v48 = vor.u32 %v2916_v39, %v2629_v40  ;;  %p1850_p13 = scmp.lt.s32.totalorder %s3920_s16, 8  ;;  %s2845_s13 = smul.u32 4294967176, %s3126_s20 }
  0x3c   : > { %1056 = vmatpush.bf16.msrb.mxu2 %v2516_v24  ;;  %v375_v45 = vld [vmem:[%s4031_s0 + $0x88] sm:$0xff]  ;;  %v374_v47 = vld [vmem:[%s4031_s0 + $0x80] sm:$0xff]  ;;  %v3395_v51 = vpack.c.bf16 %v373_v43, %v370_v42  ;;  %v2599_v55 = vld [vmem:[%s3218_s8 + $0x158] sm:$0xf] }
  0x3d   : > { %999 = vmatpush.bf16.msrb.mxu0 %v2596_v33  ;;  %v2912_v33 = vld [vmem:[%s3218_s8 + $0x178] sm:$0xf0]  ;;  %v371_v46 = vld [vmem:[%s4031_s0 + $0x68] sm:$0xff]  ;;  %v2913_v49 = vld [vmem:[%s3218_s8 + $0x184] sm:$0xf]  ;;  %v3397_v52 = vpack.c.bf16 %v375_v45, %v372_v44 }
  0x3e   : > { %v2612_v34 = vor.u32 %v2912_v33, %v2611_v30  ;;  %v2909_v56 = vld [vmem:[%s3218_s8 + $0x160] sm:$0xf0]  ;;  %v2707_v57 = vld [vmem:[%s3218_s8 + $0x230] sm:$0xf]  ;;  %v2936_v59 = vld [vmem:[%s3218_s8 + $0x238] sm:$0xf0] }
  0x3f   : > { %1028 = vmatpush.bf16.msrb.mxu1 %v2692_v50  ;;  %975 = vmatpush.bf16.msra.mxu3 %v2440_v4  ;;  %v2617_v50 = vld [vmem:[%s3218_s8 + $0x18c] sm:$0xf0]  ;;  %v2600_v58 = vor.u32 %v2909_v56, %v2599_v55  ;;  %v2491_v60 = vld [vmem:[%s3218_s8 + $0x80] sm:$0xf]  ;;  %v2882_v61 = vld [vmem:[%s3218_s8 + $0x88] sm:$0xf0] }
  0x40   : > { %v2620_v54 = vor.u32 %v2913_v49, %v2617_v50  ;;  %v2492_v63 = vor.u32 %v2882_v61, %v2491_v60  ;;  %v2587_v0 = vld [vmem:[%s3218_s8 + $0x140] sm:$0xf]  ;;  %v2906_v1 = vld [vmem:[%s3218_s8 + $0x148] sm:$0xf0]  ;;  %v2933_v4 = vld [vmem:[%s3218_s8 + $0x220] sm:$0xf0] }
  0x41   : > { %1000 = vmatpush.bf16.msrb.mxu0 %v2584_v41  ;;  %v2504_v41 = vor.u32 %v2885_v37, %v2503_v35  ;;  %v2588_v3 = vor.u32 %v2906_v1, %v2587_v0  ;;  %v2479_v5 = vld [vmem:[%s3218_s8 + $0x68] sm:$0xf]  ;;  %v2879_v6 = vld [vmem:[%s3218_s8 + $0x70] sm:$0xf0]  ;;  %v377_v16 = vld [vmem:[%s4031_s0 + $0x98] sm:$0xff] }
  0x42   : > { %v2480_v9 = vor.u32 %v2879_v6, %v2479_v5  ;;  %v376_v10 = vld [vmem:[%s4031_s0 + $0x90] sm:$0xff]  ;;  %v2575_v21 = vld [vmem:[%s3218_s8 + $0x128] sm:$0xf]  ;;  %v2930_v25 = vld [vmem:[%s3218_s8 + $0x208] sm:$0xf0] }
  0x43   : > { %1029 = vmatpush.bf16.msrb.mxu1 %v2680_v62  ;;  %976 = vmatpush.bf16.msra.mxu3 %v2428_v15  ;;  %v2708_v62 = vor.u32 %v2936_v59, %v2707_v57  ;;  %v381_v15 = vld [vmem:[%s4031_s0 + $0xb8] sm:$0xff]  ;;  %v380_v17 = vld [vmem:[%s4031_s0 + $0xb0] sm:$0xff]  ;;  %v2671_v35 = vld [vmem:[%s3218_s8 + $0x1e8] sm:$0xf]  ;;  %s1851_s25 = scalar_select %p1850_p13, 1, 0 }
  0x44   : > { %1057 = vmatpush.bf16.msrb.mxu2 %v2504_v41  ;;  %v3439_v20 = vpack.c.bf16 %v380_v17, %v377_v16  ;;  %v2467_v26 = vld [vmem:[%s3218_s8 + $0x50] sm:$0xf]  ;;  %v2876_v28 = vld [vmem:[%s3218_s8 + $0x58] sm:$0xf0]  ;;  %v2927_v37 = vld [vmem:[%s3218_s8 + $0x1f0] sm:$0xf0] }
  0x45   : > { %1001 = vmatpush.bf16.msrb.mxu0 %v2572_v53  ;;  %v3399_v53 = vpack.c.bf16 %v374_v47, %v371_v46  ;;  %v2468_v30 = vor.u32 %v2876_v28, %v2467_v26  ;;  %v2563_v33 = vld [vmem:[%s3218_s8 + $0x110] sm:$0xf]  ;;  %v2873_v39 = vld [vmem:[%s3218_s8 + $0x40] sm:$0xf0]  ;;  %v2672_v40 = vor.u32 %v2927_v37, %v2671_v35  ;;  %v2551_v42 = vld [vmem:[%s3218_s8 + $0xf8] sm:$0xf] }
  0x46   : > { %977 = vmatmul.bf16.vlgmr.msra.gmra.mxu3 %v3295_v27  ;;  %v2897_v43 = vld [vmem:[%s3218_s8 + $0x100] sm:$0xf0]  ;;  %v2659_v44 = vld [vmem:[%s3218_s8 + $0x1d0] sm:$0xf]  ;;  %v2924_v46 = vld [vmem:[%s3218_s8 + $0x1d8] sm:$0xf0] }
  0x47   : > { %1030 = vmatpush.bf16.msrb.mxu1 %v2668_v13  ;;  %1085 = vmatpush.bf16.msrb.mxu3 %v2612_v34  ;;  %v379_v13 = vld [vmem:[%s4031_s0 + $0xa8] sm:$0xff]  ;;  %v2900_v34 = vld [vmem:[%s3218_s8 + $0x118] sm:$0xf0]  ;;  %v2552_v45 = vor.u32 %v2897_v43, %v2551_v42  ;;  %v2443_v47 = vld [vmem:[%s3218_s8 + $0x20] sm:$0xf]  ;;  %v2660_v49 = vor.u32 %v2924_v46, %v2659_v44 }
  0x48   : > { %895 = vmatmul.bf16.gmra.mxu0 %v3346_v7  ;;  %1058 = vmatpush.bf16.msrb.mxu2 %v2492_v63  ;;  %v3435_v18 = vpack.c.bf16 %v379_v13, %v376_v10  ;;  %v2894_v55 = vld [vmem:[%s3218_s8 + $0xe8] sm:$0xf0]  ;;  %v2647_v56 = vld [vmem:[%s3218_s8 + $0x1b8] sm:$0xf]  ;;  %v2431_v59 = vld [vmem:[%s3218_s8 + $0x8] sm:$0xf] }
  0x49   : > { %1002 = vmatpush.bf16.msrb.mxu0 %v2560_v2  ;;  %953 = vmatmul.bf16.gmra.mxu2 %v3351_v11  ;;  %v2695_v2 = vld [vmem:[%s3218_s8 + $0x218] sm:$0xf]  ;;  %v2867_v60 = vld [vmem:[%s3218_s8 + $0x10] sm:$0xf0]  ;;  %v2527_v63 = vld [vmem:[%s3218_s8 + $0xc8] sm:$0xf] }
  0x4a   : > { %924 = vmatmul.bf16.gmra.mxu1 %v3353_v12  ;;  %v2696_v8 = vor.u32 %v2933_v4, %v2695_v2  ;;  %v2891_v0 = vld [vmem:[%s3218_s8 + $0xd0] sm:$0xf0]  ;;  %v2635_v2 = vld [vmem:[%s3218_s8 + $0x1a0] sm:$0xf]  ;;  %v2623_v5 = vld [vmem:[%s3218_s8 + $0x188] sm:$0xf] }
  0x4b   : > { %1031 = vmatpush.bf16.msrb.mxu1 %v2656_v23  ;;  %1086 = vmatpush.bf16.msrb.mxu3 %v2600_v58  ;;  %v2683_v23 = vld [vmem:[%s3218_s8 + $0x200] sm:$0xf]  ;;  %v2921_v58 = vld [vmem:[%s3218_s8 + $0x1c0] sm:$0xf0]  ;;  %v2528_v1 = vor.u32 %v2891_v0, %v2527_v63  ;;  %v2915_v6 = vld [vmem:[%s3218_s8 + $0x190] sm:$0xf0] }
  0x4c   : > { %1059 = vmatpush.bf16.msrb.mxu2 %v2480_v9  ;;  %v2684_v29 = vor.u32 %v2930_v25, %v2683_v23  ;;  %v2648_v61 = vor.u32 %v2921_v58, %v2647_v56  ;;  %v2959_v9 = vld [vmem:[%s3487_s15 + $0xb0] sm:$0xf0]  ;;  %v2799_v10 = vld [vmem:[%s3487_s15 + $0xb4] sm:$0xf0]  ;;  %v2787_v17 = vld [vmem:[%s3487_s15 + $0x9c] sm:$0xf0] }
  0x4d   : > { %1003 = vmatpush.bf16.msrb.mxu0 %v2548_v14  ;;  %v378_v14 = vld [vmem:[%s4031_s0 + $0xa0] sm:$0xff]  ;;  %v2952_v25 = vld [vmem:[%s3487_s15 + $0x7c] sm:$0xf]  ;;  %v2775_v26 = vld [vmem:[%s3487_s15 + $0x84] sm:$0xf0] }
  0x4e   : > { %v3437_v19 = vpack.c.bf16 %v381_v15, %v378_v14  ;;  %v2785_v14 = vld [vmem:[%s3487_s15 + $0x90] sm:$0xf]  ;;  %v2956_v15 = vld [vmem:[%s3487_s15 + $0x98] sm:$0xf0]  ;;  %v2953_v23 = vld [vmem:[%s3487_s15 + $0x80] sm:$0xf0]  ;;  %v3534_v28 = vor.u32 %v2952_v25, %v2775_v26 }
  0x4f   : > { %1032 = vmatpush.bf16.msrb.mxu1 %v2644_v36  ;;  %1087 = vmatpush.bf16.msrb.mxu3 %v2588_v3  ;;  %v2564_v36 = vor.u32 %v2900_v34, %v2563_v33  ;;  %v2918_v3 = vld [vmem:[%s3218_s8 + $0x1a8] sm:$0xf0]  ;;  %v3504_v16 = vor.u32 %v2956_v15, %v2785_v14  ;;  %v2805_v33 = vld [vmem:[%s3487_s15 + $0xb0] sm:$0xf]  ;;  %v2960_v35 = vld [vmem:[%s3487_s15 + $0xb8] sm:$0xf0] }
  0x50   : > { %1060 = vmatpush.bf16.msrb.mxu2 %v2468_v30  ;;  %v2636_v4 = vor.u32 %v2918_v3, %v2635_v2  ;;  %v2950_v30 = vld [vmem:[%s3487_s15 + $0x68] sm:$0xf0]  ;;  %v2749_v43 = vld [vmem:[%s3487_s15 + $0x48] sm:$0xf]  ;;  %v2947_v44 = vld [vmem:[%s3487_s15 + $0x50] sm:$0xf0] }
  0x51   : > { %1004 = vmatpush.bf16.msrb.mxu0 %v2536_v22  ;;  %v2903_v22 = vld [vmem:[%s3218_s8 + $0x130] sm:$0xf0]  ;;  %v3561_v46 = vor.u32 %v2947_v44, %v2749_v43  ;;  %v2946_v56 = vld [vmem:[%s3487_s15 + $0x4c] sm:$0xf]  ;;  %v2769_v14 = vld [vmem:[%s3487_s15 + $0x68] sm:$0xf] }
  0x52   : > { %v2576_v24 = vor.u32 %v2903_v22, %v2575_v21  ;;  %v2773_v22 = vld [vmem:[%s3487_s15 + $0x78] sm:$0xf]  ;;  %v2954_v63 = vld [vmem:[%s3487_s15 + $0x88] sm:$0xf0]  ;;  %v2951_v15 = vld [vmem:[%s3487_s15 + $0x70] sm:$0xf0] }
  0x53   : > { %1033 = vmatpush.bf16.msrb.mxu1 %v2632_v48  ;;  %v2870_v48 = vld [vmem:[%s3218_s8 + $0x28] sm:$0xf0]  ;;  %v2757_v43 = vld [vmem:[%s3487_s15 + $0x50] sm:$0xf]  ;;  %v2948_v44 = vld [vmem:[%s3487_s15 + $0x58] sm:$0xf0] }
  0x54   : > { %1088 = vmatpush.bf16.msrb.mxu3 %v2576_v24  ;;  %v2444_v50 = vor.u32 %v2870_v48, %v2443_v47  ;;  %v2938_v26 = vld [vmem:[%s3487_s15 + $0x8] sm:$0xf0] }
  0x55   : > { %1005 = vmatpush.bf16.msrb.mxu0 %v2524_v38  ;;  %v2455_v38 = vld [vmem:[%s3218_s8 + $0x38] sm:$0xf] }
  0x56   : > { %982 = vmatmul.bf16.gmra.mxu3 %v3346_v7  ;;  %v2456_v41 = vor.u32 %v2873_v39, %v2455_v38 }
  0x57   : > { %1034 = vmatpush.bf16.msrb.mxu1 %v2620_v54  ;;  %v2539_v54 = vld [vmem:[%s3218_s8 + $0xe0] sm:$0xf]  ;;  %s2973_s8 = smul.u32 3, %s3212_s29  ;;  %s3738_s29 = scalar_lea.vmem [#allocation3], %s2961_s6 }
  0x58   : > { %900 = vmatmul.bf16.gmra.mxu0 %v3395_v51  ;;  %1089 = vmatpush.bf16.msrb.mxu3 %v2564_v36  ;;  %v2540_v57 = vor.u32 %v2894_v55, %v2539_v54 }
  0x59   : > { %958 = vmatmul.bf16.gmra.mxu2 %v3397_v52  ;;  %1114 = vmatpush.bf16.msra.mxu0 %v2708_v62  ;;  %v2432_v62 = vor.u32 %v2867_v60, %v2431_v59  ;;  %s338_s23 = scalar_lea.vmem %s4033_s2, %s2973_s8  ;;  %v2737_v59 = vld [vmem:[%s3487_s15 + $0x30] sm:$0xf]  ;;  %v2944_v60 = vld [vmem:[%s3487_s15 + $0x38] sm:$0xf0]  ;;  %s347_s30 = scalar_lea.vmem %s4035_s4, %s2973_s8 }
  0x5a   : > { %929 = vmatmul.bf16.gmra.mxu1 %v3399_v53  ;;  %1061 = vmatpush.bf16.msrb.mxu2 %v2456_v41  ;;  %v3530_v24 = vld [vmem:[%s338_s23] sm:$0x7]  ;;  %v2763_v41 = vld [vmem:[%s3487_s15 + $0x6c] sm:$0xf0]  ;;  %s1541_s23 = scalar_select %p1540_p10, 1, 0 }
  0x5b   : > { %v3546_v36 = vperm.slane %v3530_v24, 0 }
  0x5c   : > { %1090 = vmatpush.bf16.msrb.mxu3 %v2552_v45  ;;  %v2793_v45 = vld [vmem:[%s3487_s15 + $0x98] sm:$0xf] }
  0x5d   : > { %1115 = vmatpush.bf16.msra.mxu0 %v2696_v8  ;;  %v2624_v8 = vor.u32 %v2915_v6, %v2623_v5  ;;  %v2739_v5 = vld [vmem:[%s3487_s15 + $0x3c] sm:$0xf0] }
  0x5e   : > { %1062 = vmatpush.bf16.msrb.mxu2 %v2444_v50 }
  0x60   : > { %1091 = vmatpush.bf16.msrb.mxu3 %v2540_v57  ;;  %v2751_v57 = vld [vmem:[%s3487_s15 + $0x54] sm:$0xf0] }
  0x61   : > { %1116 = vmatpush.bf16.msra.mxu0 %v2684_v29  ;;  %v2761_v29 = vld [vmem:[%s3487_s15 + $0x60] sm:$0xf]  ;;  %v3574_v58 = vor.u32 %v2946_v56, %v2751_v57 }
  0x62   : > { %1063 = vmatpush.bf16.msrb.mxu2 %v2432_v62  ;;  %v3539_v34 = vor.u32 %v2950_v30, %v2761_v29  ;;  %v3579_v62 = vor.u32 %v2944_v60, %v2737_v59  ;;  %v2745_v59 = vld [vmem:[%s3487_s15 + $0x38] sm:$0xf]  ;;  %v2945_v60 = vld [vmem:[%s3487_s15 + $0x40] sm:$0xf0] }
  0x64   : > { %1092 = vmatpush.bf16.msrb.mxu3 %v2528_v1 }
  0x65   : > { %1117 = vmatpush.bf16.msra.mxu0 %v2672_v40  ;;  %v2949_v40 = vld [vmem:[%s3487_s15 + $0x64] sm:$0xf] }
  0x66   : > { %987 = vmatmul.bf16.gmra.mxu3 %v3395_v51  ;;  %v3556_v42 = vor.u32 %v2949_v40, %v2763_v41 }
  0x68   : > { %905 = vmatmul.bf16.gmra.mxu0 %v3435_v18 }
  0x69   : > { %963 = vmatmul.bf16.gmra.mxu2 %v3437_v19  ;;  %1118 = vmatpush.bf16.msra.mxu0 %v2660_v49 }
  0x6a   : > { %934 = vmatmul.bf16.gmra.mxu1 %v3439_v20 }
  0x6d   : > { %1119 = vmatpush.bf16.msra.mxu0 %v2648_v61  ;;  %v2781_v61 = vld [vmem:[%s3487_s15 + $0x80] sm:$0xf] }
  0x71   : > { %1120 = vmatpush.bf16.msra.mxu0 %v2636_v4  ;;  %v2943_v4 = vld [vmem:[%s3487_s15 + $0x34] sm:$0xf] }
  0x75   : > { %1121 = vmatpush.bf16.msra.mxu0 %v2624_v8  ;;  %v3590_v8 = vor.u32 %v2943_v4, %v2739_v5  ;;  %v2733_v4 = vld [vmem:[%s3487_s15 + $0x20] sm:$0xf]  ;;  %v2942_v5 = vld [vmem:[%s3487_s15 + $0x28] sm:$0xf0] }
  0x76   : > { %992 = vmatmul.bf16.gmra.mxu3 %v3435_v18 }
  0x78   : > { %1006 = vmatmul.bf16.vlgmr.msrb.gmra.mxu0 %v3302_v32 }
  0x79   : > { %1064 = vmatmul.bf16.vlgmr.msrb.gmra.mxu2 %v3295_v27  ;;  %v2797_v27 = vld [vmem:[%s3487_s15 + $0xa8] sm:$0xf] }
  0x7a   : > { %1035 = vmatmul.bf16.vlgmr.msrb.gmra.mxu1 %v3300_v31 }
  0x86   : > { %1093 = vmatmul.bf16.vlgmr.msrb.gmra.mxu3 %v3302_v32  ;;  %v3493_v32 = vor.u32 %v2959_v9, %v2797_v27  ;;  %v2725_v9 = vld [vmem:[%s3487_s15 + $0x18] sm:$0xf] }
  0x88   : > { %1011 = vmatmul.bf16.gmra.mxu0 %v3353_v12  ;;  %1348 = vmatpush.bf16.msra.mxu1 %v3493_v32 }
  0x89   : > { %1069 = vmatmul.bf16.gmra.mxu2 %v3346_v7  ;;  %1557 = vmatpush.bf16.msrb.mxu0 %v3493_v32  ;;  %v2958_v7 = vld [vmem:[%s3487_s15 + $0xac] sm:$0xf] }
  0x8a   : > { %1040 = vmatmul.bf16.gmra.mxu1 %v3351_v11  ;;  %v3500_v13 = vor.u32 %v2958_v7, %v2799_v10  ;;  %v2941_v7 = vld [vmem:[%s3487_s15 + $0x20] sm:$0xf0] }
  0x8b   : > { %v3597_v10 = vor.u32 %v2941_v7, %v2725_v9  ;;  %v2721_v7 = vld [vmem:[%s3487_s15 + $0x8] sm:$0xf] }
  0x8c   : > { %1361 = vmatpush.bf16.msra.mxu2 %v3500_v13  ;;  %1349 = vmatpush.bf16.msra.mxu1 %v3504_v16 }
  0x8d   : > { %1558 = vmatpush.bf16.msrb.mxu0 %v3504_v16 }
  0x96   : > { %1098 = vmatmul.bf16.gmra.mxu3 %v3353_v12  ;;  %v2955_v12 = vld [vmem:[%s3487_s15 + $0x94] sm:$0xf] }
  0x97   : > { %v3514_v21 = vor.u32 %v2955_v12, %v2787_v17  ;;  %v3601_v12 = vor.u32 %v2951_v15, %v2769_v14  ;;  %v2940_v17 = vld [vmem:[%s3487_s15 + $0x1c] sm:$0xf]  ;;  %v2939_v14 = vld [vmem:[%s3487_s15 + $0x10] sm:$0xf0] }
  0x98   : > { %1016 = vmatmul.bf16.gmra.mxu0 %v3399_v53 }
  0x99   : > { %1074 = vmatmul.bf16.gmra.mxu2 %v3395_v51  ;;  %v3519_v51 = vor.u32 %v2953_v23, %v2773_v22  ;;  %v2727_v22 = vld [vmem:[%s3487_s15 + $0x24] sm:$0xf0] }
  0x9a   : > { %1045 = vmatmul.bf16.gmra.mxu1 %v3397_v52  ;;  %1362 = vmatpush.bf16.msra.mxu2 %v3514_v21  ;;  %v3606_v23 = vor.u32 %v2940_v17, %v2727_v22  ;;  %v3664_v17 = vor.u32 %v2939_v14, %v2721_v7 }
  0x9b   : > { %1350 = vmatpush.bf16.msra.mxu1 %v3519_v51  ;;  %1559 = vmatpush.bf16.msrb.mxu0 %v3519_v51 }
  0x9e   : > { %1363 = vmatpush.bf16.msra.mxu2 %v3534_v28 }
  0x9f   : > { %1351 = vmatpush.bf16.msra.mxu1 %v3539_v34  ;;  %1560 = vmatpush.bf16.msrb.mxu0 %v3539_v34 }
  0xa2   : > { %1364 = vmatpush.bf16.msra.mxu2 %v3556_v42 }
  0xa3   : > { %1352 = vmatpush.bf16.msra.mxu1 %v3561_v46  ;;  %1561 = vmatpush.bf16.msrb.mxu0 %v3561_v46 }
  0xa6   : > { %1103 = vmatmul.bf16.gmra.mxu3 %v3399_v53  ;;  %v3543_v53 = vor.u32 %v2960_v35, %v2805_v33  ;;  %1365 = vmatpush.bf16.msra.mxu2 %v3574_v58 }
  0xa7   : > { %1353 = vmatpush.bf16.msra.mxu1 %v3579_v62  ;;  %1562 = vmatpush.bf16.msrb.mxu0 %v3579_v62 }
  0xa8   : > { %1021 = vmatmul.bf16.gmra.mxu0 %v3439_v20  ;;  %1374 = vmatpush.bf16.msra.mxu3 %v3543_v53 }
  0xa9   : > { %1079 = vmatmul.bf16.gmra.mxu2 %v3435_v18  ;;  %v2957_v18 = vld [vmem:[%s3487_s15 + $0xa0] sm:$0xf0] }
  0xaa   : > { %1050 = vmatmul.bf16.gmra.mxu1 %v3437_v19  ;;  %v3565_v47 = vor.u32 %v2957_v18, %v2793_v45  ;;  %1366 = vmatpush.bf16.msra.mxu2 %v3590_v8  ;;  %v3136_v18 = vmov 0.0|0.0  }
  0xab   : > { %1354 = vmatpush.bf16.msra.mxu1 %v3597_v10  ;;  %1563 = vmatpush.bf16.msrb.mxu0 %v3597_v10 }
  0xac   : > { %1375 = vmatpush.bf16.msra.mxu3 %v3565_v47 }
  0xae   : > { %1367 = vmatpush.bf16.msra.mxu2 %v3606_v23 }
  0xb5   : > { %v891_v37 = vpop.f32.mrf.mxu0 }
  0xb6   : > { %v892_v39 = vadd.f32 %v891_v37, %v3546_v36  ;;  %1108 = vmatmul.bf16.gmra.mxu3 %v3439_v20  ;;  %v3583_v20 = vor.u32 %v2954_v63, %v2781_v61  ;;  %v2937_v37 = vld [vmem:[%s3487_s15 + $0x4] sm:$0xf]  ;;  %v3645_v63 = vor.u32 %v2945_v60, %v2745_v59 }
  0xb7   : > { %v920_v38 = vpop.f32.mrf.mxu1 }
  0xb8   : > { %1122 = vmatmul.bf16.vlgmr.msra.gmra.mxu0 %v3300_v31  ;;  %v921_v48 = vadd.f32 %v920_v38, %v892_v39  ;;  %1376 = vmatpush.bf16.msra.mxu3 %v3583_v20  ;;  %v2715_v38 = vld [vmem:[%s3487_s15 + $0xc] sm:$0xf0] }
  0xb9   : > { %v3618_v40 = vor.u32 %v2937_v37, %v2715_v38 }
  0xbb   : > { %1368 = vmatpush.bf16.msra.mxu2 %v3618_v40 }
  0xbc   : > { %v949_v31 = vpop.f32.mrf.mxu2  ;;  %1377 = vmatpush.bf16.msra.mxu3 %v3601_v12 }
  0xbd   : > { %v950_v49 = vadd.f32 %v949_v31, %v921_v48  ;;  %v893_v50 = vpop.f32.mrf.mxu0  ;;  %v3629_v48 = vor.u32 %v2948_v44, %v2757_v43 }
  0xbe   : > { %v894_v55 = vadd.f32 %v893_v50, %v3546_v36  ;;  %1369 = vmatmul.bf16.vlgmr.msra.gmra.mxu2 %v3136_v18 }
  0xbf   : > { %v922_v54 = vpop.f32.mrf.mxu1  ;;  %1143 = vst [vmem:[#allocation3] sm:$0xff] %v950_v49  ;;  %1466 = vmatpush.bf16.msrb.mxu2 %v3500_v13 }
  0xc0   : > { %v923_v0 = vadd.f32 %v922_v54, %v894_v55  ;;  %1378 = vmatpush.bf16.msra.mxu3 %v3629_v48 }
  0xc3   : > { %1467 = vmatpush.bf16.msrb.mxu2 %v3514_v21 }
  0xc4   : > { %v951_v1 = vpop.f32.mrf.mxu2  ;;  %1379 = vmatpush.bf16.msra.mxu3 %v3645_v63 }
  0xc5   : > { %v952_v2 = vadd.f32 %v951_v1, %v923_v0  ;;  %v896_v3 = vpop.f32.mrf.mxu0 }
  0xc6   : > { %v897_v27 = vadd.f32 %v896_v3, %v3546_v36 }
  0xc7   : > { %v925_v6 = vpop.f32.mrf.mxu1  ;;  %1146 = vst [vmem:[#allocation3 + $0x18] sm:$0xff] %v952_v2  ;;  %1468 = vmatpush.bf16.msrb.mxu2 %v3534_v28 }
  0xc8   : > { %1127 = vmatmul.bf16.gmra.mxu0 %v3351_v11  ;;  %v926_v25 = vadd.f32 %v925_v6, %v897_v27  ;;  %v2713_v11 = vld [vmem:[%s3487_s15] sm:$0xf]  ;;  %v3654_v6 = vor.u32 %v2942_v5, %v2733_v4  ;;  %s2810_s15 = smul.u32 120, %s3126_s20 }
  0xc9   : > { %v3613_v30 = vor.u32 %v2938_v26, %v2713_v11  ;;  %v3627_v45 = vpop.f32.mrf.mxu3 }
  0xca   : > { %1380 = vmatpush.bf16.msra.mxu3 %v3654_v6  ;;  %s3787_s8 = scalar_lea.vmem [#allocation3], %s2810_s15  ;;  %s2831_s15 = sshll.u32 %s3126_s20, 3 }
  0xcb   : > { %1355 = vmatpush.bf16.msra.mxu1 %v3613_v30  ;;  %1564 = vmatpush.bf16.msrb.mxu0 %v3613_v30 }
  0xcc   : > { %v954_v29 = vpop.f32.mrf.mxu2  ;;  %1469 = vmatpush.bf16.msrb.mxu2 %v3556_v42 }
  0xcd   : > { %v955_v33 = vadd.f32 %v954_v29, %v926_v25  ;;  %v898_v35 = vpop.f32.mrf.mxu0 }
  0xce   : > { %v899_v41 = vadd.f32 %v898_v35, %v3546_v36  ;;  %1356 = vmatmul.bf16.vlgmr.msra.gmra.mxu1 %v3136_v18  ;;  %1381 = vmatpush.bf16.msra.mxu3 %v3664_v17 }
  0xcf   : > { %v927_v39 = vpop.f32.mrf.mxu1  ;;  %1149 = vst [vmem:[#allocation3 + $0x30] sm:$0xff] %v955_v33  ;;  %1453 = vmatpush.bf16.msrb.mxu1 %v3493_v32  ;;  %1673 = vmatpush.bf16.msra.mxu0 %v3500_v13 }
  0xd0   : > { %v928_v31 = vadd.f32 %v927_v39, %v899_v41  ;;  %1470 = vmatpush.bf16.msrb.mxu2 %v3574_v58 }
  0xd1   : > { %v3639_v57 = vpop.f32.mrf.mxu3  ;;  %1382 = vmatmul.bf16.vlgmr.msra.gmra.mxu3 %v3136_v18 }
  0xd2   : > { %1479 = vmatpush.bf16.msrb.mxu3 %v3543_v53 }
  0xd3   : > { %1454 = vmatpush.bf16.msrb.mxu1 %v3504_v16  ;;  %1674 = vmatpush.bf16.msra.mxu0 %v3514_v21 }
  0xd4   : > { %v956_v49 = vpop.f32.mrf.mxu2  ;;  %1471 = vmatpush.bf16.msrb.mxu2 %v3590_v8 }
  0xd5   : > { %v957_v50 = vadd.f32 %v956_v49, %v928_v31  ;;  %v901_v54 = vpop.f32.mrf.mxu0 }
  0xd6   : > { %v902_v56 = vadd.f32 %v901_v54, %v3546_v36  ;;  %1480 = vmatpush.bf16.msrb.mxu3 %v3565_v47 }
  0xd7   : > { %v930_v55 = vpop.f32.mrf.mxu1  ;;  %1152 = vst [vmem:[#allocation3 + $0x48] sm:$0xff] %v957_v50  ;;  %1455 = vmatpush.bf16.msrb.mxu1 %v3519_v51  ;;  %1675 = vmatpush.bf16.msra.mxu0 %v3534_v28 }
  0xd8   : > { %1132 = vmatmul.bf16.gmra.mxu0 %v3397_v52  ;;  %v931_v61 = vadd.f32 %v930_v55, %v902_v56  ;;  %1472 = vmatpush.bf16.msrb.mxu2 %v3606_v23 }
  0xd9   : > { %v3658_v27 = vpop.f32.mrf.mxu3 }
  0xda   : > { %1481 = vmatpush.bf16.msrb.mxu3 %v3583_v20 }
  0xdb   : > { %1456 = vmatpush.bf16.msrb.mxu1 %v3539_v34  ;;  %1676 = vmatpush.bf16.msra.mxu0 %v3556_v42 }
  0xdc   : > { %v959_v0 = vpop.f32.mrf.mxu2  ;;  %1473 = vmatpush.bf16.msrb.mxu2 %v3618_v40 }
  0xdd   : > { %v960_v1 = vadd.f32 %v959_v0, %v931_v61  ;;  %v903_v52 = vpop.f32.mrf.mxu0 }
  0xde   : > { %v904_v3 = vadd.f32 %v903_v52, %v3546_v36  ;;  %1482 = vmatpush.bf16.msrb.mxu3 %v3601_v12 }
  0xdf   : > { %v932_v2 = vpop.f32.mrf.mxu1  ;;  %1155 = vst [vmem:[#allocation3 + $0x60] sm:$0xff] %v960_v1  ;;  %1457 = vmatpush.bf16.msrb.mxu1 %v3561_v46  ;;  %1677 = vmatpush.bf16.msra.mxu0 %v3574_v58 }
  0xe0   : > { %v933_v9 = vadd.f32 %v932_v2, %v904_v3  ;;  %1583 = vmatpush.bf16.msra.mxu2 %v3543_v53 }
  0xe1   : > { %v985_v35 = vpop.f32.mrf.mxu3 }
  0xe2   : > { %1483 = vmatpush.bf16.msrb.mxu3 %v3629_v48 }
  0xe3   : > { %1458 = vmatpush.bf16.msrb.mxu1 %v3579_v62  ;;  %1678 = vmatpush.bf16.msra.mxu0 %v3590_v8 }
  0xe4   : > { %v961_v15 = vpop.f32.mrf.mxu2  ;;  %1584 = vmatpush.bf16.msra.mxu2 %v3565_v47 }
  0xe5   : > { %v962_v22 = vadd.f32 %v961_v15, %v933_v9  ;;  %v906_v25 = vpop.f32.mrf.mxu0 }
  0xe6   : > { %v907_v26 = vadd.f32 %v906_v25, %v3546_v36  ;;  %1484 = vmatpush.bf16.msrb.mxu3 %v3645_v63 }
  0xe7   : > { %v935_v11 = vpop.f32.mrf.mxu1  ;;  %1158 = vst [vmem:[#allocation3 + $0x78] sm:$0xff] %v962_v22  ;;  %1459 = vmatpush.bf16.msrb.mxu1 %v3597_v10  ;;  %1679 = vmatpush.bf16.msra.mxu0 %v3606_v23 }
  0xe8   : > { %1137 = vmatmul.bf16.gmra.mxu0 %v3437_v19  ;;  %v936_v29 = vadd.f32 %v935_v11, %v907_v26  ;;  %v3681_v19 = vperm.slane %v3530_v24, 1  ;;  %1585 = vmatpush.bf16.msra.mxu2 %v3583_v20 }
  0xea   : > { %v979_v43 = vadd.f32 %v3627_v45, %v3681_v19  ;;  %v981_v45 = vadd.f32 %v3639_v57, %v3681_v19  ;;  %1485 = vmatpush.bf16.msrb.mxu3 %v3654_v6  ;;  %v984_v1 = vadd.f32 %v3658_v27, %v3681_v19  ;;  %v986_v27 = vadd.f32 %v985_v35, %v3681_v19 }
  0xeb   : > { %1460 = vmatpush.bf16.msrb.mxu1 %v3613_v30  ;;  %1680 = vmatpush.bf16.msra.mxu0 %v3618_v40 }
  0xec   : > { %v964_v33 = vpop.f32.mrf.mxu2  ;;  %1586 = vmatpush.bf16.msra.mxu2 %v3601_v12 }
  0xed   : > { %v965_v37 = vadd.f32 %v964_v33, %v936_v29  ;;  %v908_v38 = vpop.f32.mrf.mxu0 }
  0xee   : > { %v909_v41 = vadd.f32 %v908_v38, %v3546_v36  ;;  %v988_v36 = vpop.f32.mrf.mxu3  ;;  %1486 = vmatpush.bf16.msrb.mxu3 %v3664_v17 }
  0xef   : > { %1570 = vmatpush.bf16.msra.mxu1 %v3500_v13  ;;  %v937_v39 = vpop.f32.mrf.mxu1  ;;  %1161 = vst [vmem:[#allocation3 + $0x90] sm:$0xff] %v965_v37  ;;  %v989_v22 = vadd.f32 %v988_v36, %v3681_v19 }
  0xf0   : > { %v938_v44 = vadd.f32 %v937_v39, %v909_v41  ;;  %1587 = vmatpush.bf16.msra.mxu2 %v3629_v48 }
  0xf2   : > { %1660 = vmatpush.bf16.msra.mxu3 %v3493_v32 }
  0xf3   : > { %1571 = vmatpush.bf16.msra.mxu1 %v3514_v21 }
  0xf4   : > { %v966_v18 = vpop.f32.mrf.mxu2  ;;  %1588 = vmatpush.bf16.msra.mxu2 %v3645_v63 }
  0xf5   : > { %v967_v31 = vadd.f32 %v966_v18, %v938_v44  ;;  %v1007_v49 = vpop.f32.mrf.mxu0 }
  0xf6   : > { %v1008_v50 = vadd.f32 %v1007_v49, %v979_v43  ;;  %v990_v0 = vpop.f32.mrf.mxu3  ;;  %1661 = vmatpush.bf16.msra.mxu3 %v3504_v16 }
  0xf7   : > { %1572 = vmatpush.bf16.msra.mxu1 %v3534_v28  ;;  %v1036_v54 = vpop.f32.mrf.mxu1  ;;  %1164 = vst [vmem:[#allocation3 + $0xa8] sm:$0xff] %v967_v31  ;;  %v991_v35 = vadd.f32 %v990_v0, %v3681_v19 }
  0xf8   : > { %v1037_v55 = vadd.f32 %v1036_v54, %v1008_v50  ;;  %1589 = vmatpush.bf16.msra.mxu2 %v3654_v6 }
  0xfa   : > { %1144 = vst [vmem:[#allocation3 + $0x8] sm:$0xff] %v1037_v55  ;;  %1662 = vmatpush.bf16.msra.mxu3 %v3519_v51 }
  0xfb   : > { %1573 = vmatpush.bf16.msra.mxu1 %v3556_v42 }
  0xfc   : > { %v1065_v5 = vpop.f32.mrf.mxu2  ;;  %1590 = vmatpush.bf16.msra.mxu2 %v3664_v17 }
  0xfd   : > { %v1009_v56 = vpop.f32.mrf.mxu0 }
  0xfe   : > { %v1010_v59 = vadd.f32 %v1009_v56, %v981_v45  ;;  %v993_v4 = vpop.f32.mrf.mxu3  ;;  %1663 = vmatpush.bf16.msra.mxu3 %v3539_v34  ;;  %v494_v56 = vperm.slane %v3530_v24, 2 }
  0xff   : > { %1574 = vmatpush.bf16.msra.mxu1 %v3574_v58  ;;  %v1038_v60 = vpop.f32.mrf.mxu1  ;;  %v994_v31 = vadd.f32 %v993_v4, %v3681_v19 }
 0x100   : > { %v1039_v61 = vadd.f32 %v1038_v60, %v1010_v59 }
 0x102   : > { %1147 = vst [vmem:[#allocation3 + $0x20] sm:$0xff] %v1039_v61  ;;  %1664 = vmatpush.bf16.msra.mxu3 %v3561_v46  ;;  %v1066_v61 = vadd.f32 %v1065_v5, %v494_v56 }
 0x103   : > { %1575 = vmatpush.bf16.msra.mxu1 %v3590_v8 }
 0x104   : > { %v1067_v25 = vpop.f32.mrf.mxu2 }
 0x105   : > { %v1012_v57 = vpop.f32.mrf.mxu0 }
 0x106   : > { %v1013_v52 = vadd.f32 %v1012_v57, %v984_v1  ;;  %v995_v11 = vpop.f32.mrf.mxu3  ;;  %1665 = vmatpush.bf16.msra.mxu3 %v3579_v62 }
 0x107   : > { %1576 = vmatpush.bf16.msra.mxu1 %v3606_v23  ;;  %v1041_v2 = vpop.f32.mrf.mxu1  ;;  %v996_v59 = vadd.f32 %v995_v11, %v3681_v19 }
 0x108   : > { %v1042_v3 = vadd.f32 %v1041_v2, %v1013_v52 }
 0x10a   : > { %1150 = vst [vmem:[#allocation3 + $0x38] sm:$0xff] %v1042_v3  ;;  %1666 = vmatpush.bf16.msra.mxu3 %v3597_v10 }
 0x10b   : > { %1577 = vmatpush.bf16.msra.mxu1 %v3618_v40 }
 0x10c   : > { %v1070_v38 = vpop.f32.mrf.mxu2 }
 0x10d   : > { %v1014_v9 = vpop.f32.mrf.mxu0  ;;  %v1071_v24 = vadd.f32 %v1070_v38, %v494_v56 }
 0x10e   : > { %v1015_v7 = vadd.f32 %v1014_v9, %v986_v27  ;;  %v1094_v44 = vpop.f32.mrf.mxu3  ;;  %1667 = vmatpush.bf16.msra.mxu3 %v3613_v30  ;;  %v1068_v9 = vadd.f32 %v1067_v25, %v494_v56 }
 0x10f   : > { %v1043_v14 = vpop.f32.mrf.mxu1  ;;  %v1095_v2 = vadd.f32 %v1094_v44, %v1066_v61 }
 0x110   : > { %v1044_v15 = vadd.f32 %v1043_v14, %v1015_v7 }
 0x112   : > { %1153 = vst [vmem:[#allocation3 + $0x50] sm:$0xff] %v1044_v15 }
 0x114   : > { %v1072_v36 = vpop.f32.mrf.mxu2 }
 0x115   : > { %v1017_v26 = vpop.f32.mrf.mxu0 }
 0x116   : > { %v1018_v29 = vadd.f32 %v1017_v26, %v989_v22  ;;  %v1096_v45 = vpop.f32.mrf.mxu3 }
 0x117   : > { %v1046_v33 = vpop.f32.mrf.mxu1  ;;  %v1097_v14 = vadd.f32 %v1096_v45, %v1068_v9 }
 0x118   : > { %v1047_v37 = vadd.f32 %v1046_v33, %v1018_v29 }
 0x11a   : > { %1156 = vst [vmem:[#allocation3 + $0x68] sm:$0xff] %v1047_v37  ;;  %v1073_v37 = vadd.f32 %v1072_v36, %v494_v56 }
 0x11c   : > { %v1075_v52 = vpop.f32.mrf.mxu2 }
 0x11d   : > { %v1019_v39 = vpop.f32.mrf.mxu0 }
 0x11e   : > { %v1020_v41 = vadd.f32 %v1019_v39, %v991_v35  ;;  %v1099_v3 = vpop.f32.mrf.mxu3 }
 0x11f   : > { %v1048_v43 = vpop.f32.mrf.mxu1  ;;  %v1100_v19 = vadd.f32 %v1099_v3, %v1071_v24 }
 0x120   : > { %v1049_v18 = vadd.f32 %v1048_v43, %v1020_v41  ;;  %v1076_v41 = vadd.f32 %v1075_v52, %v494_v56 }
 0x122   : > { %1159 = vst [vmem:[#allocation3 + $0x80] sm:$0xff] %v1049_v18 }
 0x124   : > { %v1077_v7 = vpop.f32.mrf.mxu2 }
 0x125   : > { %v1022_v49 = vpop.f32.mrf.mxu0 }
 0x126   : > { %v1023_v50 = vadd.f32 %v1022_v49, %v994_v31  ;;  %v1101_v15 = vpop.f32.mrf.mxu3 }
 0x127   : > { %v1051_v54 = vpop.f32.mrf.mxu1  ;;  %v1102_v35 = vadd.f32 %v1101_v15, %v1073_v37 }
 0x128   : > { %v1052_v55 = vadd.f32 %v1051_v54, %v1023_v50 }
 0x12a   : > { %1162 = vst [vmem:[#allocation3 + $0x98] sm:$0xff] %v1052_v55  ;;  %v1078_v55 = vadd.f32 %v1077_v7, %v494_v56  ;;  %v1199_v7 = vld [vmem:[%s347_s30] sm:$0x7]  ;;  %s2818_s30 = smul.u32 72, %s3126_s20 }
 0x12b   : > { %v3732_v15 = vperm.slane %v1199_v7, 0 }
 0x12c   : > { %v1080_v5 = vpop.f32.mrf.mxu2  ;;  %s3831_s6 = scalar_lea.vmem [#allocation3], %s2818_s30 }
 0x12d   : > { %v1024_v60 = vpop.f32.mrf.mxu0 }
 0x12e   : > { %v1025_v0 = vadd.f32 %v1024_v60, %v996_v59  ;;  %v1104_v33 = vpop.f32.mrf.mxu3  ;;  %v1081_v60 = vadd.f32 %v1080_v5, %v494_v56 }
 0x12f   : > { %v1053_v1 = vpop.f32.mrf.mxu1  ;;  %v1105_v31 = vadd.f32 %v1104_v33, %v1076_v41 }
 0x130   : > { %v1054_v57 = vadd.f32 %v1053_v1, %v1025_v0 }
 0x132   : > { %1165 = vst [vmem:[#allocation3 + $0xb0] sm:$0xff] %v1054_v57 }
 0x134   : > { %v1082_v25 = vpop.f32.mrf.mxu2 }
 0x135   : > { %v1123_v4 = vpop.f32.mrf.mxu0  ;;  %v1083_v3 = vadd.f32 %v1082_v25, %v494_v56 }
 0x136   : > { %v1124_v27 = vadd.f32 %v1123_v4, %v1095_v2  ;;  %v1106_v18 = vpop.f32.mrf.mxu3 }
 0x137   : > { %v1107_v59 = vadd.f32 %v1106_v18, %v1078_v55 }
 0x138   : > { %1145 = vst [vmem:[#allocation3 + $0x10] sm:$0xff] %v1124_v27 }
 0x13d   : > { %v1125_v22 = vpop.f32.mrf.mxu0 }
 0x13e   : > { %v1126_v26 = vadd.f32 %v1125_v22, %v1097_v14  ;;  %v1109_v45 = vpop.f32.mrf.mxu3  ;;  %v3734_v22 = vperm.slane %v1199_v7, 1 }
 0x13f   : > { %v1110_v1 = vadd.f32 %v1109_v45, %v1081_v60 }
 0x140   : > { %1148 = vst [vmem:[#allocation3 + $0x28] sm:$0xff] %v1126_v26 }
 0x141   : > { %v1370_v54 = vpop.f32.mrf.mxu2 }
 0x142   : > { %v1371_v56 = vadd.f32 %v1370_v54, %v3734_v22 }
 0x145   : > { %v1128_v11 = vpop.f32.mrf.mxu0 }
 0x146   : > { %v1129_v29 = vadd.f32 %v1128_v11, %v1100_v19  ;;  %v1111_v57 = vpop.f32.mrf.mxu3 }
 0x147   : > { %v1112_v4 = vadd.f32 %v1111_v57, %v1083_v3 }
 0x148   : > { %1151 = vst [vmem:[#allocation3 + $0x40] sm:$0xff] %v1129_v29 }
 0x149   : > { %v1372_v0 = vpop.f32.mrf.mxu2 }
 0x14b   : > { %v1357_v44 = vpop.f32.mrf.mxu1 }
 0x14c   : > { %v1358_v24 = vadd.f32 %v1357_v44, %v3732_v15 }
 0x14d   : > { %v1130_v39 = vpop.f32.mrf.mxu0 }
 0x14e   : > { %v1131_v43 = vadd.f32 %v1130_v39, %v1102_v35 }
 0x150   : > { %1154 = vst [vmem:[#allocation3 + $0x58] sm:$0xff] %v1131_v43 }
 0x153   : > { %v1359_v50 = vpop.f32.mrf.mxu1 }
 0x154   : > { %v1383_v27 = vpop.f32.mrf.mxu3 }
 0x155   : > { %v1133_v49 = vpop.f32.mrf.mxu0 }
 0x156   : > { %v1134_v38 = vadd.f32 %v1133_v49, %v1105_v31  ;;  %v3742_v49 = vperm.slane %v1199_v7, 2 }
 0x158   : > { %1157 = vst [vmem:[#allocation3 + $0x70] sm:$0xff] %v1134_v38 }
 0x15c   : > { %v1385_v26 = vpop.f32.mrf.mxu3 }
 0x15d   : > { %v1135_v36 = vpop.f32.mrf.mxu0 }
 0x15e   : > { %v1136_v61 = vadd.f32 %v1135_v36, %v1107_v59  ;;  %v1384_v36 = vadd.f32 %v1383_v27, %v3742_v49 }
 0x160   : > { %1160 = vst [vmem:[#allocation3 + $0x88] sm:$0xff] %v1136_v61 }
 0x165   : > { %v1138_v52 = vpop.f32.mrf.mxu0 }
 0x166   : > { %v1139_v2 = vadd.f32 %v1138_v52, %v1110_v1 }
 0x168   : > { %1163 = vst [vmem:[#allocation3 + $0xa0] sm:$0xff] %v1139_v2 }
 0x16d   : > { %v1140_v9 = vpop.f32.mrf.mxu0 }
 0x16e   : > { %v1141_v14 = vadd.f32 %v1140_v9, %v1112_v4 }
 0x170   : > { %1166 = vst [vmem:[#allocation3 + $0xb8] sm:$0xff] %v1141_v14 }
 0x177   : > { %v1209_v19 = vld [vmem:[%s3738_s29] sm:$0xff]  ;;  %v1210_v5 = vld [vmem:[%s3738_s29 + $0x8] sm:$0xff]  ;;  %v1211_v3 = vld [vmem:[%s3738_s29 + $0x10] sm:$0xff]  ;;  %s1548_s29 = smul.u32 3, %s3126_s20 }
 0x178   : > { %v1387_v11 = vadd.f32 %v1358_v24, %v1209_v19  ;;  %v1407_v29 = vadd.f32 %v1371_v56, %v1210_v5  ;;  %v1438_v24 = vstv %s1437_s11  ;;  %s2310_s11 = scalar_lea.vmem %s3755_s14, %s2824_s10 [#allocation4] }
 0x179   : > { %vm1439_vm8 = vcmp.eq.s32.totalorder %v1438_v24, 1  ;;  %s1549_s7 = sadd.s32 2, %s1548_s29 }
 0x17a   : > { %v2807_v33 = vmul.f32 -1.442695, %v1387_v11  ;;  %v2808_v37 = vmul.f32 -1.442695, %v1407_v29  ;;  %vm2963_vm9 = vmpackc.low %vm1439_vm8, %vm1439_vm8  ;;  %p1644_p11 = scmp.lt.s32.totalorder %s1549_s7, 8  ;;  %s1858_s7 = smul.u32 4294967293, %s3126_s20 }
 0x17c   : > { %3016 = vpow2.f32 %v2807_v33  ;;  %s1645_s9 = scalar_select %p1644_p11, 1, 0 }
 0x17d   : > { %3018 = vpow2.f32 %v2808_v37 }
 0x182   : > { %v3017_v35 = vpop.eup %3016 }
 0x183   : > { %v3019_v39 = vpop.eup %3018  ;;  %v1391_v41 = vadd.f32 1.0, %v3017_v35 }
 0x184   : > { %v1411_v43 = vadd.f32 1.0, %v3019_v39  ;;  %v2811_v39 = vld [vmem:[%s3787_s8 + $0x18] sm:$0xff] }
 0x185   : > { %3020 = vrcp.f32 %v1391_v41  ;;  %v1403_v54 = vand.u32 2147483648, %v1391_v41  ;;  %v1401_v45 = vand.u32 2147483647, %v1391_v41  ;;  %vm1397_vm1 = vweird.f32 %v1391_v41 }
 0x186   : > { %3022 = vrcp.f32 %v1411_v43  ;;  %v1423_v2 = vand.u32 2147483648, %v1411_v43  ;;  %vm1417_vm5 = vweird.f32 %v1411_v43  ;;  %v1421_v4 = vand.u32 2147483647, %v1411_v43 }
 0x187   : > { %v1404_v61 = vor.u32 1.1754944e-38, %v1403_v54  ;;  %vm1402_vm3 = vcmp.eq.f32.partialorder %v1401_v45, 8.507059e+37 }
 0x188   : > { %v1424_v7 = vor.u32 1.1754944e-38, %v1423_v2  ;;  %vm1422_vm7 = vcmp.eq.f32.partialorder %v1421_v4, 8.507059e+37 }
 0x18b   : > { %v3021_v25 = vpop.eup %3020 }
 0x18c   : > { %v3023_v44 = vpop.eup %3022  ;;  %v1393_v18 = vmul.f32 %v3021_v25, %v1391_v41  ;;  %vm1398_vm0 = vweird.f32 %v3021_v25 }
 0x18d   : > { %v1413_v31 = vmul.f32 %v3023_v44, %v1411_v43  ;;  %vm1399_vm2 = vmor %vm1397_vm1, %vm1398_vm0  ;;  %vm1418_vm4 = vweird.f32 %v3023_v44 }
 0x18e   : > { %v1394_v38 = vsub.f32 1.0, %v1393_v18  ;;  %vm1419_vm6 = vmor %vm1417_vm5, %vm1418_vm4 }
 0x18f   : > { %v1414_v50 = vsub.f32 1.0, %v1413_v31  ;;  %v2812_v31 = vld [vmem:[%s3787_s8 + $0x20] sm:$0xff] }
 0x190   : > { %v1395_v55 = vmul.f32 %v3021_v25, %v1394_v38 }
 0x191   : > { %v1415_v59 = vmul.f32 %v3023_v44, %v1414_v50 }
 0x192   : > { %v1396_v60 = vadd.f32 %v3021_v25, %v1395_v55 }
 0x193   : > { %v1416_v57 = vadd.f32 %v3023_v44, %v1415_v59 }
 0x194   : > { %v1400_v0 = vsel %vm1399_vm2, %v3021_v25, %v1396_v60 }
 0x195   : > { %v1405_v1 = vsel %vm1402_vm3, %v1404_v61, %v1400_v0  ;;  %v1420_v9 = vsel %vm1419_vm6, %v3023_v44, %v1416_v57 }
 0x196   : > { %v1427_v52 = vmul.f32 %v1405_v1, %v1384_v36  ;;  %v1425_v14 = vsel %vm1422_vm7, %v1424_v7, %v1420_v9 }
 0x197   : > { %v1430_v56 = vsub.f32 1.0, %v1425_v14  ;;  %v1432_v5 = vmul.f32 0.0, %v1425_v14 }
 0x198   : > { %v1428_v27 = vadd.f32 %v1427_v52, %v1211_v3 }
 0x19a   : > { %3024 = vtanh.f32 %v1428_v27 }
 0x1a0   : > { %v3025_v26 = vpop.eup %3024 }
 0x1a1   : > { %v1431_v19 = vmul.f32 %v3025_v26, %v1430_v56 }
 0x1a3   : > { %v1433_v11 = vadd.f32 %v1432_v5, %v1431_v19 }
 0x1a5   : > { %v3758_v29 = vsel %vm1439_vm8, %v1433_v11, 0.0  ;;  %v2964_v33 = vpack.c.bf16 %v1433_v11, %v1433_v11 }
 0x1a6   : > { %1443 = vst [vmem:[%s1442_s18] sm:$0xff] %v3758_v29  ;;  %s1748_s18 = scalar_select %p1747_p12, 1, 0 }
 0x1a7   : > { %2965 = vmatmul.msk.bf16.vlgmr.msrb.gmra.mxu1 %vm2963_vm9, %v2964_v33  ;;  %2968 = vmatmul.msk.bf16.vlgmr.msrb.gmra.mxu2 %vm2963_vm9, %v2964_v33 }
 0x1a8   : > { %2971 = vmatmul.msk.bf16.vlgmr.msrb.gmra.mxu3 %vm2963_vm9, %v2964_v33  ;;  %1686 = vmatpush.bf16.msrb.mxu1 %v3543_v53  ;;  %v2813_v33 = vld [vmem:[%s3787_s8 + $0x28] sm:$0xff]  ;;  %s2316_s8 = scalar_lea.vmem %s3755_s14, %s2831_s15 [#allocation4] }
 0x1a9   : > { %1763 = vmatpush.bf16.msrb.mxu2 %v3493_v32  ;;  %1776 = vmatpush.bf16.msrb.mxu3 %v3500_v13 }
 0x1ac   : > { %1687 = vmatpush.bf16.msrb.mxu1 %v3565_v47 }
 0x1ad   : > { %1764 = vmatpush.bf16.msrb.mxu2 %v3504_v16  ;;  %1777 = vmatpush.bf16.msrb.mxu3 %v3514_v21 }
 0x1b0   : > { %1688 = vmatpush.bf16.msrb.mxu1 %v3583_v20 }
 0x1b1   : > { %1765 = vmatpush.bf16.msrb.mxu2 %v3519_v51  ;;  %1778 = vmatpush.bf16.msrb.mxu3 %v3534_v28 }
 0x1b4   : > { %1689 = vmatpush.bf16.msrb.mxu1 %v3601_v12 }
 0x1b5   : > { %1766 = vmatpush.bf16.msrb.mxu2 %v3539_v34  ;;  %1779 = vmatpush.bf16.msrb.mxu3 %v3556_v42 }
 0x1b8   : > { %1690 = vmatpush.bf16.msrb.mxu1 %v3629_v48 }
 0x1b9   : > { %1767 = vmatpush.bf16.msrb.mxu2 %v3561_v46  ;;  %1780 = vmatpush.bf16.msrb.mxu3 %v3574_v58 }
 0x1bc   : > { %1691 = vmatpush.bf16.msrb.mxu1 %v3645_v63 }
 0x1bd   : > { %1768 = vmatpush.bf16.msrb.mxu2 %v3579_v62  ;;  %1781 = vmatpush.bf16.msrb.mxu3 %v3590_v8 }
 0x1c0   : > { %1692 = vmatpush.bf16.msrb.mxu1 %v3654_v6 }
 0x1c1   : > { %1769 = vmatpush.bf16.msrb.mxu2 %v3597_v10  ;;  %1782 = vmatpush.bf16.msrb.mxu3 %v3606_v23 }
 0x1c4   : > { %1693 = vmatpush.bf16.msrb.mxu1 %v3664_v17 }
 0x1c5   : > { %1770 = vmatpush.bf16.msrb.mxu2 %v3613_v30  ;;  %1783 = vmatpush.bf16.msrb.mxu3 %v3618_v40 }
 0x224   : > { %v1462_v37 = vpop.f32.mrf.mxu1 }
 0x225   : > { %v1463_v35 = vadd.f32 %v1462_v37, %v3732_v15 }
 0x227   : > { %v1492_v41 = vadd.f32 %v2811_v39, %v1463_v35 }
 0x229   : > { %v2814_v43 = vmul.f32 -1.442695, %v1492_v41 }
 0x22a   : > { %v1475_v25 = vpop.f32.mrf.mxu2 }
 0x22b   : > { %3026 = vpow2.f32 %v2814_v43  ;;  %v1476_v44 = vadd.f32 %v1475_v25, %v3734_v22  ;;  %v1488_v18 = vpop.f32.mrf.mxu3 }
 0x22c   : > { %v1464_v38 = vpop.f32.mrf.mxu1  ;;  %v1489_v24 = vadd.f32 %v1488_v18, %v3742_v49  ;;  %v1542_v18 = vstv %s1541_s23  ;;  %s3925_s23 = scalar_lea.vmem [#allocation3], %s2962_s17 }
 0x22d   : > { %v1512_v50 = vadd.f32 %v2812_v31, %v1476_v44  ;;  %vm1543_vm2 = vcmp.eq.s32.totalorder %v1542_v18, 1 }
 0x22f   : > { %v2815_v54 = vmul.f32 -1.442695, %v1512_v50 }
 0x231   : > { %v3027_v55 = vpop.eup %3026  ;;  %3028 = vpow2.f32 %v2815_v54 }
 0x232   : > { %v1496_v45 = vadd.f32 1.0, %v3027_v55  ;;  %v1477_v59 = vpop.f32.mrf.mxu2 }
 0x233   : > { %v1490_v36 = vpop.f32.mrf.mxu3 }
 0x234   : > { %3030 = vrcp.f32 %v1496_v45  ;;  %v1508_v52 = vand.u32 2147483648, %v1496_v45  ;;  %v1506_v3 = vand.u32 2147483647, %v1496_v45  ;;  %vm1502_vm11 = vweird.f32 %v1496_v45 }
 0x236   : > { %v1509_v7 = vor.u32 1.1754944e-38, %v1508_v52  ;;  %vm1507_vm13 = vcmp.eq.f32.partialorder %v1506_v3, 8.507059e+37 }
 0x237   : > { %v3029_v60 = vpop.eup %3028 }
 0x238   : > { %v1516_v61 = vadd.f32 1.0, %v3029_v60 }
 0x23a   : > { %v3031_v0 = vpop.eup %3030  ;;  %3032 = vrcp.f32 %v1516_v61  ;;  %v1528_v5 = vand.u32 2147483648, %v1516_v61  ;;  %v1526_v37 = vand.u32 2147483647, %v1516_v61  ;;  %vm1522_vm15 = vweird.f32 %v1516_v61 }
 0x23b   : > { %v1498_v1 = vmul.f32 %v3031_v0, %v1496_v45  ;;  %vm1503_vm10 = vweird.f32 %v3031_v0 }
 0x23c   : > { %vm1504_vm12 = vmor %vm1502_vm11, %vm1503_vm10  ;;  %v1529_v41 = vor.u32 1.1754944e-38, %v1528_v5  ;;  %vm1527_vm1 = vcmp.eq.f32.partialorder %v1526_v37, 8.507059e+37 }
 0x23d   : > { %v1499_v57 = vsub.f32 1.0, %v1498_v1 }
 0x23f   : > { %v1500_v2 = vmul.f32 %v3031_v0, %v1499_v57 }
 0x240   : > { %v3033_v4 = vpop.eup %3032 }
 0x241   : > { %v1518_v27 = vmul.f32 %v3033_v4, %v1516_v61  ;;  %v1501_v9 = vadd.f32 %v3031_v0, %v1500_v2  ;;  %vm1523_vm14 = vweird.f32 %v3033_v4  ;;  %v2819_v61 = vld [vmem:[%s3831_s6 + $0x30] sm:$0xff] }
 0x242   : > { %vm1524_vm0 = vmor %vm1522_vm15, %vm1523_vm14 }
 0x243   : > { %v1519_v14 = vsub.f32 1.0, %v1518_v27  ;;  %v1505_v56 = vsel %vm1504_vm12, %v3031_v0, %v1501_v9  ;;  %v2820_v0 = vld [vmem:[%s3831_s6 + $0x38] sm:$0xff] }
 0x244   : > { %v1510_v26 = vsel %vm1507_vm13, %v1509_v7, %v1505_v56 }
 0x245   : > { %v1520_v19 = vmul.f32 %v3033_v4, %v1519_v14  ;;  %v1532_v11 = vmul.f32 %v1510_v26, %v1489_v24 }
 0x247   : > { %v1521_v35 = vadd.f32 %v3033_v4, %v1520_v19  ;;  %v1533_v39 = vadd.f32 %v2813_v33, %v1532_v11 }
 0x249   : > { %v1525_v43 = vsel %vm1524_vm0, %v3033_v4, %v1521_v35  ;;  %3034 = vtanh.f32 %v1533_v39 }
 0x24a   : > { %v1530_v25 = vsel %vm1527_vm1, %v1529_v41, %v1525_v43 }
 0x24b   : > { %v1535_v44 = vsub.f32 1.0, %v1530_v25  ;;  %v1537_v50 = vmul.f32 %v1530_v25, %v3758_v29 }
 0x24f   : > { %v3035_v31 = vpop.eup %3034 }
 0x250   : > { %v1536_v38 = vmul.f32 %v3035_v31, %v1535_v44 }
 0x252   : > { %v1538_v54 = vadd.f32 %v1537_v50, %v1536_v38 }
 0x254   : > { %v3799_v55 = vsel %vm1543_vm2, %v1538_v54, %v3758_v29 }
 0x255   : > { %2817 = vst [vmem:[%s2302_s27 + $0x8] sm:$0xff] %v3799_v55  ;;  %v1556_v45 = vpack.c.bf16 %v3799_v55, %v3799_v55  ;;  %s2836_s27 = sshll.u32 %s3920_s16, 3 }
 0x256   : > { %s1856_s30 = scalar_lea.vmem %s3755_s14, %s2836_s27 [#allocation4]  ;;  %s2853_s27 = smul.u32 4294967128, %s3126_s20 }
 0x257   : > { %1565 = vmatmul.bf16.vlgmr.msrb.gmra.mxu0 %v1556_v45  ;;  %1578 = vmatmul.bf16.vlgmr.msra.gmra.mxu1 %v1556_v45 }
 0x258   : > { %1591 = vmatmul.bf16.vlgmr.msra.gmra.mxu2 %v1556_v45  ;;  %1789 = vmatpush.bf16.msrb.mxu0 %v3543_v53 }
 0x259   : > { %1867 = vmatpush.bf16.msra.mxu1 %v3493_v32  ;;  %1880 = vmatpush.bf16.msra.mxu2 %v3500_v13 }
 0x25c   : > { %1790 = vmatpush.bf16.msrb.mxu0 %v3565_v47 }
 0x25d   : > { %1868 = vmatpush.bf16.msra.mxu1 %v3504_v16  ;;  %1881 = vmatpush.bf16.msra.mxu2 %v3514_v21 }
 0x260   : > { %1791 = vmatpush.bf16.msrb.mxu0 %v3583_v20 }
 0x261   : > { %1869 = vmatpush.bf16.msra.mxu1 %v3519_v51  ;;  %1882 = vmatpush.bf16.msra.mxu2 %v3534_v28 }
 0x264   : > { %1792 = vmatpush.bf16.msrb.mxu0 %v3601_v12 }
 0x265   : > { %1870 = vmatpush.bf16.msra.mxu1 %v3539_v34  ;;  %1883 = vmatpush.bf16.msra.mxu2 %v3556_v42 }
 0x268   : > { %1793 = vmatpush.bf16.msrb.mxu0 %v3629_v48 }
 0x269   : > { %1871 = vmatpush.bf16.msra.mxu1 %v3561_v46  ;;  %1884 = vmatpush.bf16.msra.mxu2 %v3574_v58 }
 0x26c   : > { %1794 = vmatpush.bf16.msrb.mxu0 %v3645_v63 }
 0x26d   : > { %1872 = vmatpush.bf16.msra.mxu1 %v3579_v62  ;;  %1885 = vmatpush.bf16.msra.mxu2 %v3590_v8 }
 0x270   : > { %1795 = vmatpush.bf16.msrb.mxu0 %v3654_v6 }
 0x271   : > { %1873 = vmatpush.bf16.msra.mxu1 %v3597_v10  ;;  %1886 = vmatpush.bf16.msra.mxu2 %v3606_v23 }
 0x274   : > { %1796 = vmatpush.bf16.msrb.mxu0 %v3664_v17 }
 0x275   : > { %1874 = vmatpush.bf16.msra.mxu1 %v3613_v30  ;;  %1887 = vmatpush.bf16.msra.mxu2 %v3618_v40 }
 0x2d4   : > { %v1566_v29 = vpop.f32.mrf.mxu0  ;;  %v1579_v59 = vpop.f32.mrf.mxu1 }
 0x2d5   : > { %v1567_v36 = vadd.f32 %v1566_v29, %v3732_v15  ;;  %v1580_v60 = vadd.f32 %v1579_v59, %v3734_v22  ;;  %v2821_v29 = vld [vmem:[%s3831_s6 + $0x40] sm:$0xff]  ;;  %s2837_s6 = smul.u32 4294967224, %s3126_s20 }
 0x2d7   : > { %v1596_v1 = vadd.f32 %v2819_v61, %v1567_v36  ;;  %v1616_v57 = vadd.f32 %v2820_v0, %v1580_v60  ;;  %s3951_s29 = scalar_lea.vmem [#allocation3], %s2837_s6  ;;  %s2066_s6 = smul.u32 4294967289, %s3126_s20 }
 0x2d9   : > { %v2822_v52 = vmul.f32 -1.442695, %v1596_v1  ;;  %v2823_v2 = vmul.f32 -1.442695, %v1616_v57  ;;  %v1646_v57 = vstv %s1645_s9  ;;  %s1859_s9 = sadd.s32 5, %s1858_s7 }
 0x2da   : > { %vm1647_vm11 = vcmp.eq.s32.totalorder %v1646_v57, 1  ;;  %p1954_p0 = scmp.lt.s32.totalorder %s1859_s9, 8  ;;  %s2859_s9 = smul.u32 4294967240, %s3126_s20 }
 0x2db   : > { %3036 = vpow2.f32 %v2822_v52  ;;  %v1592_v3 = vpop.f32.mrf.mxu2 }
 0x2dc   : > { %3038 = vpow2.f32 %v2823_v2  ;;  %v1568_v4 = vpop.f32.mrf.mxu0  ;;  %v1581_v27 = vpop.f32.mrf.mxu1  ;;  %v1593_v18 = vadd.f32 %v1592_v3, %v3742_v49  ;;  %s1955_s10 = scalar_select %p1954_p0, 1, 0 }
 0x2e1   : > { %v3037_v9 = vpop.eup %3036 }
 0x2e2   : > { %v3039_v7 = vpop.eup %3038  ;;  %v1600_v14 = vadd.f32 1.0, %v3037_v9 }
 0x2e3   : > { %v1620_v24 = vadd.f32 1.0, %v3039_v7  ;;  %v1594_v56 = vpop.f32.mrf.mxu2 }
 0x2e4   : > { %3040 = vrcp.f32 %v1600_v14  ;;  %v1612_v35 = vand.u32 2147483648, %v1600_v14  ;;  %v1610_v41 = vand.u32 2147483647, %v1600_v14  ;;  %vm1606_vm4 = vweird.f32 %v1600_v14 }
 0x2e5   : > { %3042 = vrcp.f32 %v1620_v24  ;;  %v1632_v54 = vand.u32 2147483648, %v1620_v24  ;;  %vm1626_vm8 = vweird.f32 %v1620_v24  ;;  %v1630_v59 = vand.u32 2147483647, %v1620_v24 }
 0x2e6   : > { %v1613_v44 = vor.u32 1.1754944e-38, %v1612_v35  ;;  %vm1611_vm6 = vcmp.eq.f32.partialorder %v1610_v41, 8.507059e+37 }
 0x2e7   : > { %v1633_v61 = vor.u32 1.1754944e-38, %v1632_v54  ;;  %vm1631_vm10 = vcmp.eq.f32.partialorder %v1630_v59, 8.507059e+37 }
 0x2ea   : > { %v3041_v26 = vpop.eup %3040 }
 0x2eb   : > { %v3043_v19 = vpop.eup %3042  ;;  %v1602_v5 = vmul.f32 %v3041_v26, %v1600_v14  ;;  %vm1607_vm3 = vweird.f32 %v3041_v26 }
 0x2ec   : > { %v1622_v11 = vmul.f32 %v3043_v19, %v1620_v24  ;;  %vm1608_vm5 = vmor %vm1606_vm4, %vm1607_vm3  ;;  %vm1627_vm7 = vweird.f32 %v3043_v19  ;;  %v2827_v24 = vld [vmem:[%s3876_s12 + $0x50] sm:$0xff] }
 0x2ed   : > { %v1603_v33 = vsub.f32 1.0, %v1602_v5  ;;  %vm1628_vm9 = vmor %vm1626_vm8, %vm1627_vm7 }
 0x2ee   : > { %v1623_v37 = vsub.f32 1.0, %v1622_v11  ;;  %v2826_v11 = vld [vmem:[%s3876_s12 + $0x48] sm:$0xff] }
 0x2ef   : > { %v1604_v39 = vmul.f32 %v3041_v26, %v1603_v33 }
 0x2f0   : > { %v1624_v43 = vmul.f32 %v3043_v19, %v1623_v37 }
 0x2f1   : > { %v1605_v25 = vadd.f32 %v3041_v26, %v1604_v39 }
 0x2f2   : > { %v1625_v50 = vadd.f32 %v3043_v19, %v1624_v43 }
 0x2f3   : > { %v1609_v31 = vsel %vm1608_vm5, %v3041_v26, %v1605_v25 }
 0x2f4   : > { %v1614_v38 = vsel %vm1611_vm6, %v1613_v44, %v1609_v31  ;;  %v1629_v60 = vsel %vm1628_vm9, %v3043_v19, %v1625_v50 }
 0x2f5   : > { %v1636_v45 = vmul.f32 %v1614_v38, %v1593_v18  ;;  %v1634_v0 = vsel %vm1631_vm10, %v1633_v61, %v1629_v60 }
 0x2f6   : > { %v1639_v1 = vsub.f32 1.0, %v1634_v0  ;;  %v1641_v3 = vmul.f32 %v1634_v0, %v3799_v55 }
 0x2f7   : > { %v1637_v36 = vadd.f32 %v2821_v29, %v1636_v45 }
 0x2f9   : > { %3044 = vtanh.f32 %v1637_v36 }
 0x2ff   : > { %v3045_v52 = vpop.eup %3044 }
 0x300   : > { %v1640_v2 = vmul.f32 %v3045_v52, %v1639_v1 }
 0x302   : > { %v1642_v4 = vadd.f32 %v1641_v3, %v1640_v2 }
 0x304   : > { %v3844_v27 = vsel %vm1647_vm11, %v1642_v4, %v3799_v55 }
 0x305   : > { %2825 = vst [vmem:[%s2310_s11 + $0x10] sm:$0xff] %v3844_v27  ;;  %v1659_v9 = vpack.c.bf16 %v3844_v27, %v3844_v27  ;;  %s2843_s11 = smul.u32 4294967272, %s3126_s20 }
 0x307   : > { %1668 = vmatmul.bf16.vlgmr.msra.gmra.mxu3 %v1659_v9  ;;  %1681 = vmatmul.bf16.vlgmr.msra.gmra.mxu0 %v1659_v9 }
 0x308   : > { %1694 = vmatmul.bf16.vlgmr.msrb.gmra.mxu1 %v1659_v9  ;;  %1893 = vmatpush.bf16.msra.mxu3 %v3543_v53 }
 0x309   : > { %1971 = vmatpush.bf16.msra.mxu0 %v3493_v32  ;;  %1984 = vmatpush.bf16.msrb.mxu1 %v3500_v13 }
 0x30c   : > { %1894 = vmatpush.bf16.msra.mxu3 %v3565_v47 }
 0x30d   : > { %1972 = vmatpush.bf16.msra.mxu0 %v3504_v16  ;;  %1985 = vmatpush.bf16.msrb.mxu1 %v3514_v21 }
 0x310   : > { %1895 = vmatpush.bf16.msra.mxu3 %v3583_v20 }
 0x311   : > { %1973 = vmatpush.bf16.msra.mxu0 %v3519_v51  ;;  %1986 = vmatpush.bf16.msrb.mxu1 %v3534_v28 }
 0x314   : > { %1896 = vmatpush.bf16.msra.mxu3 %v3601_v12 }
 0x315   : > { %1974 = vmatpush.bf16.msra.mxu0 %v3539_v34  ;;  %1987 = vmatpush.bf16.msrb.mxu1 %v3556_v42 }
 0x318   : > { %1897 = vmatpush.bf16.msra.mxu3 %v3629_v48 }
 0x319   : > { %1975 = vmatpush.bf16.msra.mxu0 %v3561_v46  ;;  %1988 = vmatpush.bf16.msrb.mxu1 %v3574_v58 }
 0x31c   : > { %1898 = vmatpush.bf16.msra.mxu3 %v3645_v63 }
 0x31d   : > { %1976 = vmatpush.bf16.msra.mxu0 %v3579_v62  ;;  %1989 = vmatpush.bf16.msrb.mxu1 %v3590_v8 }
 0x320   : > { %1899 = vmatpush.bf16.msra.mxu3 %v3654_v6 }
 0x321   : > { %1977 = vmatpush.bf16.msra.mxu0 %v3597_v10  ;;  %1990 = vmatpush.bf16.msrb.mxu1 %v3606_v23 }
 0x324   : > { %1900 = vmatpush.bf16.msra.mxu3 %v3664_v17 }
 0x325   : > { %1978 = vmatpush.bf16.msra.mxu0 %v3613_v30  ;;  %1991 = vmatpush.bf16.msrb.mxu1 %v3618_v40 }
 0x384   : > { %v1682_v55 = vpop.f32.mrf.mxu0 }
 0x385   : > { %v1683_v7 = vadd.f32 %v1682_v55, %v3734_v22  ;;  %v1695_v14 = vpop.f32.mrf.mxu1 }
 0x386   : > { %v1696_v57 = vadd.f32 %v1695_v14, %v3742_v49 }
 0x387   : > { %v1719_v56 = vadd.f32 %v2827_v24, %v1683_v7  ;;  %v2828_v7 = vld [vmem:[%s3876_s12 + $0x58] sm:$0xff]  ;;  %s2328_s12 = scalar_lea.vmem %s3755_s14, %s2843_s11 [#allocation4] }
 0x389   : > { %v2830_v26 = vmul.f32 -1.442695, %v1719_v56 }
 0x38a   : > { %v1669_v19 = vpop.f32.mrf.mxu3 }
 0x38b   : > { %3046 = vpow2.f32 %v2830_v26  ;;  %v1670_v5 = vadd.f32 %v1669_v19, %v3732_v15 }
 0x38c   : > { %v1684_v33 = vpop.f32.mrf.mxu0 }
 0x38d   : > { %v1699_v37 = vadd.f32 %v2826_v11, %v1670_v5  ;;  %v1697_v35 = vpop.f32.mrf.mxu1  ;;  %v1749_v5 = vstv %s1748_s18  ;;  %s3971_s18 = scalar_lea.vmem [#allocation3], %s2845_s13  ;;  %s2186_s13 = scalar_lea.vmem (%p3199_p3), %s4036_s5, %s2831_s15 }
 0x38e   : > { %vm1750_vm4 = vcmp.eq.s32.totalorder %v1749_v5, 1 }
 0x38f   : > { %v2829_v39 = vmul.f32 -1.442695, %v1699_v37 }
 0x391   : > { %v3047_v41 = vpop.eup %3046  ;;  %3048 = vpow2.f32 %v2829_v39 }
 0x392   : > { %v1723_v43 = vadd.f32 1.0, %v3047_v41  ;;  %v1671_v25 = vpop.f32.mrf.mxu3 }
 0x394   : > { %3050 = vrcp.f32 %v1723_v43  ;;  %v1735_v4 = vand.u32 2147483648, %v1723_v43  ;;  %vm1729_vm1 = vweird.f32 %v1723_v43  ;;  %v1733_v55 = vand.u32 2147483647, %v1723_v43 }
 0x396   : > { %v1736_v26 = vor.u32 1.1754944e-38, %v1735_v4  ;;  %vm1734_vm3 = vcmp.eq.f32.partialorder %v1733_v55, 8.507059e+37 }
 0x397   : > { %v3049_v44 = vpop.eup %3048 }
 0x398   : > { %v1703_v18 = vadd.f32 1.0, %v3049_v44 }
 0x39a   : > { %3052 = vrcp.f32 %v1703_v18  ;;  %v3051_v31 = vpop.eup %3050  ;;  %v1715_v59 = vand.u32 2147483648, %v1703_v18  ;;  %v1713_v60 = vand.u32 2147483647, %v1703_v18  ;;  %vm1709_vm13 = vweird.f32 %v1703_v18 }
 0x39b   : > { %v1725_v38 = vmul.f32 %v3051_v31, %v1723_v43  ;;  %vm1730_vm0 = vweird.f32 %v3051_v31 }
 0x39c   : > { %v1716_v1 = vor.u32 1.1754944e-38, %v1715_v59  ;;  %vm1714_vm15 = vcmp.eq.f32.partialorder %v1713_v60, 8.507059e+37  ;;  %vm1731_vm2 = vmor %vm1729_vm1, %vm1730_vm0 }
 0x39d   : > { %v1726_v45 = vsub.f32 1.0, %v1725_v38 }
 0x39f   : > { %v1727_v61 = vmul.f32 %v3051_v31, %v1726_v45 }
 0x3a0   : > { %v3053_v50 = vpop.eup %3052 }
 0x3a1   : > { %v1705_v54 = vmul.f32 %v3053_v50, %v1703_v18  ;;  %vm1710_vm12 = vweird.f32 %v3053_v50  ;;  %v1728_v2 = vadd.f32 %v3051_v31, %v1727_v61 }
 0x3a2   : > { %vm1711_vm14 = vmor %vm1709_vm13, %vm1710_vm12 }
 0x3a3   : > { %v1706_v29 = vsub.f32 1.0, %v1705_v54  ;;  %v1732_v56 = vsel %vm1731_vm2, %v3051_v31, %v1728_v2 }
 0x3a4   : > { %v1737_v14 = vsel %vm1734_vm3, %v1736_v26, %v1732_v56  ;;  %v1852_v26 = vstv %s1851_s25 }
 0x3a5   : > { %v1707_v36 = vmul.f32 %v3053_v50, %v1706_v29  ;;  %v1742_v19 = vsub.f32 1.0, %v1737_v14  ;;  %v1744_v37 = vmul.f32 %v1737_v14, %v3844_v27  ;;  %vm1853_vm13 = vcmp.eq.s32.totalorder %v1852_v26, 1  ;;  %v2846_v26 = vld [vmem:[%s3971_s18 + $0x90] sm:$0xff] }
 0x3a7   : > { %v1708_v0 = vadd.f32 %v3053_v50, %v1707_v36 }
 0x3a9   : > { %v1712_v52 = vsel %vm1711_vm14, %v3053_v50, %v1708_v0 }
 0x3aa   : > { %v1717_v3 = vsel %vm1714_vm15, %v1716_v1, %v1712_v52 }
 0x3ab   : > { %v1739_v9 = vmul.f32 %v1717_v3, %v1696_v57  ;;  %v1761_v3 = vld [vmem:[%s3925_s23 + $0x10] sm:$0xff] }
 0x3ad   : > { %v1740_v24 = vadd.f32 %v2828_v7, %v1739_v9 }
 0x3af   : > { %3054 = vtanh.f32 %v1740_v24 }
 0x3b5   : > { %v3055_v11 = vpop.eup %3054 }
 0x3b6   : > { %v1743_v33 = vmul.f32 %v3055_v11, %v1742_v19 }
 0x3b8   : > { %v1745_v35 = vadd.f32 %v1744_v37, %v1743_v33 }
 0x3ba   : > { %v3890_v39 = vsel %vm1750_vm4, %v1745_v35, %v3844_v27 }
 0x3bb   : > { %2832 = vst [vmem:[%s2316_s8 + $0x18] sm:$0xff] %v3890_v39  ;;  %v1762_v41 = vpack.c.bf16 %v3890_v39, %v3890_v39  ;;  %s1962_s8 = smul.u32 4294967291, %s3126_s20 }
 0x3bd   : > { %1771 = vmatmul.bf16.vlgmr.msrb.gmra.mxu2 %v1762_v41  ;;  %1784 = vmatmul.bf16.vlgmr.msrb.gmra.mxu3 %v1762_v41  ;;  %s1963_s16 = sadd.s32 6, %s1962_s8 }
 0x3be   : > { %1797 = vmatmul.bf16.vlgmr.msrb.gmra.mxu0 %v1762_v41  ;;  %1997 = vmatpush.bf16.msrb.mxu2 %v3543_v53  ;;  %v2839_v41 = vld [vmem:[%s3951_s29 + $0x80] sm:$0xff]  ;;  %p2058_p1 = scmp.lt.s32.totalorder %s1963_s16, 8 }
 0x3bf   : > { %2075 = vmatpush.bf16.msrb.mxu3 %v3493_v32  ;;  %2088 = vmatpush.bf16.msrb.mxu0 %v3500_v13 }
 0x3c0   : > { %s2059_s17 = scalar_select %p2058_p1, 1, 0 }
 0x3c2   : > { %1998 = vmatpush.bf16.msrb.mxu2 %v3565_v47 }
 0x3c3   : > { %2076 = vmatpush.bf16.msrb.mxu3 %v3504_v16  ;;  %2089 = vmatpush.bf16.msrb.mxu0 %v3514_v21 }
 0x3c6   : > { %1999 = vmatpush.bf16.msrb.mxu2 %v3583_v20 }
 0x3c7   : > { %2077 = vmatpush.bf16.msrb.mxu3 %v3519_v51  ;;  %2090 = vmatpush.bf16.msrb.mxu0 %v3534_v28  ;;  %v1759_v28 = vld [vmem:[%s3925_s23] sm:$0xff] }
 0x3ca   : > { %2000 = vmatpush.bf16.msrb.mxu2 %v3601_v12 }
 0x3cb   : > { %2078 = vmatpush.bf16.msrb.mxu3 %v3539_v34  ;;  %2091 = vmatpush.bf16.msrb.mxu0 %v3556_v42  ;;  %v1760_v34 = vld [vmem:[%s3925_s23 + $0x8] sm:$0xff]  ;;  %s2851_s23 = smul.u32 4294967256, %s3126_s20 }
 0x3cd   : > { %s2336_s25 = scalar_lea.vmem %s3755_s14, %s2851_s23 [#allocation4] }
 0x3ce   : > { %2001 = vmatpush.bf16.msrb.mxu2 %v3629_v48 }
 0x3cf   : > { %2079 = vmatpush.bf16.msrb.mxu3 %v3561_v46  ;;  %2092 = vmatpush.bf16.msrb.mxu0 %v3574_v58 }
 0x3d2   : > { %2002 = vmatpush.bf16.msrb.mxu2 %v3645_v63 }
 0x3d3   : > { %2080 = vmatpush.bf16.msrb.mxu3 %v3579_v62  ;;  %2093 = vmatpush.bf16.msrb.mxu0 %v3590_v8 }
 0x3d6   : > { %2003 = vmatpush.bf16.msrb.mxu2 %v3654_v6 }
 0x3d7   : > { %2081 = vmatpush.bf16.msrb.mxu3 %v3597_v10  ;;  %2094 = vmatpush.bf16.msrb.mxu0 %v3606_v23 }
 0x3da   : > { %2004 = vmatpush.bf16.msrb.mxu2 %v3664_v17 }
 0x3db   : > { %2082 = vmatpush.bf16.msrb.mxu3 %v3613_v30  ;;  %2095 = vmatpush.bf16.msrb.mxu0 %v3618_v40 }
 0x43b   : > { %v1798_v32 = vpop.f32.mrf.mxu0 }
 0x43c   : > { %v1799_v61 = vadd.f32 %v1798_v32, %v3742_v49 }
 0x440   : > { %v1772_v13 = vpop.f32.mrf.mxu2  ;;  %v1785_v16 = vpop.f32.mrf.mxu3 }
 0x441   : > { %v1773_v21 = vadd.f32 %v1772_v13, %v3732_v15  ;;  %v1786_v51 = vadd.f32 %v1785_v16, %v3734_v22 }
 0x443   : > { %v1802_v42 = vadd.f32 %v1773_v21, %v1759_v28  ;;  %v1822_v46 = vadd.f32 %v1786_v51, %v1760_v34  ;;  %v1800_v58 = vpop.f32.mrf.mxu0 }
 0x445   : > { %v2834_v62 = vmul.f32 -1.442695, %v1802_v42  ;;  %v2835_v8 = vmul.f32 -1.442695, %v1822_v46 }
 0x447   : > { %3056 = vpow2.f32 %v2834_v62 }
 0x448   : > { %3058 = vpow2.f32 %v2835_v8  ;;  %v1774_v10 = vpop.f32.mrf.mxu2  ;;  %v1787_v23 = vpop.f32.mrf.mxu3 }
 0x44d   : > { %v3057_v30 = vpop.eup %3056 }
 0x44e   : > { %v3059_v40 = vpop.eup %3058  ;;  %v1806_v27 = vadd.f32 1.0, %v3057_v30 }
 0x44f   : > { %v1826_v43 = vadd.f32 1.0, %v3059_v40 }
 0x450   : > { %3060 = vrcp.f32 %v1806_v27  ;;  %v1818_v50 = vand.u32 2147483648, %v1806_v27  ;;  %v1816_v29 = vand.u32 2147483647, %v1806_v27  ;;  %vm1812_vm6 = vweird.f32 %v1806_v27 }
 0x451   : > { %3062 = vrcp.f32 %v1826_v43  ;;  %v1838_v2 = vand.u32 2147483648, %v1826_v43  ;;  %vm1832_vm10 = vweird.f32 %v1826_v43  ;;  %v1836_v4 = vand.u32 2147483647, %v1826_v43 }
 0x452   : > { %v1819_v60 = vor.u32 1.1754944e-38, %v1818_v50  ;;  %vm1817_vm8 = vcmp.eq.f32.partialorder %v1816_v29, 8.507059e+37 }
 0x453   : > { %v1839_v7 = vor.u32 1.1754944e-38, %v1838_v2  ;;  %vm1837_vm12 = vcmp.eq.f32.partialorder %v1836_v4, 8.507059e+37 }
 0x456   : > { %v3061_v25 = vpop.eup %3060 }
 0x457   : > { %v3063_v44 = vpop.eup %3062  ;;  %v1808_v18 = vmul.f32 %v3061_v25, %v1806_v27  ;;  %vm1813_vm5 = vweird.f32 %v3061_v25 }
 0x458   : > { %v1828_v31 = vmul.f32 %v3063_v44, %v1826_v43  ;;  %vm1814_vm7 = vmor %vm1812_vm6, %vm1813_vm5  ;;  %vm1833_vm9 = vweird.f32 %v3063_v44 }
 0x459   : > { %v1809_v38 = vsub.f32 1.0, %v1808_v18  ;;  %vm1834_vm11 = vmor %vm1832_vm10, %vm1833_vm9 }
 0x45a   : > { %v1829_v54 = vsub.f32 1.0, %v1828_v31 }
 0x45b   : > { %v1810_v45 = vmul.f32 %v3061_v25, %v1809_v38 }
 0x45c   : > { %v1830_v59 = vmul.f32 %v3063_v44, %v1829_v54  ;;  %v2840_v54 = vld [vmem:[%s3951_s29 + $0x88] sm:$0xff] }
 0x45d   : > { %v1811_v36 = vadd.f32 %v3061_v25, %v1810_v45 }
 0x45e   : > { %v1831_v57 = vadd.f32 %v3063_v44, %v1830_v59 }
 0x45f   : > { %v1815_v0 = vsel %vm1814_vm7, %v3061_v25, %v1811_v36 }
 0x460   : > { %v1820_v1 = vsel %vm1817_vm8, %v1819_v60, %v1815_v0  ;;  %v1835_v55 = vsel %vm1834_vm11, %v3063_v44, %v1831_v57 }
 0x461   : > { %v1842_v52 = vmul.f32 %v1820_v1, %v1799_v61  ;;  %v1840_v24 = vsel %vm1837_vm12, %v1839_v7, %v1835_v55  ;;  %v1956_v1 = vstv %s1955_s10  ;;  %s2344_s10 = scalar_lea.vmem %s3755_s14, %s2859_s9 [#allocation4] }
 0x462   : > { %v1845_v56 = vsub.f32 1.0, %v1840_v24  ;;  %v1847_v19 = vmul.f32 %v1840_v24, %v3890_v39  ;;  %vm1957_vm6 = vcmp.eq.s32.totalorder %v1956_v1, 1 }
 0x463   : > { %v1843_v9 = vadd.f32 %v1842_v52, %v1761_v3 }
 0x465   : > { %3064 = vtanh.f32 %v1843_v9 }
 0x46b   : > { %v3065_v14 = vpop.eup %3064 }
 0x46c   : > { %v1846_v5 = vmul.f32 %v3065_v14, %v1845_v56  ;;  %v2847_v14 = vld [vmem:[%s3971_s18 + $0x98] sm:$0xff] }
 0x46e   : > { %v1848_v11 = vadd.f32 %v1847_v19, %v1846_v5 }
 0x470   : > { %v3936_v33 = vsel %vm1853_vm13, %v1848_v11, %v3890_v39 }
 0x471   : > { %1857 = vst [vmem:[%s1856_s30] sm:$0xff] %v3936_v33  ;;  %v1866_v37 = vpack.c.bf16 %v3936_v33, %v3936_v33  ;;  %s3989_s30 = scalar_lea.vmem [#allocation3], %s2853_s27 }
 0x473   : > { %1875 = vmatmul.bf16.vlgmr.msra.gmra.mxu1 %v1866_v37  ;;  %1888 = vmatmul.bf16.vlgmr.msra.gmra.mxu2 %v1866_v37 }
 0x474   : > { %1901 = vmatmul.bf16.vlgmr.msra.gmra.mxu3 %v1866_v37  ;;  %2101 = vmatpush.bf16.msra.mxu1 %v3543_v53  ;;  %v2838_v53 = vld [vmem:[%s3951_s29 + $0x78] sm:$0xff]  ;;  %s2067_s29 = sadd.s32 7, %s2066_s6 }
 0x475   : > { %p2162_p2 = scmp.lt.s32.totalorder %s2067_s29, 8 }
 0x477   : > { %s2163_s7 = scalar_select %p2162_p2, 1, 0 }
 0x478   : > { %2102 = vmatpush.bf16.msra.mxu1 %v3565_v47 }
 0x47c   : > { %2103 = vmatpush.bf16.msra.mxu1 %v3583_v20 }
 0x480   : > { %2104 = vmatpush.bf16.msra.mxu1 %v3601_v12 }
 0x484   : > { %2105 = vmatpush.bf16.msra.mxu1 %v3629_v48 }
 0x488   : > { %2106 = vmatpush.bf16.msra.mxu1 %v3645_v63 }
 0x48c   : > { %2107 = vmatpush.bf16.msra.mxu1 %v3654_v6 }
 0x490   : > { %2108 = vmatpush.bf16.msra.mxu1 %v3664_v17 }
 0x4f0   : > { %v1876_v35 = vpop.f32.mrf.mxu1 }
 0x4f1   : > { %v1877_v39 = vadd.f32 %v1876_v35, %v3732_v15 }
 0x4f3   : > { %v1906_v47 = vadd.f32 %v2838_v53, %v1877_v39 }
 0x4f5   : > { %v2841_v20 = vmul.f32 -1.442695, %v1906_v47 }
 0x4f6   : > { %v1889_v12 = vpop.f32.mrf.mxu2 }
 0x4f7   : > { %3066 = vpow2.f32 %v2841_v20  ;;  %v1890_v48 = vadd.f32 %v1889_v12, %v3734_v22  ;;  %v1902_v63 = vpop.f32.mrf.mxu3 }
 0x4f8   : > { %v1878_v6 = vpop.f32.mrf.mxu1  ;;  %v1903_v25 = vadd.f32 %v1902_v63, %v3742_v49 }
 0x4f9   : > { %v1926_v32 = vadd.f32 %v2839_v41, %v1890_v48 }
 0x4fb   : > { %v2842_v17 = vmul.f32 -1.442695, %v1926_v32 }
 0x4fd   : > { %v3067_v13 = vpop.eup %3066  ;;  %3068 = vpow2.f32 %v2842_v17 }
 0x4fe   : > { %v1910_v16 = vadd.f32 1.0, %v3067_v13  ;;  %v1891_v21 = vpop.f32.mrf.mxu2 }
 0x4ff   : > { %v1904_v51 = vpop.f32.mrf.mxu3 }
 0x500   : > { %3070 = vrcp.f32 %v1910_v16  ;;  %v1922_v62 = vand.u32 2147483648, %v1910_v16  ;;  %v1920_v10 = vand.u32 2147483647, %v1910_v16  ;;  %vm1916_vm15 = vweird.f32 %v1910_v16 }
 0x502   : > { %v1923_v27 = vor.u32 1.1754944e-38, %v1922_v62  ;;  %vm1921_vm1 = vcmp.eq.f32.partialorder %v1920_v10, 8.507059e+37 }
 0x503   : > { %v3069_v28 = vpop.eup %3068 }
 0x504   : > { %v1930_v34 = vadd.f32 1.0, %v3069_v28 }
 0x506   : > { %v3071_v42 = vpop.eup %3070  ;;  %3072 = vrcp.f32 %v1930_v34  ;;  %v1942_v38 = vand.u32 2147483648, %v1930_v34  ;;  %v1940_v45 = vand.u32 2147483647, %v1930_v34  ;;  %vm1936_vm3 = vweird.f32 %v1930_v34 }
 0x507   : > { %v1912_v46 = vmul.f32 %v3071_v42, %v1910_v16  ;;  %vm1917_vm14 = vweird.f32 %v3071_v42 }
 0x508   : > { %vm1918_vm0 = vmor %vm1916_vm15, %vm1917_vm14  ;;  %v1943_v36 = vor.u32 1.1754944e-38, %v1942_v38  ;;  %vm1941_vm5 = vcmp.eq.f32.partialorder %v1940_v45, 8.507059e+37 }
 0x509   : > { %v1913_v58 = vsub.f32 1.0, %v1912_v46 }
 0x50b   : > { %v1914_v8 = vmul.f32 %v3071_v42, %v1913_v58 }
 0x50c   : > { %v3073_v23 = vpop.eup %3072 }
 0x50d   : > { %v1932_v30 = vmul.f32 %v3073_v23, %v1930_v34  ;;  %v1915_v40 = vadd.f32 %v3071_v42, %v1914_v8  ;;  %vm1937_vm2 = vweird.f32 %v3073_v23 }
 0x50e   : > { %vm1938_vm4 = vmor %vm1936_vm3, %vm1937_vm2 }
 0x50f   : > { %v1933_v43 = vsub.f32 1.0, %v1932_v30  ;;  %v1919_v44 = vsel %vm1918_vm0, %v3071_v42, %v1915_v40  ;;  %v2848_v30 = vld [vmem:[%s3971_s18 + $0xa0] sm:$0xff] }
 0x510   : > { %v1924_v18 = vsel %vm1921_vm1, %v1923_v27, %v1919_v44 }
 0x511   : > { %v1934_v31 = vmul.f32 %v3073_v23, %v1933_v43  ;;  %v1946_v50 = vmul.f32 %v1924_v18, %v1903_v25 }
 0x513   : > { %v1935_v29 = vadd.f32 %v3073_v23, %v1934_v31  ;;  %v1947_v59 = vadd.f32 %v2840_v54, %v1946_v50  ;;  %v2060_v31 = vstv %s2059_s17 }
 0x514   : > { %vm2061_vm15 = vcmp.eq.s32.totalorder %v2060_v31, 1 }
 0x515   : > { %v1939_v60 = vsel %vm1938_vm4, %v3073_v23, %v1935_v29  ;;  %3074 = vtanh.f32 %v1947_v59 }
 0x516   : > { %v1944_v61 = vsel %vm1941_vm5, %v1943_v36, %v1939_v60 }
 0x517   : > { %v1949_v0 = vsub.f32 1.0, %v1944_v61  ;;  %v1951_v2 = vmul.f32 %v1944_v61, %v3936_v33 }
 0x51b   : > { %v3075_v57 = vpop.eup %3074 }
 0x51c   : > { %v1950_v52 = vmul.f32 %v3075_v57, %v1949_v0  ;;  %v2855_v0 = vld [vmem:[%s3989_s30 + $0xb0] sm:$0xff] }
 0x51e   : > { %v1952_v3 = vadd.f32 %v1951_v2, %v1950_v52 }
 0x520   : > { %v3963_v4 = vsel %vm1957_vm6, %v1952_v3, %v3936_v33  ;;  %v2854_v3 = vld [vmem:[%s3989_s30 + $0xa8] sm:$0xff] }
 0x521   : > { %2844 = vst [vmem:[%s2328_s12 + $0x28] sm:$0xff] %v3963_v4  ;;  %v1970_v9 = vpack.c.bf16 %v3963_v4, %v3963_v4 }
 0x523   : > { %1979 = vmatmul.bf16.vlgmr.msra.gmra.mxu0 %v1970_v9  ;;  %1992 = vmatmul.bf16.vlgmr.msrb.gmra.mxu1 %v1970_v9 }
 0x524   : > { %2005 = vmatmul.bf16.vlgmr.msrb.gmra.mxu2 %v1970_v9 }
 0x5a0   : > { %v1980_v55 = vpop.f32.mrf.mxu0  ;;  %v1993_v7 = vpop.f32.mrf.mxu1 }
 0x5a1   : > { %v1981_v24 = vadd.f32 %v1980_v55, %v3732_v15  ;;  %v1994_v56 = vadd.f32 %v1993_v7, %v3734_v22 }
 0x5a3   : > { %v2010_v19 = vadd.f32 %v2846_v26, %v1981_v24  ;;  %v2030_v5 = vadd.f32 %v2847_v14, %v1994_v56 }
 0x5a5   : > { %v2849_v11 = vmul.f32 -1.442695, %v2010_v19  ;;  %v2850_v33 = vmul.f32 -1.442695, %v2030_v5 }
 0x5a7   : > { %3076 = vpow2.f32 %v2849_v11  ;;  %v2006_v37 = vpop.f32.mrf.mxu2 }
 0x5a8   : > { %3078 = vpow2.f32 %v2850_v33  ;;  %v1982_v35 = vpop.f32.mrf.mxu0  ;;  %v1995_v39 = vpop.f32.mrf.mxu1  ;;  %v2007_v46 = vadd.f32 %v2006_v37, %v3742_v49 }
 0x5ad   : > { %v3077_v53 = vpop.eup %3076 }
 0x5ae   : > { %v3079_v47 = vpop.eup %3078  ;;  %v2014_v20 = vadd.f32 1.0, %v3077_v53 }
 0x5af   : > { %v2034_v12 = vadd.f32 1.0, %v3079_v47  ;;  %v2008_v48 = vpop.f32.mrf.mxu2 }
 0x5b0   : > { %3080 = vrcp.f32 %v2014_v20  ;;  %v2026_v16 = vand.u32 2147483648, %v2014_v20  ;;  %v2024_v51 = vand.u32 2147483647, %v2014_v20  ;;  %vm2020_vm8 = vweird.f32 %v2014_v20 }
 0x5b1   : > { %3082 = vrcp.f32 %v2034_v12  ;;  %v2046_v10 = vand.u32 2147483648, %v2034_v12  ;;  %vm2040_vm12 = vweird.f32 %v2034_v12  ;;  %v2044_v40 = vand.u32 2147483647, %v2034_v12 }
 0x5b2   : > { %v2027_v42 = vor.u32 1.1754944e-38, %v2026_v16  ;;  %vm2025_vm10 = vcmp.eq.f32.partialorder %v2024_v51, 8.507059e+37  ;;  %v2856_v16 = vld [vmem:[%s3989_s30 + $0xb8] sm:$0xff] }
 0x5b3   : > { %v2047_v25 = vor.u32 1.1754944e-38, %v2046_v10  ;;  %vm2045_vm14 = vcmp.eq.f32.partialorder %v2044_v40, 8.507059e+37 }
 0x5b6   : > { %v3081_v63 = vpop.eup %3080 }
 0x5b7   : > { %v3083_v41 = vpop.eup %3082  ;;  %v2016_v6 = vmul.f32 %v3081_v63, %v2014_v20  ;;  %vm2021_vm7 = vweird.f32 %v3081_v63 }
 0x5b8   : > { %v2036_v32 = vmul.f32 %v3083_v41, %v2034_v12  ;;  %vm2022_vm9 = vmor %vm2020_vm8, %vm2021_vm7  ;;  %vm2041_vm11 = vweird.f32 %v3083_v41 }
 0x5b9   : > { %v2017_v17 = vsub.f32 1.0, %v2016_v6  ;;  %vm2042_vm13 = vmor %vm2040_vm12, %vm2041_vm11 }
 0x5ba   : > { %v2037_v13 = vsub.f32 1.0, %v2036_v32 }
 0x5bb   : > { %v2018_v21 = vmul.f32 %v3081_v63, %v2017_v17 }
 0x5bc   : > { %v2038_v28 = vmul.f32 %v3083_v41, %v2037_v13 }
 0x5bd   : > { %v2019_v34 = vadd.f32 %v3081_v63, %v2018_v21 }
 0x5be   : > { %v2039_v8 = vadd.f32 %v3083_v41, %v2038_v28 }
 0x5bf   : > { %v2023_v58 = vsel %vm2022_vm9, %v3081_v63, %v2019_v34 }
 0x5c0   : > { %v2028_v62 = vsel %vm2025_vm10, %v2027_v42, %v2023_v58  ;;  %v2043_v43 = vsel %vm2042_vm13, %v3083_v41, %v2039_v8  ;;  %v2164_v42 = vstv %s2163_s7 }
 0x5c1   : > { %v2050_v23 = vmul.f32 %v2028_v62, %v2007_v46  ;;  %v2048_v44 = vsel %vm2045_vm14, %v2047_v25, %v2043_v43  ;;  %vm2165_vm8 = vcmp.eq.s32.totalorder %v2164_v42, 1 }
 0x5c2   : > { %v2053_v18 = vsub.f32 1.0, %v2048_v44  ;;  %v2055_v54 = vmul.f32 %v2048_v44, %v3963_v4 }
 0x5c3   : > { %v2051_v27 = vadd.f32 %v2848_v30, %v2050_v23 }
 0x5c5   : > { %3084 = vtanh.f32 %v2051_v27 }
 0x5cb   : > { %v3085_v38 = vpop.eup %3084 }
 0x5cc   : > { %v2054_v50 = vmul.f32 %v3085_v38, %v2053_v18 }
 0x5ce   : > { %v2056_v45 = vadd.f32 %v2055_v54, %v2054_v50 }
 0x5d0   : > { %v3982_v29 = vsel %vm2061_vm15, %v2056_v45, %v3963_v4 }
 0x5d1   : > { %2852 = vst [vmem:[%s2336_s25 + $0x30] sm:$0xff] %v3982_v29  ;;  %v2074_v59 = vpack.c.bf16 %v3982_v29, %v3982_v29 }
 0x5d3   : > { %2083 = vmatmul.bf16.vlgmr.msrb.gmra.mxu3 %v2074_v59  ;;  %2096 = vmatmul.bf16.vlgmr.msrb.gmra.mxu0 %v2074_v59 }
 0x5d4   : > { %2109 = vmatmul.bf16.vlgmr.msra.gmra.mxu1 %v2074_v59 }
 0x650   : > { %v2097_v36 = vpop.f32.mrf.mxu0 }
 0x651   : > { %v2098_v60 = vadd.f32 %v2097_v36, %v3734_v22  ;;  %v2110_v61 = vpop.f32.mrf.mxu1 }
 0x652   : > { %v2111_v48 = vadd.f32 %v2110_v61, %v3742_v49 }
 0x653   : > { %v2134_v1 = vadd.f32 %v2855_v0, %v2098_v60 }
 0x655   : > { %v2858_v57 = vmul.f32 -1.442695, %v2134_v1 }
 0x656   : > { %v2084_v52 = vpop.f32.mrf.mxu3 }
 0x657   : > { %3086 = vpow2.f32 %v2858_v57  ;;  %v2085_v2 = vadd.f32 %v2084_v52, %v3732_v15 }
 0x658   : > { %v2099_v4 = vpop.f32.mrf.mxu0 }
 0x659   : > { %v2114_v9 = vadd.f32 %v2854_v3, %v2085_v2  ;;  %v2112_v55 = vpop.f32.mrf.mxu1 }
 0x65b   : > { %v2857_v7 = vmul.f32 -1.442695, %v2114_v9 }
 0x65d   : > { %v3087_v24 = vpop.eup %3086  ;;  %3088 = vpow2.f32 %v2857_v7 }
 0x65e   : > { %v2138_v22 = vadd.f32 1.0, %v3087_v24  ;;  %v2086_v56 = vpop.f32.mrf.mxu3 }
 0x660   : > { %3090 = vrcp.f32 %v2138_v22  ;;  %v2150_v32 = vand.u32 2147483648, %v2138_v22  ;;  %vm2144_vm5 = vweird.f32 %v2138_v22  ;;  %v2148_v13 = vand.u32 2147483647, %v2138_v22 }
 0x662   : > { %v2151_v28 = vor.u32 1.1754944e-38, %v2150_v32  ;;  %vm2149_vm7 = vcmp.eq.f32.partialorder %v2148_v13, 8.507059e+37 }
 0x663   : > { %v3089_v26 = vpop.eup %3088 }
 0x664   : > { %v2118_v14 = vadd.f32 1.0, %v3089_v26 }
 0x666   : > { %3092 = vrcp.f32 %v2118_v14  ;;  %v3091_v19 = vpop.eup %3090  ;;  %v2130_v35 = vand.u32 2147483648, %v2118_v14  ;;  %v2128_v53 = vand.u32 2147483647, %v2118_v14  ;;  %vm2124_vm1 = vweird.f32 %v2118_v14 }
 0x667   : > { %v2140_v5 = vmul.f32 %v3091_v19, %v2138_v22  ;;  %vm2145_vm4 = vweird.f32 %v3091_v19 }
 0x668   : > { %v2131_v12 = vor.u32 1.1754944e-38, %v2130_v35  ;;  %vm2129_vm3 = vcmp.eq.f32.partialorder %v2128_v53, 8.507059e+37  ;;  %vm2146_vm6 = vmor %vm2144_vm5, %vm2145_vm4 }
 0x669   : > { %v2141_v37 = vsub.f32 1.0, %v2140_v5 }
 0x66b   : > { %v2142_v47 = vmul.f32 %v3091_v19, %v2141_v37 }
 0x66c   : > { %v3093_v11 = vpop.eup %3092 }
 0x66d   : > { %v2120_v33 = vmul.f32 %v3093_v11, %v2118_v14  ;;  %vm2125_vm0 = vweird.f32 %v3093_v11  ;;  %v2143_v41 = vadd.f32 %v3091_v19, %v2142_v47 }
 0x66e   : > { %vm2126_vm2 = vmor %vm2124_vm1, %vm2125_vm0 }
 0x66f   : > { %v2121_v15 = vsub.f32 1.0, %v2120_v33  ;;  %v2147_v51 = vsel %vm2146_vm6, %v3091_v19, %v2143_v41 }
 0x670   : > { %v2152_v49 = vsel %vm2149_vm7, %v2151_v28, %v2147_v51 }
 0x671   : > { %v2122_v39 = vmul.f32 %v3093_v11, %v2121_v15  ;;  %v2157_v34 = vsub.f32 1.0, %v2152_v49  ;;  %v2159_v58 = vmul.f32 %v2152_v49, %v3982_v29 }
 0x673   : > { %v2123_v20 = vadd.f32 %v3093_v11, %v2122_v39 }
 0x675   : > { %v2127_v63 = vsel %vm2126_vm2, %v3093_v11, %v2123_v20 }
 0x676   : > { %v2132_v6 = vsel %vm2129_vm3, %v2131_v12, %v2127_v63 }
 0x677   : > { %v2154_v17 = vmul.f32 %v2132_v6, %v2111_v48 }
 0x679   : > { %v2155_v21 = vadd.f32 %v2856_v16, %v2154_v17 }
 0x67b   : > { %3094 = vtanh.f32 %v2155_v21 }
 0x681   : > { %v3095_v46 = vpop.eup %3094 }
 0x682   : > { %v2158_v62 = vmul.f32 %v3095_v46, %v2157_v34 }
 0x683   : > { %2177 = sbr.rel (!%p3199_p3) target bundleno = 1687 (0x697), region = 48 }
 0x684   : > { %v2160_v8 = vadd.f32 %v2159_v58, %v2158_v62 }
 0x686   : > { %v2166_v10 = vsel %vm2165_vm8, %v2160_v8, %v3982_v29 }
 0x687   : > { %2860 = vst [vmem:[%s2344_s10 + $0x38] sm:$0xff] %v2166_v10 }
 0x68e   : > { %v2229_v23 = vld [vmem:[%s3755_s14] sm:$0xff]  ;;  %v2231_v30 = vld [vmem:[%s3755_s14 + $0x8] sm:$0xff]  ;;  %v2233_v40 = vld [vmem:[%s3755_s14 + $0x10] sm:$0xff] }
 0x68f   : > { %2230 = vst [vmem:[%s2186_s13] sm:$0xff] %v2229_v23  ;;  %v2235_v27 = vld [vmem:[%s3755_s14 + $0x18] sm:$0xff]  ;;  %v2237_v43 = vld [vmem:[%s3755_s14 + $0x20] sm:$0xff]  ;;  %v2239_v25 = vld [vmem:[%s3755_s14 + $0x28] sm:$0xff] }
 0x690   : > { %2232 = vst [vmem:[%s2186_s13 + $0x10] sm:$0xff] %v2231_v30  ;;  %v2241_v44 = vld [vmem:[%s3755_s14 + $0x30] sm:$0xff]  ;;  %v2243_v18 = vld [vmem:[%s3755_s14 + $0x38] sm:$0xff] }
 0x691   : > { %2234 = vst [vmem:[%s2186_s13 + $0x20] sm:$0xff] %v2233_v40 }
 0x692   : > { %2236 = vst [vmem:[%s2186_s13 + $0x30] sm:$0xff] %v2235_v27 }
 0x693   : > { %2238 = vst [vmem:[%s2186_s13 + $0x40] sm:$0xff] %v2237_v43 }
 0x694   : > { %2240 = vst [vmem:[%s2186_s13 + $0x50] sm:$0xff] %v2239_v25 }
 0x695   : > { %2242 = vst [vmem:[%s2186_s13 + $0x60] sm:$0xff] %v2241_v44 }
 0x696   : > { %2244 = vst [vmem:[%s2186_s13 + $0x70] sm:$0xff] %v2243_v18 }
 0x697 PF: > { %s15_s22 = sadd.s32 1, %s3134_s22   ;;  %s4039_s18 = smov %s3122_s19 }
 0x698   : > { %p12_p3 = scmp.ge.s32.totalorder %s15_s22, 4   ;;  %s4040_s19 = smov %s3208_s28 }
 0x699   : > { %s4041_s20 = smov %s3130_s21  ;;  %s4042_s21 = smov %s4044_s24 }
 0x69a   :  { %14 = sbr.rel (!%p12_p3) target bundleno = 3 (0x3), region = 140 }

// kernel: capsule_main.3
= control target key start
LH: loop header
LB: loop body
LE: loop exit
PB: predicated region body
PF: predicated region fallthrough
CT: control target
= control target key end

     0   :  { %vm400_vm0 = vcmask 80896   ;;  %v4474_v0 = vmov 0.0   ;;  %vm6661_vm1 = vcmask 1041408   ;;  %vm533_vm7 = vcmask 261120   ;;  %s6625_s1 = inlined_call_operand.vmem [shape: bf16[256,160], index: 1, kind: input, shape index: {}]   ;;  %s6626_s0 = inlined_call_operand.vmem [shape: f32[8,8,256], index: 0, kind: input, shape index: {}]   ;;  %s6627_s2 = inlined_call_operand.vmem [shape: f32[10,160], index: 2, kind: input, shape index: {}]   ;;  %s6628_s3 = inlined_call_operand.vmem [shape: f32[160,10], index: 3, kind: input, shape index: {}]   ;;  %s6629_s4 = inlined_call_operand.vmem [shape: f32[160,2], index: 4, kind: input, shape index: {}]   ;;  %s6630_s5 = inlined_call_operand.vmem [shape: f32[1,2], index: 5, kind: input, shape index: {}]   ;;  %s6631_s6 = inlined_call_operand.vmem [shape: f32[8,2], index: 6, kind: output, shape index: {}]  }
   0x1   :  { %v401_v1 = vsel %vm400_vm0, 1.0, %v4474_v0  ;;  %v4007_v2 = vld [vmem:[%s6625_s1 + $0x70] sm:$0xf]  ;;  %v4241_v3 = vld [vmem:[%s6625_s1 + $0x74] sm:$0xf0]  ;;  %v23_v55 = vld [vmem:[%s6626_s0] sm:$0xff] }
   0x2   :  { %402 = vadd.xlane.f32.xlu0 %v401_v1  ;;  %v4008_v4 = vor.u32 %v4241_v3, %v4007_v2  ;;  %v4071_v5 = vld [vmem:[%s6625_s1 + $0xf0] sm:$0xf]  ;;  %v4257_v6 = vld [vmem:[%s6625_s1 + $0xf4] sm:$0xf0]  ;;  %v3999_v7 = vld [vmem:[%s6625_s1 + $0x60] sm:$0xf] }
   0x3   :  { %v4072_v8 = vor.u32 %v4257_v6, %v4071_v5  ;;  %v4239_v9 = vld [vmem:[%s6625_s1 + $0x64] sm:$0xf0]  ;;  %v4063_v10 = vld [vmem:[%s6625_s1 + $0xe0] sm:$0xf]  ;;  %v3991_v14 = vld [vmem:[%s6625_s1 + $0x50] sm:$0xf] }
   0x4   :  { %v4255_v11 = vld [vmem:[%s6625_s1 + $0xe4] sm:$0xf0]  ;;  %239 = vmatpush.bf16.msra.mxu0 %v4008_v4  ;;  %v4000_v12 = vor.u32 %v4239_v9, %v3999_v7  ;;  %v4237_v15 = vld [vmem:[%s6625_s1 + $0x54] sm:$0xf0]  ;;  %v4055_v16 = vld [vmem:[%s6625_s1 + $0xd0] sm:$0xf] }
   0x5   :  { %268 = vmatpush.bf16.msra.mxu1 %v4072_v8  ;;  %v4064_v13 = vor.u32 %v4255_v11, %v4063_v10  ;;  %v4253_v17 = vld [vmem:[%s6625_s1 + $0xd4] sm:$0xf0]  ;;  %v3992_v18 = vor.u32 %v4237_v15, %v3991_v14  ;;  %v3983_v20 = vld [vmem:[%s6625_s1 + $0x40] sm:$0xf]  ;;  %v4235_v21 = vld [vmem:[%s6625_s1 + $0x44] sm:$0xf0] }
   0x6   :  { %v4056_v19 = vor.u32 %v4253_v17, %v4055_v16  ;;  %v4047_v22 = vld [vmem:[%s6625_s1 + $0xc0] sm:$0xf]  ;;  %v4251_v23 = vld [vmem:[%s6625_s1 + $0xc4] sm:$0xf0]  ;;  %v3984_v24 = vor.u32 %v4235_v21, %v3983_v20  ;;  %v3975_v26 = vld [vmem:[%s6625_s1 + $0x30] sm:$0xf] }
   0x7   :  { %v4048_v25 = vor.u32 %v4251_v23, %v4047_v22  ;;  %v4233_v27 = vld [vmem:[%s6625_s1 + $0x34] sm:$0xf0]  ;;  %v4039_v28 = vld [vmem:[%s6625_s1 + $0xb0] sm:$0xf]  ;;  %v3967_v32 = vld [vmem:[%s6625_s1 + $0x20] sm:$0xf] }
   0x8   :  { %240 = vmatpush.bf16.msra.mxu0 %v4000_v12  ;;  %v4249_v29 = vld [vmem:[%s6625_s1 + $0xb4] sm:$0xf0]  ;;  %v3976_v30 = vor.u32 %v4233_v27, %v3975_v26  ;;  %v4231_v33 = vld [vmem:[%s6625_s1 + $0x24] sm:$0xf0]  ;;  %v4031_v34 = vld [vmem:[%s6625_s1 + $0xa0] sm:$0xf] }
   0x9   :  { %269 = vmatpush.bf16.msra.mxu1 %v4064_v13  ;;  %v4040_v31 = vor.u32 %v4249_v29, %v4039_v28  ;;  %v4247_v35 = vld [vmem:[%s6625_s1 + $0xa4] sm:$0xf0]  ;;  %v3968_v36 = vor.u32 %v4231_v33, %v3967_v32  ;;  %v4240_v37 = vld [vmem:[%s6625_s1 + $0x74] sm:$0xf]  ;;  %v4009_v38 = vld [vmem:[%s6625_s1 + $0x78] sm:$0xf0] }
   0xa   :  { %v4256_v39 = vld [vmem:[%s6625_s1 + $0xf4] sm:$0xf]  ;;  %v4032_v40 = vor.u32 %v4247_v35, %v4031_v34  ;;  %v3959_v41 = vld [vmem:[%s6625_s1 + $0x10] sm:$0xf]  ;;  %v4229_v42 = vld [vmem:[%s6625_s1 + $0x14] sm:$0xf0]  ;;  %v4012_v43 = vor.u32 %v4240_v37, %v4009_v38 }
   0xb   :  { %v4073_v44 = vld [vmem:[%s6625_s1 + $0xf8] sm:$0xf0]  ;;  %v4023_v45 = vld [vmem:[%s6625_s1 + $0x90] sm:$0xf]  ;;  %v4245_v46 = vld [vmem:[%s6625_s1 + $0x94] sm:$0xf0]  ;;  %v3960_v48 = vor.u32 %v4229_v42, %v3959_v41 }
   0xc   :  { %241 = vmatpush.bf16.msra.mxu0 %v3992_v18  ;;  %v4076_v47 = vor.u32 %v4256_v39, %v4073_v44  ;;  %297 = vmatpush.bf16.msra.mxu2 %v4012_v43  ;;  %v4024_v49 = vor.u32 %v4245_v46, %v4023_v45  ;;  %v3951_v50 = vld [vmem:[%s6625_s1] sm:$0xf]  ;;  %v4227_v51 = vld [vmem:[%s6625_s1 + $0x4] sm:$0xf0]  ;;  %v25_v56 = vld [vmem:[%s6626_s0 + $0x10] sm:$0xff]  ;;  %vm664_vm8 = vcmask 1041409  }
   0xd   :  { %270 = vmatpush.bf16.msra.mxu1 %v4056_v19  ;;  %v4015_v52 = vld [vmem:[%s6625_s1 + $0x80] sm:$0xf]  ;;  %v4243_v53 = vld [vmem:[%s6625_s1 + $0x84] sm:$0xf0]  ;;  %v3952_v54 = vor.u32 %v4227_v51, %v3951_v50  ;;  %v26_v59 = vld [vmem:[%s6626_s0 + $0x18] sm:$0xff]  ;;  %v4636_v61 = vpack.c.bf16 %v25_v56, %v23_v55  ;;  %vm666_vm9 = vcmask 1042434  }
   0xe   :  { %326 = vmatpush.bf16.msra.mxu3 %v4076_v47  ;;  %v4016_v57 = vor.u32 %v4243_v53, %v4015_v52  ;;  %v24_v58 = vld [vmem:[%s6626_s0 + $0x8] sm:$0xff]  ;;  %v4634_v60 = vld [vmem:[%s6627_s2 + $0x10] sm:$0x3]  ;;  %v4641_v62 = vld [vmem:[%s6627_s2 + $0x18] sm:$0x3]  ;;  %vm668_vm10 = vcmask 1043459  }
   0xf   :  { %v4643_v63 = vpack.c.bf16 %v26_v59, %v24_v58  ;;  %v4238_v0 = vld [vmem:[%s6625_s1 + $0x64] sm:$0xf]  ;;  %v4001_v1 = vld [vmem:[%s6625_s1 + $0x68] sm:$0xf0]  ;;  %v4236_v5 = vld [vmem:[%s6625_s1 + $0x54] sm:$0xf] }
  0x10   :  { %242 = vmatpush.bf16.msra.mxu0 %v3984_v24  ;;  %v4254_v2 = vld [vmem:[%s6625_s1 + $0xe4] sm:$0xf]  ;;  %v4004_v3 = vor.u32 %v4238_v0, %v4001_v1  ;;  %v4065_v4 = vld [vmem:[%s6625_s1 + $0xe8] sm:$0xf0]  ;;  %v3993_v6 = vld [vmem:[%s6625_s1 + $0x58] sm:$0xf0] }
  0x11   :  { %271 = vmatpush.bf16.msra.mxu1 %v4048_v25  ;;  %v4068_v7 = vor.u32 %v4254_v2, %v4065_v4  ;;  %v4252_v8 = vld [vmem:[%s6625_s1 + $0xd4] sm:$0xf]  ;;  %v4057_v9 = vld [vmem:[%s6625_s1 + $0xd8] sm:$0xf0]  ;;  %v4678_v10 = vld [vmem:[%s6627_s2] sm:$0xff]  ;;  %v3996_v11 = vor.u32 %v4236_v5, %v3993_v6  ;;  %vm670_vm11 = vcmask 1044484  }
  0x12   :  { %298 = vmatpush.bf16.msra.mxu2 %v4004_v3  ;;  %v4060_v12 = vor.u32 %v4252_v8, %v4057_v9  ;;  %v4234_v13 = vld [vmem:[%s6625_s1 + $0x44] sm:$0xf]  ;;  %v3985_v14 = vld [vmem:[%s6625_s1 + $0x48] sm:$0xf0]  ;;  %v29_v19 = vld [vmem:[%s6626_s0 + $0x30] sm:$0xff]  ;;  %vm672_vm12 = vcmask 1045509  }
  0x13   :  { %327 = vmatpush.bf16.msra.mxu3 %v4068_v7  ;;  %v4250_v15 = vld [vmem:[%s6625_s1 + $0xc4] sm:$0xf]  ;;  %v4049_v16 = vld [vmem:[%s6625_s1 + $0xc8] sm:$0xf0]  ;;  %v3988_v20 = vor.u32 %v4234_v13, %v3985_v14  ;;  %v4232_v23 = vld [vmem:[%s6625_s1 + $0x34] sm:$0xf] }
  0x14   :  { %243 = vmatpush.bf16.msra.mxu0 %v3976_v30  ;;  %v4698_v17 = vld [vmem:[%s6627_s2 + $0x8] sm:$0xff]  ;;  %v27_v18 = vld [vmem:[%s6626_s0 + $0x20] sm:$0xff]  ;;  %v4052_v22 = vor.u32 %v4250_v15, %v4049_v16  ;;  %v3977_v24 = vld [vmem:[%s6625_s1 + $0x38] sm:$0xf0]  ;;  %vm674_vm13 = vcmask 1046534   ;;  %vm676_vm14 = vcmask 1047559  }
  0x15   :  { %272 = vmatpush.bf16.msra.mxu1 %v4040_v31  ;;  %v28_v21 = vld [vmem:[%s6626_s0 + $0x28] sm:$0xff]  ;;  %v30_v25 = vld [vmem:[%s6626_s0 + $0x38] sm:$0xff]  ;;  %v4248_v26 = vld [vmem:[%s6625_s1 + $0xb4] sm:$0xf]  ;;  %v41_v28 = vpack.c.bf16 %v29_v19, %v27_v18  ;;  %v3980_v29 = vor.u32 %v4232_v23, %v3977_v24 }
  0x16   :  { %299 = vmatpush.bf16.msra.mxu2 %v3996_v11  ;;  %v4041_v27 = vld [vmem:[%s6625_s1 + $0xb8] sm:$0xf0]  ;;  %v42_v30 = vpack.c.bf16 %v30_v25, %v28_v21  ;;  %v4230_v32 = vld [vmem:[%s6625_s1 + $0x24] sm:$0xf]  ;;  %v3969_v33 = vld [vmem:[%s6625_s1 + $0x28] sm:$0xf0] }
  0x17   :  { %328 = vmatpush.bf16.msra.mxu3 %v4060_v12  ;;  %v4044_v31 = vor.u32 %v4248_v26, %v4041_v27  ;;  %v4246_v34 = vld [vmem:[%s6625_s1 + $0xa4] sm:$0xf]  ;;  %v3972_v35 = vor.u32 %v4230_v32, %v3969_v33  ;;  %v33_v39 = vld [vmem:[%s6626_s0 + $0x50] sm:$0xff]  ;;  %v34_v41 = vld [vmem:[%s6626_s0 + $0x58] sm:$0xff] }
  0x18   :  { %244 = vmatpush.bf16.msra.mxu0 %v3968_v36  ;;  %v4033_v36 = vld [vmem:[%s6625_s1 + $0xa8] sm:$0xf0]  ;;  %v31_v38 = vld [vmem:[%s6626_s0 + $0x40] sm:$0xff]  ;;  %v37_v45 = vld [vmem:[%s6626_s0 + $0x70] sm:$0xff] }
  0x19   :  { %273 = vmatpush.bf16.msra.mxu1 %v4032_v40  ;;  %v4036_v37 = vor.u32 %v4246_v34, %v4033_v36  ;;  %v32_v40 = vld [vmem:[%s6626_s0 + $0x48] sm:$0xff]  ;;  %v43_v42 = vpack.c.bf16 %v33_v39, %v31_v38  ;;  %v35_v44 = vld [vmem:[%s6626_s0 + $0x60] sm:$0xff]  ;;  %v38_v47 = vld [vmem:[%s6626_s0 + $0x78] sm:$0xff] }
  0x1a   :  { %300 = vmatpush.bf16.msra.mxu2 %v3988_v20  ;;  %v44_v43 = vpack.c.bf16 %v34_v41, %v32_v40  ;;  %v36_v46 = vld [vmem:[%s6626_s0 + $0x68] sm:$0xff]  ;;  %v4228_v50 = vld [vmem:[%s6625_s1 + $0x14] sm:$0xf]  ;;  %v3961_v51 = vld [vmem:[%s6625_s1 + $0x18] sm:$0xf0] }
  0x1b   :  { %329 = vmatpush.bf16.msra.mxu3 %v4052_v22  ;;  %v4244_v52 = vld [vmem:[%s6625_s1 + $0x94] sm:$0xf]  ;;  %v3964_v53 = vor.u32 %v4228_v50, %v3961_v51  ;;  %v4226_v56 = vld [vmem:[%s6625_s1 + $0x4] sm:$0xf]  ;;  %v4017_v0 = vld [vmem:[%s6625_s1 + $0x88] sm:$0xf0] }
  0x1c   :  { %245 = vmatpush.bf16.msra.mxu0 %v3960_v48  ;;  %v45_v48 = vpack.c.bf16 %v37_v45, %v35_v44  ;;  %v4242_v58 = vld [vmem:[%s6625_s1 + $0x84] sm:$0xf]  ;;  %v4844_v33 = vld [vmem:[%s6628_s3 + $0x78] sm:$0xff]  ;;  %v4849_v34 = vld [vmem:[%s6628_s3 + $0x70] sm:$0xff] }
  0x1d   :  { %274 = vmatpush.bf16.msra.mxu1 %v4024_v49  ;;  %v46_v49 = vpack.c.bf16 %v38_v47, %v36_v46  ;;  %v4020_v1 = vor.u32 %v4242_v58, %v4017_v0  ;;  %v4862_v39 = vld [vmem:[%s6628_s3 + $0x68] sm:$0xff]  ;;  %v4867_v40 = vld [vmem:[%s6628_s3 + $0x60] sm:$0xff]  ;;  %v4876_v45 = vld [vmem:[%s6628_s3 + $0x58] sm:$0xff]  ;;  %v355_v47 = vlaneseq }
  0x1e   :  { %301 = vmatpush.bf16.msra.mxu2 %v3980_v29  ;;  %v4881_v46 = vld [vmem:[%s6628_s3 + $0x50] sm:$0xff] }
  0x1f   :  { %330 = vmatpush.bf16.msra.mxu3 %v4044_v31 }
  0x20   :  { %246 = vmatpush.bf16.msra.mxu0 %v3952_v54  ;;  %v4025_v54 = vld [vmem:[%s6625_s1 + $0x98] sm:$0xf0] }
  0x21   :  { %275 = vmatpush.bf16.msra.mxu1 %v4016_v57  ;;  %v4028_v55 = vor.u32 %v4244_v52, %v4025_v54  ;;  %v3953_v57 = vld [vmem:[%s6625_s1 + $0x8] sm:$0xf0] }
  0x22   :  { %302 = vmatpush.bf16.msra.mxu2 %v3972_v35  ;;  %v3956_v59 = vor.u32 %v4226_v56, %v3953_v57  ;;  %v4894_v52 = vld [vmem:[%s6628_s3 + $0x48] sm:$0xff] }
  0x23   :  { %247 = vmatmul.bf16.vlgmr.msra.gmra.mxu0 %v4636_v61  ;;  %331 = vmatpush.bf16.msra.mxu3 %v4036_v37 }
  0x24   :  { %4077 = vmatpush.msk.msrb.mxu0 %vm6661_vm1, %v4634_v60  ;;  %276 = vmatmul.bf16.vlgmr.msra.gmra.mxu1 %v4643_v63 }
  0x25   :  { %4086 = vmatpush.msk.msrb.mxu1 %vm6661_vm1, %v4641_v62 }
  0x26   :  { %444 = vmatpush.msrb.mxu0 %v4678_v10  ;;  %303 = vmatpush.bf16.msra.mxu2 %v3964_v53  ;;  %v4899_v53 = vld [vmem:[%s6628_s3 + $0x40] sm:$0xff] }
  0x27   :  { %485 = vmatpush.msrb.mxu1 %v4698_v17  ;;  %332 = vmatpush.bf16.msra.mxu3 %v4028_v55 }
  0x28   :  { %4108 = vmatpush.msk.msra.mxu0 %vm6661_vm1, %v4634_v60 }
  0x29   :  { %4117 = vmatpush.msk.msra.mxu1 %vm6661_vm1, %v4641_v62 }
  0x2a   :  { %1198 = vmatpush.msra.mxu0 %v4678_v10  ;;  %304 = vmatpush.bf16.msra.mxu2 %v3956_v59 }
  0x2b   :  { %1239 = vmatpush.msra.mxu1 %v4698_v17  ;;  %333 = vmatpush.bf16.msra.mxu3 %v4020_v1 }
  0x2d   :  { %305 = vmatmul.bf16.vlgmr.msra.gmra.mxu2 %v4636_v61 }
  0x2e   :  { %334 = vmatmul.bf16.vlgmr.msra.gmra.mxu3 %v4643_v63  ;;  %688 = vmatpush.msrb.mxu2 %v4844_v33 }
  0x2f   :  { %4098 = vmatpush.msk.msrb.mxu3 %vm6661_vm1, %v4641_v62 }
  0x30   :  { %689 = vmatpush.msrb.mxu2 %v4849_v34 }
  0x31   :  { %776 = vmatpush.msrb.mxu3 %v4698_v17 }
  0x32   :  { %690 = vmatpush.msrb.mxu2 %v4862_v39 }
  0x33   :  { %252 = vmatmul.bf16.gmra.mxu0 %v41_v28 }
  0x34   :  { %281 = vmatmul.bf16.gmra.mxu1 %v42_v30  ;;  %691 = vmatpush.msrb.mxu2 %v4867_v40 }
  0x36   :  { %692 = vmatpush.msrb.mxu2 %v4876_v45 }
  0x38   :  { %693 = vmatpush.msrb.mxu2 %v4881_v46 }
  0x3a   :  { %694 = vmatpush.msrb.mxu2 %v4894_v52 }
  0x3c   :  { %695 = vmatpush.msrb.mxu2 %v4899_v53 }
  0x3d   :  { %310 = vmatmul.bf16.gmra.mxu2 %v41_v28 }
  0x3e   :  { %339 = vmatmul.bf16.gmra.mxu3 %v42_v30 }
  0x43   :  { %257 = vmatmul.bf16.gmra.mxu0 %v43_v42 }
  0x44   :  { %286 = vmatmul.bf16.gmra.mxu1 %v44_v43 }
  0x4d   :  { %315 = vmatmul.bf16.gmra.mxu2 %v43_v42 }
  0x4e   :  { %344 = vmatmul.bf16.gmra.mxu3 %v44_v43 }
  0x53   :  { %262 = vmatmul.bf16.gmra.mxu0 %v45_v48 }
  0x54   :  { %291 = vmatmul.bf16.gmra.mxu1 %v46_v49 }
  0x5d   :  { %320 = vmatmul.bf16.gmra.mxu2 %v45_v48  ;;  %v4887_v48 = vshrl.u32 %v355_v47, 7 }
  0x5e   :  { %349 = vmatmul.bf16.gmra.mxu3 %v46_v49 }
  0x5f   :  { %vm357_vm6 = vcmp.lt.s32.totalorder %v4887_v48, 4 }
  0x75   :  { %v403_v2 = vpop.xlane.xlu0 %402 }
  0x76   :  { %4260 = vrcp.f32 %v403_v2  ;;  %v415_v6 = vand.u32 2147483648, %v403_v2  ;;  %v413_v8 = vand.u32 2147483647, %v403_v2  ;;  %vm409_vm3 = vweird.f32 %v403_v2 }
  0x78   :  { %v416_v61 = vor.u32 1.1754944e-38, %v415_v6  ;;  %vm414_vm5 = vcmp.eq.f32.partialorder %v413_v8, 8.507059e+37 }
  0x7c   :  { %v4261_v3 = vpop.eup %4260 }
  0x7d   :  { %v405_v4 = vmul.f32 %v4261_v3, %v403_v2  ;;  %vm410_vm2 = vweird.f32 %v4261_v3 }
  0x7e   :  { %vm411_vm4 = vmor %vm409_vm3, %vm410_vm2 }
  0x7f   :  { %v406_v5 = vsub.f32 1.0, %v405_v4  ;;  %v4926_v4 = vld [vmem:[%s6628_s3 + $0x30] sm:$0xff] }
  0x81   :  { %v407_v7 = vmul.f32 %v4261_v3, %v406_v5 }
  0x83   :  { %v408_v9 = vadd.f32 %v4261_v3, %v407_v7 }
  0x85   :  { %v412_v63 = vsel %vm411_vm4, %v4261_v3, %v408_v9  ;;  %v4921_v3 = vld [vmem:[%s6628_s3 + $0x38] sm:$0xff] }
  0x86   :  { %v417_v11 = vsel %vm414_vm5, %v416_v61, %v412_v63  ;;  %696 = vmatpush.msrb.mxu2 %v4921_v3 }
  0x87   :  { %4078 = vmatmul.msk.f32.vlgmr.msrb.gmra.mxu0 %vm400_vm0, %v417_v11  ;;  %4087 = vmatmul.msk.f32.vlgmr.msrb.gmra.mxu1 %vm400_vm0, %v417_v11 }
  0x88   :  { %4148 = vmatpush.msk.msrb.mxu1 %vm6661_vm1, %v4641_v62  ;;  %1631 = vmatpush.msrb.mxu0 %v4844_v33 }
  0x89   :  { %697 = vmatpush.msrb.mxu2 %v4926_v4 }
  0x8a   :  { %1985 = vmatpush.msrb.mxu1 %v4698_v17  ;;  %1632 = vmatpush.msrb.mxu0 %v4849_v34 }
  0x8c   :  { %1633 = vmatpush.msrb.mxu0 %v4862_v39 }
  0x8e   :  { %1634 = vmatpush.msrb.mxu0 %v4867_v40 }
  0x8f   :  { %4079 = vmatmul.msk.f32.gmra.mxu0 %vm400_vm0, %v417_v11  ;;  %4088 = vmatmul.msk.f32.gmra.mxu1 %vm400_vm0, %v417_v11 }
  0x90   :  { %1635 = vmatpush.msrb.mxu0 %v4876_v45 }
  0x92   :  { %1636 = vmatpush.msrb.mxu0 %v4881_v46 }
  0x94   :  { %1637 = vmatpush.msrb.mxu0 %v4894_v52 }
  0x96   :  { %1638 = vmatpush.msrb.mxu0 %v4899_v53 }
  0x97   :  { %4080 = vmatmul.msk.f32.gmra.mxu0 %vm400_vm0, %v417_v11  ;;  %4089 = vmatmul.msk.f32.gmra.mxu1 %vm400_vm0, %v417_v11 }
  0x98   :  { %1639 = vmatpush.msrb.mxu0 %v4921_v3 }
  0x9a   :  { %1640 = vmatpush.msrb.mxu0 %v4926_v4 }
  0x9f   :  { %4081 = vmatmul.msk.f32.gmra.mxu0 %vm400_vm0, %v417_v11  ;;  %4090 = vmatmul.msk.f32.gmra.mxu1 %vm400_vm0, %v417_v11 }
  0xa0   :  { %v248_v12 = vpop.f32.mrf.mxu0 }
  0xa1   :  { %v277_v13 = vpop.f32.mrf.mxu1 }
  0xa2   :  { %v278_v56 = vadd.f32 %v277_v13, %v248_v12  ;;  %v4942_v12 = vld [vmem:[%s6628_s3 + $0x28] sm:$0xff] }
  0xa3   :  { %698 = vmatpush.msrb.mxu2 %v4942_v12  ;;  %1641 = vmatpush.msrb.mxu0 %v4942_v12 }
  0xa4   :  { %v4912_v58 = vsel %vm357_vm6, %v278_v56, 0.0 }
  0xa7   :  { %4082 = vmatmul.msk.f32.gmra.mxu0 %vm400_vm0, %v417_v11  ;;  %4091 = vmatmul.msk.f32.gmra.mxu1 %vm400_vm0, %v417_v11 }
  0xa8   :  { %v4813_v14 = vpop.f32.mrf.mxu0 }
  0xa9   :  { %v4815_v15 = vpop.f32.mrf.mxu1 }
  0xaa   :  { %v280_v61 = vadd.f32 %v4815_v15, %v4813_v14 }
  0xac   :  { %v4952_v14 = vsel %vm357_vm6, %v280_v61, 0.0 }
  0xad   :  { %6681 = vst [vmem:[#allocation4_spill] sm:$0xff] %v4952_v14 }
  0xaf   :  { %4083 = vmatmul.msk.f32.gmra.mxu0 %vm400_vm0, %v417_v11  ;;  %4092 = vmatmul.msk.f32.gmra.mxu1 %vm400_vm0, %v417_v11 }
  0xb0   :  { %v4817_v16 = vpop.f32.mrf.mxu0  ;;  %v306_v25 = vpop.f32.mrf.mxu2 }
  0xb1   :  { %v4819_v18 = vpop.f32.mrf.mxu1  ;;  %v335_v26 = vpop.f32.mrf.mxu3 }
  0xb2   :  { %v336_v49 = vadd.f32 %v335_v26, %v306_v25  ;;  %v283_v13 = vadd.f32 %v4819_v18, %v4817_v16  ;;  %v4959_v16 = vld [vmem:[%s6628_s3 + $0x20] sm:$0xff] }
  0xb3   :  { %699 = vmatpush.msrb.mxu2 %v4959_v16  ;;  %1642 = vmatpush.msrb.mxu0 %v4959_v16 }
  0xb4   :  { %v4908_v57 = vsel %vm357_vm6, %v336_v49, 0.0  ;;  %v4991_v49 = vld [vmem:[%s6628_s3 + $0x10] sm:$0xff] }
  0xb5   :  { %6679 = vst [vmem:[#allocation2_spill] sm:$0xff] %v4908_v57 }
  0xb7   :  { %4084 = vmatmul.msk.f32.gmra.mxu0 %vm400_vm0, %v417_v11  ;;  %4093 = vmatmul.msk.f32.gmra.mxu1 %vm400_vm0, %v417_v11 }
  0xb8   :  { %v4821_v19 = vpop.f32.mrf.mxu0  ;;  %v308_v29 = vpop.f32.mrf.mxu2 }
  0xb9   :  { %v4823_v20 = vpop.f32.mrf.mxu1  ;;  %v337_v30 = vpop.f32.mrf.mxu3 }
  0xba   :  { %v338_v5 = vadd.f32 %v337_v30, %v308_v29  ;;  %v285_v25 = vadd.f32 %v4823_v20, %v4821_v19 }
  0xbf   :  { %4085 = vmatmul.msk.f32.gmra.mxu0 %vm400_vm0, %v417_v11  ;;  %4094 = vmatmul.msk.f32.gmra.mxu1 %vm400_vm0, %v417_v11  ;;  %v4937_v11 = vsel %vm357_vm6, %v338_v5, 0.0 }
  0xc0   :  { %v4825_v21 = vpop.f32.mrf.mxu0  ;;  %v4853_v35 = vpop.f32.mrf.mxu2  ;;  %6680 = vst [vmem:[#allocation3_spill] sm:$0xff] %v4937_v11 }
  0xc1   :  { %v4827_v22 = vpop.f32.mrf.mxu1  ;;  %v4855_v36 = vpop.f32.mrf.mxu3 }
  0xc2   :  { %v341_v15 = vadd.f32 %v4855_v36, %v4853_v35  ;;  %v288_v18 = vadd.f32 %v4827_v22, %v4825_v21  ;;  %v4969_v35 = vld [vmem:[%s6628_s3 + $0x18] sm:$0xff]  ;;  %v4974_v36 = vsel %vm357_vm6, %v283_v13, 0.0  ;;  %v4978_v21 = vsel %vm357_vm6, %v285_v25, 0.0 }
  0xc3   :  { %6682 = vst [vmem:[#allocation5_spill] sm:$0xff] %v4974_v36  ;;  %700 = vmatpush.msrb.mxu2 %v4969_v35  ;;  %1643 = vmatpush.msrb.mxu0 %v4969_v35 }
  0xc4   :  { %6683 = vst [vmem:[#allocation6_spill] sm:$0xff] %v4978_v21 }
  0xc5   :  { %701 = vmatpush.msrb.mxu2 %v4991_v49  ;;  %1644 = vmatpush.msrb.mxu0 %v4991_v49 }
  0xc8   :  { %v4829_v23 = vpop.f32.mrf.mxu0  ;;  %v313_v41 = vpop.f32.mrf.mxu2 }
  0xc9   :  { %v4831_v24 = vpop.f32.mrf.mxu1  ;;  %v342_v42 = vpop.f32.mrf.mxu3 }
  0xca   :  { %v290_v22 = vadd.f32 %v4831_v24, %v4829_v23  ;;  %v4996_v23 = vsel %vm357_vm6, %v288_v18, 0.0 }
  0xcb   :  { %6685 = vst [vmem:[#allocation8_spill] sm:$0xff] %v4996_v23 }
  0xd0   :  { %v4833_v27 = vpop.f32.mrf.mxu0  ;;  %v316_v54 = vpop.f32.mrf.mxu2 }
  0xd1   :  { %v4835_v28 = vpop.f32.mrf.mxu1  ;;  %v345_v55 = vpop.f32.mrf.mxu3 }
  0xd8   :  { %v4837_v31 = vpop.f32.mrf.mxu0  ;;  %v318_v8 = vpop.f32.mrf.mxu2 }
  0xd9   :  { %v4839_v32 = vpop.f32.mrf.mxu1  ;;  %v347_v9 = vpop.f32.mrf.mxu3 }
  0xda   :  { %v348_v47 = vadd.f32 %v347_v9, %v318_v8  ;;  %v293_v8 = vadd.f32 %v4835_v28, %v4833_v27 }
 0x104   :  { %v446_v37 = vpop.f32.mrf.mxu0  ;;  %v487_v38 = vpop.f32.mrf.mxu1 }
 0x105   :  { %v511_v59 = vmul.f32 %v446_v37, %v4912_v58  ;;  %v512_v0 = vmul.f32 %v487_v38, %v4908_v57  ;;  %v343_v38 = vadd.f32 %v342_v42, %v313_v41  ;;  %v4985_v41 = vsel %vm357_vm6, %v341_v15, 0.0 }
 0x106   :  { %6684 = vst [vmem:[#allocation7_spill] sm:$0xff] %v4985_v41  ;;  %v5032_v15 = vsel %vm357_vm6, %v348_v47, 0.0 }
 0x107   :  { %v527_v6 = vrot.slane %v511_v59, 4  ;;  %v534_v7 = vsel %vm533_vm7, %v512_v0, 0.0  ;;  %v321_v0 = vpop.f32.mrf.mxu2  ;;  %6689 = vst [vmem:[#allocation12_spill] sm:$0xff] %v5032_v15 }
 0x108   :  { %v535_v63 = vrot.slane %v534_v7, 4 }
 0x109   :  { %v528_v26 = vadd.f32 %v527_v6, %v511_v59  ;;  %v5009_v6 = vld [vmem:[%s6628_s3 + $0x8] sm:$0xff] }
 0x10a   :  { %v536_v37 = vadd.f32 %v535_v63, %v534_v7  ;;  %v5019_v7 = vsel %vm357_vm6, %v290_v22, 0.0  ;;  %702 = vmatpush.msrb.mxu2 %v5009_v6  ;;  %1645 = vmatpush.msrb.mxu0 %v5009_v6 }
 0x10b   :  { %6687 = vst [vmem:[#allocation10_spill] sm:$0xff] %v5019_v7 }
 0x10c   :  { %v449_v43 = vpop.f32.mrf.mxu0  ;;  %v490_v44 = vpop.f32.mrf.mxu1 }
 0x10d   :  { %v513_v19 = vmul.f32 %v449_v43, %v4952_v14  ;;  %v514_v20 = vmul.f32 %v490_v44, %v4937_v11  ;;  %v529_v43 = vrot.slane %v528_v26, 2  ;;  %v346_v44 = vadd.f32 %v345_v55, %v316_v54 }
 0x10e   :  { %v537_v54 = vrot.slane %v536_v37, 2  ;;  %v5003_v55 = vsel %vm357_vm6, %v343_v38, 0.0 }
 0x10f   :  { %v541_v24 = vrot.slane %v513_v19, 4  ;;  %v547_v56 = vsel %vm533_vm7, %v514_v20, 0.0  ;;  %6686 = vst [vmem:[#allocation9_spill] sm:$0xff] %v5003_v55  ;;  %v530_v9 = vadd.f32 %v529_v43, %v528_v26  ;;  %v5028_v25 = vsel %vm357_vm6, %v346_v44, 0.0  ;;  %v5044_v44 = vld [vmem:[%s6628_s3 + $0x98] sm:$0xff] }
 0x110   :  { %v548_v63 = vrot.slane %v547_v56, 4  ;;  %6688 = vst [vmem:[#allocation11_spill] sm:$0xff] %v5028_v25  ;;  %v295_v20 = vadd.f32 %v4839_v32, %v4837_v31  ;;  %v538_v38 = vadd.f32 %v537_v54, %v536_v37  ;;  %938 = vmatpush.msra.mxu3 %v5044_v44  ;;  %v5064_v54 = vsel %vm357_vm6, %v293_v8, 0.0 }
 0x111   :  { %v542_v27 = vadd.f32 %v541_v24, %v513_v19  ;;  %6690 = vst [vmem:[#allocation13_spill] sm:$0xff] %v5044_v44  ;;  %v5049_v19 = vld [vmem:[%s6628_s3 + $0x90] sm:$0xff] }
 0x112   :  { %6691 = vst [vmem:[#allocation14_spill] sm:$0xff] %v5049_v19  ;;  %v549_v37 = vadd.f32 %v548_v63, %v547_v56  ;;  %939 = vmatpush.msra.mxu3 %v5049_v19 }
 0x113   :  { %6693 = vst [vmem:[#allocation16_spill] sm:$0xff] %v5064_v54 }
 0x114   :  { %v452_v50 = vpop.f32.mrf.mxu0  ;;  %v4889_v51 = vpop.f32.mrf.mxu1 }
 0x115   :  { %v515_v42 = vmul.f32 %v452_v50, %v4974_v36  ;;  %v350_v50 = vpop.f32.mrf.mxu3  ;;  %v516_v61 = vmul.f32 %v4889_v51, %v4985_v41 }
 0x116   :  { %v351_v43 = vadd.f32 %v350_v50, %v321_v0  ;;  %v5060_v50 = vld [vmem:[%s6628_s3 + $0x88] sm:$0xff] }
 0x117   :  { %v554_v13 = vrot.slane %v515_v42, 4  ;;  %v560_v47 = vsel %vm533_vm7, %v516_v61, 0.0  ;;  %6692 = vst [vmem:[#allocation15_spill] sm:$0xff] %v5060_v50  ;;  %v543_v61 = vrot.slane %v542_v27, 2  ;;  %940 = vmatpush.msra.mxu3 %v5060_v50 }
 0x118   :  { %v561_v56 = vrot.slane %v560_v47, 4 }
 0x119   :  { %v555_v24 = vadd.f32 %v554_v13, %v515_v42  ;;  %v5071_v42 = vsel %vm357_vm6, %v295_v20, 0.0  ;;  %v5075_v13 = vsel %vm357_vm6, %v351_v43, 0.0 }
 0x11a   :  { %6694 = vst [vmem:[#allocation17_spill] sm:$0xff] %v5071_v42 }
 0x11b   :  { %6695 = vst [vmem:[#allocation18_spill] sm:$0xff] %v5075_v13 }
 0x11c   :  { %v455_v1 = vpop.f32.mrf.mxu0  ;;  %v4916_v2 = vpop.f32.mrf.mxu1 }
 0x11d   :  { %v517_v59 = vmul.f32 %v455_v1, %v4978_v21  ;;  %v5014_v1 = vld [vmem:[%s6628_s3] sm:$0xff]  ;;  %v518_v51 = vmul.f32 %v4916_v2, %v5003_v55  ;;  %v531_v2 = vrot.slane %v530_v9, 1  ;;  %v352_v20 = vpop.f32.mrf.mxu3  ;;  %v544_v55 = vadd.f32 %v543_v61, %v542_v27 }
 0x11e   :  { %703 = vmatpush.msrb.mxu2 %v5014_v1  ;;  %1646 = vmatpush.msrb.mxu0 %v5014_v1 }
 0x11f   :  { %v567_v28 = vrot.slane %v517_v59, 4  ;;  %v5082_v8 = vadd.f32 %v531_v2, %v530_v9 }
 0x120   :  { %720 = vmatpush.msra.mxu2 %v5044_v44 }
 0x122   :  { %721 = vmatpush.msra.mxu2 %v5049_v19 }
 0x124   :  { %v458_v29 = vpop.f32.mrf.mxu0  ;;  %v499_v30 = vpop.f32.mrf.mxu1  ;;  %722 = vmatpush.msra.mxu2 %v5060_v50 }
 0x125   :  { %v519_v5 = vmul.f32 %v458_v29, %v4996_v23  ;;  %v520_v31 = vmul.f32 %v499_v30, %v5028_v25  ;;  %v568_v30 = vadd.f32 %v567_v28, %v517_v59  ;;  %v5080_v59 = vld [vmem:[%s6628_s3 + $0x80] sm:$0xff] }
 0x126   :  { %723 = vmatpush.msra.mxu2 %v5080_v59  ;;  %941 = vmatpush.msra.mxu3 %v5080_v59 }
 0x127   :  { %v580_v22 = vrot.slane %v519_v5, 4  ;;  %v586_v28 = vsel %vm533_vm7, %v520_v31, 0.0  ;;  %v569_v9 = vrot.slane %v568_v30, 2 }
 0x128   :  { %v587_v21 = vrot.slane %v586_v28, 4 }
 0x129   :  { %v581_v63 = vadd.f32 %v580_v22, %v519_v5  ;;  %v550_v5 = vrot.slane %v549_v37, 2  ;;  %v556_v22 = vrot.slane %v555_v24, 2 }
 0x12a   :  { %v588_v44 = vadd.f32 %v587_v21, %v586_v28 }
 0x12b   :  { %v551_v50 = vadd.f32 %v550_v5, %v549_v37  ;;  %v557_v27 = vadd.f32 %v556_v22, %v555_v24 }
 0x12c   :  { %v461_v29 = vpop.f32.mrf.mxu0  ;;  %v502_v18 = vpop.f32.mrf.mxu1 }
 0x12d   :  { %v521_v26 = vmul.f32 %v461_v29, %v5019_v7  ;;  %v522_v0 = vmul.f32 %v502_v18, %v5032_v15  ;;  %v573_v29 = vsel %vm533_vm7, %v518_v51, 0.0  ;;  %v539_v18 = vrot.slane %v538_v38, 1  ;;  %v323_v15 = vpop.f32.mrf.mxu2 }
 0x12e   :  { %v574_v43 = vrot.slane %v573_v29, 4  ;;  %v353_v41 = vadd.f32 %v352_v20, %v323_v15  ;;  %v632_v20 = vmul.f32 %v5082_v8, %v5082_v8  ;;  %v552_v5 = vrot.slane %v551_v50, 1 }
 0x12f   :  { %v593_v32 = vrot.slane %v521_v26, 4  ;;  %v599_v7 = vsel %vm533_vm7, %v522_v0, 0.0 }
 0x130   :  { %v600_v11 = vrot.slane %v599_v7, 4  ;;  %v575_v61 = vadd.f32 %v574_v43, %v573_v29  ;;  %v5097_v15 = vsel %vm357_vm6, %v353_v41, 0.0 }
 0x131   :  { %v594_v51 = vadd.f32 %v593_v32, %v521_v26  ;;  %v562_v26 = vadd.f32 %v561_v56, %v560_v47  ;;  %v582_v32 = vrot.slane %v581_v63, 2  ;;  %6696 = vst [vmem:[#allocation19_spill] sm:$0xff] %v5097_v15 }
 0x132   :  { %v601_v24 = vadd.f32 %v600_v11, %v599_v7 }
 0x133   :  { %v595_v36 = vrot.slane %v594_v51, 2  ;;  %v563_v47 = vrot.slane %v562_v26, 2  ;;  %v583_v56 = vadd.f32 %v582_v32, %v581_v63 }
 0x134   :  { %v464_v25 = vpop.f32.mrf.mxu0  ;;  %v505_v23 = vpop.f32.mrf.mxu1  ;;  %v602_v7 = vrot.slane %v601_v24, 2 }
 0x135   :  { %v523_v2 = vmul.f32 %v464_v25, %v5064_v54  ;;  %v524_v31 = vmul.f32 %v505_v23, %v5075_v13  ;;  %v5093_v25 = vadd.f32 %v539_v18, %v538_v38  ;;  %v545_v23 = vrot.slane %v544_v55, 1 }
 0x136   :  { %v570_v13 = vadd.f32 %v569_v9, %v568_v30  ;;  %v596_v37 = vadd.f32 %v595_v36, %v594_v51  ;;  %v558_v38 = vrot.slane %v557_v27, 1  ;;  %v576_v18 = vrot.slane %v575_v61, 2 }
 0x137   :  { %v606_v14 = vrot.slane %v523_v2, 4  ;;  %v612_v0 = vsel %vm533_vm7, %v524_v31, 0.0  ;;  %v5103_v28 = vadd.f32 %v545_v23, %v544_v55  ;;  %v564_v43 = vadd.f32 %v563_v47, %v562_v26 }
 0x138   :  { %v613_v19 = vrot.slane %v612_v0, 4  ;;  %v571_v63 = vrot.slane %v570_v13, 1  ;;  %v584_v9 = vrot.slane %v583_v56, 1  ;;  %v589_v36 = vrot.slane %v588_v44, 2 }
 0x139   :  { %v607_v54 = vadd.f32 %v606_v14, %v523_v2  ;;  %v597_v11 = vrot.slane %v596_v37, 1  ;;  %v5106_v2 = vadd.f32 %v558_v38, %v557_v27  ;;  %v577_v55 = vadd.f32 %v576_v18, %v575_v61 }
 0x13a   :  { %v614_v22 = vadd.f32 %v613_v19, %v612_v0  ;;  %v5108_v0 = vadd.f32 %v552_v5, %v551_v50  ;;  %v634_v23 = vmul.f32 %v5103_v28, %v5103_v28  ;;  %v5114_v47 = vadd.f32 %v584_v9, %v583_v56 }
 0x13b   :  { %v608_v29 = vrot.slane %v607_v54, 2  ;;  %v603_v27 = vadd.f32 %v602_v7, %v601_v24  ;;  %v636_v50 = vmul.f32 %v5106_v2, %v5106_v2 }
 0x13c   :  { %v467_v30 = vpop.f32.mrf.mxu0  ;;  %v508_v14 = vpop.f32.mrf.mxu1 }
 0x13d   :  { %v609_v21 = vadd.f32 %v608_v29, %v607_v54  ;;  %v525_v48 = vmul.f32 %v467_v30, %v5071_v42  ;;  %v526_v41 = vmul.f32 %v508_v14, %v5097_v15  ;;  %v615_v54 = vrot.slane %v614_v22, 2 }
 0x13e   :  { %v5110_v29 = vadd.f32 %v571_v63, %v570_v13  ;;  %v590_v30 = vadd.f32 %v589_v36, %v588_v44  ;;  %v5116_v15 = vadd.f32 %v597_v11, %v596_v37  ;;  %v578_v63 = vrot.slane %v577_v55, 1 }
 0x13f   :  { %v619_v51 = vrot.slane %v525_v48, 4  ;;  %v625_v19 = vsel %vm533_vm7, %v526_v41, 0.0  ;;  %v610_v31 = vrot.slane %v609_v21, 1  ;;  %v565_v41 = vrot.slane %v564_v43, 1 }
 0x140   :  { %v626_v32 = vrot.slane %v625_v19, 4  ;;  %v616_v13 = vadd.f32 %v615_v54, %v614_v22  ;;  %v638_v18 = vmul.f32 %v5110_v29, %v5110_v29  ;;  %v665_v44 = vsel %vm664_vm8, %v634_v23, %v632_v20 }
 0x141   :  { %v620_v26 = vadd.f32 %v619_v51, %v525_v48  ;;  %v5120_v5 = vadd.f32 %v610_v31, %v609_v21  ;;  %v640_v37 = vmul.f32 %v5114_v47, %v5114_v47  ;;  %v591_v24 = vrot.slane %v590_v30, 1 }
 0x142   :  { %v627_v14 = vadd.f32 %v626_v32, %v625_v19  ;;  %v5127_v9 = vadd.f32 %v565_v41, %v564_v43  ;;  %v642_v21 = vmul.f32 %v5116_v15, %v5116_v15  ;;  %v604_v22 = vrot.slane %v603_v27, 1 }
 0x143   :  { %v621_v38 = vrot.slane %v620_v26, 2  ;;  %v617_v11 = vrot.slane %v616_v13, 1  ;;  %v644_v7 = vmul.f32 %v5120_v5, %v5120_v5  ;;  %v667_v51 = vsel %vm666_vm9, %v636_v50, %v665_v44 }
 0x144   :  { %v628_v61 = vrot.slane %v627_v14, 2  ;;  %v5134_v20 = vadd.f32 %v578_v63, %v577_v55  ;;  %v669_v43 = vsel %vm668_vm10, %v638_v18, %v667_v51  ;;  %v5139_v54 = vadd.f32 %v591_v24, %v590_v30 }
 0x145   :  { %v622_v56 = vadd.f32 %v621_v38, %v620_v26  ;;  %v671_v32 = vsel %vm670_vm11, %v640_v37, %v669_v43  ;;  %v635_v26 = vmul.f32 %v5108_v0, %v5108_v0  ;;  %v5144_v23 = vadd.f32 %v604_v22, %v603_v27 }
 0x146   :  { %v629_v48 = vadd.f32 %v628_v61, %v627_v14  ;;  %v673_v55 = vsel %vm672_vm12, %v642_v21, %v671_v32  ;;  %v637_v41 = vmul.f32 %v5127_v9, %v5127_v9  ;;  %v5151_v38 = vadd.f32 %v617_v11, %v616_v13 }
 0x147   :  { %v623_v36 = vrot.slane %v622_v56, 1  ;;  %v675_v30 = vsel %vm674_vm13, %v644_v7, %v673_v55  ;;  %v633_v50 = vmul.f32 %v5093_v25, %v5093_v25  ;;  %v639_v61 = vmul.f32 %v5134_v20, %v5134_v20 }
 0x148   :  { %v630_v31 = vrot.slane %v629_v48, 1  ;;  %v641_v63 = vmul.f32 %v5139_v54, %v5139_v54  ;;  %v643_v13 = vmul.f32 %v5144_v23, %v5144_v23  ;;  %v645_v37 = vmul.f32 %v5151_v38, %v5151_v38 }
 0x149   :  { %v5136_v19 = vadd.f32 %v623_v36, %v622_v56  ;;  %v678_v56 = vsel %vm664_vm8, %v635_v26, %v633_v50  ;;  %v6701_v50 = vld [vmem:[#allocation3_spill] sm:$0xff] }
 0x14a   :  { %v5158_v27 = vadd.f32 %v630_v31, %v629_v48  ;;  %v679_v44 = vsel %vm666_vm9, %v637_v41, %v678_v56 }
 0x14b   :  { %v646_v14 = vmul.f32 %v5136_v19, %v5136_v19  ;;  %v680_v48 = vsel %vm668_vm10, %v639_v61, %v679_v44 }
 0x14c   :  { %v647_v24 = vmul.f32 %v5158_v27, %v5158_v27  ;;  %v681_v21 = vsel %vm670_vm11, %v641_v63, %v680_v48  ;;  %v6703_v48 = vld [vmem:[#allocation7_spill] sm:$0xff] }
 0x14d   :  { %v677_v18 = vsel %vm676_vm14, %v646_v14, %v675_v30  ;;  %v682_v22 = vsel %vm672_vm12, %v643_v13, %v681_v21 }
 0x14e   :  { %704 = vmatmul.f32.vlgmr.msrb.gmra.mxu2 %v677_v18  ;;  %v683_v36 = vsel %vm674_vm13, %v645_v37, %v682_v22  ;;  %v6702_v37 = vld [vmem:[#allocation5_spill] sm:$0xff] }
 0x14f   :  { %4096 = vmatpush.msk.msrb.mxu2 %vm6661_vm1, %v4634_v60  ;;  %v684_v60 = vsel %vm676_vm14, %v647_v24, %v683_v36 }
 0x151   :  { %756 = vmatpush.msrb.mxu2 %v4678_v10 }
 0x156   :  { %4095 = vmatmul.msk.f32.vlgmr.msra.gmra.mxu2 %vm533_vm7, %v684_v60 }
 0x157   :  { %885 = vmatpush.msra.mxu2 %v4844_v33 }
 0x159   :  { %886 = vmatpush.msra.mxu2 %v4849_v34 }
 0x15b   :  { %887 = vmatpush.msra.mxu2 %v4862_v39 }
 0x15d   :  { %888 = vmatpush.msra.mxu2 %v4867_v40 }
 0x15f   :  { %889 = vmatpush.msra.mxu2 %v4876_v45 }
 0x161   :  { %890 = vmatpush.msra.mxu2 %v4881_v46 }
 0x163   :  { %891 = vmatpush.msra.mxu2 %v4894_v52 }
 0x165   :  { %892 = vmatpush.msra.mxu2 %v4899_v53 }
 0x167   :  { %893 = vmatpush.msra.mxu2 %v4921_v3 }
 0x169   :  { %894 = vmatpush.msra.mxu2 %v4926_v4 }
 0x16b   :  { %895 = vmatpush.msra.mxu2 %v4942_v12 }
 0x16d   :  { %896 = vmatpush.msra.mxu2 %v4959_v16 }
 0x16f   :  { %897 = vmatpush.msra.mxu2 %v4969_v35 }
 0x171   :  { %898 = vmatpush.msra.mxu2 %v4991_v49 }
 0x173   :  { %899 = vmatpush.msra.mxu2 %v5009_v6 }
 0x175   :  { %900 = vmatpush.msra.mxu2 %v5014_v1 }
 0x1d1   :  { %v705_v11 = vpop.f32.mrf.mxu2 }
 0x1d2   :  { %v706_v7 = vadd.f32 1e-07, %v705_v11  ;;  %v6704_v11 = vld [vmem:[#allocation6_spill] sm:$0xff] }
 0x1d9   :  { %v725_v51 = vpop.f32.mrf.mxu2 }
 0x1da   :  { %v726_v31 = vadd.f32 %v725_v51, %v706_v7  ;;  %v6705_v51 = vld [vmem:[#allocation9_spill] sm:$0xff] }
 0x1dc   :  { %4262 = vrsqrt.f32 %v726_v31  ;;  %vm734_vm2 = vweird.f32 %v726_v31 }
 0x1e2   :  { %v4263_v43 = vpop.eup %4262 }
 0x1e3   :  { %v729_v32 = vmul.f32 %v4263_v43, %v726_v31  ;;  %vm735_vm15 = vweird.f32 %v4263_v43 }
 0x1e4   :  { %vm736_vm3 = vmor %vm734_vm2, %vm735_vm15 }
 0x1e5   :  { %v730_v26 = vmul.f32 %v4263_v43, %v729_v32 }
 0x1e7   :  { %v731_v14 = vmul.f32 0.5, %v730_v26 }
 0x1e9   :  { %v732_v55 = vsub.f32 1.5, %v731_v14 }
 0x1eb   :  { %v733_v41 = vmul.f32 %v4263_v43, %v732_v55  ;;  %v6706_v55 = vld [vmem:[#allocation8_spill] sm:$0xff] }
 0x1ed   :  { %v737_v30 = vsel %vm736_vm3, %v4263_v43, %v733_v41 }
 0x1ee   :  { %4097 = vmatmul.msk.f32.vlgmr.msrb.gmra.mxu2 %vm400_vm0, %v737_v30  ;;  %4099 = vmatmul.msk.f32.vlgmr.msrb.gmra.mxu3 %vm400_vm0, %v737_v30  ;;  %v6707_v30 = vld [vmem:[#allocation11_spill] sm:$0xff] }
 0x1ef   :  { %1434 = vmatpush.msrb.mxu3 %v4844_v33  ;;  %4129 = vmatpush.msk.msrb.mxu2 %vm6661_vm1, %v4641_v62 }
 0x1f1   :  { %1435 = vmatpush.msrb.mxu3 %v4849_v34  ;;  %1522 = vmatpush.msrb.mxu2 %v4698_v17 }
 0x1f3   :  { %1436 = vmatpush.msrb.mxu3 %v4862_v39 }
 0x1f5   :  { %1437 = vmatpush.msrb.mxu3 %v4867_v40 }
 0x1f7   :  { %1438 = vmatpush.msrb.mxu3 %v4876_v45 }
 0x1f9   :  { %1439 = vmatpush.msrb.mxu3 %v4881_v46 }
 0x1fb   :  { %1440 = vmatpush.msrb.mxu3 %v4894_v52 }
 0x1fd   :  { %1441 = vmatpush.msrb.mxu3 %v4899_v53 }
 0x1ff   :  { %1442 = vmatpush.msrb.mxu3 %v4921_v3 }
 0x201   :  { %1443 = vmatpush.msrb.mxu3 %v4926_v4 }
 0x203   :  { %1444 = vmatpush.msrb.mxu3 %v4942_v12  ;;  %v6697_v12 = vld [vmem:[#allocation13_spill] sm:$0xff] }
 0x205   :  { %1445 = vmatpush.msrb.mxu3 %v4959_v16 }
 0x207   :  { %1446 = vmatpush.msrb.mxu3 %v4969_v35 }
 0x209   :  { %1447 = vmatpush.msrb.mxu3 %v4991_v49 }
 0x20b   :  { %1448 = vmatpush.msrb.mxu3 %v5009_v6 }
 0x20d   :  { %1449 = vmatpush.msrb.mxu3 %v5014_v1  ;;  %v5238_v1 = vld [vmem:[%s6627_s2 + $0x10] sm:$0x3] }
 0x271   :  { %v5217_v62 = vpop.f32.mrf.mxu2  ;;  %v5219_v17 = vpop.f32.mrf.mxu3 }
 0x272   :  { %v813_v33 = vmul.f32 %v5217_v62, %v5082_v8  ;;  %v814_v34 = vmul.f32 %v5219_v17, %v5093_v25  ;;  %v783_v39 = vrot.slane %v5217_v62, 1  ;;  %v784_v40 = vrot.slane %v5219_v17, 1  ;;  %v6698_v8 = vld [vmem:[#allocation14_spill] sm:$0xff]  ;;  %v6699_v25 = vld [vmem:[#allocation15_spill] sm:$0xff] }
 0x273   :  { %v785_v49 = vrot.slane %v5217_v62, 2  ;;  %v786_v6 = vrot.slane %v5219_v17, 2  ;;  %v787_v44 = vrot.slane %v5217_v62, 3  ;;  %v789_v36 = vrot.slane %v5217_v62, 4 }
 0x274   :  { %v829_v45 = vperm.slane %v813_v33, 0  ;;  %v830_v46 = vperm.slane %v814_v34, 0  ;;  %v815_v3 = vmul.f32 %v783_v39, %v5103_v28  ;;  %v816_v4 = vmul.f32 %v784_v40, %v5108_v0  ;;  %v6700_v28 = vld [vmem:[#allocation4_spill] sm:$0xff] }
 0x275   :  { %v817_v18 = vmul.f32 %v785_v49, %v5106_v2  ;;  %v818_v63 = vmul.f32 %v786_v6, %v5127_v9  ;;  %v819_v22 = vmul.f32 %v787_v44, %v5110_v29  ;;  %v790_v60 = vrot.slane %v5219_v17, 4  ;;  %v6710_v49 = vld [vmem:[#allocation16_spill] sm:$0xff] }
 0x276   :  { %v845_v52 = vmul.f32 %v829_v45, %v4912_v58  ;;  %v846_v53 = vmul.f32 %v830_v46, %v4908_v57  ;;  %v831_v16 = vperm.slane %v815_v3, 0  ;;  %v832_v35 = vperm.slane %v816_v4, 0  ;;  %v6708_v46 = vld [vmem:[#allocation10_spill] sm:$0xff] }
 0x277   :  { %v833_v56 = vperm.slane %v817_v18, 0  ;;  %v834_v13 = vperm.slane %v818_v63, 0  ;;  %v821_v43 = vmul.f32 %v789_v36, %v5114_v47  ;;  %v822_v32 = vmul.f32 %v790_v60, %v5139_v54  ;;  %v6712_v63 = vld [vmem:[#allocation19_spill] sm:$0xff] }
 0x278   :  { %901 = vmatmul.f32.vlgmr.msra.gmra.mxu2 %v845_v52  ;;  %4100 = vmatmul.msk.f32.vlgmr.msra.gmra.mxu3 %vm533_vm7, %v846_v53  ;;  %v847_v0 = vmul.f32 %v831_v16, %v6700_v28  ;;  %v848_v61 = vmul.f32 %v832_v35, %v6701_v50  ;;  %v791_v26 = vrot.slane %v5217_v62, 5  ;;  %v792_v14 = vrot.slane %v5219_v17, 5  ;;  %v6709_v53 = vld [vmem:[#allocation12_spill] sm:$0xff] }
 0x279   :  { %1466 = vmatpush.msra.mxu3 %v6697_v12  ;;  %4139 = vmatpush.msk.msra.mxu2 %vm6661_vm1, %v5238_v1  ;;  %v849_v24 = vmul.f32 %v833_v56, %v6702_v37  ;;  %v850_v21 = vmul.f32 %v834_v13, %v6703_v48  ;;  %v837_v29 = vperm.slane %v821_v43, 0  ;;  %v793_v40 = vrot.slane %v5217_v62, 6 }
 0x27a   :  { %v823_v34 = vmul.f32 %v791_v26, %v5116_v15  ;;  %v824_v39 = vmul.f32 %v792_v14, %v5144_v23  ;;  %v794_v45 = vrot.slane %v5219_v17, 6  ;;  %v795_v16 = vrot.slane %v5217_v62, 7 }
 0x27b   :  { %1467 = vmatpush.msra.mxu3 %v6698_v8  ;;  %1944 = vmatpush.msra.mxu2 %v4678_v10  ;;  %v788_v10 = vrot.slane %v5219_v17, 3  ;;  %v853_v41 = vmul.f32 %v837_v29, %v6706_v55  ;;  %v825_v4 = vmul.f32 %v793_v40, %v5120_v5  ;;  %v796_v35 = vrot.slane %v5219_v17, 7  ;;  %v6711_v8 = vld [vmem:[#allocation18_spill] sm:$0xff] }
 0x27c   :  { %v839_v47 = vperm.slane %v823_v34, 0  ;;  %v840_v54 = vperm.slane %v824_v39, 0  ;;  %v826_v12 = vmul.f32 %v794_v45, %v5151_v38 }
 0x27d   :  { %1468 = vmatpush.msra.mxu3 %v6699_v25  ;;  %v820_v2 = vmul.f32 %v788_v10, %v5134_v20  ;;  %v838_v20 = vperm.slane %v822_v32, 0  ;;  %v841_v15 = vperm.slane %v825_v4, 0 }
 0x27e   :  { %v855_v52 = vmul.f32 %v839_v47, %v6708_v46  ;;  %v856_v3 = vmul.f32 %v840_v54, %v6709_v53  ;;  %v842_v23 = vperm.slane %v826_v12, 0 }
 0x27f   :  { %1469 = vmatpush.msra.mxu3 %v5080_v59  ;;  %v835_v59 = vperm.slane %v819_v22, 0  ;;  %v836_v9 = vperm.slane %v820_v2, 0  ;;  %v854_v33 = vmul.f32 %v838_v20, %v6707_v30  ;;  %v857_v6 = vmul.f32 %v841_v15, %v6710_v49 }
 0x280   :  { %904 = vmatmul.f32.gmra.mxu2 %v847_v0  ;;  %4101 = vmatmul.msk.f32.gmra.mxu3 %vm533_vm7, %v848_v61  ;;  %v858_v25 = vmul.f32 %v842_v23, %v6711_v8  ;;  %v827_v0 = vmul.f32 %v795_v16, %v5136_v19  ;;  %v828_v61 = vmul.f32 %v796_v35, %v5158_v27 }
 0x281   :  { %v851_v7 = vmul.f32 %v835_v59, %v6704_v11  ;;  %v852_v31 = vmul.f32 %v836_v9, %v6705_v51 }
 0x282   :  { %v843_v5 = vperm.slane %v827_v0, 0  ;;  %v844_v38 = vperm.slane %v828_v61, 0 }
 0x284   :  { %v859_v18 = vmul.f32 %v843_v5, %v5071_v42  ;;  %v860_v56 = vmul.f32 %v844_v38, %v6712_v63 }
 0x288   :  { %907 = vmatmul.f32.gmra.mxu2 %v849_v24  ;;  %4102 = vmatmul.msk.f32.gmra.mxu3 %vm533_vm7, %v850_v21 }
 0x290   :  { %910 = vmatmul.f32.gmra.mxu2 %v851_v7  ;;  %4103 = vmatmul.msk.f32.gmra.mxu3 %vm533_vm7, %v852_v31 }
 0x298   :  { %913 = vmatmul.f32.gmra.mxu2 %v853_v41  ;;  %4104 = vmatmul.msk.f32.gmra.mxu3 %vm533_vm7, %v854_v33 }
 0x2a0   :  { %916 = vmatmul.f32.gmra.mxu2 %v855_v52  ;;  %4105 = vmatmul.msk.f32.gmra.mxu3 %vm533_vm7, %v856_v3 }
 0x2a8   :  { %919 = vmatmul.f32.gmra.mxu2 %v857_v6  ;;  %4106 = vmatmul.msk.f32.gmra.mxu3 %vm533_vm7, %v858_v25 }
 0x2b0   :  { %922 = vmatmul.f32.gmra.mxu2 %v859_v18  ;;  %4107 = vmatmul.msk.f32.gmra.mxu3 %vm533_vm7, %v860_v56 }
 0x2fb   :  { %v902_v62 = vpop.f32.mrf.mxu2  ;;  %v943_v17 = vpop.f32.mrf.mxu3 }
 0x2fc   :  { %v944_v13 = vadd.f32 %v943_v17, %v902_v62 }
 0x2fe   :  { %v967_v44 = vsel %vm400_vm0, %v944_v13, -inf }
 0x2ff   :  { %968 = vmax.xlane.f32.xlu0 %v967_v44 }
 0x303   :  { %v905_v19 = vpop.f32.mrf.mxu2  ;;  %v946_v27 = vpop.f32.mrf.mxu3 }
 0x304   :  { %v947_v10 = vadd.f32 %v946_v27, %v905_v19 }
 0x306   :  { %v970_v24 = vsel %vm400_vm0, %v947_v10, -inf }
 0x307   :  { %971 = vmax.xlane.f32.xlu1 %v970_v24 }
 0x30b   :  { %v908_v21 = vpop.f32.mrf.mxu2  ;;  %v949_v22 = vpop.f32.mrf.mxu3 }
 0x30c   :  { %v950_v2 = vadd.f32 %v949_v22, %v908_v21 }
 0x30e   :  { %v973_v59 = vsel %vm400_vm0, %v950_v2, -inf }
 0x30f   :  { %974 = vmax.xlane.f32.xlu1 %v973_v59 }
 0x313   :  { %v911_v9 = vpop.f32.mrf.mxu2  ;;  %v952_v36 = vpop.f32.mrf.mxu3 }
 0x314   :  { %v953_v60 = vadd.f32 %v952_v36, %v911_v9 }
 0x316   :  { %v976_v7 = vsel %vm400_vm0, %v953_v60, -inf }
 0x317   :  { %977 = vmax.xlane.f32.xlu2 %v976_v7 }
 0x31b   :  { %v914_v31 = vpop.f32.mrf.mxu2  ;;  %v955_v43 = vpop.f32.mrf.mxu3 }
 0x31c   :  { %v956_v32 = vadd.f32 %v955_v43, %v914_v31 }
 0x31e   :  { %v979_v29 = vsel %vm400_vm0, %v956_v32, -inf }
 0x31f   :  { %980 = vmax.xlane.f32.xlu2 %v979_v29 }
 0x323   :  { %v917_v20 = vpop.f32.mrf.mxu2  ;;  %v958_v26 = vpop.f32.mrf.mxu3 }
 0x324   :  { %v959_v14 = vadd.f32 %v958_v26, %v917_v20 }
 0x326   :  { %v982_v41 = vsel %vm400_vm0, %v959_v14, -inf }
 0x327   :  { %983 = vmax.xlane.f32.xlu0 %v982_v41 }
 0x32b   :  { %v920_v33 = vpop.f32.mrf.mxu2  ;;  %v961_v34 = vpop.f32.mrf.mxu3 }
 0x32c   :  { %v962_v39 = vadd.f32 %v961_v34, %v920_v33 }
 0x32e   :  { %v985_v47 = vsel %vm400_vm0, %v962_v39, -inf }
 0x32f   :  { %986 = vmax.xlane.f32.xlu1 %v985_v47 }
 0x333   :  { %v923_v54 = vpop.f32.mrf.mxu2  ;;  %v964_v40 = vpop.f32.mrf.mxu3 }
 0x334   :  { %v965_v45 = vadd.f32 %v964_v40, %v923_v54 }
 0x336   :  { %v988_v52 = vsel %vm400_vm0, %v965_v45, -inf }
 0x337   :  { %989 = vmax.xlane.f32.xlu0 %v988_v52 }
 0x372   :  { %v969_v3 = vpop.xlane.xlu0 %968 }
 0x373   :  { %v991_v4 = vsub.f32 %v944_v13, %v969_v3 }
 0x375   :  { %v999_v12 = vmul.f32 1.442695, %v991_v4 }
 0x377   :  { %4264 = vpow2.f32 %v999_v12 }
 0x37a   :  { %v972_v15 = vpop.xlane.xlu1 %971 }
 0x37b   :  { %v992_v23 = vsub.f32 %v947_v10, %v972_v15 }
 0x37d   :  { %v5297_v16 = vpop.eup %4264  ;;  %v1001_v35 = vmul.f32 1.442695, %v992_v23 }
 0x37e   :  { %v1015_v6 = vsel %vm400_vm0, %v5297_v16, 0.0 }
 0x37f   :  { %4266 = vpow2.f32 %v1001_v35  ;;  %1016 = vadd.xlane.f32.xlu2 %v1015_v6 }
 0x382   :  { %v975_v25 = vpop.xlane.xlu1 %974 }
 0x383   :  { %v993_v0 = vsub.f32 %v950_v2, %v975_v25 }
 0x385   :  { %v5301_v61 = vpop.eup %4266  ;;  %v1003_v5 = vmul.f32 1.442695, %v993_v0 }
 0x386   :  { %v1018_v38 = vsel %vm400_vm0, %v5301_v61, 0.0 }
 0x387   :  { %4268 = vpow2.f32 %v1003_v5  ;;  %1019 = vadd.xlane.f32.xlu1 %v1018_v38 }
 0x38a   :  { %v978_v18 = vpop.xlane.xlu2 %977 }
 0x38b   :  { %v994_v56 = vsub.f32 %v953_v60, %v978_v18 }
 0x38d   :  { %v5305_v62 = vpop.eup %4268  ;;  %v1005_v17 = vmul.f32 1.442695, %v994_v56 }
 0x38e   :  { %v1021_v13 = vsel %vm400_vm0, %v5305_v62, 0.0 }
 0x38f   :  { %4270 = vpow2.f32 %v1005_v17  ;;  %1022 = vadd.xlane.f32.xlu2 %v1021_v13  ;;  %v5335_v17 = vld [vmem:[%s6628_s3 + $0x78] sm:$0xff] }
 0x392   :  { %v981_v44 = vpop.xlane.xlu2 %980 }
 0x393   :  { %v995_v19 = vsub.f32 %v956_v32, %v981_v44 }
 0x395   :  { %v5309_v27 = vpop.eup %4270  ;;  %v1007_v10 = vmul.f32 1.442695, %v995_v19  ;;  %v5343_v19 = vld [vmem:[%s6628_s3 + $0x70] sm:$0xff] }
 0x396   :  { %v1024_v24 = vsel %vm400_vm0, %v5309_v27, 0.0 }
 0x397   :  { %4272 = vpow2.f32 %v1007_v10  ;;  %1025 = vadd.xlane.f32.xlu0 %v1024_v24  ;;  %v5349_v10 = vld [vmem:[%s6627_s2] sm:$0xff] }
 0x39a   :  { %v984_v21 = vpop.xlane.xlu0 %983 }
 0x39b   :  { %v996_v22 = vsub.f32 %v959_v14, %v984_v21 }
 0x39d   :  { %v5313_v2 = vpop.eup %4272  ;;  %v1009_v59 = vmul.f32 1.442695, %v996_v22 }
 0x39e   :  { %v1027_v9 = vsel %vm400_vm0, %v5313_v2, 0.0 }
 0x39f   :  { %4274 = vpow2.f32 %v1009_v59  ;;  %1028 = vadd.xlane.f32.xlu1 %v1027_v9  ;;  %v5355_v9 = vld [vmem:[%s6628_s3 + $0x68] sm:$0xff] }
 0x3a2   :  { %v987_v36 = vpop.xlane.xlu1 %986 }
 0x3a3   :  { %v997_v60 = vsub.f32 %v962_v39, %v987_v36 }
 0x3a5   :  { %v5317_v7 = vpop.eup %4274  ;;  %v1011_v31 = vmul.f32 1.442695, %v997_v60 }
 0x3a6   :  { %v1030_v43 = vsel %vm400_vm0, %v5317_v7, 0.0 }
 0x3a7   :  { %4276 = vpow2.f32 %v1011_v31  ;;  %1031 = vadd.xlane.f32.xlu2 %v1030_v43  ;;  %v5362_v43 = vld [vmem:[%s6628_s3 + $0x60] sm:$0xff] }
 0x3aa   :  { %v990_v32 = vpop.xlane.xlu0 %989 }
 0x3ab   :  { %v998_v29 = vsub.f32 %v965_v45, %v990_v32 }
 0x3ad   :  { %v5321_v20 = vpop.eup %4276  ;;  %v1013_v26 = vmul.f32 1.442695, %v998_v29 }
 0x3ae   :  { %v1033_v14 = vsel %vm400_vm0, %v5321_v20, 0.0 }
 0x3af   :  { %4278 = vpow2.f32 %v1013_v26  ;;  %1034 = vadd.xlane.f32.xlu0 %v1033_v14  ;;  %v5370_v26 = vld [vmem:[%s6628_s3 + $0x58] sm:$0xff] }
 0x3b5   :  { %v5325_v41 = vpop.eup %4278 }
 0x3b6   :  { %v1036_v33 = vsel %vm400_vm0, %v5325_v41, 0.0 }
 0x3b7   :  { %1037 = vadd.xlane.f32.xlu1 %v1036_v33 }
 0x3f2   :  { %v1017_v34 = vpop.xlane.xlu2 %1016 }
 0x3f3   :  { %4280 = vrcp.f32 %v1017_v34  ;;  %v1050_v45 = vand.u32 2147483648, %v1017_v34  ;;  %v1048_v3 = vand.u32 2147483647, %v1017_v34  ;;  %vm1044_vm5 = vweird.f32 %v1017_v34 }
 0x3f5   :  { %v1051_v15 = vor.u32 1.1754944e-38, %v1050_v45  ;;  %vm1049_vm15 = vcmp.eq.f32.partialorder %v1048_v3, 8.507059e+37  ;;  %v5382_v45 = vld [vmem:[%s6628_s3 + $0x48] sm:$0xff] }
 0x3f9   :  { %v4281_v39 = vpop.eup %4280 }
 0x3fa   :  { %v1040_v47 = vmul.f32 %v4281_v39, %v1017_v34  ;;  %v1020_v54 = vpop.xlane.xlu1 %1019  ;;  %vm1045_vm4 = vweird.f32 %v4281_v39  ;;  %v5376_v34 = vld [vmem:[%s6628_s3 + $0x50] sm:$0xff] }
 0x3fb   :  { %4282 = vrcp.f32 %v1020_v54  ;;  %vm1046_vm6 = vmor %vm1044_vm5, %vm1045_vm4  ;;  %v1065_v38 = vand.u32 2147483648, %v1020_v54  ;;  %v1063_v56 = vand.u32 2147483647, %v1020_v54  ;;  %vm1059_vm3 = vweird.f32 %v1020_v54 }
 0x3fc   :  { %v1041_v40 = vsub.f32 1.0, %v1040_v47 }
 0x3fd   :  { %v1066_v44 = vor.u32 1.1754944e-38, %v1065_v38  ;;  %vm1064_vm5 = vcmp.eq.f32.partialorder %v1063_v56, 8.507059e+37 }
 0x3fe   :  { %v1042_v52 = vmul.f32 %v4281_v39, %v1041_v40 }
 0x400   :  { %v1043_v4 = vadd.f32 %v4281_v39, %v1042_v52 }
 0x401   :  { %v4283_v12 = vpop.eup %4282 }
 0x402   :  { %v1047_v23 = vsel %vm1046_vm6, %v4281_v39, %v1043_v4  ;;  %v1055_v35 = vmul.f32 %v4283_v12, %v1020_v54  ;;  %v1023_v6 = vpop.xlane.xlu2 %1022  ;;  %vm1060_vm2 = vweird.f32 %v4283_v12 }
 0x403   :  { %v1052_v25 = vsel %vm1049_vm15, %v1051_v15, %v1047_v23  ;;  %4284 = vrcp.f32 %v1023_v6  ;;  %vm1061_vm4 = vmor %vm1059_vm3, %vm1060_vm2  ;;  %v1080_v31 = vand.u32 2147483648, %v1023_v6  ;;  %v1078_v29 = vand.u32 2147483647, %v1023_v6 }
 0x404   :  { %v1056_v0 = vsub.f32 1.0, %v1055_v35  ;;  %v1053_v5 = vmul.f32 %v5297_v16, %v1052_v25  ;;  %vm1074_vm15 = vweird.f32 %v1023_v6  ;;  %v5397_v35 = vld [vmem:[%s6628_s3 + $0x38] sm:$0xff] }
 0x405   :  { %v1081_v33 = vor.u32 1.1754944e-38, %v1080_v31  ;;  %vm1079_vm3 = vcmp.eq.f32.partialorder %v1078_v29, 8.507059e+37 }
 0x406   :  { %v1057_v18 = vmul.f32 %v4283_v12, %v1056_v0  ;;  %4109 = vmatmul.msk.f32.vlgmr.msra.gmra.mxu0 %vm400_vm0, %v1053_v5  ;;  %4118 = vmatmul.msk.f32.vlgmr.msra.gmra.mxu1 %vm400_vm0, %v1053_v5  ;;  %v5403_v0 = vld [vmem:[%s6628_s3 + $0x30] sm:$0xff] }
 0x407   :  { %2377 = vmatpush.msra.mxu0 %v5335_v17  ;;  %4170 = vmatpush.msk.msra.mxu1 %vm6661_vm1, %v5238_v1 }
 0x408   :  { %v1058_v16 = vadd.f32 %v4283_v12, %v1057_v18 }
 0x409   :  { %v4285_v13 = vpop.eup %4284  ;;  %2378 = vmatpush.msra.mxu0 %v5343_v19  ;;  %2690 = vmatpush.msra.mxu1 %v5349_v10 }
 0x40a   :  { %v1070_v24 = vmul.f32 %v4285_v13, %v1023_v6  ;;  %v1026_v21 = vpop.xlane.xlu0 %1025  ;;  %v1062_v22 = vsel %vm1061_vm4, %v4283_v12, %v1058_v16  ;;  %vm1075_vm6 = vweird.f32 %v4285_v13  ;;  %v5389_v12 = vld [vmem:[%s6628_s3 + $0x40] sm:$0xff]  ;;  %v5409_v16 = vld [vmem:[%s6628_s3 + $0x28] sm:$0xff] }
 0x40b   :  { %4286 = vrcp.f32 %v1026_v21  ;;  %v1067_v59 = vsel %vm1064_vm5, %v1066_v44, %v1062_v22  ;;  %2379 = vmatpush.msra.mxu0 %v5355_v9  ;;  %vm1076_vm2 = vmor %vm1074_vm15, %vm1075_vm6  ;;  %v1095_v4 = vand.u32 2147483648, %v1026_v21  ;;  %v1093_v23 = vand.u32 2147483647, %v1026_v21 }
 0x40c   :  { %v1071_v36 = vsub.f32 1.0, %v1070_v24  ;;  %v1068_v60 = vmul.f32 %v5301_v61, %v1067_v59  ;;  %vm1089_vm5 = vweird.f32 %v1026_v21 }
 0x40d   :  { %2380 = vmatpush.msra.mxu0 %v5362_v43  ;;  %v1096_v25 = vor.u32 1.1754944e-38, %v1095_v4  ;;  %vm1094_vm15 = vcmp.eq.f32.partialorder %v1093_v23, 8.507059e+37 }
 0x40e   :  { %v1072_v32 = vmul.f32 %v4285_v13, %v1071_v36  ;;  %4110 = vmatmul.msk.f32.gmra.mxu0 %vm400_vm0, %v1068_v60  ;;  %4119 = vmatmul.msk.f32.gmra.mxu1 %vm400_vm0, %v1068_v60  ;;  %v5424_v36 = vld [vmem:[%s6628_s3 + $0x18] sm:$0xff] }
 0x40f   :  { %2381 = vmatpush.msra.mxu0 %v5370_v26 }
 0x410   :  { %v1073_v61 = vadd.f32 %v4285_v13, %v1072_v32  ;;  %v5430_v32 = vld [vmem:[%s6628_s3 + $0x10] sm:$0xff] }
 0x411   :  { %v4287_v14 = vpop.eup %4286  ;;  %2382 = vmatpush.msra.mxu0 %v5376_v34 }
 0x412   :  { %v1085_v39 = vmul.f32 %v4287_v14, %v1026_v21  ;;  %v1029_v47 = vpop.xlane.xlu1 %1028  ;;  %v1077_v54 = vsel %vm1076_vm2, %v4285_v13, %v1073_v61  ;;  %vm1090_vm4 = vweird.f32 %v4287_v14  ;;  %v5416_v21 = vld [vmem:[%s6628_s3 + $0x20] sm:$0xff] }
 0x413   :  { %4288 = vrcp.f32 %v1029_v47  ;;  %v1082_v40 = vsel %vm1079_vm3, %v1081_v33, %v1077_v54  ;;  %2383 = vmatpush.msra.mxu0 %v5382_v45  ;;  %vm1091_vm6 = vmor %vm1089_vm5, %vm1090_vm4  ;;  %v1110_v24 = vand.u32 2147483648, %v1029_v47  ;;  %v1108_v59 = vand.u32 2147483647, %v1029_v47 }
 0x414   :  { %v1086_v52 = vsub.f32 1.0, %v1085_v39  ;;  %v1083_v3 = vmul.f32 %v5305_v62, %v1082_v40  ;;  %vm1104_vm3 = vweird.f32 %v1029_v47  ;;  %v5436_v39 = vld [vmem:[%s6628_s3 + $0x8] sm:$0xff] }
 0x415   :  { %2384 = vmatpush.msra.mxu0 %v5389_v12  ;;  %v1111_v31 = vor.u32 1.1754944e-38, %v1110_v24  ;;  %vm1109_vm5 = vcmp.eq.f32.partialorder %v1108_v59, 8.507059e+37 }
 0x416   :  { %v1087_v15 = vmul.f32 %v4287_v14, %v1086_v52  ;;  %4111 = vmatmul.msk.f32.gmra.mxu0 %vm400_vm0, %v1083_v3  ;;  %4120 = vmatmul.msk.f32.gmra.mxu1 %vm400_vm0, %v1083_v3  ;;  %v5443_v52 = vld [vmem:[%s6628_s3] sm:$0xff] }
 0x417   :  { %2385 = vmatpush.msra.mxu0 %v5397_v35 }
 0x418   :  { %v1088_v62 = vadd.f32 %v4287_v14, %v1087_v15 }
 0x419   :  { %v4289_v6 = vpop.eup %4288  ;;  %2386 = vmatpush.msra.mxu0 %v5403_v0 }
 0x41a   :  { %v1100_v5 = vmul.f32 %v4289_v6, %v1029_v47  ;;  %v1032_v38 = vpop.xlane.xlu2 %1031  ;;  %v1092_v18 = vsel %vm1091_vm6, %v4287_v14, %v1088_v62  ;;  %vm1105_vm2 = vweird.f32 %v4289_v6 }
 0x41b   :  { %4290 = vrcp.f32 %v1032_v38  ;;  %v1097_v56 = vsel %vm1094_vm15, %v1096_v25, %v1092_v18  ;;  %2387 = vmatpush.msra.mxu0 %v5409_v16  ;;  %vm1106_vm4 = vmor %vm1104_vm3, %vm1105_vm2  ;;  %v1125_v40 = vand.u32 2147483648, %v1032_v38  ;;  %v1123_v4 = vand.u32 2147483647, %v1032_v38 }
 0x41c   :  { %v1101_v13 = vsub.f32 1.0, %v1100_v5  ;;  %v1098_v44 = vmul.f32 %v5309_v27, %v1097_v56  ;;  %vm1119_vm15 = vweird.f32 %v1032_v38 }
 0x41d   :  { %2388 = vmatpush.msra.mxu0 %v5416_v21  ;;  %v1126_v62 = vor.u32 1.1754944e-38, %v1125_v40  ;;  %vm1124_vm3 = vcmp.eq.f32.partialorder %v1123_v4, 8.507059e+37 }
 0x41e   :  { %v1102_v22 = vmul.f32 %v4289_v6, %v1101_v13  ;;  %4112 = vmatmul.msk.f32.gmra.mxu0 %vm400_vm0, %v1098_v44  ;;  %4121 = vmatmul.msk.f32.gmra.mxu1 %vm400_vm0, %v1098_v44 }
 0x41f   :  { %2389 = vmatpush.msra.mxu0 %v5424_v36 }
 0x420   :  { %v1103_v27 = vadd.f32 %v4289_v6, %v1102_v22 }
 0x421   :  { %v4291_v60 = vpop.eup %4290  ;;  %2390 = vmatpush.msra.mxu0 %v5430_v32 }
 0x422   :  { %v1115_v29 = vmul.f32 %v4291_v60, %v1032_v38  ;;  %v1035_v61 = vpop.xlane.xlu0 %1034  ;;  %v1107_v14 = vsel %vm1106_vm4, %v4289_v6, %v1103_v27  ;;  %vm1120_vm6 = vweird.f32 %v4291_v60 }
 0x423   :  { %4292 = vrcp.f32 %v1035_v61  ;;  %v1112_v33 = vsel %vm1109_vm5, %v1111_v31, %v1107_v14  ;;  %2391 = vmatpush.msra.mxu0 %v5436_v39  ;;  %vm1121_vm2 = vmor %vm1119_vm15, %vm1120_vm6  ;;  %v1140_v13 = vand.u32 2147483648, %v1035_v61  ;;  %v1138_v38 = vand.u32 2147483647, %v1035_v61 }
 0x424   :  { %v1116_v47 = vsub.f32 1.0, %v1115_v29  ;;  %v1113_v54 = vmul.f32 %v5313_v2, %v1112_v33  ;;  %vm1134_vm5 = vweird.f32 %v1035_v61 }
 0x425   :  { %2392 = vmatpush.msra.mxu0 %v5443_v52  ;;  %v1141_v59 = vor.u32 1.1754944e-38, %v1140_v13  ;;  %vm1139_vm15 = vcmp.eq.f32.partialorder %v1138_v38, 8.507059e+37 }
 0x426   :  { %v1117_v3 = vmul.f32 %v4291_v60, %v1116_v47  ;;  %4113 = vmatmul.msk.f32.gmra.mxu0 %vm400_vm0, %v1113_v54  ;;  %4122 = vmatmul.msk.f32.gmra.mxu1 %vm400_vm0, %v1113_v54 }
 0x428   :  { %v1118_v15 = vadd.f32 %v4291_v60, %v1117_v3 }
 0x429   :  { %v4293_v23 = vpop.eup %4292 }
 0x42a   :  { %v1130_v2 = vmul.f32 %v4293_v23, %v1035_v61  ;;  %v1038_v6 = vpop.xlane.xlu1 %1037  ;;  %v1122_v25 = vsel %vm1121_vm2, %v4291_v60, %v1118_v15  ;;  %vm1135_vm4 = vweird.f32 %v4293_v23 }
 0x42b   :  { %4294 = vrcp.f32 %v1038_v6  ;;  %v1127_v5 = vsel %vm1124_vm3, %v1126_v62, %v1122_v25  ;;  %vm1136_vm6 = vmor %vm1134_vm5, %vm1135_vm4  ;;  %v1155_v14 = vand.u32 2147483648, %v1038_v6  ;;  %v1153_v47 = vand.u32 2147483647, %v1038_v6 }
 0x42c   :  { %v1131_v18 = vsub.f32 1.0, %v1130_v2  ;;  %v1128_v56 = vmul.f32 %v5317_v7, %v1127_v5  ;;  %vm1149_vm3 = vweird.f32 %v1038_v6 }
 0x42d   :  { %v1156_v54 = vor.u32 1.1754944e-38, %v1155_v14  ;;  %vm1154_vm4 = vcmp.eq.f32.partialorder %v1153_v47, 8.507059e+37 }
 0x42e   :  { %v1132_v44 = vmul.f32 %v4293_v23, %v1131_v18  ;;  %4114 = vmatmul.msk.f32.gmra.mxu0 %vm400_vm0, %v1128_v56  ;;  %4123 = vmatmul.msk.f32.gmra.mxu1 %vm400_vm0, %v1128_v56 }
 0x430   :  { %v1133_v24 = vadd.f32 %v4293_v23, %v1132_v44 }
 0x431   :  { %v4295_v22 = vpop.eup %4294 }
 0x432   :  { %v1145_v27 = vmul.f32 %v4295_v22, %v1038_v6  ;;  %v1137_v60 = vsel %vm1136_vm6, %v4293_v23, %v1133_v24  ;;  %vm1150_vm2 = vweird.f32 %v4295_v22 }
 0x433   :  { %v1142_v31 = vsel %vm1139_vm15, %v1141_v59, %v1137_v60  ;;  %vm1151_vm1 = vmor %vm1149_vm3, %vm1150_vm2 }
 0x434   :  { %v1146_v29 = vsub.f32 1.0, %v1145_v27  ;;  %v1143_v7 = vmul.f32 %v5321_v20, %v1142_v31 }
 0x436   :  { %v1147_v33 = vmul.f32 %v4295_v22, %v1146_v29  ;;  %4115 = vmatmul.msk.f32.gmra.mxu0 %vm400_vm0, %v1143_v7  ;;  %4124 = vmatmul.msk.f32.gmra.mxu1 %vm400_vm0, %v1143_v7 }
 0x438   :  { %v1148_v61 = vadd.f32 %v4295_v22, %v1147_v33 }
 0x43a   :  { %v1152_v40 = vsel %vm1151_vm1, %v4295_v22, %v1148_v61  ;;  %vm6713_vm1 = vcmask 1041408  }
 0x43b   :  { %v1157_v3 = vsel %vm1154_vm4, %v1156_v54, %v1152_v40  ;;  %vm6715_vm2 = vmmov %vm6713_vm1 }
 0x43c   :  { %v1158_v4 = vmul.f32 %v5325_v41, %v1157_v3 }
 0x43e   :  { %4116 = vmatmul.msk.f32.gmra.mxu0 %vm400_vm0, %v1158_v4  ;;  %4125 = vmatmul.msk.f32.gmra.mxu1 %vm400_vm0, %v1158_v4 }
 0x483   :  { %v1200_v20 = vpop.f32.mrf.mxu0  ;;  %v1241_v15 = vpop.f32.mrf.mxu1 }
 0x484   :  { %v1266_v18 = vmul.f32 %v1241_v15, %v4908_v57  ;;  %v1265_v56 = vmul.f32 %v1200_v20, %v4912_v58 }
 0x486   :  { %v1287_v13 = vsel %vm533_vm7, %v1266_v18, 0.0  ;;  %v1281_v44 = vrot.slane %v1265_v56, 4 }
 0x487   :  { %v1288_v41 = vrot.slane %v1287_v13, 4 }
 0x488   :  { %v1282_v59 = vadd.f32 %v1281_v44, %v1265_v56 }
 0x489   :  { %v1289_v27 = vadd.f32 %v1288_v41, %v1287_v13 }
 0x48a   :  { %v1283_v33 = vrot.slane %v1282_v59, 2 }
 0x48b   :  { %v1203_v23 = vpop.f32.mrf.mxu0  ;;  %v1244_v62 = vpop.f32.mrf.mxu1  ;;  %v1290_v61 = vrot.slane %v1289_v27, 2 }
 0x48c   :  { %v1267_v22 = vmul.f32 %v1203_v23, %v6700_v28  ;;  %v1268_v31 = vmul.f32 %v1244_v62, %v6701_v50 }
 0x48e   :  { %v1294_v7 = vrot.slane %v1267_v22, 4  ;;  %v1300_v4 = vsel %vm533_vm7, %v1268_v31, 0.0 }
 0x490   :  { %v1295_v62 = vadd.f32 %v1294_v7, %v1267_v22 }
 0x493   :  { %v1206_v2 = vpop.f32.mrf.mxu0  ;;  %v1247_v25 = vpop.f32.mrf.mxu1 }
 0x494   :  { %v1269_v60 = vmul.f32 %v1206_v2, %v6702_v37  ;;  %v1270_v47 = vmul.f32 %v1247_v25, %v6703_v48  ;;  %v1301_v25 = vrot.slane %v1300_v4, 4 }
 0x496   :  { %v1307_v54 = vrot.slane %v1269_v60, 4  ;;  %v1313_v18 = vsel %vm533_vm7, %v1270_v47, 0.0  ;;  %v1302_v7 = vadd.f32 %v1301_v25, %v1300_v4 }
 0x498   :  { %v1308_v44 = vadd.f32 %v1307_v54, %v1269_v60 }
 0x49b   :  { %v1209_v5 = vpop.f32.mrf.mxu0  ;;  %v1250_v6 = vpop.f32.mrf.mxu1 }
 0x49c   :  { %v1271_v29 = vmul.f32 %v1209_v5, %v6704_v11  ;;  %v1272_v15 = vmul.f32 %v1250_v6, %v6705_v51  ;;  %v1284_v5 = vadd.f32 %v1283_v33, %v1282_v59  ;;  %v1296_v11 = vrot.slane %v1295_v62, 2 }
 0x49d   :  { %v1314_v6 = vrot.slane %v1313_v18, 4  ;;  %v1309_v33 = vrot.slane %v1308_v44, 2 }
 0x49e   :  { %v1320_v20 = vrot.slane %v1271_v29, 4  ;;  %v1326_v31 = vsel %vm533_vm7, %v1272_v15, 0.0 }
 0x49f   :  { %v1327_v47 = vrot.slane %v1326_v31, 4  ;;  %v1310_v25 = vadd.f32 %v1309_v33, %v1308_v44 }
 0x4a1   :  { %v1311_v28 = vrot.slane %v1310_v25, 1 }
 0x4a3   :  { %v1212_v38 = vpop.f32.mrf.mxu0  ;;  %v1253_v24 = vpop.f32.mrf.mxu1 }
 0x4a4   :  { %v1273_v14 = vmul.f32 %v1212_v38, %v6706_v55  ;;  %v1274_v56 = vmul.f32 %v1253_v24, %v6707_v30  ;;  %v1291_v38 = vadd.f32 %v1290_v61, %v1289_v27  ;;  %v1321_v55 = vadd.f32 %v1320_v20, %v1271_v29 }
 0x4a5   :  { %v1297_v61 = vadd.f32 %v1296_v11, %v1295_v62  ;;  %v1315_v20 = vadd.f32 %v1314_v6, %v1313_v18 }
 0x4a6   :  { %v1333_v2 = vrot.slane %v1273_v14, 4  ;;  %v1339_v22 = vsel %vm533_vm7, %v1274_v56, 0.0  ;;  %v1292_v54 = vrot.slane %v1291_v38, 1 }
 0x4a7   :  { %v1340_v15 = vrot.slane %v1339_v22, 4 }
 0x4a8   :  { %v1334_v51 = vadd.f32 %v1333_v2, %v1273_v14  ;;  %v5480_v62 = vadd.f32 %v1292_v54, %v1291_v38 }
 0x4a9   :  { %v1341_v11 = vadd.f32 %v1340_v15, %v1339_v22 }
 0x4aa   :  { %v1335_v14 = vrot.slane %v1334_v51, 2 }
 0x4ab   :  { %v1215_v40 = vpop.f32.mrf.mxu0  ;;  %v1256_v3 = vpop.f32.mrf.mxu1  ;;  %v1342_v22 = vrot.slane %v1341_v11, 2 }
 0x4ac   :  { %v1275_v23 = vmul.f32 %v1215_v40, %v6708_v46  ;;  %v1276_v41 = vmul.f32 %v1256_v3, %v6709_v53  ;;  %v1285_v40 = vrot.slane %v1284_v5, 1  ;;  %v1322_v3 = vrot.slane %v1321_v55, 2 }
 0x4ae   :  { %v1346_v13 = vrot.slane %v1275_v23, 4  ;;  %v1352_v24 = vsel %vm533_vm7, %v1276_v41, 0.0  ;;  %v1328_v41 = vadd.f32 %v1327_v47, %v1326_v31  ;;  %v5478_v30 = vadd.f32 %v1285_v40, %v1284_v5 }
 0x4af   :  { %v1353_v56 = vrot.slane %v1352_v24, 4  ;;  %v1323_v48 = vadd.f32 %v1322_v3, %v1321_v55  ;;  %v5487_v3 = vadd.f32 %v1311_v28, %v1310_v25 }
 0x4b0   :  { %v1347_v59 = vadd.f32 %v1346_v13, %v1275_v23  ;;  %v1303_v13 = vrot.slane %v1302_v7, 2 }
 0x4b1   :  { %v1354_v6 = vadd.f32 %v1353_v56, %v1352_v24  ;;  %v1324_v33 = vrot.slane %v1323_v48, 1  ;;  %v1389_v25 = vmul.f32 %v5487_v3, %v5487_v3 }
 0x4b2   :  { %v1348_v2 = vrot.slane %v1347_v59, 2  ;;  %v1304_v50 = vadd.f32 %v1303_v13, %v1302_v7 }
 0x4b3   :  { %v1218_v46 = vpop.f32.mrf.mxu0  ;;  %v1259_v60 = vpop.f32.mrf.mxu1  ;;  %v1355_v24 = vrot.slane %v1354_v6, 2 }
 0x4b4   :  { %v1277_v27 = vmul.f32 %v1218_v46, %v6710_v49  ;;  %v1278_v29 = vmul.f32 %v1259_v60, %v6711_v8  ;;  %v1298_v46 = vrot.slane %v1297_v61, 1  ;;  %v1316_v49 = vrot.slane %v1315_v20, 2 }
 0x4b5   :  { %v1336_v60 = vadd.f32 %v1335_v14, %v1334_v51  ;;  %v1349_v18 = vadd.f32 %v1348_v2, %v1347_v59  ;;  %v1356_v28 = vadd.f32 %v1355_v24, %v1354_v6 }
 0x4b6   :  { %v1359_v23 = vrot.slane %v1277_v27, 4  ;;  %v1365_v4 = vsel %vm533_vm7, %v1278_v29, 0.0  ;;  %v1329_v29 = vrot.slane %v1328_v41, 2  ;;  %v5484_v47 = vadd.f32 %v1298_v46, %v1297_v61 }
 0x4b7   :  { %v1366_v53 = vrot.slane %v1365_v4, 4  ;;  %v1317_v51 = vadd.f32 %v1316_v49, %v1315_v20  ;;  %v1337_v38 = vrot.slane %v1336_v60, 1  ;;  %v1350_v59 = vrot.slane %v1349_v18, 1 }
 0x4b8   :  { %v1360_v37 = vadd.f32 %v1359_v23, %v1277_v27  ;;  %v1330_v15 = vadd.f32 %v1329_v29, %v1328_v41  ;;  %v1387_v49 = vmul.f32 %v5484_v47, %v5484_v47  ;;  %v1343_v20 = vadd.f32 %v1342_v22, %v1341_v11 }
 0x4b9   :  { %v1367_v57 = vadd.f32 %v1366_v53, %v1365_v4  ;;  %v5493_v61 = vadd.f32 %v1337_v38, %v1336_v60  ;;  %v1318_v23 = vrot.slane %v1317_v51, 1  ;;  %v5495_v4 = vadd.f32 %v1350_v59, %v1349_v18 }
 0x4ba   :  { %v1361_v8 = vrot.slane %v1360_v37, 2  ;;  %v1385_v29 = vmul.f32 %v5478_v30, %v5478_v30  ;;  %v1331_v11 = vrot.slane %v1330_v15, 1  ;;  %v1344_v6 = vrot.slane %v1343_v20, 1 }
 0x4bb   :  { %v1221_v44 = vpop.f32.mrf.mxu0  ;;  %v1262_v31 = vpop.f32.mrf.mxu1  ;;  %v1368_v27 = vrot.slane %v1367_v57, 2  ;;  %v1393_v18 = vmul.f32 %v5493_v61, %v5493_v61  ;;  %v5513_v22 = vadd.f32 %v1318_v23, %v1317_v51  ;;  %v1386_v23 = vmul.f32 %v5480_v62, %v5480_v62 }
 0x4bc   :  { %v1362_v5 = vadd.f32 %v1361_v8, %v1360_v37  ;;  %v1279_v55 = vmul.f32 %v1221_v44, %v5071_v42  ;;  %v1280_v40 = vmul.f32 %v1262_v31, %v6712_v63  ;;  %v1305_v37 = vrot.slane %v1304_v50, 1 }
 0x4bd   :  { %v5489_v8 = vadd.f32 %v1324_v33, %v1323_v48  ;;  %v1369_v48 = vadd.f32 %v1368_v27, %v1367_v57  ;;  %v1395_v57 = vmul.f32 %v5495_v4, %v5495_v4  ;;  %v5517_v24 = vadd.f32 %v1331_v11, %v1330_v15 }
 0x4be   :  { %v1372_v54 = vrot.slane %v1279_v55, 4  ;;  %v1378_v7 = vsel %vm533_vm7, %v1280_v40, 0.0  ;;  %v1363_v53 = vrot.slane %v1362_v5, 1  ;;  %v5505_v31 = vadd.f32 %v1305_v37, %v1304_v50 }
 0x4bf   :  { %v1379_v14 = vrot.slane %v1378_v7, 4  ;;  %v1391_v60 = vmul.f32 %v5489_v8, %v5489_v8  ;;  %v1370_v59 = vrot.slane %v1369_v48, 1  ;;  %v5522_v27 = vadd.f32 %v1344_v6, %v1343_v20 }
 0x4c0   :  { %v1373_v2 = vadd.f32 %v1372_v54, %v1279_v55  ;;  %v5499_v46 = vadd.f32 %v1363_v53, %v1362_v5  ;;  %v1417_v5 = vsel %vm664_vm8, %v1387_v49, %v1385_v29  ;;  %v1357_v55 = vrot.slane %v1356_v28, 1 }
 0x4c1   :  { %v1380_v56 = vadd.f32 %v1379_v14, %v1378_v7  ;;  %v1418_v38 = vsel %vm666_vm9, %v1389_v25, %v1417_v5  ;;  %v1388_v37 = vmul.f32 %v5505_v31, %v5505_v31  ;;  %v1390_v49 = vmul.f32 %v5513_v22, %v5513_v22 }
 0x4c2   :  { %v1374_v13 = vrot.slane %v1373_v2, 2  ;;  %v1397_v50 = vmul.f32 %v5499_v46, %v5499_v46  ;;  %v1419_v53 = vsel %vm668_vm10, %v1391_v60, %v1418_v38  ;;  %v5527_v51 = vadd.f32 %v1357_v55, %v1356_v28  ;;  %v5572_v55 = vld [vmem:[%s6628_s3 + $0x90] sm:$0xff]  ;;  %v5584_v38 = vld [vmem:[%s6628_s3 + $0x80] sm:$0xff] }
 0x4c3   :  { %v1381_v41 = vrot.slane %v1380_v56, 2  ;;  %v1420_v14 = vsel %vm670_vm11, %v1393_v18, %v1419_v53  ;;  %v1424_v29 = vsel %vm664_vm8, %v1388_v37, %v1386_v23 }
 0x4c4   :  { %v1375_v44 = vadd.f32 %v1374_v13, %v1373_v2  ;;  %v1421_v15 = vsel %vm672_vm12, %v1395_v57, %v1420_v14  ;;  %v1392_v13 = vmul.f32 %v5517_v24, %v5517_v24  ;;  %v1425_v60 = vsel %vm666_vm9, %v1390_v49, %v1424_v29  ;;  %v5566_v57 = vld [vmem:[%s6628_s3 + $0x98] sm:$0xff] }
 0x4c5   :  { %v1382_v33 = vadd.f32 %v1381_v41, %v1380_v56  ;;  %v5534_v56 = vadd.f32 %v1370_v59, %v1369_v48  ;;  %v1422_v20 = vsel %vm674_vm13, %v1397_v50, %v1421_v15  ;;  %v1394_v41 = vmul.f32 %v5522_v27, %v5522_v27 }
 0x4c6   :  { %v1376_v40 = vrot.slane %v1375_v44, 1  ;;  %v1396_v48 = vmul.f32 %v5527_v51, %v5527_v51  ;;  %v1426_v18 = vsel %vm668_vm10, %v1392_v13, %v1425_v60  ;;  %v6717_v13 = vld [vmem:[#allocation3_spill] sm:$0xff] }
 0x4c7   :  { %v1383_v7 = vrot.slane %v1382_v33, 1  ;;  %v1398_v11 = vmul.f32 %v5534_v56, %v5534_v56  ;;  %v1427_v6 = vsel %vm670_vm11, %v1394_v41, %v1426_v18 }
 0x4c8   :  { %v5519_v54 = vadd.f32 %v1376_v40, %v1375_v44  ;;  %v5578_v40 = vld [vmem:[%s6628_s3 + $0x88] sm:$0xff] }
 0x4c9   :  { %v5541_v28 = vadd.f32 %v1383_v7, %v1382_v33  ;;  %v1428_v33 = vsel %vm672_vm12, %v1396_v48, %v1427_v6  ;;  %v6719_v6 = vld [vmem:[#allocation7_spill] sm:$0xff] }
 0x4ca   :  { %v1399_v2 = vmul.f32 %v5519_v54, %v5519_v54  ;;  %v1429_v5 = vsel %vm674_vm13, %v1398_v11, %v1428_v33 }
 0x4cb   :  { %v1400_v44 = vmul.f32 %v5541_v28, %v5541_v28 }
 0x4cc   :  { %v1423_v25 = vsel %vm676_vm14, %v1399_v2, %v1422_v20 }
 0x4cd   :  { %1450 = vmatmul.f32.vlgmr.msrb.gmra.mxu3 %v1423_v25 }
 0x4ce   :  { %4127 = vmatpush.msk.msrb.mxu3 %vm6713_vm1, %v5238_v1  ;;  %v1430_v1 = vsel %vm676_vm14, %v1400_v44, %v1429_v5  ;;  %v6718_v44 = vld [vmem:[#allocation5_spill] sm:$0xff] }
 0x4d0   :  { %1502 = vmatpush.msrb.mxu3 %v5349_v10 }
 0x4d5   :  { %4126 = vmatmul.msk.f32.vlgmr.msra.gmra.mxu3 %vm533_vm7, %v1430_v1 }
 0x4d6   :  { %1684 = vmatpush.msra.mxu3 %v5566_v57 }
 0x4d8   :  { %1685 = vmatpush.msra.mxu3 %v5572_v55 }
 0x4da   :  { %1686 = vmatpush.msra.mxu3 %v5578_v40 }
 0x4dc   :  { %1687 = vmatpush.msra.mxu3 %v5584_v38 }
 0x550   :  { %v1451_v50 = vpop.f32.mrf.mxu3 }
 0x551   :  { %v1452_v59 = vadd.f32 1e-07, %v1451_v50  ;;  %v6721_v50 = vld [vmem:[#allocation9_spill] sm:$0xff] }
 0x558   :  { %v1471_v7 = vpop.f32.mrf.mxu3 }
 0x559   :  { %v1472_v53 = vadd.f32 %v1471_v7, %v1452_v59 }
 0x55b   :  { %4296 = vrsqrt.f32 %v1472_v53  ;;  %vm1480_vm6 = vweird.f32 %v1472_v53 }
 0x561   :  { %v4297_v14 = vpop.eup %4296 }
 0x562   :  { %v1475_v37 = vmul.f32 %v4297_v14, %v1472_v53  ;;  %vm1481_vm5 = vweird.f32 %v4297_v14 }
 0x563   :  { %vm1482_vm15 = vmor %vm1480_vm6, %vm1481_vm5 }
 0x564   :  { %v1476_v2 = vmul.f32 %v4297_v14, %v1475_v37 }
 0x566   :  { %v1477_v15 = vmul.f32 0.5, %v1476_v2  ;;  %v6722_v2 = vld [vmem:[#allocation8_spill] sm:$0xff] }
 0x568   :  { %v1478_v49 = vsub.f32 1.5, %v1477_v15 }
 0x56a   :  { %v1479_v20 = vmul.f32 %v4297_v14, %v1478_v49  ;;  %v6723_v49 = vld [vmem:[#allocation11_spill] sm:$0xff] }
 0x56c   :  { %v1483_v23 = vsel %vm1482_vm15, %v4297_v14, %v1479_v20  ;;  %vm6728_vm15 = vmmov %vm6715_vm2 }
 0x56d   :  { %4128 = vmatmul.msk.f32.vlgmr.msrb.gmra.mxu3 %vm400_vm0, %v1483_v23  ;;  %4130 = vmatmul.msk.f32.vlgmr.msrb.gmra.mxu2 %vm400_vm0, %v1483_v23 }
 0x56e   :  { %2180 = vmatpush.msrb.mxu3 %v5335_v17  ;;  %2212 = vmatpush.msrb.mxu2 %v5566_v57 }
 0x570   :  { %2181 = vmatpush.msrb.mxu3 %v5343_v19  ;;  %2213 = vmatpush.msrb.mxu2 %v5572_v55 }
 0x572   :  { %2182 = vmatpush.msrb.mxu3 %v5355_v9  ;;  %2214 = vmatpush.msrb.mxu2 %v5578_v40 }
 0x574   :  { %2183 = vmatpush.msrb.mxu3 %v5362_v43  ;;  %2215 = vmatpush.msrb.mxu2 %v5584_v38 }
 0x576   :  { %2184 = vmatpush.msrb.mxu3 %v5370_v26 }
 0x578   :  { %2185 = vmatpush.msrb.mxu3 %v5376_v34 }
 0x57a   :  { %2186 = vmatpush.msrb.mxu3 %v5382_v45 }
 0x57c   :  { %2187 = vmatpush.msrb.mxu3 %v5389_v12 }
 0x57e   :  { %2188 = vmatpush.msrb.mxu3 %v5397_v35 }
 0x580   :  { %2189 = vmatpush.msrb.mxu3 %v5403_v0  ;;  %v6714_v0 = vld [vmem:[#allocation2_spill] sm:$0xff] }
 0x582   :  { %2190 = vmatpush.msrb.mxu3 %v5409_v16 }
 0x584   :  { %2191 = vmatpush.msrb.mxu3 %v5416_v21 }
 0x586   :  { %2192 = vmatpush.msrb.mxu3 %v5424_v36 }
 0x588   :  { %2193 = vmatpush.msrb.mxu3 %v5430_v32 }
 0x58a   :  { %2194 = vmatpush.msrb.mxu3 %v5436_v39 }
 0x58c   :  { %2195 = vmatpush.msrb.mxu3 %v5443_v52 }
 0x5f0   :  { %v5609_v17 = vpop.f32.mrf.mxu3  ;;  %v5611_v19 = vpop.f32.mrf.mxu2 }
 0x5f1   :  { %v1559_v9 = vmul.f32 %v5609_v17, %v5478_v30  ;;  %v1560_v43 = vmul.f32 %v5611_v19, %v5480_v62  ;;  %v1529_v26 = vrot.slane %v5609_v17, 1  ;;  %v1530_v34 = vrot.slane %v5611_v19, 1  ;;  %v5627_v30 = vld [vmem:[%s6627_s2 + $0x10] sm:$0x3] }
 0x5f2   :  { %v1531_v52 = vrot.slane %v5609_v17, 2  ;;  %v1532_v62 = vrot.slane %v5611_v19, 2  ;;  %v1534_v11 = vrot.slane %v5611_v19, 3  ;;  %v1537_v14 = vrot.slane %v5609_v17, 5 }
 0x5f3   :  { %v1575_v45 = vperm.slane %v1559_v9, 0  ;;  %v1576_v12 = vperm.slane %v1560_v43, 0  ;;  %v1561_v21 = vmul.f32 %v1529_v26, %v5484_v47  ;;  %v1562_v36 = vmul.f32 %v1530_v34, %v5505_v31  ;;  %v6716_v47 = vld [vmem:[#allocation4_spill] sm:$0xff]  ;;  %v6724_v34 = vld [vmem:[#allocation10_spill] sm:$0xff] }
 0x5f4   :  { %v1563_v41 = vmul.f32 %v1531_v52, %v5487_v3  ;;  %v1564_v29 = vmul.f32 %v1532_v62, %v5513_v22  ;;  %v1566_v22 = vmul.f32 %v1534_v11, %v5517_v24  ;;  %v1538_v37 = vrot.slane %v5611_v19, 5  ;;  %v6727_v62 = vld [vmem:[#allocation18_spill] sm:$0xff] }
 0x5f5   :  { %v1591_v35 = vmul.f32 %v1575_v45, %v4912_v58  ;;  %v1592_v16 = vmul.f32 %v1576_v12, %v6714_v0  ;;  %v1577_v32 = vperm.slane %v1561_v21, 0  ;;  %v1578_v39 = vperm.slane %v1562_v36, 0  ;;  %v6725_v12 = vld [vmem:[#allocation12_spill] sm:$0xff] }
 0x5f6   :  { %v1579_v48 = vperm.slane %v1563_v41, 0  ;;  %v1580_v60 = vperm.slane %v1564_v29, 0  ;;  %v1582_v1 = vperm.slane %v1566_v22, 0  ;;  %v1569_v23 = vmul.f32 %v1537_v14, %v5495_v4 }
 0x5f7   :  { %1647 = vmatmul.f32.vlgmr.msrb.gmra.mxu0 %v1591_v35  ;;  %4131 = vmatmul.msk.f32.vlgmr.msra.gmra.mxu3 %vm533_vm7, %v1592_v16  ;;  %v1593_v31 = vmul.f32 %v1577_v32, %v6716_v47  ;;  %v1594_v25 = vmul.f32 %v1578_v39, %v6717_v13  ;;  %v1570_v9 = vmul.f32 %v1538_v37, %v5527_v51  ;;  %v1539_v43 = vrot.slane %v5609_v17, 6  ;;  %v6726_v39 = vld [vmem:[#allocation16_spill] sm:$0xff] }
 0x5f8   :  { %4158 = vmatpush.msk.msra.mxu3 %vm6715_vm2, %v5627_v30  ;;  %2958 = vmatpush.msrb.mxu0 %v5566_v57  ;;  %v1595_v18 = vmul.f32 %v1579_v48, %v6718_v44  ;;  %v1596_v33 = vmul.f32 %v1580_v60, %v6719_v6  ;;  %v1535_v57 = vrot.slane %v5609_v17, 4  ;;  %v1598_v59 = vmul.f32 %v1582_v1, %v6721_v50 }
 0x5f9   :  { %v1540_v26 = vrot.slane %v5611_v19, 6  ;;  %v1571_v16 = vmul.f32 %v1539_v43, %v5499_v46  ;;  %v1541_v36 = vrot.slane %v5609_v17, 7  ;;  %v1542_v32 = vrot.slane %v5611_v19, 7 }
 0x5fa   :  { %2248 = vmatpush.msra.mxu3 %v5349_v10  ;;  %2959 = vmatpush.msrb.mxu0 %v5572_v55  ;;  %v1533_v10 = vrot.slane %v5609_v17, 3  ;;  %v1536_v55 = vrot.slane %v5611_v19, 4  ;;  %v1567_v7 = vmul.f32 %v1535_v57, %v5493_v61  ;;  %v1585_v61 = vperm.slane %v1569_v23, 0 }
 0x5fb   :  { %v1572_v21 = vmul.f32 %v1540_v26, %v5534_v56  ;;  %v1587_v4 = vperm.slane %v1571_v16, 0  ;;  %v1574_v41 = vmul.f32 %v1542_v32, %v5541_v28 }
 0x5fc   :  { %2960 = vmatpush.msrb.mxu0 %v5578_v40  ;;  %v1565_v3 = vmul.f32 %v1533_v10, %v5489_v8  ;;  %v6720_v40 = vld [vmem:[#allocation6_spill] sm:$0xff]  ;;  %v1568_v53 = vmul.f32 %v1536_v55, %v5522_v27  ;;  %v1583_v8 = vperm.slane %v1567_v7, 0  ;;  %v1586_v27 = vperm.slane %v1570_v9, 0 }
 0x5fd   :  { %v1601_v45 = vmul.f32 %v1585_v61, %v6724_v34  ;;  %v1588_v51 = vperm.slane %v1572_v21, 0  ;;  %v1603_v52 = vmul.f32 %v1587_v4, %v6726_v39  ;;  %v1590_v56 = vperm.slane %v1574_v41, 0 }
 0x5fe   :  { %2961 = vmatpush.msrb.mxu0 %v5584_v38  ;;  %v1581_v5 = vperm.slane %v1565_v3, 0  ;;  %v1584_v24 = vperm.slane %v1568_v53, 0  ;;  %v1599_v15 = vmul.f32 %v1583_v8, %v6722_v2  ;;  %v1602_v35 = vmul.f32 %v1586_v27, %v6725_v12 }
 0x5ff   :  { %1650 = vmatmul.f32.gmra.mxu0 %v1593_v31  ;;  %4132 = vmatmul.msk.f32.gmra.mxu3 %vm533_vm7, %v1594_v25  ;;  %v1604_v31 = vmul.f32 %v1588_v51, %v6727_v62  ;;  %v1573_v25 = vmul.f32 %v1541_v36, %v5519_v54  ;;  %v1606_v48 = vmul.f32 %v1590_v56, %v6712_v63 }
 0x600   :  { %v1597_v38 = vmul.f32 %v1581_v5, %v6720_v40  ;;  %v1600_v20 = vmul.f32 %v1584_v24, %v6723_v49 }
 0x601   :  { %v1589_v46 = vperm.slane %v1573_v25, 0 }
 0x603   :  { %v1605_v29 = vmul.f32 %v1589_v46, %v5071_v42 }
 0x607   :  { %1653 = vmatmul.f32.gmra.mxu0 %v1595_v18  ;;  %4133 = vmatmul.msk.f32.gmra.mxu3 %vm533_vm7, %v1596_v33 }
 0x60f   :  { %1656 = vmatmul.f32.gmra.mxu0 %v1597_v38  ;;  %4134 = vmatmul.msk.f32.gmra.mxu3 %vm533_vm7, %v1598_v59 }
 0x617   :  { %1659 = vmatmul.f32.gmra.mxu0 %v1599_v15  ;;  %4135 = vmatmul.msk.f32.gmra.mxu3 %vm533_vm7, %v1600_v20 }
 0x61f   :  { %1662 = vmatmul.f32.gmra.mxu0 %v1601_v45  ;;  %4136 = vmatmul.msk.f32.gmra.mxu3 %vm533_vm7, %v1602_v35 }
 0x627   :  { %1665 = vmatmul.f32.gmra.mxu0 %v1603_v52  ;;  %4137 = vmatmul.msk.f32.gmra.mxu3 %vm533_vm7, %v1604_v31 }
 0x62f   :  { %1668 = vmatmul.f32.gmra.mxu0 %v1605_v29  ;;  %4138 = vmatmul.msk.f32.gmra.mxu3 %vm533_vm7, %v1606_v48 }
 0x674   :  { %v1648_v17 = vpop.f32.mrf.mxu0 }
 0x67a   :  { %v1689_v19 = vpop.f32.mrf.mxu3 }
 0x67b   :  { %v1690_v60 = vadd.f32 %v1689_v19, %v1648_v17 }
 0x67c   :  { %v1651_v10 = vpop.f32.mrf.mxu0 }
 0x67d   :  { %v1713_v54 = vsel %vm400_vm0, %v1690_v60, -inf }
 0x67e   :  { %1714 = vmax.xlane.f32.xlu2 %v1713_v54 }
 0x682   :  { %v1692_v28 = vpop.f32.mrf.mxu3 }
 0x683   :  { %v1693_v11 = vadd.f32 %v1692_v28, %v1651_v10 }
 0x684   :  { %v1654_v18 = vpop.f32.mrf.mxu0 }
 0x685   :  { %v1716_v33 = vsel %vm400_vm0, %v1693_v11, -inf }
 0x686   :  { %1717 = vmax.xlane.f32.xlu0 %v1716_v33 }
 0x68a   :  { %v1695_v3 = vpop.f32.mrf.mxu3 }
 0x68b   :  { %v1696_v22 = vadd.f32 %v1695_v3, %v1654_v18 }
 0x68c   :  { %v1657_v5 = vpop.f32.mrf.mxu0 }
 0x68d   :  { %v1719_v1 = vsel %vm400_vm0, %v1696_v22, -inf }
 0x68e   :  { %1720 = vmax.xlane.f32.xlu1 %v1719_v1 }
 0x692   :  { %v1698_v57 = vpop.f32.mrf.mxu3 }
 0x693   :  { %v1699_v55 = vadd.f32 %v1698_v57, %v1657_v5 }
 0x694   :  { %v1660_v38 = vpop.f32.mrf.mxu0 }
 0x695   :  { %v1722_v59 = vsel %vm400_vm0, %v1699_v55, -inf }
 0x696   :  { %1723 = vmax.xlane.f32.xlu2 %v1722_v59 }
 0x69a   :  { %v1701_v7 = vpop.f32.mrf.mxu3 }
 0x69b   :  { %v1702_v53 = vadd.f32 %v1701_v7, %v1660_v38 }
 0x69c   :  { %v1663_v24 = vpop.f32.mrf.mxu0 }
 0x69d   :  { %v1725_v8 = vsel %vm400_vm0, %v1702_v53, -inf }
 0x69e   :  { %1726 = vmax.xlane.f32.xlu0 %v1725_v8 }
 0x6a2   :  { %v1704_v14 = vpop.f32.mrf.mxu3 }
 0x6a3   :  { %v1705_v37 = vadd.f32 %v1704_v14, %v1663_v24 }
 0x6a4   :  { %v1666_v20 = vpop.f32.mrf.mxu0 }
 0x6a5   :  { %v1728_v15 = vsel %vm400_vm0, %v1705_v37, -inf }
 0x6a6   :  { %1729 = vmax.xlane.f32.xlu1 %v1728_v15 }
 0x6aa   :  { %v1707_v23 = vpop.f32.mrf.mxu3 }
 0x6ab   :  { %v1708_v9 = vadd.f32 %v1707_v23, %v1666_v20 }
 0x6ac   :  { %v1669_v27 = vpop.f32.mrf.mxu0 }
 0x6ad   :  { %v1731_v61 = vsel %vm400_vm0, %v1708_v9, -inf }
 0x6ae   :  { %1732 = vmax.xlane.f32.xlu2 %v1731_v61 }
 0x6b2   :  { %v1710_v43 = vpop.f32.mrf.mxu3 }
 0x6b3   :  { %v1711_v26 = vadd.f32 %v1710_v43, %v1669_v27 }
 0x6b5   :  { %v1734_v45 = vsel %vm400_vm0, %v1711_v26, -inf }
 0x6b6   :  { %1735 = vmax.xlane.f32.xlu1 %v1734_v45 }
 0x6f1   :  { %v1715_v35 = vpop.xlane.xlu2 %1714 }
 0x6f2   :  { %v1737_v16 = vsub.f32 %v1690_v60, %v1715_v35 }
 0x6f4   :  { %v1745_v21 = vmul.f32 1.442695, %v1737_v16 }
 0x6f6   :  { %4298 = vpow2.f32 %v1745_v21 }
 0x6f9   :  { %v1718_v4 = vpop.xlane.xlu0 %1717 }
 0x6fa   :  { %v1738_v51 = vsub.f32 %v1693_v11, %v1718_v4 }
 0x6fc   :  { %v5689_v36 = vpop.eup %4298  ;;  %v1747_v32 = vmul.f32 1.442695, %v1738_v51 }
 0x6fd   :  { %v1761_v52 = vsel %vm400_vm0, %v5689_v36, 0.0 }
 0x6fe   :  { %4300 = vpow2.f32 %v1747_v32  ;;  %1762 = vadd.xlane.f32.xlu0 %v1761_v52 }
 0x701   :  { %v1721_v31 = vpop.xlane.xlu1 %1720 }
 0x702   :  { %v1739_v25 = vsub.f32 %v1696_v22, %v1721_v31 }
 0x704   :  { %v5693_v41 = vpop.eup %4300  ;;  %v1749_v46 = vmul.f32 1.442695, %v1739_v25 }
 0x705   :  { %v1764_v56 = vsel %vm400_vm0, %v5693_v41, 0.0 }
 0x706   :  { %4302 = vpow2.f32 %v1749_v46  ;;  %1765 = vadd.xlane.f32.xlu2 %v1764_v56 }
 0x709   :  { %v1724_v29 = vpop.xlane.xlu2 %1723 }
 0x70a   :  { %v1740_v48 = vsub.f32 %v1699_v55, %v1724_v29 }
 0x70c   :  { %v5697_v17 = vpop.eup %4302  ;;  %v1751_v19 = vmul.f32 1.442695, %v1740_v48 }
 0x70d   :  { %v1767_v60 = vsel %vm400_vm0, %v5697_v17, 0.0 }
 0x70e   :  { %4304 = vpow2.f32 %v1751_v19  ;;  %1768 = vadd.xlane.f32.xlu0 %v1767_v60  ;;  %v5727_v19 = vld [vmem:[%s6627_s2 + $0x18] sm:$0x3] }
 0x711   :  { %v1727_v10 = vpop.xlane.xlu0 %1726 }
 0x712   :  { %v1741_v54 = vsub.f32 %v1702_v53, %v1727_v10 }
 0x714   :  { %v5701_v28 = vpop.eup %4304  ;;  %v1753_v11 = vmul.f32 1.442695, %v1741_v54  ;;  %v5736_v54 = vld [vmem:[%s6627_s2 + $0x8] sm:$0xff] }
 0x715   :  { %v1770_v18 = vsel %vm400_vm0, %v5701_v28, 0.0 }
 0x716   :  { %4306 = vpow2.f32 %v1753_v11  ;;  %1771 = vadd.xlane.f32.xlu1 %v1770_v18  ;;  %v4429_v11 = vld [vmem:[%s6627_s2] sm:$0xff] }
 0x719   :  { %v1730_v33 = vpop.xlane.xlu1 %1729 }
 0x71a   :  { %v1742_v3 = vsub.f32 %v1705_v37, %v1730_v33 }
 0x71c   :  { %v5705_v22 = vpop.eup %4306  ;;  %v1755_v5 = vmul.f32 1.442695, %v1742_v3 }
 0x71d   :  { %v1773_v1 = vsel %vm400_vm0, %v5705_v22, 0.0 }
 0x71e   :  { %4308 = vpow2.f32 %v1755_v5  ;;  %1774 = vadd.xlane.f32.xlu2 %v1773_v1 }
 0x721   :  { %v1733_v57 = vpop.xlane.xlu2 %1732 }
 0x722   :  { %v1743_v55 = vsub.f32 %v1708_v9, %v1733_v57 }
 0x724   :  { %v5709_v38 = vpop.eup %4308  ;;  %v1757_v59 = vmul.f32 1.442695, %v1743_v55 }
 0x725   :  { %v1776_v7 = vsel %vm400_vm0, %v5709_v38, 0.0 }
 0x726   :  { %4310 = vpow2.f32 %v1757_v59  ;;  %1777 = vadd.xlane.f32.xlu0 %v1776_v7 }
 0x729   :  { %v1736_v53 = vpop.xlane.xlu1 %1735 }
 0x72a   :  { %v1744_v8 = vsub.f32 %v1711_v26, %v1736_v53 }
 0x72c   :  { %v5713_v24 = vpop.eup %4310  ;;  %v1759_v14 = vmul.f32 1.442695, %v1744_v8 }
 0x72d   :  { %v1779_v37 = vsel %vm400_vm0, %v5713_v24, 0.0 }
 0x72e   :  { %4312 = vpow2.f32 %v1759_v14  ;;  %1780 = vadd.xlane.f32.xlu1 %v1779_v37 }
 0x734   :  { %v5717_v15 = vpop.eup %4312 }
 0x735   :  { %v1782_v20 = vsel %vm400_vm0, %v5717_v15, 0.0 }
 0x736   :  { %1783 = vadd.xlane.f32.xlu2 %v1782_v20 }
 0x771   :  { %v1763_v23 = vpop.xlane.xlu0 %1762 }
 0x772   :  { %4314 = vrcp.f32 %v1763_v23  ;;  %v1796_v26 = vand.u32 2147483648, %v1763_v23  ;;  %v1794_v35 = vand.u32 2147483647, %v1763_v23  ;;  %vm1790_vm4 = vweird.f32 %v1763_v23 }
 0x774   :  { %v1797_v4 = vor.u32 1.1754944e-38, %v1796_v26  ;;  %vm1795_vm5 = vcmp.eq.f32.partialorder %v1794_v35, 8.507059e+37 }
 0x778   :  { %v4315_v9 = vpop.eup %4314 }
 0x779   :  { %v1786_v61 = vmul.f32 %v4315_v9, %v1763_v23  ;;  %v1766_v27 = vpop.xlane.xlu2 %1765  ;;  %vm1791_vm3 = vweird.f32 %v4315_v9 }
 0x77a   :  { %4316 = vrcp.f32 %v1766_v27  ;;  %vm1792_vm1 = vmor %vm1790_vm4, %vm1791_vm3  ;;  %v1811_v56 = vand.u32 2147483648, %v1766_v27  ;;  %v1809_v48 = vand.u32 2147483647, %v1766_v27  ;;  %vm1805_vm3 = vweird.f32 %v1766_v27 }
 0x77b   :  { %v1787_v43 = vsub.f32 1.0, %v1786_v61 }
 0x77c   :  { %v1812_v10 = vor.u32 1.1754944e-38, %v1811_v56 }
 0x77d   :  { %v1788_v45 = vmul.f32 %v4315_v9, %v1787_v43 }
 0x77f   :  { %v1789_v16 = vadd.f32 %v4315_v9, %v1788_v45 }
 0x780   :  { %v4317_v21 = vpop.eup %4316 }
 0x781   :  { %v1793_v51 = vsel %vm1792_vm1, %v4315_v9, %v1789_v16  ;;  %v1801_v32 = vmul.f32 %v4317_v21, %v1766_v27  ;;  %v1769_v52 = vpop.xlane.xlu0 %1768  ;;  %vm1806_vm6 = vweird.f32 %v4317_v21  ;;  %vm1810_vm1 = vcmp.eq.f32.partialorder %v1809_v48, 8.507059e+37 }
 0x782   :  { %v1798_v31 = vsel %vm1795_vm5, %v1797_v4, %v1793_v51  ;;  %4318 = vrcp.f32 %v1769_v52  ;;  %vm1807_vm4 = vmor %vm1805_vm3, %vm1806_vm6  ;;  %v1826_v55 = vand.u32 2147483648, %v1769_v52  ;;  %v1824_v59 = vand.u32 2147483647, %v1769_v52 }
 0x783   :  { %v1802_v25 = vsub.f32 1.0, %v1801_v32  ;;  %v1799_v46 = vmul.f32 %v5689_v36, %v1798_v31  ;;  %vm1820_vm6 = vweird.f32 %v1769_v52 }
 0x784   :  { %v1827_v8 = vor.u32 1.1754944e-38, %v1826_v55 }
 0x785   :  { %v1803_v29 = vmul.f32 %v4317_v21, %v1802_v25  ;;  %4140 = vmatmul.msk.f32.vlgmr.msra.gmra.mxu2 %vm400_vm0, %v1799_v46  ;;  %4149 = vmatmul.msk.f32.vlgmr.msrb.gmra.mxu1 %vm400_vm0, %v1799_v46 }
 0x786   :  { %4160 = vmatpush.msk.msra.mxu2 %vm6728_vm15, %v5727_v19  ;;  %4189 = vmatpush.msk.msrb.mxu1 %vm6715_vm2, %v5627_v30  ;;  %vm1825_vm2 = vcmp.eq.f32.partialorder %v1824_v59, 8.507059e+37 }
 0x787   :  { %v1804_v36 = vadd.f32 %v4317_v21, %v1803_v29 }
 0x788   :  { %v4319_v60 = vpop.eup %4318  ;;  %2268 = vmatpush.msra.mxu2 %v5736_v54  ;;  %2994 = vmatpush.msrb.mxu1 %v4429_v11 }
 0x789   :  { %v1816_v18 = vmul.f32 %v4319_v60, %v1769_v52  ;;  %v1772_v33 = vpop.xlane.xlu1 %1771  ;;  %v1808_v30 = vsel %vm1807_vm4, %v4317_v21, %v1804_v36  ;;  %vm1821_vm5 = vweird.f32 %v4319_v60 }
 0x78a   :  { %4320 = vrcp.f32 %v1772_v33  ;;  %v1813_v3 = vsel %vm1810_vm1, %v1812_v10, %v1808_v30  ;;  %vm1822_vm15 = vmor %vm1820_vm6, %vm1821_vm5  ;;  %v1841_v27 = vand.u32 2147483648, %v1772_v33  ;;  %v1839_v43 = vand.u32 2147483647, %v1772_v33 }
 0x78b   :  { %v1817_v5 = vsub.f32 1.0, %v1816_v18  ;;  %v1814_v1 = vmul.f32 %v5693_v41, %v1813_v3  ;;  %vm1835_vm4 = vweird.f32 %v1772_v33 }
 0x78c   :  { %v1842_v35 = vor.u32 1.1754944e-38, %v1841_v27  ;;  %vm1840_vm5 = vcmp.eq.f32.partialorder %v1839_v43, 8.507059e+37 }
 0x78d   :  { %v1818_v57 = vmul.f32 %v4319_v60, %v1817_v5  ;;  %4141 = vmatmul.msk.f32.gmra.mxu2 %vm400_vm0, %v1814_v1  ;;  %4150 = vmatmul.msk.f32.gmra.mxu1 %vm400_vm0, %v1814_v1 }
 0x78f   :  { %v1819_v7 = vadd.f32 %v4319_v60, %v1818_v57 }
 0x790   :  { %v4321_v53 = vpop.eup %4320 }
 0x791   :  { %v1831_v14 = vmul.f32 %v4321_v53, %v1772_v33  ;;  %v1775_v37 = vpop.xlane.xlu2 %1774  ;;  %v1823_v20 = vsel %vm1822_vm15, %v4319_v60, %v1819_v7  ;;  %vm1836_vm3 = vweird.f32 %v4321_v53 }
 0x792   :  { %4322 = vrcp.f32 %v1775_v37  ;;  %v1828_v41 = vsel %vm1825_vm2, %v1827_v8, %v1823_v20  ;;  %vm1837_vm1 = vmor %vm1835_vm4, %vm1836_vm3  ;;  %v1856_v31 = vand.u32 2147483648, %v1775_v37  ;;  %v1854_v25 = vand.u32 2147483647, %v1775_v37 }
 0x793   :  { %v1832_v23 = vsub.f32 1.0, %v1831_v14  ;;  %v1829_v9 = vmul.f32 %v5697_v17, %v1828_v41  ;;  %vm1850_vm15 = vweird.f32 %v1775_v37 }
 0x794   :  { %v1857_v29 = vor.u32 1.1754944e-38, %v1856_v31  ;;  %vm1855_vm3 = vcmp.eq.f32.partialorder %v1854_v25, 8.507059e+37 }
 0x795   :  { %v1833_v61 = vmul.f32 %v4321_v53, %v1832_v23  ;;  %4142 = vmatmul.msk.f32.gmra.mxu2 %vm400_vm0, %v1829_v9  ;;  %4151 = vmatmul.msk.f32.gmra.mxu1 %vm400_vm0, %v1829_v9 }
 0x797   :  { %v1834_v26 = vadd.f32 %v4321_v53, %v1833_v61 }
 0x798   :  { %v4323_v45 = vpop.eup %4322 }
 0x799   :  { %v1846_v16 = vmul.f32 %v4323_v45, %v1775_v37  ;;  %v1778_v21 = vpop.xlane.xlu0 %1777  ;;  %v1838_v4 = vsel %vm1837_vm1, %v4321_v53, %v1834_v26  ;;  %vm1851_vm6 = vweird.f32 %v4323_v45 }
 0x79a   :  { %4324 = vrcp.f32 %v1778_v21  ;;  %v1843_v17 = vsel %vm1840_vm5, %v1842_v35, %v1838_v4  ;;  %vm1852_vm2 = vmor %vm1850_vm15, %vm1851_vm6  ;;  %v1871_v33 = vand.u32 2147483648, %v1778_v21  ;;  %v1869_v30 = vand.u32 2147483647, %v1778_v21 }
 0x79b   :  { %v1847_v51 = vsub.f32 1.0, %v1846_v16  ;;  %v1844_v32 = vmul.f32 %v5701_v28, %v1843_v17  ;;  %vm1865_vm1 = vweird.f32 %v1778_v21 }
 0x79c   :  { %v1872_v1 = vor.u32 1.1754944e-38, %v1871_v33  ;;  %vm1870_vm6 = vcmp.eq.f32.partialorder %v1869_v30, 8.507059e+37 }
 0x79d   :  { %v1848_v52 = vmul.f32 %v4323_v45, %v1847_v51  ;;  %4143 = vmatmul.msk.f32.gmra.mxu2 %vm400_vm0, %v1844_v32  ;;  %4152 = vmatmul.msk.f32.gmra.mxu1 %vm400_vm0, %v1844_v32 }
 0x79f   :  { %v1849_v46 = vadd.f32 %v4323_v45, %v1848_v52 }
 0x7a0   :  { %v4325_v56 = vpop.eup %4324 }
 0x7a1   :  { %v1861_v48 = vmul.f32 %v4325_v56, %v1778_v21  ;;  %v1781_v36 = vpop.xlane.xlu1 %1780  ;;  %v1853_v60 = vsel %vm1852_vm2, %v4323_v45, %v1849_v46  ;;  %vm1866_vm4 = vweird.f32 %v4325_v56 }
 0x7a2   :  { %4326 = vrcp.f32 %v1781_v36  ;;  %v1858_v28 = vsel %vm1855_vm3, %v1857_v29, %v1853_v60  ;;  %vm1867_vm5 = vmor %vm1865_vm1, %vm1866_vm4  ;;  %v1886_v53 = vand.u32 2147483648, %v1781_v36  ;;  %v1884_v37 = vand.u32 2147483647, %v1781_v36 }
 0x7a3   :  { %v1862_v10 = vsub.f32 1.0, %v1861_v48  ;;  %v1859_v11 = vmul.f32 %v5705_v22, %v1858_v28  ;;  %vm1880_vm2 = vweird.f32 %v1781_v36 }
 0x7a4   :  { %v1887_v41 = vor.u32 1.1754944e-38, %v1886_v53  ;;  %vm1885_vm4 = vcmp.eq.f32.partialorder %v1884_v37, 8.507059e+37 }
 0x7a5   :  { %v1863_v18 = vmul.f32 %v4325_v56, %v1862_v10  ;;  %4144 = vmatmul.msk.f32.gmra.mxu2 %vm400_vm0, %v1859_v11  ;;  %4153 = vmatmul.msk.f32.gmra.mxu1 %vm400_vm0, %v1859_v11 }
 0x7a7   :  { %v1864_v3 = vadd.f32 %v4325_v56, %v1863_v18 }
 0x7a8   :  { %v4327_v5 = vpop.eup %4326 }
 0x7a9   :  { %v1876_v57 = vmul.f32 %v4327_v5, %v1781_v36  ;;  %v1784_v55 = vpop.xlane.xlu2 %1783  ;;  %v1868_v59 = vsel %vm1867_vm5, %v4325_v56, %v1864_v3  ;;  %vm1881_vm15 = vweird.f32 %v4327_v5 }
 0x7aa   :  { %4328 = vrcp.f32 %v1784_v55  ;;  %v1873_v22 = vsel %vm1870_vm6, %v1872_v1, %v1868_v59  ;;  %vm1882_vm3 = vmor %vm1880_vm2, %vm1881_vm15  ;;  %v1899_v35 = vand.u32 2147483647, %v1784_v55  ;;  %vm1895_vm5 = vweird.f32 %v1784_v55 }
 0x7ab   :  { %v1877_v7 = vsub.f32 1.0, %v1876_v57  ;;  %v1874_v8 = vmul.f32 %v5709_v38, %v1873_v22  ;;  %v1901_v38 = vand.u32 2147483648, %v1784_v55  ;;  %vm6729_vm2 = vcmask 1041408  }
 0x7ac   :  { %vm1900_vm15 = vcmp.eq.f32.partialorder %v1899_v35, 8.507059e+37 }
 0x7ad   :  { %v1878_v14 = vmul.f32 %v4327_v5, %v1877_v7  ;;  %4145 = vmatmul.msk.f32.gmra.mxu2 %vm400_vm0, %v1874_v8  ;;  %4154 = vmatmul.msk.f32.gmra.mxu1 %vm400_vm0, %v1874_v8  ;;  %v1902_v21 = vor.u32 1.1754944e-38, %v1901_v38 }
 0x7af   :  { %v1879_v20 = vadd.f32 %v4327_v5, %v1878_v14 }
 0x7b0   :  { %v4329_v23 = vpop.eup %4328 }
 0x7b1   :  { %v1891_v9 = vmul.f32 %v4329_v23, %v1784_v55  ;;  %v1883_v61 = vsel %vm1882_vm3, %v4327_v5, %v1879_v20  ;;  %vm1896_vm1 = vweird.f32 %v4329_v23 }
 0x7b2   :  { %v1888_v27 = vsel %vm1885_vm4, %v1887_v41, %v1883_v61  ;;  %vm1897_vm6 = vmor %vm1895_vm5, %vm1896_vm1 }
 0x7b3   :  { %v1892_v43 = vsub.f32 1.0, %v1891_v9  ;;  %v1889_v26 = vmul.f32 %v5713_v24, %v1888_v27  ;;  %vm6730_vm5 = vmmov %vm6729_vm2 }
 0x7b5   :  { %v1893_v45 = vmul.f32 %v4329_v23, %v1892_v43  ;;  %4146 = vmatmul.msk.f32.gmra.mxu2 %vm400_vm0, %v1889_v26  ;;  %4155 = vmatmul.msk.f32.gmra.mxu1 %vm400_vm0, %v1889_v26 }
 0x7b7   :  { %v1894_v16 = vadd.f32 %v4329_v23, %v1893_v45 }
 0x7b9   :  { %v1898_v4 = vsel %vm1897_vm6, %v4329_v23, %v1894_v16 }
 0x7ba   :  { %v1903_v51 = vsel %vm1900_vm15, %v1902_v21, %v1898_v4 }
 0x7bb   :  { %v1904_v17 = vmul.f32 %v5717_v15, %v1903_v51 }
 0x7bd   :  { %4147 = vmatmul.msk.f32.gmra.mxu2 %vm400_vm0, %v1904_v17  ;;  %4156 = vmatmul.msk.f32.gmra.mxu1 %vm400_vm0, %v1904_v17 }
 0x802   :  { %v1987_v24 = vpop.f32.mrf.mxu1 }
 0x803   :  { %v2012_v46 = vmul.f32 %v1987_v24, %v6714_v0 }
 0x805   :  { %v2033_v48 = vsel %vm533_vm7, %v2012_v46, 0.0 }
 0x806   :  { %v2034_v36 = vrot.slane %v2033_v48, 4 }
 0x808   :  { %v1946_v32 = vpop.f32.mrf.mxu2  ;;  %v2035_v11 = vadd.f32 %v2034_v36, %v2033_v48 }
 0x809   :  { %v2011_v10 = vmul.f32 %v1946_v32, %v4912_v58 }
 0x80a   :  { %v1990_v52 = vpop.f32.mrf.mxu1  ;;  %v2036_v1 = vrot.slane %v2035_v11, 2 }
 0x80b   :  { %v2014_v15 = vmul.f32 %v1990_v52, %v6717_v13  ;;  %v2027_v33 = vrot.slane %v2011_v10, 4 }
 0x80c   :  { %v2037_v37 = vadd.f32 %v2036_v1, %v2035_v11 }
 0x80d   :  { %v2046_v30 = vsel %vm533_vm7, %v2014_v15, 0.0  ;;  %v2028_v7 = vadd.f32 %v2027_v33, %v2011_v10 }
 0x80e   :  { %v2047_v57 = vrot.slane %v2046_v30, 4  ;;  %v2038_v21 = vrot.slane %v2037_v37, 1 }
 0x80f   :  { %v2029_v27 = vrot.slane %v2028_v7, 2 }
 0x810   :  { %v1949_v31 = vpop.f32.mrf.mxu2  ;;  %v2048_v41 = vadd.f32 %v2047_v57, %v2046_v30 }
 0x811   :  { %v2013_v53 = vmul.f32 %v1949_v31, %v6716_v47  ;;  %v2030_v52 = vadd.f32 %v2029_v27, %v2028_v7 }
 0x812   :  { %v1993_v25 = vpop.f32.mrf.mxu1  ;;  %v2049_v51 = vrot.slane %v2048_v41, 2 }
 0x813   :  { %v2016_v18 = vmul.f32 %v1993_v25, %v6719_v6  ;;  %v2040_v45 = vrot.slane %v2013_v53, 4  ;;  %v2031_v30 = vrot.slane %v2030_v52, 1 }
 0x814   :  { %v2050_v11 = vadd.f32 %v2049_v51, %v2048_v41 }
 0x815   :  { %v2059_v55 = vsel %vm533_vm7, %v2016_v18, 0.0 }
 0x816   :  { %v2060_v20 = vrot.slane %v2059_v55, 4 }
 0x818   :  { %v1952_v56 = vpop.f32.mrf.mxu2  ;;  %v2061_v4 = vadd.f32 %v2060_v20, %v2059_v55 }
 0x819   :  { %v2015_v9 = vmul.f32 %v1952_v56, %v6718_v44  ;;  %v2041_v56 = vadd.f32 %v2040_v45, %v2013_v53 }
 0x81a   :  { %v1996_v29 = vpop.f32.mrf.mxu1  ;;  %v2062_v10 = vrot.slane %v2061_v4, 2 }
 0x81b   :  { %v2018_v3 = vmul.f32 %v1996_v29, %v6721_v50  ;;  %v2053_v17 = vrot.slane %v2015_v9, 4  ;;  %v2042_v57 = vrot.slane %v2041_v56, 2 }
 0x81c   :  { %v2063_v53 = vadd.f32 %v2062_v10, %v2061_v4 }
 0x81d   :  { %v2072_v22 = vsel %vm533_vm7, %v2018_v3, 0.0  ;;  %v2054_v18 = vadd.f32 %v2053_v17, %v2015_v9  ;;  %v5787_v9 = vadd.f32 %v2031_v30, %v2030_v52 }
 0x81e   :  { %v2073_v61 = vrot.slane %v2072_v22, 4 }
 0x820   :  { %v1955_v60 = vpop.f32.mrf.mxu2  ;;  %v2074_v24 = vadd.f32 %v2073_v61, %v2072_v22 }
 0x821   :  { %v2017_v43 = vmul.f32 %v1955_v60, %v6720_v40  ;;  %v5781_v60 = vadd.f32 %v2038_v21, %v2037_v37  ;;  %v2055_v37 = vrot.slane %v2054_v18, 2  ;;  %v2064_v21 = vrot.slane %v2063_v53, 1 }
 0x822   :  { %v1999_v28 = vpop.f32.mrf.mxu1  ;;  %v2075_v33 = vrot.slane %v2074_v24, 2 }
 0x823   :  { %v2020_v5 = vmul.f32 %v1999_v28, %v6723_v49  ;;  %v2066_v31 = vrot.slane %v2017_v43, 4  ;;  %v2132_v22 = vmul.f32 %v5781_v60, %v5781_v60 }
 0x824   :  { %v2076_v20 = vadd.f32 %v2075_v33, %v2074_v24  ;;  %v2056_v24 = vadd.f32 %v2055_v37, %v2054_v18 }
 0x825   :  { %v2085_v8 = vsel %vm533_vm7, %v2020_v5, 0.0  ;;  %v2067_v3 = vadd.f32 %v2066_v31, %v2017_v43 }
 0x826   :  { %v2086_v26 = vrot.slane %v2085_v8, 4  ;;  %v2077_v31 = vrot.slane %v2076_v20, 1  ;;  %v2057_v18 = vrot.slane %v2056_v24, 1 }
 0x827   :  { %v2068_v61 = vrot.slane %v2067_v3, 2 }
 0x828   :  { %v1958_v59 = vpop.f32.mrf.mxu2  ;;  %v2087_v25 = vadd.f32 %v2086_v26, %v2085_v8  ;;  %v2043_v26 = vadd.f32 %v2042_v57, %v2041_v56 }
 0x829   :  { %v2019_v35 = vmul.f32 %v1958_v59, %v6722_v2 }
 0x82a   :  { %v2002_v14 = vpop.f32.mrf.mxu1  ;;  %v2088_v5 = vrot.slane %v2087_v25, 2  ;;  %v2044_v56 = vrot.slane %v2043_v26, 1 }
 0x82b   :  { %v2022_v23 = vmul.f32 %v2002_v14, %v6725_v12  ;;  %v2079_v29 = vrot.slane %v2019_v35, 4  ;;  %v2051_v14 = vrot.slane %v2050_v11, 1 }
 0x82c   :  { %v2089_v27 = vadd.f32 %v2088_v5, %v2087_v25  ;;  %v5803_v37 = vadd.f32 %v2044_v56, %v2043_v26 }
 0x82d   :  { %v2098_v38 = vsel %vm533_vm7, %v2022_v23, 0.0  ;;  %v2080_v55 = vadd.f32 %v2079_v29, %v2019_v35 }
 0x82e   :  { %v2099_v16 = vrot.slane %v2098_v38, 4  ;;  %v2090_v29 = vrot.slane %v2089_v27, 1 }
 0x830   :  { %v1961_v32 = vpop.f32.mrf.mxu2  ;;  %v2100_v48 = vadd.f32 %v2099_v16, %v2098_v38  ;;  %v2081_v38 = vrot.slane %v2080_v55, 2 }
 0x831   :  { %v2021_v46 = vmul.f32 %v1961_v32, %v6724_v34  ;;  %v5791_v32 = vadd.f32 %v2051_v14, %v2050_v11 }
 0x832   :  { %v2005_v36 = vpop.f32.mrf.mxu1  ;;  %v2101_v59 = vrot.slane %v2100_v48, 2  ;;  %v2082_v10 = vadd.f32 %v2081_v38, %v2080_v55  ;;  %v5811_v38 = vadd.f32 %v2057_v18, %v2056_v24 }
 0x833   :  { %v2092_v15 = vrot.slane %v2021_v46, 4  ;;  %v2024_v28 = vmul.f32 %v2005_v36, %v6727_v62  ;;  %v2134_v11 = vmul.f32 %v5791_v32, %v5791_v32 }
 0x834   :  { %v2102_v45 = vadd.f32 %v2101_v59, %v2100_v48 }
 0x835   :  { %v2111_v1 = vsel %vm533_vm7, %v2024_v28, 0.0  ;;  %v2093_v8 = vadd.f32 %v2092_v15, %v2021_v46  ;;  %v2069_v46 = vadd.f32 %v2068_v61, %v2067_v3  ;;  %v5794_v28 = vadd.f32 %v2064_v21, %v2063_v53 }
 0x836   :  { %v2112_v7 = vrot.slane %v2111_v1, 4  ;;  %v2103_v48 = vrot.slane %v2102_v45, 1  ;;  %v2083_v53 = vrot.slane %v2082_v10, 1  ;;  %v2170_v26 = vsel %vm664_vm8, %v2134_v11, %v2132_v22 }
 0x837   :  { %v2094_v51 = vrot.slane %v2093_v8, 2  ;;  %v2070_v59 = vrot.slane %v2069_v46, 1 }
 0x838   :  { %v2113_v23 = vadd.f32 %v2112_v7, %v2111_v1  ;;  %v1964_v41 = vpop.f32.mrf.mxu2  ;;  %v5798_v1 = vadd.f32 %v2077_v31, %v2076_v20  ;;  %v5800_v7 = vadd.f32 %v2090_v29, %v2089_v27 }
 0x839   :  { %v2023_v43 = vmul.f32 %v1964_v41, %v6726_v39  ;;  %v2095_v33 = vadd.f32 %v2094_v51, %v2093_v8  ;;  %v5805_v8 = vadd.f32 %v2103_v48, %v2102_v45  ;;  %v2136_v41 = vmul.f32 %v5794_v28, %v5794_v28 }
 0x83a   :  { %v2114_v35 = vrot.slane %v2113_v23, 2  ;;  %v2008_v16 = vpop.f32.mrf.mxu1  ;;  %v2138_v27 = vmul.f32 %v5798_v1, %v5798_v1  ;;  %v5816_v21 = vadd.f32 %v2070_v59, %v2069_v46  ;;  %v2140_v45 = vmul.f32 %v5800_v7, %v5800_v7 }
 0x83b   :  { %v2105_v4 = vrot.slane %v2023_v43, 4  ;;  %v2026_v17 = vmul.f32 %v2008_v16, %v6712_v63  ;;  %v2096_v61 = vrot.slane %v2095_v33, 1  ;;  %v2142_v24 = vmul.f32 %v5805_v8, %v5805_v8 }
 0x83c   :  { %v2115_v52 = vadd.f32 %v2114_v35, %v2113_v23  ;;  %v2131_v48 = vmul.f32 %v5787_v9, %v5787_v9 }
 0x83d   :  { %v2106_v25 = vadd.f32 %v2105_v4, %v2023_v43  ;;  %v2124_v36 = vsel %vm533_vm7, %v2026_v17, 0.0  ;;  %v2133_v4 = vmul.f32 %v5803_v37, %v5803_v37  ;;  %v5822_v17 = vadd.f32 %v2083_v53, %v2082_v10 }
 0x83e   :  { %v2125_v15 = vrot.slane %v2124_v36, 4  ;;  %v2116_v30 = vrot.slane %v2115_v52, 1  ;;  %v5827_v29 = vadd.f32 %v2096_v61, %v2095_v33 }
 0x83f   :  { %v2107_v5 = vrot.slane %v2106_v25, 2 }
 0x840   :  { %v2126_v3 = vadd.f32 %v2125_v15, %v2124_v36  ;;  %v1967_v57 = vpop.f32.mrf.mxu2  ;;  %v5809_v20 = vadd.f32 %v2116_v30, %v2115_v52  ;;  %v2171_v52 = vsel %vm666_vm9, %v2136_v41, %v2170_v26  ;;  %v2137_v15 = vmul.f32 %v5816_v21, %v5816_v21 }
 0x841   :  { %v2108_v14 = vadd.f32 %v2107_v5, %v2106_v25  ;;  %v2025_v55 = vmul.f32 %v1967_v57, %v5071_v42  ;;  %v2135_v25 = vmul.f32 %v5811_v38, %v5811_v38  ;;  %v2172_v36 = vsel %vm668_vm10, %v2138_v27, %v2171_v52 }
 0x842   :  { %v2127_v23 = vrot.slane %v2126_v3, 2  ;;  %v2144_v22 = vmul.f32 %v5809_v20, %v5809_v20  ;;  %v2173_v33 = vsel %vm670_vm11, %v2140_v45, %v2172_v36  ;;  %v2139_v5 = vmul.f32 %v5822_v17, %v5822_v17  ;;  %v5872_v45 = vld [vmem:[%s6628_s3 + $0x98] sm:$0xff] }
 0x843   :  { %v2118_v43 = vrot.slane %v2025_v55, 4  ;;  %v2109_v35 = vrot.slane %v2108_v14, 1  ;;  %v2174_v18 = vsel %vm672_vm12, %v2142_v24, %v2173_v33  ;;  %v2141_v57 = vmul.f32 %v5827_v29, %v5827_v29  ;;  %v5890_v24 = vld [vmem:[%s6628_s3 + $0x80] sm:$0xff] }
 0x844   :  { %v2128_v16 = vadd.f32 %v2127_v23, %v2126_v3  ;;  %v2163_v3 = vsel %vm664_vm8, %v2133_v4, %v2131_v48  ;;  %v5884_v4 = vld [vmem:[%s6628_s3 + $0x88] sm:$0xff] }
 0x845   :  { %v2119_v51 = vadd.f32 %v2118_v43, %v2025_v55  ;;  %v5834_v56 = vadd.f32 %v2109_v35, %v2108_v14  ;;  %v2175_v14 = vsel %vm674_vm13, %v2144_v22, %v2174_v18  ;;  %v2164_v55 = vsel %vm666_vm9, %v2135_v25, %v2163_v3  ;;  %v4435_v18 = vld [vmem:[%s6628_s3 + $0x70] sm:$0xff]  ;;  %v4436_v3 = vld [vmem:[%s6628_s3 + $0x68] sm:$0xff] }
 0x846   :  { %v2129_v31 = vrot.slane %v2128_v16, 1  ;;  %v2165_v41 = vsel %vm668_vm10, %v2137_v15, %v2164_v55  ;;  %v4442_v55 = vld [vmem:[%s6628_s3 + $0x38] sm:$0xff] }
 0x847   :  { %v2120_v46 = vrot.slane %v2119_v51, 2  ;;  %v2143_v53 = vmul.f32 %v5834_v56, %v5834_v56  ;;  %v2166_v43 = vsel %vm670_vm11, %v2139_v5, %v2165_v41  ;;  %v5940_v41 = vld [vmem:[%s6628_s3 + $0x20] sm:$0xff] }
 0x848   :  { %v5836_v10 = vadd.f32 %v2129_v31, %v2128_v16  ;;  %v2167_v35 = vsel %vm672_vm12, %v2141_v57, %v2166_v43  ;;  %v4437_v57 = vld [vmem:[%s6628_s3 + $0x60] sm:$0xff]  ;;  %v5946_v43 = vld [vmem:[%s6628_s3 + $0x18] sm:$0xff] }
 0x849   :  { %v2121_v30 = vadd.f32 %v2120_v46, %v2119_v51  ;;  %v2168_v16 = vsel %vm674_vm13, %v2143_v53, %v2167_v35  ;;  %v5878_v51 = vld [vmem:[%s6628_s3 + $0x90] sm:$0xff]  ;;  %v5958_v35 = vld [vmem:[%s6628_s3 + $0x8] sm:$0xff] }
 0x84a   :  { %v2146_v11 = vmul.f32 %v5836_v10, %v5836_v10  ;;  %v5928_v53 = vld [vmem:[%s6628_s3 + $0x30] sm:$0xff] }
 0x84b   :  { %v2122_v59 = vrot.slane %v2121_v30, 1 }
 0x84c   :  { %v2176_v23 = vsel %vm676_vm14, %v2146_v11, %v2175_v14  ;;  %v4434_v11 = vld [vmem:[%s6628_s3 + $0x78] sm:$0xff]  ;;  %v4441_v14 = vld [vmem:[%s6628_s3 + $0x40] sm:$0xff] }
 0x84d   :  { %v5857_v61 = vadd.f32 %v2122_v59, %v2121_v30  ;;  %4157 = vmatmul.msk.f32.vlgmr.msrb.gmra.mxu2 %vm533_vm7, %v2176_v23  ;;  %v4439_v59 = vld [vmem:[%s6628_s3 + $0x50] sm:$0xff]  ;;  %v5934_v23 = vld [vmem:[%s6628_s3 + $0x28] sm:$0xff] }
 0x84e   :  { %4179 = vmatpush.msk.msrb.mxu2 %vm6729_vm2, %v5727_v19 }
 0x84f   :  { %v2145_v27 = vmul.f32 %v5857_v61, %v5857_v61 }
 0x850   :  { %2731 = vmatpush.msrb.mxu2 %v5736_v54 }
 0x851   :  { %v2169_v26 = vsel %vm676_vm14, %v2145_v27, %v2168_v16  ;;  %v5952_v27 = vld [vmem:[%s6628_s3 + $0x10] sm:$0xff]  ;;  %v5964_v16 = vld [vmem:[%s6628_s3] sm:$0xff] }
 0x852   :  { %2196 = vmatmul.f32.vlgmr.msrb.gmra.mxu3 %v2169_v26 }
 0x853   :  { %2430 = vmatpush.msrb.mxu3 %v5872_v45 }
 0x855   :  { %2431 = vmatpush.msrb.mxu3 %v5878_v51 }
 0x857   :  { %2432 = vmatpush.msrb.mxu3 %v5884_v4 }
 0x859   :  { %2433 = vmatpush.msrb.mxu3 %v5890_v24 }
 0x8d0   :  { %v2217_v22 = vpop.f32.mrf.mxu2 }
 0x8d5   :  { %v2197_v31 = vpop.f32.mrf.mxu3 }
 0x8d6   :  { %v2198_v52 = vadd.f32 1e-07, %v2197_v31 }
 0x8d8   :  { %v2218_v46 = vadd.f32 %v2217_v22, %v2198_v52 }
 0x8da   :  { %4330 = vrsqrt.f32 %v2218_v46  ;;  %vm2226_vm4 = vweird.f32 %v2218_v46 }
 0x8e0   :  { %v4331_v25 = vpop.eup %4330 }
 0x8e1   :  { %v2221_v36 = vmul.f32 %v4331_v25, %v2218_v46  ;;  %vm2227_vm3 = vweird.f32 %v4331_v25 }
 0x8e2   :  { %vm2228_vm1 = vmor %vm2226_vm4, %vm2227_vm3 }
 0x8e3   :  { %v2222_v48 = vmul.f32 %v4331_v25, %v2221_v36 }
 0x8e5   :  { %v2223_v15 = vmul.f32 0.5, %v2222_v48 }
 0x8e7   :  { %v2224_v33 = vsub.f32 1.5, %v2223_v15 }
 0x8e9   :  { %v2225_v30 = vmul.f32 %v4331_v25, %v2224_v33 }
 0x8eb   :  { %v2229_v5 = vsel %vm2228_vm1, %v4331_v25, %v2225_v30  ;;  %vm6733_vm1 = vmmov %vm6730_vm5 }
 0x8ec   :  { %4159 = vmatmul.msk.f32.vlgmr.msra.gmra.mxu3 %vm400_vm0, %v2229_v5  ;;  %4161 = vmatmul.msk.f32.vlgmr.msra.gmra.mxu2 %vm400_vm0, %v2229_v5 }
 0x8ed   :  { %2926 = vmatpush.msra.mxu3 %v4434_v11  ;;  %4191 = vmatpush.msk.msra.mxu2 %vm6730_vm5, %v5727_v19  ;;  %v4438_v19 = vld [vmem:[%s6628_s3 + $0x58] sm:$0xff]  ;;  %vm6734_vm5 = vmmov %vm6733_vm1 }
 0x8ef   :  { %2927 = vmatpush.msra.mxu3 %v4435_v18  ;;  %3014 = vmatpush.msra.mxu2 %v5736_v54  ;;  %v4440_v54 = vld [vmem:[%s6628_s3 + $0x48] sm:$0xff] }
 0x8f1   :  { %2928 = vmatpush.msra.mxu3 %v4436_v3 }
 0x8f3   :  { %2929 = vmatpush.msra.mxu3 %v4437_v57 }
 0x8f5   :  { %2930 = vmatpush.msra.mxu3 %v4438_v19 }
 0x8f7   :  { %2931 = vmatpush.msra.mxu3 %v4439_v59 }
 0x8f9   :  { %2932 = vmatpush.msra.mxu3 %v4440_v54 }
 0x8fb   :  { %2933 = vmatpush.msra.mxu3 %v4441_v14 }
 0x8fd   :  { %2934 = vmatpush.msra.mxu3 %v4442_v55 }
 0x8ff   :  { %2935 = vmatpush.msra.mxu3 %v5928_v53 }
 0x901   :  { %2936 = vmatpush.msra.mxu3 %v5934_v23 }
 0x903   :  { %2937 = vmatpush.msra.mxu3 %v5940_v41 }
 0x905   :  { %2938 = vmatpush.msra.mxu3 %v5946_v43 }
 0x907   :  { %2939 = vmatpush.msra.mxu3 %v5952_v27 }
 0x909   :  { %2940 = vmatpush.msra.mxu3 %v5958_v35 }
 0x90b   :  { %2941 = vmatpush.msra.mxu3 %v5964_v16 }
 0x96f   :  { %v5967_v26 = vpop.f32.mrf.mxu3  ;;  %v5969_v31 = vpop.f32.mrf.mxu2 }
 0x970   :  { %v2306_v52 = vmul.f32 %v5969_v31, %v5781_v60  ;;  %v2305_v22 = vmul.f32 %v5967_v26, %v5787_v9  ;;  %v2275_v46 = vrot.slane %v5967_v26, 1  ;;  %v2276_v25 = vrot.slane %v5969_v31, 1 }
 0x971   :  { %v2277_v63 = vrot.slane %v5967_v26, 2  ;;  %v2278_v42 = vrot.slane %v5969_v31, 2 }
 0x972   :  { %v2321_v36 = vperm.slane %v2305_v22, 0  ;;  %v2322_v48 = vperm.slane %v2306_v52, 0  ;;  %v2307_v30 = vmul.f32 %v2275_v46, %v5803_v37  ;;  %v2308_v5 = vmul.f32 %v2276_v25, %v5791_v32 }
 0x973   :  { %v2309_v52 = vmul.f32 %v2277_v63, %v5811_v38  ;;  %v2285_v25 = vrot.slane %v5967_v26, 6 }
 0x974   :  { %v2337_v15 = vmul.f32 %v2321_v36, %v4912_v58  ;;  %v2338_v33 = vmul.f32 %v2322_v48, %v6714_v0  ;;  %v2323_v60 = vperm.slane %v2307_v30, 0  ;;  %v2324_v9 = vperm.slane %v2308_v5, 0 }
 0x975   :  { %v2317_v48 = vmul.f32 %v2285_v25, %v5834_v56 }
 0x976   :  { %2393 = vmatmul.f32.vlgmr.msra.gmra.mxu0 %v2337_v15  ;;  %4162 = vmatmul.msk.f32.vlgmr.msrb.gmra.mxu3 %vm533_vm7, %v2338_v33  ;;  %v2339_v37 = vmul.f32 %v2323_v60, %v6716_v47  ;;  %v2340_v32 = vmul.f32 %v2324_v9, %v6717_v13  ;;  %v2287_v15 = vrot.slane %v5967_v26, 7  ;;  %v2288_v33 = vrot.slane %v5969_v31, 7 }
 0x977   :  { %3123 = vmatpush.msrb.mxu3 %v4434_v11  ;;  %3176 = vmatpush.msra.mxu0 %v5872_v45  ;;  %v2310_v11 = vmul.f32 %v2278_v42, %v5794_v28  ;;  %v2325_v45 = vperm.slane %v2309_v52, 0  ;;  %v6732_v52 = vld [vmem:[#allocation19_spill] sm:$0xff] }
 0x978   :  { %v2319_v60 = vmul.f32 %v2287_v15, %v5857_v61  ;;  %v2320_v9 = vmul.f32 %v2288_v33, %v5836_v10 }
 0x979   :  { %3124 = vmatpush.msrb.mxu3 %v4435_v18  ;;  %3177 = vmatpush.msra.mxu0 %v5878_v51  ;;  %v2326_v18 = vperm.slane %v2310_v11, 0  ;;  %v2279_v51 = vrot.slane %v5967_v26, 3  ;;  %v2341_v63 = vmul.f32 %v2325_v45, %v6718_v44 }
 0x97a   :  { %v2336_v56 = vperm.slane %v2320_v9, 0 }
 0x97b   :  { %3125 = vmatpush.msrb.mxu3 %v4436_v3  ;;  %3178 = vmatpush.msra.mxu0 %v5884_v4  ;;  %v2280_v3 = vrot.slane %v5969_v31, 3  ;;  %v2342_v42 = vmul.f32 %v2326_v18, %v6719_v6  ;;  %v2311_v28 = vmul.f32 %v2279_v51, %v5816_v21 }
 0x97c   :  { %v2352_v11 = vmul.f32 %v2336_v56, %v6732_v52 }
 0x97d   :  { %3126 = vmatpush.msrb.mxu3 %v4437_v57  ;;  %3179 = vmatpush.msra.mxu0 %v5890_v24  ;;  %v2312_v38 = vmul.f32 %v2280_v3, %v5798_v1  ;;  %v2327_v4 = vperm.slane %v2311_v28, 0  ;;  %v2282_v24 = vrot.slane %v5969_v31, 4 }
 0x97e   :  { %2396 = vmatmul.f32.gmra.mxu0 %v2339_v37  ;;  %4163 = vmatmul.msk.f32.gmra.mxu3 %vm533_vm7, %v2340_v32  ;;  %v6731_v37 = vld [vmem:[#allocation17_spill] sm:$0xff] }
 0x97f   :  { %3127 = vmatpush.msrb.mxu3 %v4438_v19  ;;  %v2328_v57 = vperm.slane %v2312_v38, 0  ;;  %v2281_v19 = vrot.slane %v5967_v26, 4 }
 0x981   :  { %3128 = vmatpush.msrb.mxu3 %v4439_v59  ;;  %v2343_v59 = vmul.f32 %v2327_v4, %v6720_v40  ;;  %v2344_v21 = vmul.f32 %v2328_v57, %v6721_v50  ;;  %v2313_v1 = vmul.f32 %v2281_v19, %v5822_v17 }
 0x983   :  { %3129 = vmatpush.msrb.mxu3 %v4440_v54  ;;  %v2314_v54 = vmul.f32 %v2282_v24, %v5800_v7 }
 0x985   :  { %3130 = vmatpush.msrb.mxu3 %v4441_v14  ;;  %v2329_v14 = vperm.slane %v2313_v1, 0 }
 0x986   :  { %2399 = vmatmul.f32.gmra.mxu0 %v2341_v63  ;;  %4164 = vmatmul.msk.f32.gmra.mxu3 %vm533_vm7, %v2342_v42 }
 0x987   :  { %3131 = vmatpush.msrb.mxu3 %v4442_v55  ;;  %v2330_v55 = vperm.slane %v2314_v54, 0  ;;  %v2345_v17 = vmul.f32 %v2329_v14, %v6722_v2 }
 0x989   :  { %3132 = vmatpush.msrb.mxu3 %v5928_v53  ;;  %v2283_v53 = vrot.slane %v5967_v26, 5  ;;  %v2346_v7 = vmul.f32 %v2330_v55, %v6723_v49 }
 0x98b   :  { %3133 = vmatpush.msrb.mxu3 %v5934_v23  ;;  %v2284_v23 = vrot.slane %v5969_v31, 5 }
 0x98d   :  { %3134 = vmatpush.msrb.mxu3 %v5940_v41  ;;  %v2315_v41 = vmul.f32 %v2283_v53, %v5827_v29  ;;  %v2316_v22 = vmul.f32 %v2284_v23, %v5805_v8  ;;  %v2333_v8 = vperm.slane %v2317_v48, 0 }
 0x98e   :  { %2402 = vmatmul.f32.gmra.mxu0 %v2343_v59  ;;  %4165 = vmatmul.msk.f32.gmra.mxu3 %vm533_vm7, %v2344_v21 }
 0x98f   :  { %3135 = vmatpush.msrb.mxu3 %v5946_v43  ;;  %v2331_v43 = vperm.slane %v2315_v41, 0  ;;  %v2332_v46 = vperm.slane %v2316_v22, 0  ;;  %v2349_v30 = vmul.f32 %v2333_v8, %v6726_v39 }
 0x991   :  { %3136 = vmatpush.msrb.mxu3 %v5952_v27  ;;  %v2286_v27 = vrot.slane %v5969_v31, 6  ;;  %v2348_v36 = vmul.f32 %v2332_v46, %v6725_v12 }
 0x993   :  { %3137 = vmatpush.msrb.mxu3 %v5958_v35  ;;  %v2347_v35 = vmul.f32 %v2331_v43, %v6724_v34  ;;  %v2318_v29 = vmul.f32 %v2286_v27, %v5809_v20  ;;  %v2335_v20 = vperm.slane %v2319_v60, 0 }
 0x995   :  { %3138 = vmatpush.msrb.mxu3 %v5964_v16  ;;  %v2334_v16 = vperm.slane %v2318_v29, 0  ;;  %v2351_v32 = vmul.f32 %v2335_v20, %v6731_v37 }
 0x996   :  { %2405 = vmatmul.f32.gmra.mxu0 %v2345_v17  ;;  %4166 = vmatmul.msk.f32.gmra.mxu3 %vm533_vm7, %v2346_v7 }
 0x997   :  { %v2350_v5 = vmul.f32 %v2334_v16, %v6727_v62 }
 0x99e   :  { %2408 = vmatmul.f32.gmra.mxu0 %v2347_v35  ;;  %4167 = vmatmul.msk.f32.gmra.mxu3 %vm533_vm7, %v2348_v36 }
 0x9a6   :  { %2411 = vmatmul.f32.gmra.mxu0 %v2349_v30  ;;  %4168 = vmatmul.msk.f32.gmra.mxu3 %vm533_vm7, %v2350_v5 }
 0x9ae   :  { %2414 = vmatmul.f32.gmra.mxu0 %v2351_v32  ;;  %4169 = vmatmul.msk.f32.gmra.mxu3 %vm533_vm7, %v2352_v11 }
 0x9f3   :  { %v2394_v26 = vpop.f32.mrf.mxu0 }
 0x9f9   :  { %v2435_v31 = vpop.f32.mrf.mxu3 }
 0x9fa   :  { %v2436_v45 = vadd.f32 %v2435_v31, %v2394_v26 }
 0x9fb   :  { %v2397_v18 = vpop.f32.mrf.mxu0 }
 0x9fc   :  { %v2459_v61 = vsel %vm400_vm0, %v2436_v45, -inf }
 0x9fd   :  { %2460 = vmax.xlane.f32.xlu0 %v2459_v61 }
 0xa01   :  { %v2438_v10 = vpop.f32.mrf.mxu3 }
 0xa02   :  { %v2439_v51 = vadd.f32 %v2438_v10, %v2397_v18 }
 0xa03   :  { %v2400_v3 = vpop.f32.mrf.mxu0 }
 0xa04   :  { %v2462_v63 = vsel %vm400_vm0, %v2439_v51, -inf }
 0xa05   :  { %2463 = vmax.xlane.f32.xlu1 %v2462_v63 }
 0xa09   :  { %v2441_v42 = vpop.f32.mrf.mxu3 }
 0xa0a   :  { %v2442_v28 = vadd.f32 %v2441_v42, %v2400_v3 }
 0xa0b   :  { %v2403_v38 = vpop.f32.mrf.mxu0 }
 0xa0c   :  { %v2465_v4 = vsel %vm400_vm0, %v2442_v28, -inf }
 0xa0d   :  { %2466 = vmax.xlane.f32.xlu2 %v2465_v4 }
 0xa11   :  { %v2444_v57 = vpop.f32.mrf.mxu3 }
 0xa12   :  { %v2445_v19 = vadd.f32 %v2444_v57, %v2403_v38 }
 0xa13   :  { %v2406_v24 = vpop.f32.mrf.mxu0 }
 0xa14   :  { %v2468_v59 = vsel %vm400_vm0, %v2445_v19, -inf }
 0xa15   :  { %2469 = vmax.xlane.f32.xlu0 %v2468_v59 }
 0xa19   :  { %v2447_v21 = vpop.f32.mrf.mxu3 }
 0xa1a   :  { %v2448_v1 = vadd.f32 %v2447_v21, %v2406_v24 }
 0xa1b   :  { %v2409_v14 = vpop.f32.mrf.mxu0 }
 0xa1c   :  { %v2471_v54 = vsel %vm400_vm0, %v2448_v1, -inf }
 0xa1d   :  { %2472 = vmax.xlane.f32.xlu1 %v2471_v54 }
 0xa21   :  { %v2450_v55 = vpop.f32.mrf.mxu3 }
 0xa22   :  { %v2451_v53 = vadd.f32 %v2450_v55, %v2409_v14 }
 0xa23   :  { %v2412_v17 = vpop.f32.mrf.mxu0 }
 0xa24   :  { %v2474_v23 = vsel %vm400_vm0, %v2451_v53, -inf }
 0xa25   :  { %2475 = vmax.xlane.f32.xlu2 %v2474_v23 }
 0xa29   :  { %v2453_v7 = vpop.f32.mrf.mxu3 }
 0xa2a   :  { %v2454_v41 = vadd.f32 %v2453_v7, %v2412_v17 }
 0xa2b   :  { %v2415_v43 = vpop.f32.mrf.mxu0 }
 0xa2c   :  { %v2477_v22 = vsel %vm400_vm0, %v2454_v41, -inf }
 0xa2d   :  { %2478 = vmax.xlane.f32.xlu0 %v2477_v22 }
 0xa31   :  { %v2456_v46 = vpop.f32.mrf.mxu3 }
 0xa32   :  { %v2457_v25 = vadd.f32 %v2456_v46, %v2415_v43 }
 0xa34   :  { %v2480_v27 = vsel %vm400_vm0, %v2457_v25, -inf }
 0xa35   :  { %2481 = vmax.xlane.f32.xlu2 %v2480_v27 }
 0xa70   :  { %v2461_v35 = vpop.xlane.xlu0 %2460 }
 0xa71   :  { %v2483_v36 = vsub.f32 %v2436_v45, %v2461_v35 }
 0xa73   :  { %v2491_v48 = vmul.f32 1.442695, %v2483_v36 }
 0xa75   :  { %4332 = vpow2.f32 %v2491_v48 }
 0xa78   :  { %v2464_v29 = vpop.xlane.xlu1 %2463 }
 0xa79   :  { %v2484_v8 = vsub.f32 %v2439_v51, %v2464_v29 }
 0xa7b   :  { %v6046_v16 = vpop.eup %4332  ;;  %v2493_v15 = vmul.f32 1.442695, %v2484_v8 }
 0xa7c   :  { %v2507_v33 = vsel %vm400_vm0, %v6046_v16, 0.0 }
 0xa7d   :  { %4334 = vpow2.f32 %v2493_v15  ;;  %2508 = vadd.xlane.f32.xlu1 %v2507_v33 }
 0xa80   :  { %v2467_v30 = vpop.xlane.xlu2 %2466 }
 0xa81   :  { %v2485_v5 = vsub.f32 %v2442_v28, %v2467_v30 }
 0xa83   :  { %v6050_v60 = vpop.eup %4334  ;;  %v2495_v9 = vmul.f32 1.442695, %v2485_v5 }
 0xa84   :  { %v2510_v20 = vsel %vm400_vm0, %v6050_v60, 0.0 }
 0xa85   :  { %4336 = vpow2.f32 %v2495_v9  ;;  %2511 = vadd.xlane.f32.xlu0 %v2510_v20 }
 0xa88   :  { %v2470_v56 = vpop.xlane.xlu0 %2469 }
 0xa89   :  { %v2486_v32 = vsub.f32 %v2445_v19, %v2470_v56 }
 0xa8b   :  { %v6054_v11 = vpop.eup %4336  ;;  %v2497_v26 = vmul.f32 1.442695, %v2486_v32  ;;  %v6084_v32 = vld [vmem:[%s6627_s2 + $0x18] sm:$0x3] }
 0xa8c   :  { %v2513_v31 = vsel %vm400_vm0, %v6054_v11, 0.0 }
 0xa8d   :  { %4338 = vpow2.f32 %v2497_v26  ;;  %2514 = vadd.xlane.f32.xlu1 %v2513_v31 }
 0xa90   :  { %v2473_v45 = vpop.xlane.xlu1 %2472 }
 0xa91   :  { %v2487_v18 = vsub.f32 %v2448_v1, %v2473_v45  ;;  %v6098_v45 = vld [vmem:[%s6627_s2 + $0x8] sm:$0xff] }
 0xa93   :  { %v6058_v61 = vpop.eup %4338  ;;  %v2499_v10 = vmul.f32 1.442695, %v2487_v18  ;;  %v6104_v18 = vld [vmem:[%s6627_s2] sm:$0xff] }
 0xa94   :  { %v2516_v51 = vsel %vm400_vm0, %v6058_v61, 0.0 }
 0xa95   :  { %4340 = vpow2.f32 %v2499_v10  ;;  %2517 = vadd.xlane.f32.xlu2 %v2516_v51 }
 0xa98   :  { %v2476_v3 = vpop.xlane.xlu2 %2475 }
 0xa99   :  { %v2488_v63 = vsub.f32 %v2451_v53, %v2476_v3 }
 0xa9b   :  { %v6062_v42 = vpop.eup %4340  ;;  %v2501_v28 = vmul.f32 1.442695, %v2488_v63 }
 0xa9c   :  { %v2519_v38 = vsel %vm400_vm0, %v6062_v42, 0.0 }
 0xa9d   :  { %4342 = vpow2.f32 %v2501_v28  ;;  %2520 = vadd.xlane.f32.xlu0 %v2519_v38 }
 0xaa0   :  { %v2479_v4 = vpop.xlane.xlu0 %2478 }
 0xaa1   :  { %v2489_v57 = vsub.f32 %v2454_v41, %v2479_v4 }
 0xaa3   :  { %v6066_v19 = vpop.eup %4342  ;;  %v2503_v24 = vmul.f32 1.442695, %v2489_v57 }
 0xaa4   :  { %v2522_v59 = vsel %vm400_vm0, %v6066_v19, 0.0 }
 0xaa5   :  { %4344 = vpow2.f32 %v2503_v24  ;;  %2523 = vadd.xlane.f32.xlu1 %v2522_v59 }
 0xaa8   :  { %v2482_v21 = vpop.xlane.xlu2 %2481 }
 0xaa9   :  { %v2490_v1 = vsub.f32 %v2457_v25, %v2482_v21 }
 0xaab   :  { %v6070_v54 = vpop.eup %4344  ;;  %v2505_v14 = vmul.f32 1.442695, %v2490_v1 }
 0xaac   :  { %v2525_v55 = vsel %vm400_vm0, %v6070_v54, 0.0 }
 0xaad   :  { %4346 = vpow2.f32 %v2505_v14  ;;  %2526 = vadd.xlane.f32.xlu2 %v2525_v55 }
 0xab3   :  { %v6074_v53 = vpop.eup %4346 }
 0xab4   :  { %v2528_v23 = vsel %vm400_vm0, %v6074_v53, 0.0 }
 0xab5   :  { %2529 = vadd.xlane.f32.xlu0 %v2528_v23 }
 0xaf0   :  { %v2509_v17 = vpop.xlane.xlu1 %2508 }
 0xaf1   :  { %4348 = vrcp.f32 %v2509_v17  ;;  %v2542_v46 = vand.u32 2147483648, %v2509_v17  ;;  %v2540_v27 = vand.u32 2147483647, %v2509_v17  ;;  %vm2536_vm15 = vweird.f32 %v2509_v17 }
 0xaf3   :  { %v2543_v48 = vor.u32 1.1754944e-38, %v2542_v46  ;;  %vm2541_vm3 = vcmp.eq.f32.partialorder %v2540_v27, 8.507059e+37 }
 0xaf7   :  { %v4349_v7 = vpop.eup %4348 }
 0xaf8   :  { %v2532_v41 = vmul.f32 %v4349_v7, %v2509_v17  ;;  %v2512_v22 = vpop.xlane.xlu0 %2511  ;;  %vm2537_vm6 = vweird.f32 %v4349_v7 }
 0xaf9   :  { %4350 = vrcp.f32 %v2512_v22  ;;  %vm2538_vm2 = vmor %vm2536_vm15, %vm2537_vm6  ;;  %v2557_v20 = vand.u32 2147483648, %v2512_v22  ;;  %v2555_v56 = vand.u32 2147483647, %v2512_v22  ;;  %vm2551_vm6 = vweird.f32 %v2512_v22 }
 0xafa   :  { %v2533_v43 = vsub.f32 1.0, %v2532_v41 }
 0xafb   :  { %v2558_v10 = vor.u32 1.1754944e-38, %v2557_v20 }
 0xafc   :  { %v2534_v25 = vmul.f32 %v4349_v7, %v2533_v43 }
 0xafe   :  { %v2535_v35 = vadd.f32 %v4349_v7, %v2534_v25 }
 0xaff   :  { %v4351_v36 = vpop.eup %4350 }
 0xb00   :  { %v2539_v29 = vsel %vm2538_vm2, %v4349_v7, %v2535_v35  ;;  %v2547_v8 = vmul.f32 %v4351_v36, %v2512_v22  ;;  %v2515_v15 = vpop.xlane.xlu1 %2514  ;;  %vm2552_vm4 = vweird.f32 %v4351_v36  ;;  %vm2556_vm2 = vcmp.eq.f32.partialorder %v2555_v56, 8.507059e+37 }
 0xb01   :  { %v2544_v33 = vsel %vm2541_vm3, %v2543_v48, %v2539_v29  ;;  %4352 = vrcp.f32 %v2515_v15  ;;  %vm2553_vm15 = vmor %vm2551_vm6, %vm2552_vm4  ;;  %v2572_v24 = vand.u32 2147483648, %v2515_v15  ;;  %v2570_v59 = vand.u32 2147483647, %v2515_v15 }
 0xb02   :  { %v2545_v30 = vmul.f32 %v6046_v16, %v2544_v33  ;;  %v2548_v5 = vsub.f32 1.0, %v2547_v8  ;;  %v6091_v16 = vld [vmem:[%s6627_s2 + $0x10] sm:$0x3]  ;;  %vm2566_vm4 = vweird.f32 %v2515_v15 }
 0xb03   :  { %v2573_v14 = vor.u32 1.1754944e-38, %v2572_v24 }
 0xb04   :  { %v2549_v9 = vmul.f32 %v4351_v36, %v2548_v5  ;;  %4171 = vmatmul.msk.f32.vlgmr.msra.gmra.mxu1 %vm400_vm0, %v2545_v30  ;;  %4180 = vmatmul.msk.f32.vlgmr.msrb.gmra.mxu2 %vm400_vm0, %v2545_v30 }
 0xb05   :  { %4210 = vmatpush.msk.msrb.mxu2 %vm6733_vm1, %v6084_v32  ;;  %4201 = vmatpush.msk.msra.mxu1 %vm6734_vm5, %v6091_v16  ;;  %vm2571_vm5 = vcmp.eq.f32.partialorder %v2570_v59, 8.507059e+37 }
 0xb06   :  { %v2550_v26 = vadd.f32 %v4351_v36, %v2549_v9 }
 0xb07   :  { %v4353_v31 = vpop.eup %4352  ;;  %3477 = vmatpush.msrb.mxu2 %v6098_v45  ;;  %3436 = vmatpush.msra.mxu1 %v6104_v18 }
 0xb08   :  { %v2562_v51 = vmul.f32 %v4353_v31, %v2515_v15  ;;  %v2518_v3 = vpop.xlane.xlu2 %2517  ;;  %v2554_v63 = vsel %vm2553_vm15, %v4351_v36, %v2550_v26  ;;  %vm2567_vm3 = vweird.f32 %v4353_v31 }
 0xb09   :  { %4354 = vrcp.f32 %v2518_v3  ;;  %v2559_v38 = vsel %vm2556_vm2, %v2558_v10, %v2554_v63  ;;  %vm2568_vm1 = vmor %vm2566_vm4, %vm2567_vm3  ;;  %v2587_v43 = vand.u32 2147483648, %v2518_v3  ;;  %v2585_v46 = vand.u32 2147483647, %v2518_v3 }
 0xb0a   :  { %v2563_v28 = vsub.f32 1.0, %v2562_v51  ;;  %v2560_v4 = vmul.f32 %v6050_v60, %v2559_v38  ;;  %vm2581_vm15 = vweird.f32 %v2518_v3 }
 0xb0b   :  { %v2588_v35 = vor.u32 1.1754944e-38, %v2587_v43  ;;  %vm2586_vm3 = vcmp.eq.f32.partialorder %v2585_v46, 8.507059e+37 }
 0xb0c   :  { %v2564_v57 = vmul.f32 %v4353_v31, %v2563_v28  ;;  %4172 = vmatmul.msk.f32.gmra.mxu1 %vm400_vm0, %v2560_v4  ;;  %4181 = vmatmul.msk.f32.gmra.mxu2 %vm400_vm0, %v2560_v4 }
 0xb0e   :  { %v2565_v21 = vadd.f32 %v4353_v31, %v2564_v57 }
 0xb0f   :  { %v4355_v1 = vpop.eup %4354 }
 0xb10   :  { %v2577_v55 = vmul.f32 %v4355_v1, %v2518_v3  ;;  %v2521_v23 = vpop.xlane.xlu0 %2520  ;;  %v2569_v17 = vsel %vm2568_vm1, %v4353_v31, %v2565_v21  ;;  %vm2582_vm6 = vweird.f32 %v4355_v1 }
 0xb11   :  { %4356 = vrcp.f32 %v2521_v23  ;;  %v2574_v60 = vsel %vm2571_vm5, %v2573_v14, %v2569_v17  ;;  %vm2583_vm2 = vmor %vm2581_vm15, %vm2582_vm6  ;;  %v2602_v30 = vand.u32 2147483648, %v2521_v23  ;;  %v2600_v5 = vand.u32 2147483647, %v2521_v23 }
 0xb12   :  { %v2578_v7 = vsub.f32 1.0, %v2577_v55  ;;  %v2575_v41 = vmul.f32 %v6054_v11, %v2574_v60  ;;  %vm2596_vm1 = vweird.f32 %v2521_v23 }
 0xb13   :  { %v2603_v56 = vor.u32 1.1754944e-38, %v2602_v30  ;;  %vm2601_vm6 = vcmp.eq.f32.partialorder %v2600_v5, 8.507059e+37 }
 0xb14   :  { %v2579_v22 = vmul.f32 %v4355_v1, %v2578_v7  ;;  %4173 = vmatmul.msk.f32.gmra.mxu1 %vm400_vm0, %v2575_v41  ;;  %4182 = vmatmul.msk.f32.gmra.mxu2 %vm400_vm0, %v2575_v41 }
 0xb16   :  { %v2580_v25 = vadd.f32 %v4355_v1, %v2579_v22 }
 0xb17   :  { %v4357_v27 = vpop.eup %4356 }
 0xb18   :  { %v2592_v36 = vmul.f32 %v4357_v27, %v2521_v23  ;;  %v2524_v48 = vpop.xlane.xlu1 %2523  ;;  %v2584_v29 = vsel %vm2583_vm2, %v4355_v1, %v2580_v25  ;;  %vm2597_vm4 = vweird.f32 %v4357_v27 }
 0xb19   :  { %4358 = vrcp.f32 %v2524_v48  ;;  %v2589_v11 = vsel %vm2586_vm3, %v2588_v35, %v2584_v29  ;;  %vm2598_vm5 = vmor %vm2596_vm1, %vm2597_vm4  ;;  %v2617_v28 = vand.u32 2147483648, %v2524_v48  ;;  %v2615_v38 = vand.u32 2147483647, %v2524_v48 }
 0xb1a   :  { %v2593_v8 = vsub.f32 1.0, %v2592_v36  ;;  %v2590_v15 = vmul.f32 %v6058_v61, %v2589_v11  ;;  %vm2611_vm2 = vweird.f32 %v2524_v48 }
 0xb1b   :  { %v2618_v24 = vor.u32 1.1754944e-38, %v2617_v28  ;;  %vm2616_vm4 = vcmp.eq.f32.partialorder %v2615_v38, 8.507059e+37 }
 0xb1c   :  { %v2594_v33 = vmul.f32 %v4357_v27, %v2593_v8  ;;  %4174 = vmatmul.msk.f32.gmra.mxu1 %vm400_vm0, %v2590_v15  ;;  %4183 = vmatmul.msk.f32.gmra.mxu2 %vm400_vm0, %v2590_v15 }
 0xb1e   :  { %v2595_v9 = vadd.f32 %v4357_v27, %v2594_v33 }
 0xb1f   :  { %v4359_v20 = vpop.eup %4358 }
 0xb20   :  { %v2607_v26 = vmul.f32 %v4359_v20, %v2524_v48  ;;  %v2527_v31 = vpop.xlane.xlu2 %2526  ;;  %v2599_v10 = vsel %vm2598_vm5, %v4357_v27, %v2595_v9  ;;  %vm2612_vm15 = vweird.f32 %v4359_v20 }
 0xb21   :  { %4360 = vrcp.f32 %v2527_v31  ;;  %v2604_v61 = vsel %vm2601_vm6, %v2603_v56, %v2599_v10  ;;  %vm2613_vm3 = vmor %vm2611_vm2, %vm2612_vm15  ;;  %v2632_v55 = vand.u32 2147483648, %v2527_v31  ;;  %v2630_v7 = vand.u32 2147483647, %v2527_v31 }
 0xb22   :  { %v2608_v51 = vsub.f32 1.0, %v2607_v26  ;;  %v2605_v3 = vmul.f32 %v6062_v42, %v2604_v61  ;;  %vm2626_vm5 = vweird.f32 %v2527_v31 }
 0xb23   :  { %v2633_v22 = vor.u32 1.1754944e-38, %v2632_v55  ;;  %vm2631_vm15 = vcmp.eq.f32.partialorder %v2630_v7, 8.507059e+37 }
 0xb24   :  { %v2609_v63 = vmul.f32 %v4359_v20, %v2608_v51  ;;  %4175 = vmatmul.msk.f32.gmra.mxu1 %vm400_vm0, %v2605_v3  ;;  %4184 = vmatmul.msk.f32.gmra.mxu2 %vm400_vm0, %v2605_v3 }
 0xb26   :  { %v2610_v4 = vadd.f32 %v4359_v20, %v2609_v63 }
 0xb27   :  { %v4361_v57 = vpop.eup %4360 }
 0xb28   :  { %v2622_v59 = vmul.f32 %v4361_v57, %v2527_v31  ;;  %v2530_v21 = vpop.xlane.xlu0 %2529  ;;  %v2614_v1 = vsel %vm2613_vm3, %v4359_v20, %v2610_v4  ;;  %vm2627_vm1 = vweird.f32 %v4361_v57 }
 0xb29   :  { %4362 = vrcp.f32 %v2530_v21  ;;  %v2619_v42 = vsel %vm2616_vm4, %v2618_v24, %v2614_v1  ;;  %vm2628_vm6 = vmor %vm2626_vm5, %vm2627_vm1  ;;  %v2645_v48 = vand.u32 2147483647, %v2530_v21  ;;  %vm2641_vm3 = vweird.f32 %v2530_v21 }
 0xb2a   :  { %v2623_v14 = vsub.f32 1.0, %v2622_v59  ;;  %v2620_v23 = vmul.f32 %v6066_v19, %v2619_v42  ;;  %v2647_v19 = vand.u32 2147483648, %v2530_v21 }
 0xb2b   :  { %vm2646_vm1 = vcmp.eq.f32.partialorder %v2645_v48, 8.507059e+37 }
 0xb2c   :  { %v2624_v17 = vmul.f32 %v4361_v57, %v2623_v14  ;;  %4176 = vmatmul.msk.f32.gmra.mxu1 %vm400_vm0, %v2620_v23  ;;  %4185 = vmatmul.msk.f32.gmra.mxu2 %vm400_vm0, %v2620_v23  ;;  %v2648_v8 = vor.u32 1.1754944e-38, %v2647_v19 }
 0xb2e   :  { %v2625_v60 = vadd.f32 %v4361_v57, %v2624_v17 }
 0xb2f   :  { %v4363_v41 = vpop.eup %4362 }
 0xb30   :  { %v2637_v43 = vmul.f32 %v4363_v41, %v2530_v21  ;;  %v2629_v46 = vsel %vm2628_vm6, %v4361_v57, %v2625_v60  ;;  %vm2642_vm2 = vweird.f32 %v4363_v41 }
 0xb31   :  { %v2634_v25 = vsel %vm2631_vm15, %v2633_v22, %v2629_v46  ;;  %vm2643_vm4 = vmor %vm2641_vm3, %vm2642_vm2  ;;  %vm6735_vm2 = vcmask 1041408  }
 0xb32   :  { %v2638_v27 = vsub.f32 1.0, %v2637_v43  ;;  %v2635_v35 = vmul.f32 %v6070_v54, %v2634_v25  ;;  %vm6736_vm3 = vmmov %vm6735_vm2 }
 0xb34   :  { %v2639_v36 = vmul.f32 %v4363_v41, %v2638_v27  ;;  %4177 = vmatmul.msk.f32.gmra.mxu1 %vm400_vm0, %v2635_v35  ;;  %4186 = vmatmul.msk.f32.gmra.mxu2 %vm400_vm0, %v2635_v35 }
 0xb36   :  { %v2640_v29 = vadd.f32 %v4363_v41, %v2639_v36 }
 0xb38   :  { %v2644_v11 = vsel %vm2643_vm4, %v4363_v41, %v2640_v29 }
 0xb39   :  { %v2649_v15 = vsel %vm2646_vm1, %v2648_v8, %v2644_v11 }
 0xb3a   :  { %v2650_v33 = vmul.f32 %v6074_v53, %v2649_v15 }
 0xb3c   :  { %4178 = vmatmul.msk.f32.gmra.mxu1 %vm400_vm0, %v2650_v33  ;;  %4187 = vmatmul.msk.f32.gmra.mxu2 %vm400_vm0, %v2650_v33 }
 0xb81   :  { %v2692_v54 = vpop.f32.mrf.mxu1 }
 0xb82   :  { %v2757_v31 = vmul.f32 %v2692_v54, %v4912_v58 }
 0xb84   :  { %v2773_v51 = vrot.slane %v2757_v31, 4 }
 0xb86   :  { %v2774_v28 = vadd.f32 %v2773_v51, %v2757_v31 }
 0xb87   :  { %v2733_v30 = vpop.f32.mrf.mxu2 }
 0xb88   :  { %v2758_v3 = vmul.f32 %v2733_v30, %v6714_v0  ;;  %v2775_v59 = vrot.slane %v2774_v28, 2 }
 0xb89   :  { %v2695_v5 = vpop.f32.mrf.mxu1 }
 0xb8a   :  { %v2759_v10 = vmul.f32 %v2695_v5, %v6716_v47  ;;  %v2779_v38 = vsel %vm533_vm7, %v2758_v3, 0.0  ;;  %v2776_v41 = vadd.f32 %v2775_v59, %v2774_v28 }
 0xb8b   :  { %v2780_v21 = vrot.slane %v2779_v38, 4 }
 0xb8c   :  { %v2786_v53 = vrot.slane %v2759_v10, 4  ;;  %v2777_v11 = vrot.slane %v2776_v41, 1 }
 0xb8d   :  { %v2781_v46 = vadd.f32 %v2780_v21, %v2779_v38 }
 0xb8e   :  { %v2787_v4 = vadd.f32 %v2786_v53, %v2759_v10  ;;  %v6145_v53 = vadd.f32 %v2777_v11, %v2776_v41 }
 0xb8f   :  { %v2736_v9 = vpop.f32.mrf.mxu2  ;;  %v2782_v33 = vrot.slane %v2781_v46, 2 }
 0xb90   :  { %v2760_v42 = vmul.f32 %v2736_v9, %v6717_v13  ;;  %v2788_v55 = vrot.slane %v2787_v4, 2 }
 0xb91   :  { %v2698_v20 = vpop.f32.mrf.mxu1 }
 0xb92   :  { %v2761_v57 = vmul.f32 %v2698_v20, %v6718_v44  ;;  %v2792_v35 = vsel %vm533_vm7, %v2760_v42, 0.0  ;;  %v2789_v36 = vadd.f32 %v2788_v55, %v2787_v4  ;;  %v2783_v4 = vadd.f32 %v2782_v33, %v2781_v46 }
 0xb93   :  { %v2793_v54 = vrot.slane %v2792_v35, 4 }
 0xb94   :  { %v2799_v23 = vrot.slane %v2761_v57, 4  ;;  %v2790_v31 = vrot.slane %v2789_v36, 1 }
 0xb96   :  { %v2800_v48 = vadd.f32 %v2799_v23, %v2761_v57  ;;  %v2794_v57 = vadd.f32 %v2793_v54, %v2792_v35  ;;  %v6149_v42 = vadd.f32 %v2790_v31, %v2789_v36 }
 0xb97   :  { %v2739_v56 = vpop.f32.mrf.mxu2 }
 0xb98   :  { %v2762_v17 = vmul.f32 %v2739_v56, %v6719_v6  ;;  %v2801_v10 = vrot.slane %v2800_v48, 2  ;;  %v2879_v36 = vmul.f32 %v6149_v42, %v6149_v42 }
 0xb99   :  { %v2701_v26 = vpop.f32.mrf.mxu1 }
 0xb9a   :  { %v2763_v24 = vmul.f32 %v2701_v26, %v6720_v40  ;;  %v2805_v29 = vsel %vm533_vm7, %v2762_v17, 0.0  ;;  %v2802_v55 = vadd.f32 %v2801_v10, %v2800_v48 }
 0xb9b   :  { %v2806_v20 = vrot.slane %v2805_v29, 4 }
 0xb9c   :  { %v2812_v7 = vrot.slane %v2763_v24, 4  ;;  %v2803_v48 = vrot.slane %v2802_v55, 1 }
 0xb9d   :  { %v2807_v21 = vadd.f32 %v2806_v20, %v2805_v29 }
 0xb9e   :  { %v2813_v8 = vadd.f32 %v2812_v7, %v2763_v24  ;;  %v2877_v7 = vmul.f32 %v6145_v53, %v6145_v53 }
 0xb9f   :  { %v2742_v61 = vpop.f32.mrf.mxu2  ;;  %v2808_v35 = vrot.slane %v2807_v21, 2 }
 0xba0   :  { %v2764_v22 = vmul.f32 %v2742_v61, %v6721_v50  ;;  %v2814_v51 = vrot.slane %v2813_v8, 2 }
 0xba1   :  { %v2704_v63 = vpop.f32.mrf.mxu1 }
 0xba2   :  { %v2765_v1 = vmul.f32 %v2704_v63, %v6722_v2  ;;  %v2818_v15 = vsel %vm533_vm7, %v2764_v22, 0.0  ;;  %v2815_v23 = vadd.f32 %v2814_v51, %v2813_v8  ;;  %v2784_v22 = vrot.slane %v2783_v4, 1 }
 0xba3   :  { %v2819_v61 = vrot.slane %v2818_v15, 4  ;;  %v2809_v51 = vadd.f32 %v2808_v35, %v2807_v21 }
 0xba4   :  { %v2825_v25 = vrot.slane %v2765_v1, 4  ;;  %v2816_v8 = vrot.slane %v2815_v23, 1  ;;  %v6158_v10 = vadd.f32 %v2784_v22, %v2783_v4 }
 0xba5   :  { %v2820_v17 = vadd.f32 %v2819_v61, %v2818_v15  ;;  %v2810_v21 = vrot.slane %v2809_v51, 1 }
 0xba6   :  { %v2826_v30 = vadd.f32 %v2825_v25, %v2765_v1 }
 0xba7   :  { %v2745_v14 = vpop.f32.mrf.mxu2  ;;  %v2821_v15 = vrot.slane %v2820_v17, 2 }
 0xba8   :  { %v2766_v27 = vmul.f32 %v2745_v14, %v6723_v49  ;;  %v2827_v24 = vrot.slane %v2826_v30, 2 }
 0xba9   :  { %v2707_v60 = vpop.f32.mrf.mxu1 }
 0xbaa   :  { %v2767_v43 = vmul.f32 %v2707_v60, %v6724_v34  ;;  %v2831_v5 = vsel %vm533_vm7, %v2766_v27, 0.0  ;;  %v2828_v25 = vadd.f32 %v2827_v24, %v2826_v30 }
 0xbab   :  { %v2832_v63 = vrot.slane %v2831_v5, 4 }
 0xbac   :  { %v2838_v19 = vrot.slane %v2767_v43, 4 }
 0xbad   :  { %v2833_v60 = vadd.f32 %v2832_v63, %v2831_v5  ;;  %v6160_v63 = vadd.f32 %v2803_v48, %v2802_v55 }
 0xbae   :  { %v2839_v56 = vadd.f32 %v2838_v19, %v2767_v43  ;;  %v2795_v43 = vrot.slane %v2794_v57, 2 }
 0xbaf   :  { %v2748_v9 = vpop.f32.mrf.mxu2  ;;  %v2834_v54 = vrot.slane %v2833_v60, 2 }
 0xbb0   :  { %v2768_v26 = vmul.f32 %v2748_v9, %v6725_v12  ;;  %v2840_v1 = vrot.slane %v2839_v56, 2  ;;  %v2796_v20 = vadd.f32 %v2795_v43, %v2794_v57 }
 0xbb1   :  { %v2710_v3 = vpop.f32.mrf.mxu1 }
 0xbb2   :  { %v2844_v28 = vsel %vm533_vm7, %v2768_v26, 0.0  ;;  %v2769_v38 = vmul.f32 %v2710_v3, %v6726_v39  ;;  %v2841_v19 = vadd.f32 %v2840_v1, %v2839_v56  ;;  %v2829_v26 = vrot.slane %v2828_v25, 1 }
 0xbb3   :  { %v2845_v59 = vrot.slane %v2844_v28, 4  ;;  %v6163_v1 = vadd.f32 %v2816_v8, %v2815_v23  ;;  %v2797_v57 = vrot.slane %v2796_v20, 1 }
 0xbb4   :  { %v2851_v14 = vrot.slane %v2769_v38, 4  ;;  %v2842_v61 = vrot.slane %v2841_v19, 1  ;;  %v6165_v43 = vadd.f32 %v2829_v26, %v2828_v25 }
 0xbb5   :  { %v2846_v46 = vadd.f32 %v2845_v59, %v2844_v28  ;;  %v2822_v28 = vadd.f32 %v2821_v15, %v2820_v17  ;;  %v2909_v59 = vsel %vm664_vm8, %v2879_v36, %v2877_v7  ;;  %v2883_v25 = vmul.f32 %v6163_v1, %v6163_v1 }
 0xbb6   :  { %v2852_v41 = vadd.f32 %v2851_v14, %v2769_v38  ;;  %v2835_v14 = vadd.f32 %v2834_v54, %v2833_v60  ;;  %v6167_v35 = vadd.f32 %v2842_v61, %v2841_v19  ;;  %v6177_v48 = vadd.f32 %v2797_v57, %v2796_v20 }
 0xbb7   :  { %v2751_v27 = vpop.f32.mrf.mxu2  ;;  %v2847_v31 = vrot.slane %v2846_v46, 2  ;;  %v2823_v7 = vrot.slane %v2822_v28, 1  ;;  %v2885_v19 = vmul.f32 %v6165_v43, %v6165_v43 }
 0xbb8   :  { %v2853_v29 = vrot.slane %v2852_v41, 2  ;;  %v2770_v11 = vmul.f32 %v2751_v27, %v6727_v62  ;;  %v2887_v54 = vmul.f32 %v6167_v35, %v6167_v35 }
 0xbb9   :  { %v2713_v33 = vpop.f32.mrf.mxu1  ;;  %v2848_v27 = vadd.f32 %v2847_v31, %v2846_v46  ;;  %v6186_v26 = vadd.f32 %v2823_v7, %v2822_v28 }
 0xbba   :  { %v2854_v5 = vadd.f32 %v2853_v29, %v2852_v41  ;;  %v2857_v9 = vsel %vm533_vm7, %v2770_v11, 0.0  ;;  %v2771_v30 = vmul.f32 %v2713_v33, %v6731_v37  ;;  %v2881_v29 = vmul.f32 %v6160_v63, %v6160_v63 }
 0xbbb   :  { %v2858_v56 = vrot.slane %v2857_v9, 4  ;;  %v2836_v11 = vrot.slane %v2835_v14, 1  ;;  %v2849_v8 = vrot.slane %v2848_v27, 1  ;;  %v6181_v33 = vadd.f32 %v2810_v21, %v2809_v51 }
 0xbbc   :  { %v2864_v3 = vrot.slane %v2771_v30, 4  ;;  %v2855_v38 = vrot.slane %v2854_v5, 1  ;;  %v2880_v51 = vmul.f32 %v6177_v48, %v6177_v48 }
 0xbbd   :  { %v2859_v24 = vadd.f32 %v2858_v56, %v2857_v9  ;;  %v6191_v61 = vadd.f32 %v2836_v11, %v2835_v14  ;;  %v2882_v28 = vmul.f32 %v6181_v33, %v6181_v33 }
 0xbbe   :  { %v2865_v41 = vadd.f32 %v2864_v3, %v2771_v30  ;;  %v6172_v23 = vadd.f32 %v2855_v38, %v2854_v5  ;;  %v2910_v30 = vsel %vm666_vm9, %v2881_v29, %v2909_v59  ;;  %v6197_v38 = vadd.f32 %v2849_v8, %v2848_v27 }
 0xbbf   :  { %v2860_v4 = vrot.slane %v2859_v24, 2  ;;  %v2754_v22 = vpop.f32.mrf.mxu2  ;;  %v2911_v56 = vsel %vm668_vm10, %v2883_v25, %v2910_v30  ;;  %v2884_v27 = vmul.f32 %v6186_v26, %v6186_v26  ;;  %v4455_v30 = vld [vmem:[%s6628_s3 + $0x70] sm:$0xff] }
 0xbc0   :  { %v2866_v55 = vrot.slane %v2865_v41, 2  ;;  %v2772_v17 = vmul.f32 %v2754_v22, %v6732_v52  ;;  %v2889_v20 = vmul.f32 %v6172_v23, %v6172_v23  ;;  %v2912_v59 = vsel %vm670_vm11, %v2885_v19, %v2911_v56  ;;  %v4458_v56 = vld [vmem:[%s6628_s3 + $0x58] sm:$0xff] }
 0xbc1   :  { %v2861_v60 = vadd.f32 %v2860_v4, %v2859_v24  ;;  %v2913_v14 = vsel %vm672_vm12, %v2887_v54, %v2912_v59  ;;  %v2878_v4 = vmul.f32 %v6158_v10, %v6158_v10  ;;  %v2888_v7 = vmul.f32 %v6197_v38, %v6197_v38  ;;  %v4461_v59 = vld [vmem:[%s6628_s3 + $0x40] sm:$0xff] }
 0xbc2   :  { %v2867_v46 = vadd.f32 %v2866_v55, %v2865_v41  ;;  %v2870_v36 = vsel %vm533_vm7, %v2772_v17, 0.0  ;;  %v2914_v21 = vsel %vm674_vm13, %v2889_v20, %v2913_v14  ;;  %v2886_v55 = vmul.f32 %v6191_v61, %v6191_v61  ;;  %v4456_v20 = vld [vmem:[%s6628_s3 + $0x68] sm:$0xff] }
 0xbc3   :  { %v2871_v15 = vrot.slane %v2870_v36, 4  ;;  %v2862_v5 = vrot.slane %v2861_v60, 1  ;;  %v2916_v29 = vsel %vm664_vm8, %v2880_v51, %v2878_v4  ;;  %v4459_v51 = vld [vmem:[%s6628_s3 + $0x50] sm:$0xff]  ;;  %v4464_v14 = vld [vmem:[%s6628_s3 + $0x28] sm:$0xff]  ;;  %v4465_v4 = vld [vmem:[%s6628_s3 + $0x20] sm:$0xff] }
 0xbc4   :  { %v2868_v9 = vrot.slane %v2867_v46, 1  ;;  %v2917_v25 = vsel %vm666_vm9, %v2882_v28, %v2916_v29  ;;  %v4462_v28 = vld [vmem:[%s6628_s3 + $0x38] sm:$0xff] }
 0xbc5   :  { %v2872_v31 = vadd.f32 %v2871_v15, %v2870_v36  ;;  %v6202_v41 = vadd.f32 %v2862_v5, %v2861_v60 }
 0xbc6   :  { %v6193_v3 = vadd.f32 %v2868_v9, %v2867_v46  ;;  %v2918_v46 = vsel %vm668_vm10, %v2884_v27, %v2917_v25  ;;  %v4454_v9 = vld [vmem:[%s6628_s3 + $0x78] sm:$0xff] }
 0xbc7   :  { %v2873_v24 = vrot.slane %v2872_v31, 2  ;;  %v2890_v11 = vmul.f32 %v6202_v41, %v6202_v41  ;;  %v2919_v19 = vsel %vm670_vm11, %v2886_v55, %v2918_v46  ;;  %v4466_v27 = vld [vmem:[%s6628_s3 + $0x18] sm:$0xff]  ;;  %v4469_v55 = vld [vmem:[%s6628_s3] sm:$0xff] }
 0xbc8   :  { %v2891_v57 = vmul.f32 %v6193_v3, %v6193_v3  ;;  %v2920_v15 = vsel %vm672_vm12, %v2888_v7, %v2919_v19 }
 0xbc9   :  { %v2874_v22 = vadd.f32 %v2873_v24, %v2872_v31  ;;  %v2921_v54 = vsel %vm674_vm13, %v2890_v11, %v2920_v15  ;;  %v4457_v31 = vld [vmem:[%s6628_s3 + $0x60] sm:$0xff]  ;;  %v4460_v24 = vld [vmem:[%s6628_s3 + $0x48] sm:$0xff] }
 0xbca   :  { %v2915_v17 = vsel %vm676_vm14, %v2891_v57, %v2914_v21  ;;  %v4463_v57 = vld [vmem:[%s6628_s3 + $0x30] sm:$0xff]  ;;  %v4468_v21 = vld [vmem:[%s6628_s3 + $0x8] sm:$0xff] }
 0xbcb   :  { %v2875_v60 = vrot.slane %v2874_v22, 1  ;;  %2942 = vmatmul.f32.vlgmr.msra.gmra.mxu3 %v2915_v17 }
 0xbcd   :  { %v6222_v36 = vadd.f32 %v2875_v60, %v2874_v22  ;;  %v4467_v22 = vld [vmem:[%s6628_s3 + $0x10] sm:$0xff] }
 0xbcf   :  { %v2892_v8 = vmul.f32 %v6222_v36, %v6222_v36 }
 0xbd1   :  { %v2922_v5 = vsel %vm676_vm14, %v2892_v8, %v2921_v54 }
 0xbd2   :  { %4188 = vmatmul.msk.f32.vlgmr.msrb.gmra.mxu0 %vm533_vm7, %v2922_v5  ;;  %v4470_v5 = vld [vmem:[%s6628_s3 + $0x98] sm:$0xff] }
 0xbd3   :  { %3672 = vmatpush.msrb.mxu0 %v4454_v9  ;;  %v4471_v9 = vld [vmem:[%s6628_s3 + $0x90] sm:$0xff] }
 0xbd5   :  { %3673 = vmatpush.msrb.mxu0 %v4455_v30  ;;  %v4472_v30 = vld [vmem:[%s6628_s3 + $0x88] sm:$0xff] }
 0xbd7   :  { %3674 = vmatpush.msrb.mxu0 %v4456_v20  ;;  %v4473_v20 = vld [vmem:[%s6628_s3 + $0x80] sm:$0xff] }
 0xbd9   :  { %3675 = vmatpush.msrb.mxu0 %v4457_v31 }
 0xbdb   :  { %3676 = vmatpush.msrb.mxu0 %v4458_v56 }
 0xbdd   :  { %3677 = vmatpush.msrb.mxu0 %v4459_v51 }
 0xbdf   :  { %3678 = vmatpush.msrb.mxu0 %v4460_v24 }
 0xbe1   :  { %3679 = vmatpush.msrb.mxu0 %v4461_v59 }
 0xbe3   :  { %3680 = vmatpush.msrb.mxu0 %v4462_v28 }
 0xbe5   :  { %3681 = vmatpush.msrb.mxu0 %v4463_v57 }
 0xbe7   :  { %3682 = vmatpush.msrb.mxu0 %v4464_v14 }
 0xbe9   :  { %3683 = vmatpush.msrb.mxu0 %v4465_v4 }
 0xbeb   :  { %3684 = vmatpush.msrb.mxu0 %v4466_v27 }
 0xbed   :  { %3685 = vmatpush.msrb.mxu0 %v4467_v22 }
 0xbef   :  { %3686 = vmatpush.msrb.mxu0 %v4468_v21 }
 0xbf1   :  { %3687 = vmatpush.msrb.mxu0 %v4469_v55 }
 0xc4e   :  { %v2943_v17 = vpop.f32.mrf.mxu3 }
 0xc4f   :  { %v2944_v29 = vadd.f32 1e-07, %v2943_v17  ;;  %v2963_v7 = vpop.f32.mrf.mxu0 }
 0xc51   :  { %v2964_v60 = vadd.f32 %v2963_v7, %v2944_v29 }
 0xc53   :  { %4364 = vrsqrt.f32 %v2964_v60  ;;  %vm2972_vm6 = vweird.f32 %v2964_v60 }
 0xc59   :  { %v4365_v25 = vpop.eup %4364 }
 0xc5a   :  { %v2967_v11 = vmul.f32 %v4365_v25, %v2964_v60  ;;  %vm2973_vm5 = vweird.f32 %v4365_v25 }
 0xc5b   :  { %vm2974_vm15 = vmor %vm2972_vm6, %vm2973_vm5 }
 0xc5c   :  { %v2968_v46 = vmul.f32 %v4365_v25, %v2967_v11 }
 0xc5e   :  { %v2969_v19 = vmul.f32 0.5, %v2968_v46 }
 0xc60   :  { %v2970_v8 = vsub.f32 1.5, %v2969_v19 }
 0xc62   :  { %v2971_v15 = vmul.f32 %v4365_v25, %v2970_v8 }
 0xc64   :  { %v2975_v54 = vsel %vm2974_vm15, %v4365_v25, %v2971_v15 }
 0xc65   :  { %4190 = vmatmul.msk.f32.vlgmr.msrb.gmra.mxu1 %vm400_vm0, %v2975_v54  ;;  %4192 = vmatmul.msk.f32.vlgmr.msra.gmra.mxu2 %vm400_vm0, %v2975_v54 }
 0xc66   :  { %3704 = vmatpush.msrb.mxu1 %v4470_v5  ;;  %4220 = vmatpush.msk.msra.mxu2 %vm6735_vm2, %v6091_v16 }
 0xc68   :  { %3705 = vmatpush.msrb.mxu1 %v4471_v9  ;;  %3740 = vmatpush.msra.mxu2 %v6104_v18 }
 0xc6a   :  { %3706 = vmatpush.msrb.mxu1 %v4472_v30 }
 0xc6c   :  { %3707 = vmatpush.msrb.mxu1 %v4473_v20 }
 0xce2   :  { %v6296_v31 = vpop.f32.mrf.mxu1 }
 0xce3   :  { %v3051_v16 = vmul.f32 %v6296_v31, %v6145_v53  ;;  %v3021_v56 = vrot.slane %v6296_v31, 1  ;;  %v3023_v27 = vrot.slane %v6296_v31, 2  ;;  %v3025_v29 = vrot.slane %v6296_v31, 3 }
 0xce4   :  { %v3029_v5 = vrot.slane %v6296_v31, 5 }
 0xce5   :  { %v3067_v51 = vperm.slane %v3051_v16, 0  ;;  %v3053_v24 = vmul.f32 %v3021_v56, %v6149_v42  ;;  %v3055_v21 = vmul.f32 %v3023_v27, %v6160_v63  ;;  %v3057_v60 = vmul.f32 %v3025_v29, %v6163_v1 }
 0xce6   :  { %v3061_v20 = vmul.f32 %v3029_v5, %v6167_v35 }
 0xce7   :  { %v3083_v18 = vmul.f32 %v3067_v51, %v4912_v58  ;;  %v3069_v4 = vperm.slane %v3053_v24, 0  ;;  %v3071_v17 = vperm.slane %v3055_v21, 0  ;;  %v3073_v11 = vperm.slane %v3057_v60, 0 }
 0xce8   :  { %v6303_v59 = vpop.f32.mrf.mxu2  ;;  %v3077_v56 = vperm.slane %v3061_v20, 0  ;;  %v3031_v51 = vrot.slane %v6296_v31, 6 }
 0xce9   :  { %v3052_v28 = vmul.f32 %v6303_v59, %v6158_v10  ;;  %3139 = vmatmul.f32.vlgmr.msrb.gmra.mxu3 %v3083_v18  ;;  %v3022_v57 = vrot.slane %v6303_v59, 1  ;;  %v3085_v42 = vmul.f32 %v3069_v4, %v6716_v47  ;;  %v3024_v55 = vrot.slane %v6303_v59, 2 }
 0xcea   :  { %v3087_v63 = vmul.f32 %v3071_v17, %v6718_v44  ;;  %v3026_v25 = vrot.slane %v6303_v59, 3  ;;  %v3028_v1 = vrot.slane %v6303_v59, 4  ;;  %v3032_v35 = vrot.slane %v6303_v59, 6 }
 0xceb   :  { %v3068_v14 = vperm.slane %v3052_v28, 0  ;;  %v3054_v22 = vmul.f32 %v3022_v57, %v6177_v48  ;;  %v3056_v7 = vmul.f32 %v3024_v55, %v6181_v33  ;;  %v3089_v33 = vmul.f32 %v3073_v11, %v6720_v40 }
 0xcec   :  { %v3058_v19 = vmul.f32 %v3026_v25, %v6186_v26  ;;  %v3060_v30 = vmul.f32 %v3028_v1, %v6191_v61  ;;  %v3093_v61 = vmul.f32 %v3077_v56, %v6724_v34  ;;  %v3063_v28 = vmul.f32 %v3031_v51, %v6172_v23 }
 0xced   :  { %v3084_v53 = vmul.f32 %v3068_v14, %v6714_v0  ;;  %v3070_v10 = vperm.slane %v3054_v22, 0  ;;  %v3033_v4 = vrot.slane %v6296_v31, 7  ;;  %v3034_v23 = vrot.slane %v6303_v59, 7 }
 0xcee   :  { %v3074_v15 = vperm.slane %v3058_v19, 0  ;;  %v3076_v16 = vperm.slane %v3060_v30, 0  ;;  %v3079_v14 = vperm.slane %v3063_v28, 0 }
 0xcef   :  { %4193 = vmatmul.msk.f32.vlgmr.msra.gmra.mxu0 %vm533_vm7, %v3084_v53  ;;  %v3086_v48 = vmul.f32 %v3070_v10, %v6717_v13  ;;  %v3064_v53 = vmul.f32 %v3032_v35, %v6202_v41  ;;  %v3065_v22 = vmul.f32 %v3033_v4, %v6193_v3  ;;  %v3066_v55 = vmul.f32 %v3034_v23, %v6222_v36 }
 0xcf0   :  { %4222 = vmatpush.msk.msra.mxu0 %vm6736_vm3, %v6084_v32  ;;  %v3072_v32 = vperm.slane %v3056_v7, 0  ;;  %v3090_v9 = vmul.f32 %v3074_v15, %v6721_v50  ;;  %v3092_v18 = vmul.f32 %v3076_v16, %v6723_v49 }
 0xcf1   :  { %3142 = vmatmul.f32.gmra.mxu3 %v3085_v42  ;;  %v3080_v42 = vperm.slane %v3064_v53, 0  ;;  %v3081_v21 = vperm.slane %v3065_v22, 0  ;;  %v3082_v41 = vperm.slane %v3066_v55, 0 }
 0xcf2   :  { %3760 = vmatpush.msra.mxu0 %v6098_v45  ;;  %v3027_v45 = vrot.slane %v6296_v31, 4  ;;  %v3088_v46 = vmul.f32 %v3072_v32, %v6719_v6 }
 0xcf3   :  { %v3096_v10 = vmul.f32 %v3080_v42, %v6727_v62  ;;  %v3097_v31 = vmul.f32 %v3081_v21, %v6731_v37  ;;  %v3098_v17 = vmul.f32 %v3082_v41, %v6732_v52 }
 0xcf4   :  { %v3059_v8 = vmul.f32 %v3027_v45, %v6165_v43  ;;  %v3030_v43 = vrot.slane %v6303_v59, 5 }
 0xcf6   :  { %v3075_v54 = vperm.slane %v3059_v8, 0  ;;  %v3062_v24 = vmul.f32 %v3030_v43, %v6197_v38  ;;  %v3095_v38 = vmul.f32 %v3079_v14, %v6726_v39 }
 0xcf7   :  { %4194 = vmatmul.msk.f32.gmra.mxu0 %vm533_vm7, %v3086_v48 }
 0xcf8   :  { %v3091_v26 = vmul.f32 %v3075_v54, %v6722_v2  ;;  %v3078_v57 = vperm.slane %v3062_v24, 0 }
 0xcf9   :  { %3145 = vmatmul.f32.gmra.mxu3 %v3087_v63 }
 0xcfa   :  { %v3094_v27 = vmul.f32 %v3078_v57, %v6725_v12 }
 0xcff   :  { %4195 = vmatmul.msk.f32.gmra.mxu0 %vm533_vm7, %v3088_v46 }
 0xd01   :  { %3148 = vmatmul.f32.gmra.mxu3 %v3089_v33 }
 0xd07   :  { %4196 = vmatmul.msk.f32.gmra.mxu0 %vm533_vm7, %v3090_v9 }
 0xd09   :  { %3151 = vmatmul.f32.gmra.mxu3 %v3091_v26 }
 0xd0f   :  { %4197 = vmatmul.msk.f32.gmra.mxu0 %vm533_vm7, %v3092_v18 }
 0xd11   :  { %3154 = vmatmul.f32.gmra.mxu3 %v3093_v61 }
 0xd17   :  { %4198 = vmatmul.msk.f32.gmra.mxu0 %vm533_vm7, %v3094_v27 }
 0xd19   :  { %3157 = vmatmul.f32.gmra.mxu3 %v3095_v38 }
 0xd1f   :  { %4199 = vmatmul.msk.f32.gmra.mxu0 %vm533_vm7, %v3096_v10 }
 0xd21   :  { %3160 = vmatmul.f32.gmra.mxu3 %v3097_v31 }
 0xd27   :  { %4200 = vmatmul.msk.f32.gmra.mxu0 %vm533_vm7, %v3098_v17 }
 0xd6c   :  { %v3140_v3 = vpop.f32.mrf.mxu3  ;;  %v3181_v29 = vpop.f32.mrf.mxu0 }
 0xd6d   :  { %v3182_v48 = vadd.f32 %v3181_v29, %v3140_v3 }
 0xd6f   :  { %v3205_v59 = vsel %vm400_vm0, %v3182_v48, -inf }
 0xd70   :  { %3206 = vmax.xlane.f32.xlu1 %v3205_v59 }
 0xd74   :  { %v3143_v7 = vpop.f32.mrf.mxu3  ;;  %v3184_v63 = vpop.f32.mrf.mxu0 }
 0xd75   :  { %v3185_v60 = vadd.f32 %v3184_v63, %v3143_v7 }
 0xd77   :  { %v3208_v36 = vsel %vm400_vm0, %v3185_v60, -inf }
 0xd78   :  { %3209 = vmax.xlane.f32.xlu2 %v3208_v36 }
 0xd7c   :  { %v3146_v32 = vpop.f32.mrf.mxu3  ;;  %v3187_v25 = vpop.f32.mrf.mxu0 }
 0xd7d   :  { %v3188_v11 = vadd.f32 %v3187_v25, %v3146_v32 }
 0xd7f   :  { %v3211_v45 = vsel %vm400_vm0, %v3188_v11, -inf }
 0xd80   :  { %3212 = vmax.xlane.f32.xlu0 %v3211_v45 }
 0xd84   :  { %v3149_v46 = vpop.f32.mrf.mxu3  ;;  %v3190_v19 = vpop.f32.mrf.mxu0 }
 0xd85   :  { %v3191_v33 = vadd.f32 %v3190_v19, %v3149_v46 }
 0xd87   :  { %v3214_v8 = vsel %vm400_vm0, %v3191_v33, -inf }
 0xd88   :  { %3215 = vmax.xlane.f32.xlu1 %v3214_v8 }
 0xd8c   :  { %v3152_v15 = vpop.f32.mrf.mxu3  ;;  %v3193_v1 = vpop.f32.mrf.mxu0 }
 0xd8d   :  { %v3194_v54 = vadd.f32 %v3193_v1, %v3152_v15 }
 0xd8f   :  { %v3217_v5 = vsel %vm400_vm0, %v3194_v54, -inf }
 0xd90   :  { %3218 = vmax.xlane.f32.xlu2 %v3217_v5 }
 0xd94   :  { %v3155_v9 = vpop.f32.mrf.mxu3  ;;  %v3196_v30 = vpop.f32.mrf.mxu0 }
 0xd95   :  { %v3197_v26 = vadd.f32 %v3196_v30, %v3155_v9 }
 0xd97   :  { %v3220_v20 = vsel %vm400_vm0, %v3197_v26, -inf }
 0xd98   :  { %3221 = vmax.xlane.f32.xlu0 %v3220_v20 }
 0xd9c   :  { %v3158_v16 = vpop.f32.mrf.mxu3  ;;  %v3199_v43 = vpop.f32.mrf.mxu0 }
 0xd9d   :  { %v3200_v56 = vadd.f32 %v3199_v43, %v3158_v16 }
 0xd9f   :  { %v3223_v51 = vsel %vm400_vm0, %v3200_v56, -inf }
 0xda0   :  { %3224 = vmax.xlane.f32.xlu1 %v3223_v51 }
 0xda4   :  { %v3161_v18 = vpop.f32.mrf.mxu3  ;;  %v3202_v24 = vpop.f32.mrf.mxu0 }
 0xda5   :  { %v3203_v61 = vadd.f32 %v3202_v24, %v3161_v18 }
 0xda7   :  { %v3226_v28 = vsel %vm400_vm0, %v3203_v61, -inf }
 0xda8   :  { %3227 = vmax.xlane.f32.xlu0 %v3226_v28 }
 0xde3   :  { %v3207_v57 = vpop.xlane.xlu1 %3206 }
 0xde4   :  { %v3229_v35 = vsub.f32 %v3182_v48, %v3207_v57 }
 0xde6   :  { %v3237_v14 = vmul.f32 1.442695, %v3229_v35 }
 0xde8   :  { %4366 = vpow2.f32 %v3237_v14 }
 0xdeb   :  { %v3210_v4 = vpop.xlane.xlu2 %3209 }
 0xdec   :  { %v3230_v27 = vsub.f32 %v3185_v60, %v3210_v4 }
 0xdee   :  { %v6367_v53 = vpop.eup %4366  ;;  %v3239_v38 = vmul.f32 1.442695, %v3230_v27 }
 0xdef   :  { %v3253_v22 = vsel %vm400_vm0, %v6367_v53, 0.0 }
 0xdf0   :  { %4368 = vpow2.f32 %v3239_v38  ;;  %3254 = vadd.xlane.f32.xlu2 %v3253_v22 }
 0xdf3   :  { %v3213_v42 = vpop.xlane.xlu0 %3212 }
 0xdf4   :  { %v3231_v23 = vsub.f32 %v3188_v11, %v3213_v42 }
 0xdf6   :  { %v6371_v21 = vpop.eup %4368  ;;  %v3241_v10 = vmul.f32 1.442695, %v3231_v23 }
 0xdf7   :  { %v3256_v55 = vsel %vm400_vm0, %v6371_v21, 0.0 }
 0xdf8   :  { %4370 = vpow2.f32 %v3241_v10  ;;  %3257 = vadd.xlane.f32.xlu1 %v3256_v55 }
 0xdfb   :  { %v3216_v31 = vpop.xlane.xlu1 %3215 }
 0xdfc   :  { %v3232_v41 = vsub.f32 %v3191_v33, %v3216_v31 }
 0xdfe   :  { %v6375_v17 = vpop.eup %4370  ;;  %v3243_v3 = vmul.f32 1.442695, %v3232_v41 }
 0xdff   :  { %v3259_v29 = vsel %vm400_vm0, %v6375_v17, 0.0 }
 0xe00   :  { %4372 = vpow2.f32 %v3243_v3  ;;  %3260 = vadd.xlane.f32.xlu2 %v3259_v29 }
 0xe03   :  { %v3219_v48 = vpop.xlane.xlu2 %3218 }
 0xe04   :  { %v3233_v59 = vsub.f32 %v3194_v54, %v3219_v48 }
 0xe06   :  { %v6379_v7 = vpop.eup %4372  ;;  %v3245_v63 = vmul.f32 1.442695, %v3233_v59 }
 0xe07   :  { %v3262_v60 = vsel %vm400_vm0, %v6379_v7, 0.0 }
 0xe08   :  { %4374 = vpow2.f32 %v3245_v63  ;;  %3263 = vadd.xlane.f32.xlu0 %v3262_v60 }
 0xe0b   :  { %v3222_v36 = vpop.xlane.xlu0 %3221 }
 0xe0c   :  { %v3234_v32 = vsub.f32 %v3197_v26, %v3222_v36 }
 0xe0e   :  { %v6383_v25 = vpop.eup %4374  ;;  %v3247_v11 = vmul.f32 1.442695, %v3234_v32 }
 0xe0f   :  { %v3265_v45 = vsel %vm400_vm0, %v6383_v25, 0.0 }
 0xe10   :  { %4376 = vpow2.f32 %v3247_v11  ;;  %3266 = vadd.xlane.f32.xlu1 %v3265_v45 }
 0xe13   :  { %v3225_v46 = vpop.xlane.xlu1 %3224 }
 0xe14   :  { %v3235_v19 = vsub.f32 %v3200_v56, %v3225_v46 }
 0xe16   :  { %v6387_v33 = vpop.eup %4376  ;;  %v3249_v8 = vmul.f32 1.442695, %v3235_v19 }
 0xe17   :  { %v3268_v15 = vsel %vm400_vm0, %v6387_v33, 0.0 }
 0xe18   :  { %4378 = vpow2.f32 %v3249_v8  ;;  %3269 = vadd.xlane.f32.xlu2 %v3268_v15 }
 0xe1b   :  { %v3228_v1 = vpop.xlane.xlu0 %3227 }
 0xe1c   :  { %v3236_v54 = vsub.f32 %v3203_v61, %v3228_v1 }
 0xe1e   :  { %v6391_v5 = vpop.eup %4378  ;;  %v3251_v9 = vmul.f32 1.442695, %v3236_v54 }
 0xe1f   :  { %v3271_v30 = vsel %vm400_vm0, %v6391_v5, 0.0 }
 0xe20   :  { %4380 = vpow2.f32 %v3251_v9  ;;  %3272 = vadd.xlane.f32.xlu0 %v3271_v30 }
 0xe26   :  { %v6395_v26 = vpop.eup %4380 }
 0xe27   :  { %v3274_v20 = vsel %vm400_vm0, %v6395_v26, 0.0 }
 0xe28   :  { %3275 = vadd.xlane.f32.xlu1 %v3274_v20 }
 0xe63   :  { %v3255_v16 = vpop.xlane.xlu2 %3254 }
 0xe64   :  { %4382 = vrcp.f32 %v3255_v16  ;;  %v3288_v24 = vand.u32 2147483648, %v3255_v16  ;;  %v3286_v28 = vand.u32 2147483647, %v3255_v16  ;;  %vm3282_vm1 = vweird.f32 %v3255_v16 }
 0xe66   :  { %v3289_v14 = vor.u32 1.1754944e-38, %v3288_v24  ;;  %vm3287_vm6 = vcmp.eq.f32.partialorder %v3286_v28, 8.507059e+37 }
 0xe6a   :  { %v4383_v43 = vpop.eup %4382 }
 0xe6b   :  { %v3278_v56 = vmul.f32 %v4383_v43, %v3255_v16  ;;  %v3258_v51 = vpop.xlane.xlu1 %3257  ;;  %vm3283_vm4 = vweird.f32 %v4383_v43 }
 0xe6c   :  { %4384 = vrcp.f32 %v3258_v51  ;;  %vm3284_vm5 = vmor %vm3282_vm1, %vm3283_vm4  ;;  %v3303_v55 = vand.u32 2147483648, %v3258_v51  ;;  %v3301_v31 = vand.u32 2147483647, %v3258_v51  ;;  %vm3297_vm2 = vweird.f32 %v3258_v51 }
 0xe6d   :  { %v3279_v18 = vsub.f32 1.0, %v3278_v56 }
 0xe6e   :  { %v3304_v29 = vor.u32 1.1754944e-38, %v3303_v55  ;;  %vm3302_vm4 = vcmp.eq.f32.partialorder %v3301_v31, 8.507059e+37 }
 0xe6f   :  { %v3280_v61 = vmul.f32 %v4383_v43, %v3279_v18 }
 0xe71   :  { %v3281_v57 = vadd.f32 %v4383_v43, %v3280_v61 }
 0xe72   :  { %v4385_v35 = vpop.eup %4384 }
 0xe73   :  { %v3285_v4 = vsel %vm3284_vm5, %v4383_v43, %v3281_v57  ;;  %v3293_v27 = vmul.f32 %v4385_v35, %v3258_v51  ;;  %v3261_v38 = vpop.xlane.xlu2 %3260  ;;  %vm3298_vm15 = vweird.f32 %v4385_v35 }
 0xe74   :  { %v3290_v22 = vsel %vm3287_vm6, %v3289_v14, %v3285_v4  ;;  %4386 = vrcp.f32 %v3261_v38  ;;  %vm3299_vm3 = vmor %vm3297_vm2, %vm3298_vm15  ;;  %v3318_v11 = vand.u32 2147483648, %v3261_v38  ;;  %v3316_v45 = vand.u32 2147483647, %v3261_v38 }
 0xe75   :  { %v3291_v42 = vmul.f32 %v6367_v53, %v3290_v22  ;;  %v3294_v23 = vsub.f32 1.0, %v3293_v27  ;;  %vm3312_vm5 = vweird.f32 %v3261_v38 }
 0xe76   :  { %v3319_v8 = vor.u32 1.1754944e-38, %v3318_v11  ;;  %vm3317_vm15 = vcmp.eq.f32.partialorder %v3316_v45, 8.507059e+37 }
 0xe77   :  { %v3295_v10 = vmul.f32 %v4385_v35, %v3294_v23  ;;  %4202 = vmatmul.msk.f32.vlgmr.msra.gmra.mxu1 %vm400_vm0, %v3291_v42  ;;  %4211 = vmatmul.msk.f32.vlgmr.msrb.gmra.mxu2 %vm400_vm0, %v3291_v42 }
 0xe79   :  { %v3296_v41 = vadd.f32 %v4385_v35, %v3295_v10 }
 0xe7a   :  { %v4387_v3 = vpop.eup %4386 }
 0xe7b   :  { %v3308_v48 = vmul.f32 %v4387_v3, %v3261_v38  ;;  %v3264_v59 = vpop.xlane.xlu0 %3263  ;;  %v3300_v63 = vsel %vm3299_vm3, %v4385_v35, %v3296_v41  ;;  %vm3313_vm1 = vweird.f32 %v4387_v3 }
 0xe7c   :  { %4388 = vrcp.f32 %v3264_v59  ;;  %v3305_v60 = vsel %vm3302_vm4, %v3304_v29, %v3300_v63  ;;  %vm3314_vm6 = vmor %vm3312_vm5, %vm3313_vm1  ;;  %v3333_v16 = vand.u32 2147483648, %v3264_v59  ;;  %v3331_v43 = vand.u32 2147483647, %v3264_v59 }
 0xe7d   :  { %v3309_v53 = vsub.f32 1.0, %v3308_v48  ;;  %v3306_v36 = vmul.f32 %v6371_v21, %v3305_v60  ;;  %vm3327_vm3 = vweird.f32 %v3264_v59 }
 0xe7e   :  { %v3334_v18 = vor.u32 1.1754944e-38, %v3333_v16  ;;  %vm3332_vm1 = vcmp.eq.f32.partialorder %v3331_v43, 8.507059e+37 }
 0xe7f   :  { %v3310_v32 = vmul.f32 %v4387_v3, %v3309_v53  ;;  %4203 = vmatmul.msk.f32.gmra.mxu1 %vm400_vm0, %v3306_v36  ;;  %4212 = vmatmul.msk.f32.gmra.mxu2 %vm400_vm0, %v3306_v36 }
 0xe81   :  { %v3311_v46 = vadd.f32 %v4387_v3, %v3310_v32 }
 0xe82   :  { %v4389_v19 = vpop.eup %4388 }
 0xe83   :  { %v3323_v15 = vmul.f32 %v4389_v19, %v3264_v59  ;;  %v3267_v1 = vpop.xlane.xlu1 %3266  ;;  %v3315_v54 = vsel %vm3314_vm6, %v4387_v3, %v3311_v46  ;;  %vm3328_vm2 = vweird.f32 %v4389_v19 }
 0xe84   :  { %4390 = vrcp.f32 %v3267_v1  ;;  %v3320_v21 = vsel %vm3317_vm15, %v3319_v8, %v3315_v54  ;;  %vm3329_vm4 = vmor %vm3327_vm3, %vm3328_vm2  ;;  %v3348_v4 = vand.u32 2147483648, %v3267_v1  ;;  %v3346_v27 = vand.u32 2147483647, %v3267_v1 }
 0xe85   :  { %v3324_v9 = vsub.f32 1.0, %v3323_v15  ;;  %v3321_v30 = vmul.f32 %v6375_v17, %v3320_v21  ;;  %vm3342_vm6 = vweird.f32 %v3267_v1 }
 0xe86   :  { %v3349_v42 = vor.u32 1.1754944e-38, %v3348_v4  ;;  %vm3347_vm2 = vcmp.eq.f32.partialorder %v3346_v27, 8.507059e+37 }
 0xe87   :  { %v3325_v20 = vmul.f32 %v4389_v19, %v3324_v9  ;;  %4204 = vmatmul.msk.f32.gmra.mxu1 %vm400_vm0, %v3321_v30  ;;  %4213 = vmatmul.msk.f32.gmra.mxu2 %vm400_vm0, %v3321_v30 }
 0xe89   :  { %v3326_v56 = vadd.f32 %v4389_v19, %v3325_v20 }
 0xe8a   :  { %v4391_v51 = vpop.eup %4390 }
 0xe8b   :  { %v3338_v24 = vmul.f32 %v4391_v51, %v3267_v1  ;;  %v3270_v61 = vpop.xlane.xlu2 %3269  ;;  %v3330_v28 = vsel %vm3329_vm4, %v4389_v19, %v3326_v56  ;;  %vm3343_vm5 = vweird.f32 %v4391_v51 }
 0xe8c   :  { %4392 = vrcp.f32 %v3270_v61  ;;  %v3335_v17 = vsel %vm3332_vm1, %v3334_v18, %v3330_v28  ;;  %vm3344_vm15 = vmor %vm3342_vm6, %vm3343_vm5  ;;  %v3363_v29 = vand.u32 2147483648, %v3270_v61  ;;  %v3361_v48 = vand.u32 2147483647, %v3270_v61 }
 0xe8d   :  { %v3339_v57 = vsub.f32 1.0, %v3338_v24  ;;  %v3336_v35 = vmul.f32 %v6379_v7, %v3335_v17  ;;  %vm3357_vm4 = vweird.f32 %v3270_v61 }
 0xe8e   :  { %v3364_v60 = vor.u32 1.1754944e-38, %v3363_v29  ;;  %vm3362_vm5 = vcmp.eq.f32.partialorder %v3361_v48, 8.507059e+37 }
 0xe8f   :  { %v3340_v14 = vmul.f32 %v4391_v51, %v3339_v57  ;;  %4205 = vmatmul.msk.f32.gmra.mxu1 %vm400_vm0, %v3336_v35  ;;  %4214 = vmatmul.msk.f32.gmra.mxu2 %vm400_vm0, %v3336_v35 }
 0xe91   :  { %v3341_v38 = vadd.f32 %v4391_v51, %v3340_v14 }
 0xe92   :  { %v4393_v22 = vpop.eup %4392 }
 0xe93   :  { %v3353_v23 = vmul.f32 %v4393_v22, %v3270_v61  ;;  %v3273_v10 = vpop.xlane.xlu0 %3272  ;;  %v3345_v55 = vsel %vm3344_vm15, %v4391_v51, %v3341_v38  ;;  %vm3358_vm3 = vweird.f32 %v4393_v22 }
 0xe94   :  { %4394 = vrcp.f32 %v3273_v10  ;;  %v3350_v7 = vsel %vm3347_vm2, %v3349_v42, %v3345_v55  ;;  %vm3359_vm1 = vmor %vm3357_vm4, %vm3358_vm3  ;;  %v3378_v45 = vand.u32 2147483648, %v3273_v10  ;;  %v3376_v8 = vand.u32 2147483647, %v3273_v10 }
 0xe95   :  { %v3354_v31 = vsub.f32 1.0, %v3353_v23  ;;  %v3351_v41 = vmul.f32 %v6383_v25, %v3350_v7  ;;  %vm3372_vm15 = vweird.f32 %v3273_v10 }
 0xe96   :  { %v3379_v54 = vor.u32 1.1754944e-38, %v3378_v45  ;;  %vm3377_vm3 = vcmp.eq.f32.partialorder %v3376_v8, 8.507059e+37 }
 0xe97   :  { %v3355_v3 = vmul.f32 %v4393_v22, %v3354_v31  ;;  %4206 = vmatmul.msk.f32.gmra.mxu1 %vm400_vm0, %v3351_v41  ;;  %4215 = vmatmul.msk.f32.gmra.mxu2 %vm400_vm0, %v3351_v41 }
 0xe99   :  { %v3356_v59 = vadd.f32 %v4393_v22, %v3355_v3 }
 0xe9a   :  { %v4395_v63 = vpop.eup %4394 }
 0xe9b   :  { %v3360_v53 = vsel %vm3359_vm1, %v4393_v22, %v3356_v59  ;;  %v3368_v36 = vmul.f32 %v4395_v63, %v3273_v10  ;;  %v3276_v32 = vpop.xlane.xlu1 %3275  ;;  %vm3373_vm6 = vweird.f32 %v4395_v63 }
 0xe9c   :  { %4396 = vrcp.f32 %v3276_v32  ;;  %v3365_v25 = vsel %vm3362_vm5, %v3364_v60, %v3360_v53  ;;  %vm3374_vm2 = vmor %vm3372_vm15, %vm3373_vm6  ;;  %v3391_v56 = vand.u32 2147483647, %v3276_v32  ;;  %vm3387_vm1 = vweird.f32 %v3276_v32 }
 0xe9d   :  { %v3369_v11 = vsub.f32 1.0, %v3368_v36  ;;  %v3366_v46 = vmul.f32 %v6387_v33, %v3365_v25  ;;  %v3393_v33 = vand.u32 2147483648, %v3276_v32 }
 0xe9e   :  { %vm3392_vm6 = vcmp.eq.f32.partialorder %v3391_v56, 8.507059e+37 }
 0xe9f   :  { %v3370_v19 = vmul.f32 %v4395_v63, %v3369_v11  ;;  %4207 = vmatmul.msk.f32.gmra.mxu1 %vm400_vm0, %v3366_v46  ;;  %4216 = vmatmul.msk.f32.gmra.mxu2 %vm400_vm0, %v3366_v46  ;;  %v3394_v18 = vor.u32 1.1754944e-38, %v3393_v33 }
 0xea1   :  { %v3371_v15 = vadd.f32 %v4395_v63, %v3370_v19 }
 0xea2   :  { %v4397_v1 = vpop.eup %4396 }
 0xea3   :  { %v3375_v9 = vsel %vm3374_vm2, %v4395_v63, %v3371_v15  ;;  %v3383_v21 = vmul.f32 %v4397_v1, %v3276_v32  ;;  %vm3388_vm4 = vweird.f32 %v4397_v1 }
 0xea4   :  { %v3380_v30 = vsel %vm3377_vm3, %v3379_v54, %v3375_v9  ;;  %vm3389_vm5 = vmor %vm3387_vm1, %vm3388_vm4 }
 0xea5   :  { %v3384_v20 = vsub.f32 1.0, %v3383_v21  ;;  %v3381_v16 = vmul.f32 %v6391_v5, %v3380_v30 }
 0xea7   :  { %v3385_v43 = vmul.f32 %v4397_v1, %v3384_v20  ;;  %4208 = vmatmul.msk.f32.gmra.mxu1 %vm400_vm0, %v3381_v16  ;;  %4217 = vmatmul.msk.f32.gmra.mxu2 %vm400_vm0, %v3381_v16 }
 0xea9   :  { %v3386_v51 = vadd.f32 %v4397_v1, %v3385_v43 }
 0xeab   :  { %v3390_v24 = vsel %vm3389_vm5, %v4397_v1, %v3386_v51 }
 0xeac   :  { %v3395_v61 = vsel %vm3392_vm6, %v3394_v18, %v3390_v24 }
 0xead   :  { %v3396_v28 = vmul.f32 %v6395_v26, %v3395_v61 }
 0xeaf   :  { %4209 = vmatmul.msk.f32.gmra.mxu1 %vm400_vm0, %v3396_v28  ;;  %4218 = vmatmul.msk.f32.gmra.mxu2 %vm400_vm0, %v3396_v28 }
 0xef4   :  { %v3438_v5 = vpop.f32.mrf.mxu1 }
 0xef5   :  { %v3503_v38 = vmul.f32 %v3438_v5, %v4912_v58 }
 0xef7   :  { %v3519_v42 = vrot.slane %v3503_v38, 4 }
 0xef9   :  { %v3520_v31 = vadd.f32 %v3519_v42, %v3503_v38 }
 0xefa   :  { %v3479_v57 = vpop.f32.mrf.mxu2 }
 0xefb   :  { %v3504_v10 = vmul.f32 %v3479_v57, %v6714_v0  ;;  %v3521_v48 = vrot.slane %v3520_v31, 2 }
 0xefc   :  { %v3441_v17 = vpop.f32.mrf.mxu1 }
 0xefd   :  { %v3505_v22 = vmul.f32 %v3441_v17, %v6716_v47  ;;  %v3525_v7 = vsel %vm533_vm7, %v3504_v10, 0.0  ;;  %v3522_v11 = vadd.f32 %v3521_v48, %v3520_v31 }
 0xefe   :  { %v3526_v59 = vrot.slane %v3525_v7, 4 }
 0xeff   :  { %v3532_v26 = vrot.slane %v3505_v22, 4 }
 0xf00   :  { %v3527_v45 = vadd.f32 %v3526_v59, %v3525_v7 }
 0xf01   :  { %v3533_v41 = vadd.f32 %v3532_v26, %v3505_v22 }
 0xf02   :  { %v3482_v35 = vpop.f32.mrf.mxu2  ;;  %v3528_v9 = vrot.slane %v3527_v45, 2 }
 0xf03   :  { %v3506_v47 = vmul.f32 %v3482_v35, %v6717_v13  ;;  %v3534_v53 = vrot.slane %v3533_v41, 2 }
 0xf04   :  { %v3444_v14 = vpop.f32.mrf.mxu1  ;;  %v3529_v57 = vadd.f32 %v3528_v9, %v3527_v45 }
 0xf05   :  { %v3507_v3 = vmul.f32 %v3444_v14, %v6718_v44  ;;  %v3535_v8 = vadd.f32 %v3534_v53, %v3533_v41 }
 0xf06   :  { %v3530_v31 = vrot.slane %v3529_v57, 1 }
 0xf07   :  { %v3545_v60 = vrot.slane %v3507_v3, 4  ;;  %v3536_v33 = vrot.slane %v3535_v8, 1 }
 0xf09   :  { %v3546_v13 = vadd.f32 %v3545_v60, %v3507_v3 }
 0xf0a   :  { %v3485_v4 = vpop.f32.mrf.mxu2 }
 0xf0b   :  { %v3508_v0 = vmul.f32 %v3485_v4, %v6719_v6  ;;  %v3523_v6 = vrot.slane %v3522_v11, 1  ;;  %v3547_v43 = vrot.slane %v3546_v13, 2 }
 0xf0c   :  { %v3447_v27 = vpop.f32.mrf.mxu1 }
 0xf0d   :  { %v3509_v29 = vmul.f32 %v3447_v27, %v6720_v40  ;;  %v3551_v15 = vsel %vm533_vm7, %v3508_v0, 0.0  ;;  %v6440_v24 = vadd.f32 %v3523_v6, %v3522_v11  ;;  %v3548_v22 = vadd.f32 %v3547_v43, %v3546_v13 }
 0xf0e   :  { %v3552_v20 = vrot.slane %v3551_v15, 4 }
 0xf0f   :  { %v3558_v36 = vrot.slane %v3509_v29, 4  ;;  %v3623_v10 = vmul.f32 %v6440_v24, %v6440_v24 }
 0xf10   :  { %v3553_v4 = vadd.f32 %v3552_v20, %v3551_v15 }
 0xf11   :  { %v3559_v1 = vadd.f32 %v3558_v36, %v3509_v29 }
 0xf12   :  { %v3488_v23 = vpop.f32.mrf.mxu2  ;;  %v3554_v29 = vrot.slane %v3553_v4, 2 }
 0xf13   :  { %v3510_v25 = vmul.f32 %v3488_v23, %v6721_v50  ;;  %v3560_v56 = vrot.slane %v3559_v1, 2 }
 0xf14   :  { %v3450_v55 = vpop.f32.mrf.mxu1 }
 0xf15   :  { %v3511_v58 = vmul.f32 %v3450_v55, %v6722_v2  ;;  %v3538_v2 = vsel %vm533_vm7, %v3506_v47, 0.0  ;;  %v3564_v54 = vsel %vm533_vm7, %v3510_v25, 0.0  ;;  %v3561_v42 = vadd.f32 %v3560_v56, %v3559_v1 }
 0xf16   :  { %v3539_v21 = vrot.slane %v3538_v2, 4  ;;  %v3565_v51 = vrot.slane %v3564_v54, 4  ;;  %v3549_v47 = vrot.slane %v3548_v22, 1 }
 0xf17   :  { %v3571_v40 = vrot.slane %v3511_v58, 4  ;;  %v3562_v53 = vrot.slane %v3561_v42, 1 }
 0xf18   :  { %v3540_v17 = vadd.f32 %v3539_v21, %v3538_v2  ;;  %v3566_v23 = vadd.f32 %v3565_v51, %v3564_v54  ;;  %v6453_v2 = vadd.f32 %v3530_v31, %v3529_v57  ;;  %v6455_v13 = vadd.f32 %v3549_v47, %v3548_v22 }
 0xf19   :  { %v3572_v50 = vadd.f32 %v3571_v40, %v3511_v58  ;;  %v6458_v9 = vadd.f32 %v3562_v53, %v3561_v42 }
 0xf1a   :  { %v3491_v63 = vpop.f32.mrf.mxu2  ;;  %v3541_v7 = vrot.slane %v3540_v17, 2  ;;  %v3567_v60 = vrot.slane %v3566_v23, 2  ;;  %v3627_v51 = vmul.f32 %v6455_v13, %v6455_v13 }
 0xf1b   :  { %v3512_v46 = vmul.f32 %v3491_v63, %v6723_v49  ;;  %v3573_v35 = vrot.slane %v3572_v50, 2 }
 0xf1c   :  { %v3453_v32 = vpop.f32.mrf.mxu1  ;;  %v3568_v15 = vadd.f32 %v3567_v60, %v3566_v23  ;;  %v3624_v60 = vmul.f32 %v6453_v2, %v6453_v2 }
 0xf1d   :  { %v3513_v44 = vmul.f32 %v3453_v32, %v6724_v34  ;;  %v3577_v34 = vsel %vm533_vm7, %v3512_v46, 0.0 }
 0xf1e   :  { %v3578_v61 = vrot.slane %v3577_v34, 4 }
 0xf1f   :  { %v3584_v19 = vrot.slane %v3513_v44, 4 }
 0xf20   :  { %v3579_v26 = vadd.f32 %v3578_v61, %v3577_v34 }
 0xf21   :  { %v3585_v16 = vadd.f32 %v3584_v19, %v3513_v44  ;;  %v3542_v44 = vadd.f32 %v3541_v7, %v3540_v17 }
 0xf22   :  { %v3494_v30 = vpop.f32.mrf.mxu2  ;;  %v3580_v36 = vrot.slane %v3579_v26, 2 }
 0xf23   :  { %v3514_v49 = vmul.f32 %v3494_v30, %v6725_v12  ;;  %v3586_v27 = vrot.slane %v3585_v16, 2  ;;  %v6444_v12 = vadd.f32 %v3536_v33, %v3535_v8 }
 0xf24   :  { %v3456_v18 = vpop.f32.mrf.mxu1  ;;  %v3581_v21 = vadd.f32 %v3580_v36, %v3579_v26 }
 0xf25   :  { %v3590_v28 = vsel %vm533_vm7, %v3514_v49, 0.0  ;;  %v3515_v5 = vmul.f32 %v3456_v18, %v6726_v39  ;;  %v3574_v39 = vadd.f32 %v3573_v35, %v3572_v50  ;;  %v3587_v48 = vadd.f32 %v3586_v27, %v3585_v16 }
 0xf26   :  { %v3591_v14 = vrot.slane %v3590_v28, 4  ;;  %v3625_v63 = vmul.f32 %v6444_v12, %v6444_v12  ;;  %v3543_v50 = vrot.slane %v3542_v44, 1  ;;  %v3569_v18 = vrot.slane %v3568_v15, 1 }
 0xf27   :  { %v3597_v38 = vrot.slane %v3515_v5, 4  ;;  %v3575_v45 = vrot.slane %v3574_v39, 1  ;;  %v3588_v19 = vrot.slane %v3587_v48, 1  ;;  %v3582_v57 = vrot.slane %v3581_v21, 1 }
 0xf28   :  { %v3592_v41 = vadd.f32 %v3591_v14, %v3590_v28  ;;  %v3655_v54 = vsel %vm664_vm8, %v3625_v63, %v3623_v10  ;;  %v6472_v14 = vadd.f32 %v3543_v50, %v3542_v44  ;;  %v6481_v26 = vadd.f32 %v3569_v18, %v3568_v15  ;;  %v3827_v50 = vld [vmem:[%s6629_s4 + $0x70] sm:$0xff] }
 0xf29   :  { %v3598_v55 = vadd.f32 %v3597_v38, %v3515_v5  ;;  %v6460_v34 = vadd.f32 %v3575_v45, %v3574_v39  ;;  %v6462_v33 = vadd.f32 %v3588_v19, %v3587_v48  ;;  %v3629_v5 = vmul.f32 %v6458_v9, %v6458_v9 }
 0xf2a   :  { %v3497_v3 = vpop.f32.mrf.mxu2  ;;  %v3593_v40 = vrot.slane %v3592_v41, 2  ;;  %v3656_v10 = vsel %vm666_vm9, %v3627_v51, %v3655_v54  ;;  %v6486_v39 = vadd.f32 %v3582_v57, %v3581_v21  ;;  %v3822_v51 = vld [vmem:[%s6629_s4 + $0x48] sm:$0xff]  ;;  %v3820_v57 = vld [vmem:[%s6629_s4 + $0x38] sm:$0xff] }
 0xf2b   :  { %v3599_v59 = vrot.slane %v3598_v55, 2  ;;  %v3516_v58 = vmul.f32 %v3497_v3, %v6727_v62  ;;  %v3555_v62 = vadd.f32 %v3554_v29, %v3553_v4  ;;  %v3631_v4 = vmul.f32 %v6460_v34, %v6460_v34 }
 0xf2c   :  { %v3459_v0 = vpop.f32.mrf.mxu1  ;;  %v3594_v30 = vadd.f32 %v3593_v40, %v3592_v41  ;;  %v3633_v22 = vmul.f32 %v6462_v33, %v6462_v33  ;;  %v3657_v7 = vsel %vm668_vm10, %v3629_v5, %v3656_v10  ;;  %v3626_v3 = vmul.f32 %v6472_v14, %v6472_v14  ;;  %v3821_v5 = vld [vmem:[%s6629_s4 + $0x40] sm:$0xff] }
 0xf2d   :  { %v3600_v32 = vadd.f32 %v3599_v59, %v3598_v55  ;;  %v3603_v11 = vsel %vm533_vm7, %v3516_v58, 0.0  ;;  %v3517_v25 = vmul.f32 %v3459_v0, %v6731_v37  ;;  %v3556_v49 = vrot.slane %v3555_v62, 1 }
 0xf2e   :  { %v3604_v46 = vrot.slane %v3603_v11, 4  ;;  %v3658_v59 = vsel %vm670_vm11, %v3631_v4, %v3657_v7  ;;  %v3630_v0 = vmul.f32 %v6481_v26, %v6481_v26  ;;  %v3662_v44 = vsel %vm664_vm8, %v3626_v3, %v3624_v60  ;;  %v3832_v7 = vld [vmem:[%s6629_s4 + $0x98] sm:$0xff]  ;;  %v3815_v3 = vld [vmem:[%s6629_s4 + $0x10] sm:$0xff] }
 0xf2f   :  { %v3610_v8 = vrot.slane %v3517_v25, 4  ;;  %v3601_v1 = vrot.slane %v3600_v32, 1  ;;  %v6476_v38 = vadd.f32 %v3556_v49, %v3555_v62  ;;  %v3659_v53 = vsel %vm672_vm12, %v3633_v22, %v3658_v59  ;;  %3916 = vmatpush.msra.mxu1 %v3832_v7  ;;  %v3814_v59 = vld [vmem:[%s6629_s4 + $0x8] sm:$0xff] }
 0xf30   :  { %v3605_v6 = vadd.f32 %v3604_v46, %v3603_v11  ;;  %v3632_v11 = vmul.f32 %v6486_v39, %v6486_v39 }
 0xf31   :  { %v3611_v37 = vadd.f32 %v3610_v8, %v3517_v25  ;;  %v6467_v61 = vadd.f32 %v3601_v1, %v3600_v32  ;;  %v3628_v58 = vmul.f32 %v6476_v38, %v6476_v38 }
 0xf32   :  { %v3606_v20 = vrot.slane %v3605_v6, 2  ;;  %v3500_v16 = vpop.f32.mrf.mxu2 }
 0xf33   :  { %v3612_v43 = vrot.slane %v3611_v37, 2  ;;  %v3518_v56 = vmul.f32 %v3500_v16, %v6732_v52  ;;  %v3595_v52 = vrot.slane %v3594_v30, 1  ;;  %v3635_v55 = vmul.f32 %v6467_v61, %v6467_v61  ;;  %v3824_v16 = vld [vmem:[%s6629_s4 + $0x58] sm:$0xff] }
 0xf34   :  { %v3607_v28 = vadd.f32 %v3606_v20, %v3605_v6  ;;  %v3663_v46 = vsel %vm666_vm9, %v3628_v58, %v3662_v44  ;;  %v3825_v20 = vld [vmem:[%s6629_s4 + $0x60] sm:$0xff]  ;;  %v3830_v58 = vld [vmem:[%s6629_s4 + $0x88] sm:$0xff] }
 0xf35   :  { %v3613_v17 = vadd.f32 %v3612_v43, %v3611_v37  ;;  %v3616_v35 = vsel %vm533_vm7, %v3518_v56, 0.0  ;;  %v6492_v29 = vadd.f32 %v3595_v52, %v3594_v30  ;;  %v3660_v32 = vsel %vm674_vm13, %v3635_v55, %v3659_v53  ;;  %v3828_v37 = vld [vmem:[%s6629_s4 + $0x78] sm:$0xff]  ;;  %v3826_v30 = vld [vmem:[%s6629_s4 + $0x68] sm:$0xff]  ;;  %v3823_v43 = vld [vmem:[%s6629_s4 + $0x50] sm:$0xff] }
 0xf36   :  { %v3617_v27 = vrot.slane %v3616_v35, 4  ;;  %v3608_v42 = vrot.slane %v3607_v28, 1  ;;  %v3664_v19 = vsel %vm668_vm10, %v3630_v0, %v3663_v46  ;;  %3884 = vmatpush.msra.mxu3 %v3828_v37  ;;  %v3817_v55 = vld [vmem:[%s6629_s4 + $0x20] sm:$0xff] }
 0xf37   :  { %v3614_v23 = vrot.slane %v3613_v17, 1  ;;  %v3634_v45 = vmul.f32 %v6492_v29, %v6492_v29  ;;  %v3665_v15 = vsel %vm670_vm11, %v3632_v11, %v3664_v19  ;;  %v3829_v53 = vld [vmem:[%s6629_s4 + $0x80] sm:$0xff] }
 0xf38   :  { %v3618_v31 = vadd.f32 %v3617_v27, %v3616_v35  ;;  %v6497_v63 = vadd.f32 %v3608_v42, %v3607_v28  ;;  %3885 = vmatpush.msra.mxu3 %v3827_v50  ;;  %v3818_v35 = vld [vmem:[%s6629_s4 + $0x28] sm:$0xff] }
 0xf39   :  { %v6488_v41 = vadd.f32 %v3614_v23, %v3613_v17  ;;  %v3666_v6 = vsel %vm672_vm12, %v3634_v45, %v3665_v15  ;;  %v3819_v17 = vld [vmem:[%s6629_s4 + $0x30] sm:$0xff] }
 0xf3a   :  { %v3619_v48 = vrot.slane %v3618_v31, 2  ;;  %v3636_v62 = vmul.f32 %v6497_v63, %v6497_v63  ;;  %3886 = vmatpush.msra.mxu3 %v3826_v30 }
 0xf3b   :  { %v3637_v47 = vmul.f32 %v6488_v41, %v6488_v41 }
 0xf3c   :  { %v3620_v36 = vadd.f32 %v3619_v48, %v3618_v31  ;;  %v3667_v54 = vsel %vm674_vm13, %v3636_v62, %v3666_v6  ;;  %3887 = vmatpush.msra.mxu3 %v3825_v20  ;;  %v3816_v31 = vld [vmem:[%s6629_s4 + $0x18] sm:$0xff]  ;;  %v3831_v48 = vld [vmem:[%s6629_s4 + $0x90] sm:$0xff] }
 0xf3d   :  { %v3661_v25 = vsel %vm676_vm14, %v3637_v47, %v3660_v32  ;;  %3917 = vmatpush.msra.mxu1 %v3831_v48  ;;  %v3813_v47 = vld [vmem:[%s6629_s4] sm:$0xff] }
 0xf3e   :  { %v3621_v40 = vrot.slane %v3620_v36, 1  ;;  %3688 = vmatmul.f32.vlgmr.msrb.gmra.mxu0 %v3661_v25  ;;  %3888 = vmatpush.msra.mxu3 %v3824_v16 }
 0xf3f   :  { %3918 = vmatpush.msra.mxu1 %v3830_v58 }
 0xf40   :  { %v6517_v8 = vadd.f32 %v3621_v40, %v3620_v36  ;;  %3889 = vmatpush.msra.mxu3 %v3823_v43 }
 0xf41   :  { %3919 = vmatpush.msra.mxu1 %v3829_v53 }
 0xf42   :  { %v3638_v1 = vmul.f32 %v6517_v8, %v6517_v8  ;;  %3890 = vmatpush.msra.mxu3 %v3822_v51 }
 0xf44   :  { %v3668_v21 = vsel %vm676_vm14, %v3638_v1, %v3667_v54  ;;  %3891 = vmatpush.msra.mxu3 %v3821_v5 }
 0xf45   :  { %4219 = vmatmul.msk.f32.vlgmr.msrb.gmra.mxu1 %vm533_vm7, %v3668_v21 }
 0xf46   :  { %3892 = vmatpush.msra.mxu3 %v3820_v57 }
 0xf48   :  { %3893 = vmatpush.msra.mxu3 %v3819_v17 }
 0xf4a   :  { %3894 = vmatpush.msra.mxu3 %v3818_v35 }
 0xf4c   :  { %3895 = vmatpush.msra.mxu3 %v3817_v55 }
 0xf4e   :  { %3896 = vmatpush.msra.mxu3 %v3816_v31 }
 0xf50   :  { %3897 = vmatpush.msra.mxu3 %v3815_v3 }
 0xf52   :  { %3898 = vmatpush.msra.mxu3 %v3814_v59  ;;  %v4259_v59 = vld [vmem:[%s6630_s5] ss:$0 sm:$0xff] }
 0xf54   :  { %3899 = vmatpush.msra.mxu3 %v3813_v47 }
 0xfbb   :  { %v3689_v49 = vpop.f32.mrf.mxu0 }
 0xfbc   :  { %v3690_v56 = vadd.f32 1e-07, %v3689_v49 }
 0xfc2   :  { %v3709_v18 = vpop.f32.mrf.mxu1 }
 0xfc3   :  { %v3710_v28 = vadd.f32 %v3709_v18, %v3690_v56 }
 0xfc5   :  { %4398 = vrsqrt.f32 %v3710_v28  ;;  %vm3718_vm2 = vweird.f32 %v3710_v28 }
 0xfcb   :  { %v4399_v4 = vpop.eup %4398 }
 0xfcc   :  { %v3713_v52 = vmul.f32 %v4399_v4, %v3710_v28  ;;  %vm3719_vm15 = vweird.f32 %v4399_v4 }
 0xfcd   :  { %vm3720_vm3 = vmor %vm3718_vm2, %vm3719_vm15 }
 0xfce   :  { %v3714_v27 = vmul.f32 %v4399_v4, %v3713_v52 }
 0xfd0   :  { %v3715_v22 = vmul.f32 0.5, %v3714_v27 }
 0xfd2   :  { %v3716_v42 = vsub.f32 1.5, %v3715_v22 }
 0xfd4   :  { %v3717_v23 = vmul.f32 %v4399_v4, %v3716_v42 }
 0xfd6   :  { %v3721_v10 = vsel %vm3720_vm3, %v4399_v4, %v3717_v23 }
 0xfd7   :  { %4221 = vmatmul.msk.f32.vlgmr.msra.gmra.mxu2 %vm400_vm0, %v3721_v10  ;;  %4223 = vmatmul.msk.f32.vlgmr.msra.gmra.mxu0 %vm400_vm0, %v3721_v10 }
0x1054   :  { %v3762_v60 = vpop.f32.mrf.mxu0 }
0x1055   :  { %v3768_v0 = vrot.slane %v3762_v60, 1  ;;  %v3770_v36 = vrot.slane %v3762_v60, 2  ;;  %v3772_v32 = vrot.slane %v3762_v60, 3  ;;  %v3774_v11 = vrot.slane %v3762_v60, 4 }
0x1056   :  { %v3776_v25 = vrot.slane %v3762_v60, 5  ;;  %v3778_v44 = vrot.slane %v3762_v60, 6  ;;  %v3780_v45 = vrot.slane %v3762_v60, 7  ;;  %v3798_v54 = vmul.f32 %v3762_v60, %v6453_v2 }
0x1057   :  { %v3800_v40 = vmul.f32 %v3768_v0, %v6472_v14  ;;  %v3802_v46 = vmul.f32 %v3770_v36, %v6476_v38  ;;  %v3804_v62 = vmul.f32 %v3772_v32, %v6481_v26  ;;  %v3806_v19 = vmul.f32 %v3774_v11, %v6486_v39 }
0x1058   :  { %v3808_v15 = vmul.f32 %v3776_v25, %v6492_v29  ;;  %v3810_v1 = vmul.f32 %v3778_v44, %v6497_v63  ;;  %v3812_v6 = vmul.f32 %v3780_v45, %v6517_v8 }
0x1059   :  { %v3867_v21 = vrot.slane %v3800_v40, 7  ;;  %v3869_v37 = vrot.slane %v3802_v46, 6  ;;  %v3871_v50 = vrot.slane %v3804_v62, 5  ;;  %v3873_v30 = vrot.slane %v3806_v19, 4 }
0x105a   :  { %v3742_v20 = vpop.f32.mrf.mxu2  ;;  %v3875_v14 = vrot.slane %v3808_v15, 3  ;;  %v3877_v16 = vrot.slane %v3810_v1, 2  ;;  %v3879_v56 = vrot.slane %v3812_v6, 1 }
0x105b   :  { %v3868_v38 = vsel %vm664_vm8, %v3867_v21, %v3798_v54  ;;  %v3767_v26 = vrot.slane %v3742_v20, 1  ;;  %v3769_v49 = vrot.slane %v3742_v20, 2  ;;  %v3771_v39 = vrot.slane %v3742_v20, 3 }
0x105c   :  { %v3773_v43 = vrot.slane %v3742_v20, 4  ;;  %v3775_v29 = vrot.slane %v3742_v20, 5  ;;  %v3870_v63 = vsel %vm666_vm9, %v3869_v37, %v3868_v38  ;;  %v3777_v5 = vrot.slane %v3742_v20, 6 }
0x105d   :  { %v3799_v8 = vmul.f32 %v3767_v26, %v6444_v12  ;;  %v3801_v2 = vmul.f32 %v3769_v49, %v6455_v13  ;;  %v3803_v51 = vmul.f32 %v3771_v39, %v6458_v9  ;;  %v3872_v18 = vsel %vm668_vm10, %v3871_v50, %v3870_v63 }
0x105e   :  { %v3874_v28 = vsel %vm670_vm11, %v3873_v30, %v3872_v18  ;;  %v3779_v57 = vrot.slane %v3742_v20, 7  ;;  %v3805_v17 = vmul.f32 %v3773_v43, %v6460_v34  ;;  %v3797_v35 = vmul.f32 %v3742_v20, %v6440_v24 }
0x105f   :  { %v3853_v4 = vrot.slane %v3799_v8, 7  ;;  %v3855_v52 = vrot.slane %v3801_v2, 6  ;;  %v3876_v27 = vsel %vm672_vm12, %v3875_v14, %v3874_v28  ;;  %v3807_v13 = vmul.f32 %v3775_v29, %v6462_v33 }
0x1060   :  { %v3878_v12 = vsel %vm674_vm13, %v3877_v16, %v3876_v27  ;;  %v3809_v9 = vmul.f32 %v3777_v5, %v6467_v61  ;;  %v3857_v22 = vrot.slane %v3803_v51, 5  ;;  %v3811_v23 = vmul.f32 %v3779_v57, %v6488_v41 }
0x1061   :  { %v3880_v42 = vsel %vm676_vm14, %v3879_v56, %v3878_v12  ;;  %v3854_v10 = vsel %vm664_vm8, %v3853_v4, %v3797_v35  ;;  %v3859_v34 = vrot.slane %v3805_v17, 4  ;;  %v3861_v31 = vrot.slane %v3807_v13, 3 }
0x1062   :  { %4224 = vmatmul.msk.f32.vlgmr.msra.gmra.mxu1 %vm533_vm7, %v3880_v42  ;;  %v3856_v24 = vsel %vm666_vm9, %v3855_v52, %v3854_v10  ;;  %v3863_v33 = vrot.slane %v3809_v9, 2  ;;  %v3865_v3 = vrot.slane %v3811_v23, 1  ;;  %vm3943_vm9 = vcmask 15360  }
0x1063   :  { %v3858_v55 = vsel %vm668_vm10, %v3857_v22, %v3856_v24 }
0x1064   :  { %v3860_v7 = vsel %vm670_vm11, %v3859_v34, %v3858_v55 }
0x1065   :  { %v3862_v61 = vsel %vm672_vm12, %v3861_v31, %v3860_v7 }
0x1066   :  { %v3864_v48 = vsel %vm674_vm13, %v3863_v33, %v3862_v61 }
0x1067   :  { %v3866_v41 = vsel %vm676_vm14, %v3865_v3, %v3864_v48 }
0x1068   :  { %3900 = vmatmul.f32.vlgmr.msra.gmra.mxu3 %v3866_v41 }
0x10df   :  { %v3921_v53 = vpop.f32.mrf.mxu1 }
0x10eb   :  { %v3901_v58 = vpop.f32.mrf.mxu3 }
0x10ec   :  { %v3902_v47 = vadd.f32 %v4259_v59, %v3901_v58 }
0x10ee   :  { %v3922_v60 = vadd.f32 %v3921_v53, %v3902_v47 }
0x10f0   :  { %v4225_v0 = vmul.f32 -1.442695, %v3922_v60 }
0x10f2   :  { %4400 = vpow2.f32 %v4225_v0 }
0x10f8   :  { %v4401_v36 = vpop.eup %4400 }
0x10f9   :  { %v3927_v32 = vadd.f32 1.0, %v4401_v36 }
0x10fb   :  { %4402 = vrcp.f32 %v3927_v32  ;;  %v3939_v45 = vand.u32 2147483648, %v3927_v32  ;;  %v3937_v46 = vand.u32 2147483647, %v3927_v32  ;;  %vm3933_vm7 = vweird.f32 %v3927_v32 }
0x10fd   :  { %v3940_v19 = vor.u32 1.1754944e-38, %v3939_v45  ;;  %vm3938_vm10 = vcmp.eq.f32.partialorder %v3937_v46, 8.507059e+37 }
0x1101   :  { %v4403_v11 = vpop.eup %4402 }
0x1102   :  { %v3929_v25 = vmul.f32 %v4403_v11, %v3927_v32  ;;  %vm3934_vm0 = vweird.f32 %v4403_v11 }
0x1103   :  { %vm3935_vm8 = vmor %vm3933_vm7, %vm3934_vm0 }
0x1104   :  { %v3930_v44 = vsub.f32 1.0, %v3929_v25 }
0x1106   :  { %v3931_v40 = vmul.f32 %v4403_v11, %v3930_v44 }
0x1108   :  { %v3932_v62 = vadd.f32 %v4403_v11, %v3931_v40 }
0x110a   :  { %v3936_v15 = vsel %vm3935_vm8, %v4403_v11, %v3932_v62 }
0x110b   :  { %v3941_v1 = vsel %vm3938_vm10, %v3940_v19, %v3936_v15 }
0x110c   :  { %3944 = vst.msk [vmem:[%s6631_s6] sm:$0xff] %vm3943_vm9, %v3941_v1 }

</bundles_post_ra>
